<compile_context>
chip_gen: v6e
topology: v6e:2x2x1
jax: 0.10.0
libtpu: 0.0.40
codegen_flags: <defaults>
</compile_context>

<pallas_src>
import jax
import jax.numpy as jnp
import numpy as np
from jax.experimental import pallas as pl
from jax.experimental.pallas import tpu as pltpu


TB = 8          # images per grid step
NP = 256        # channel-packed lane width (padded from 224 -> 256)
F2 = 16         # per-image row frame for the conv2 input / output


# ----------------------------------------------------------------------------
# Host-side weight preprocessing (done once, outside jit)
# ----------------------------------------------------------------------------
def _pool_band_placement(win):
    """place[parity, kw, wcol, j] = 1 iff conv tap kw reads input column wcol
    when producing pooled-pair member column (2*j + parity) (stride 1, pad 2)."""
    wp = win // 2
    place = np.zeros((2, 5, win, wp), np.float32)
    for parity in range(2):
        for kw in range(5):
            for j in range(wp):
                wcol = 2 * j + parity + kw - 2
                if 0 <= wcol < win:
                    place[parity, kw, wcol, j] = 1.0
    return place


def _banded_conv_weight_fused(w_oihw, win, k_pad):
    """Fold a 5x5/pad=2 conv plus the even/odd-column split of the 2x2 pool
    into banded weights (5, k_pad, 2*NP) bf16: lanes [0:NP) = even pooled
    columns, [NP:2*NP) = odd pooled columns, both zero-padded to 256."""
    w = np.asarray(w_oihw, np.float32)
    cout, cin = w.shape[0], w.shape[1]
    wp = win // 2
    place = _pool_band_placement(win)                            # (2,5,win,wp)
    m = np.einsum("pkwj,oiKk->pKwijo", place, w)                 # (2,5,win,cin,wp,cout)
    m = m.reshape(2, 5, win * cin, wp * cout)
    out = np.zeros((5, k_pad, 2 * NP), np.float32)
    out[:, :win * cin, :wp * cout] = m[0]
    out[:, :win * cin, NP:NP + wp * cout] = m[1]
    return jnp.asarray(out, jnp.bfloat16)


def _pool1_selector():
    """(2, TB*F2+8, TB*32-4) bf16 exact 0/1 selectors: conv1-output rows
    (stacked, 32-row frames) -> conv2-input rows (16-row frames, data at
    offsets 2..15, border rows zero)."""
    n_in = TB * 32 - 4
    n_out = TB * F2 + 8
    p = np.zeros((2, n_out, n_in), np.float32)
    for parity in range(2):
        for t in range(TB):
            for j in range(14):
                p[parity, t * F2 + 2 + j, t * 32 + 2 * j + parity] = 1.0
    return jnp.asarray(p, jnp.bfloat16)


def _pool2_selector():
    """(2, 7*TB, TB*F2) bf16 exact 0/1 selectors: conv2-output frame rows ->
    pooled rows in h-major order (row = h*TB + t)."""
    p = np.zeros((2, 7 * TB, TB * F2), np.float32)
    for parity in range(2):
        for t in range(TB):
            for j in range(7):
                p[parity, j * TB + t, t * F2 + 2 * j + parity] = 1.0
    return jnp.asarray(p, jnp.bfloat16)


def prepare_kernel_params(params):
    """One-time repack of torch-layout parameters into the banded, parity-fused,
    256-lane, bf16 forms consumed by the fused Pallas kernel."""
    m1 = _banded_conv_weight_fused(params["w1"], 28, 28)         # (5, 28, 512)
    m2 = _banded_conv_weight_fused(params["w2"], 14, NP)         # (5, 256, 512)

    b1t = np.zeros((1, NP), np.float32)
    b1t[0, :224] = np.tile(np.asarray(params["b1"], np.float32), 14)   # j*16+co
    b2t = np.zeros((1, NP), np.float32)
    b2t[0, :224] = np.tile(np.asarray(params["b2"], np.float32), 7)    # j*32+co

    # Linear weight permuted from torch (n, c*49+h*7+w) to (h, w*32+c(+pad), n(+pad)).
    wl = np.asarray(params["wl"], np.float32).reshape(10, 32, 7, 7)    # (n, c, h, w)
    wl3 = np.zeros((7, NP, 128), np.float32)
    for h in range(7):
        wl3[h, :224, :10] = np.transpose(wl[:, :, h, :], (2, 1, 0)).reshape(224, 10)
    blp = np.zeros((1, 128), np.float32)
    blp[0, :10] = np.asarray(params["bl"], np.float32)

    return {
        "m1": m1, "m2": m2,
        "b1t": jnp.asarray(b1t), "b2t": jnp.asarray(b2t),
        "p1": _pool1_selector(), "p2": _pool2_selector(),
        "wl3": jnp.asarray(wl3, jnp.bfloat16), "blp": jnp.asarray(blp),
    }


# ----------------------------------------------------------------------------
# Fused kernel: TB images (all layers) per grid step
# ----------------------------------------------------------------------------
def _cnn_fused_kernel(x_ref, m1_ref, b1_ref, m2_ref, b2_ref, p1_ref, p2_ref,
                      wl_ref, bl_ref, feat_ref, logit_ref):
    f32, bf16 = jnp.float32, jnp.bfloat16
    M1 = p1_ref.shape[2]          # TB*32 - 4 : stacked conv1 output rows
    M2 = p2_ref.shape[2]          # TB*16     : stacked conv2 output frame rows
    tb = logit_ref.shape[0]       # TB

    # ---- conv1 (5x5, pad=2) with horizontal 2x-pool parities fused along N ---
    # image t occupies x_ref rows [t*32, t*32+32); its conv1 output row i lives
    # at y1 row t*32+i (rows 28..31 of each frame are unused garbage).
    y1 = jnp.dot(x_ref[0:M1, :].astype(bf16), m1_ref[0], preferred_element_type=f32)
    for kh in range(1, 5):
        y1 = y1 + jnp.dot(x_ref[kh:kh + M1, :].astype(bf16), m1_ref[kh],
                          preferred_element_type=f32)
    z1 = jnp.maximum(jnp.maximum(y1[:, :NP], y1[:, NP:]) + b1_ref[...], 0.0)
    z1b = z1.astype(bf16)                                          # (M1, 256)

    # ---- vertical 2x pool -> conv2 input frame (borders exactly zero) -------
    # image t's 14 pooled rows land at hb rows t*16+2 .. t*16+15; all other
    # rows of hb are zero (they are the conv2 vertical padding).
    hb = jnp.maximum(jnp.dot(p1_ref[0], z1b, preferred_element_type=f32),
                     jnp.dot(p1_ref[1], z1b, preferred_element_type=f32))  # (TB*16+8, 256)

    # ---- conv2 (5x5, pad=2, Cin=16, Cout=32), horizontal parities fused ------
    # output row r = t*16 + i reads hb rows r + kh  (a single contiguous slice
    # per tap; no per-image padding or VMEM scratch round trip needed).
    y2 = jnp.dot(hb[0:M2, :].astype(bf16), m2_ref[0], preferred_element_type=f32)
    for kh in range(1, 5):
        y2 = y2 + jnp.dot(hb[kh:kh + M2, :].astype(bf16), m2_ref[kh],
                          preferred_element_type=f32)
    y2b = jnp.maximum(y2[:, :NP], y2[:, NP:]).astype(bf16)         # (M2, 256)

    # ---- vertical 2x pool + bias + ReLU -> h2, rows ordered (h*TB + t) -------
    h2 = jnp.maximum(
        jnp.maximum(jnp.dot(p2_ref[0], y2b, preferred_element_type=f32),
                    jnp.dot(p2_ref[1], y2b, preferred_element_type=f32))
        + b2_ref[...], 0.0)                                        # (7*TB, 256)
    feat_ref[...] = h2                                             # lane-dense store
    h2b = h2.astype(bf16)

    # ---- fused linear head: one M=TB dot per spatial row h -------------------
    acc = jnp.dot(h2b[0:tb, :], wl_ref[0], preferred_element_type=f32)
    for h in range(1, 7):
        acc = acc + jnp.dot(h2b[h * tb:(h + 1) * tb, :], wl_ref[h],
                            preferred_element_type=f32)
    logit_ref[...] = acc + bl_ref[...]                             # (TB, 128)


def cnn_pallas(x2d, kp):
    """x2d: (B_pad*32, 28) f32 -- H-padded images stacked along rows."""
    G = x2d.shape[0] // (TB * 32)
    M1 = TB * 32 - 4
    return pl.pallas_call(
        _cnn_fused_kernel,
        out_shape=(
            jax.ShapeDtypeStruct((G * 7 * TB, NP), jnp.float32),   # pooled conv2 feats
            jax.ShapeDtypeStruct((G * TB, 128), jnp.float32),      # logits (N padded)
        ),
        grid=(G,),
        in_specs=[
            pl.BlockSpec((TB * 32, 28), lambda g: (g, 0)),              # images (stacked)
            pl.BlockSpec((5, 28, 2 * NP), lambda g: (0, 0, 0)),         # conv1 banded W bf16
            pl.BlockSpec((1, NP), lambda g: (0, 0)),                    # conv1 bias f32
            pl.BlockSpec((5, NP, 2 * NP), lambda g: (0, 0, 0)),         # conv2 banded W bf16
            pl.BlockSpec((1, NP), lambda g: (0, 0)),                    # conv2 bias f32
            pl.BlockSpec((2, TB * F2 + 8, M1), lambda g: (0, 0, 0)),    # pool1 selectors bf16
            pl.BlockSpec((2, 7 * TB, TB * F2), lambda g: (0, 0, 0)),    # pool2 selectors bf16
            pl.BlockSpec((7, NP, 128), lambda g: (0, 0, 0)),            # linear W bf16
            pl.BlockSpec((1, 128), lambda g: (0, 0)),                   # linear bias f32
        ],
        out_specs=(
            pl.BlockSpec((7 * TB, NP), lambda g: (g, 0)),
            pl.BlockSpec((TB, 128), lambda g: (g, 0)),
        ),
        compiler_params=pltpu.CompilerParams(
            dimension_semantics=("parallel",)),        # v7x: 2 TCs share the batch axis
    )(x2d, kp["m1"], kp["b1t"], kp["m2"], kp["b2t"],
      kp["p1"], kp["p2"], kp["wl3"], kp["blp"])


# ----------------------------------------------------------------------------
# Full model
# ----------------------------------------------------------------------------
def init_params(key):
    k1, k2, k3, k4, k5, k6 = jax.random.split(key, 6)
    return {
        "w1": 0.1 * jax.random.normal(k1, (16, 1, 5, 5), jnp.float32),     # torch OIHW
        "b1": 0.1 * jax.random.normal(k2, (16,), jnp.float32),
        "w2": 0.1 * jax.random.normal(k3, (32, 16, 5, 5), jnp.float32),
        "b2": 0.1 * jax.random.normal(k4, (32,), jnp.float32),
        "wl": 0.1 * jax.random.normal(k5, (10, 32 * 7 * 7), jnp.float32),  # torch (out, in)
        "bl": 0.1 * jax.random.normal(k6, (10,), jnp.float32),
    }


def cnn_forward(x_nchw, kparams):
    B = x_nchw.shape[0]
    G = -(-B // TB)
    B_pad = G * TB
    x = jnp.pad(x_nchw[:, 0, :, :], ((0, B_pad - B), (2, 2), (0, 0)))   # (B_pad, 32, 28)
    x2d = x.reshape(B_pad * 32, 28)

    feats_k, logits_k = cnn_pallas(x2d, kparams)

    # feats_k rows: g*(7*TB) + h*TB + t  ->  image b = g*TB + t, spatial row h
    f = feats_k.reshape(G, 7, TB, NP).transpose(0, 2, 1, 3).reshape(B_pad, 7, NP)
    f = f[:, :, :224].reshape(B_pad, 7, 7, 32)                      # (b, h, w, c)
    x_flat = jnp.transpose(f, (0, 3, 1, 2)).reshape(B_pad, 32 * 7 * 7)[:B]
    logits = logits_k[:B, :10]
    return logits, x_flat


# Plain-JAX reference of the same nn.Module (f32, HIGHEST), for validation only.
def cnn_reference(x_nchw, params):
    def conv_relu_pool(x, w, b):
        y = jax.lax.conv_general_dilated(
            x, w, window_strides=(1, 1), padding=((2, 2), (2, 2)),
            dimension_numbers=("NCHW", "OIHW", "NCHW"),
            precision=jax.lax.Precision.HIGHEST)
        y = jnp.maximum(y + b[None, :, None, None], 0.0)
        return jax.lax.reduce_window(y, -jnp.inf, jax.lax.max,
                                     (1, 1, 2, 2), (1, 1, 2, 2), "VALID")
    h1 = conv_relu_pool(x_nchw, params["w1"], params["b1"])
    h2 = conv_relu_pool(h1, params["w2"], params["b2"])
    xf = h2.reshape(x_nchw.shape[0], -1)
    logits = jnp.dot(xf, params["wl"].T, precision=jax.lax.Precision.HIGHEST) + params["bl"]
    return logits, xf


if __name__ == "__main__":
    key = jax.random.PRNGKey(0)
    kx, kp = jax.random.split(key)
    params = init_params(kp)
    kparams = prepare_kernel_params(params)                        # one-time, outside jit
    # MNIST-shaped input; B=10 exercises both batch padding (10 -> 16) and 2 grid steps.
    x = jax.random.normal(kx, (10, 1, 28, 28), dtype=jnp.float32)

    logits, feats = jax.jit(cnn_forward)(x, kparams)
    jax.block_until_ready((logits, feats))

    assert logits.shape == (10, 10) and logits.dtype == jnp.float32
    assert feats.shape == (10, 32 * 7 * 7) and feats.dtype == jnp.float32

    ref_logits, ref_feats = cnn_reference(x, params)
    # Tolerances account for bf16 MXU operands (f32 accumulation).
    np.testing.assert_allclose(np.asarray(feats), np.asarray(ref_feats),
                               rtol=2.5e-2, atol=2.5e-2)
    np.testing.assert_allclose(np.asarray(logits), np.asarray(ref_logits),
                               rtol=2.5e-2, atol=1e-1)

    print("KERNEL_OK")
</pallas_src>

<mosaic_0001>
module attributes {stable_mosaic.version = 11 : i64} {
  func.func @_cnn_fused_kernel(%arg0: i32, %arg1: memref<256x28xf32, #tpu.memory_space<vmem>>, %arg2: memref<5x28x512xbf16, #tpu.memory_space<vmem>>, %arg3: memref<1x256xf32, #tpu.memory_space<vmem>>, %arg4: memref<5x256x512xbf16, #tpu.memory_space<vmem>>, %arg5: memref<1x256xf32, #tpu.memory_space<vmem>>, %arg6: memref<2x136x252xbf16, #tpu.memory_space<vmem>>, %arg7: memref<2x56x128xbf16, #tpu.memory_space<vmem>>, %arg8: memref<7x256x128xbf16, #tpu.memory_space<vmem>>, %arg9: memref<1x128xf32, #tpu.memory_space<vmem>>, %arg10: memref<56x256xf32, #tpu.memory_space<vmem>>, %arg11: memref<8x128xf32, #tpu.memory_space<vmem>>) attributes {dimension_semantics = [#tpu.dimension_semantics<parallel>], iteration_bounds = array<i64: 2>, scalar_prefetch = 0 : i64, scratch_operands = 0 : i64, tpu.core_type = #tpu.core_type<tc>, window_params = [{transform_indices = @transform_0, window_bounds = array<i64: 256, 28>}, {pipeline_mode = #tpu.pipeline_mode<synchronous>, transform_indices = @transform_1, window_bounds = array<i64: 5, 28, 512>}, {pipeline_mode = #tpu.pipeline_mode<synchronous>, transform_indices = @transform_2, window_bounds = array<i64: 1, 256>}, {pipeline_mode = #tpu.pipeline_mode<synchronous>, transform_indices = @transform_3, window_bounds = array<i64: 5, 256, 512>}, {pipeline_mode = #tpu.pipeline_mode<synchronous>, transform_indices = @transform_4, window_bounds = array<i64: 1, 256>}, {pipeline_mode = #tpu.pipeline_mode<synchronous>, transform_indices = @transform_5, window_bounds = array<i64: 2, 136, 252>}, {pipeline_mode = #tpu.pipeline_mode<synchronous>, transform_indices = @transform_6, window_bounds = array<i64: 2, 56, 128>}, {pipeline_mode = #tpu.pipeline_mode<synchronous>, transform_indices = @transform_7, window_bounds = array<i64: 7, 256, 128>}, {pipeline_mode = #tpu.pipeline_mode<synchronous>, transform_indices = @transform_8, window_bounds = array<i64: 1, 128>}, {transform_indices = @transform_9, window_bounds = array<i64: 56, 256>}, {transform_indices = @transform_10, window_bounds = array<i64: 8, 128>}]} {
    %c0 = arith.constant 0 : index
    %c0_0 = arith.constant 0 : index
    %0 = vector.load %arg1[%c0, %c0_0] : memref<256x28xf32, #tpu.memory_space<vmem>>, vector<252x28xf32>
    %1 = arith.truncf %0 : vector<252x28xf32> to vector<252x28xbf16>
    %c0_1 = arith.constant 0 : index
    %c0_2 = arith.constant 0 : index
    %c0_3 = arith.constant 0 : index
    %2 = vector.load %arg2[%c0_1, %c0_2, %c0_3] : memref<5x28x512xbf16, #tpu.memory_space<vmem>>, vector<1x28x512xbf16>
    %3 = vector.shape_cast %2 : vector<1x28x512xbf16> to vector<28x512xbf16>
    %cst = arith.constant dense<0.000000e+00> : vector<252x512xf32>
    %4 = tpu.matmul %1, %3, %cst {dimension_numbers = #tpu.dot_dimension_numbers<[1], [0], [0], [1], [0, 0, 1, 1], [], []>} : vector<252x28xbf16>, vector<28x512xbf16>, vector<252x512xf32> -> vector<252x512xf32>
    %c1 = arith.constant 1 : index
    %c0_4 = arith.constant 0 : index
    %5 = vector.load %arg1[%c1, %c0_4] : memref<256x28xf32, #tpu.memory_space<vmem>>, vector<252x28xf32>
    %6 = arith.truncf %5 : vector<252x28xf32> to vector<252x28xbf16>
    %c1_5 = arith.constant 1 : index
    %c0_6 = arith.constant 0 : index
    %c0_7 = arith.constant 0 : index
    %7 = vector.load %arg2[%c1_5, %c0_6, %c0_7] : memref<5x28x512xbf16, #tpu.memory_space<vmem>>, vector<1x28x512xbf16>
    %8 = vector.shape_cast %7 : vector<1x28x512xbf16> to vector<28x512xbf16>
    %cst_8 = arith.constant dense<0.000000e+00> : vector<252x512xf32>
    %9 = tpu.matmul %6, %8, %cst_8 {dimension_numbers = #tpu.dot_dimension_numbers<[1], [0], [0], [1], [0, 0, 1, 1], [], []>} : vector<252x28xbf16>, vector<28x512xbf16>, vector<252x512xf32> -> vector<252x512xf32>
    %10 = arith.addf %4, %9 : vector<252x512xf32>
    %c2 = arith.constant 2 : index
    %c0_9 = arith.constant 0 : index
    %11 = vector.load %arg1[%c2, %c0_9] : memref<256x28xf32, #tpu.memory_space<vmem>>, vector<252x28xf32>
    %12 = arith.truncf %11 : vector<252x28xf32> to vector<252x28xbf16>
    %c2_10 = arith.constant 2 : index
    %c0_11 = arith.constant 0 : index
    %c0_12 = arith.constant 0 : index
    %13 = vector.load %arg2[%c2_10, %c0_11, %c0_12] : memref<5x28x512xbf16, #tpu.memory_space<vmem>>, vector<1x28x512xbf16>
    %14 = vector.shape_cast %13 : vector<1x28x512xbf16> to vector<28x512xbf16>
    %cst_13 = arith.constant dense<0.000000e+00> : vector<252x512xf32>
    %15 = tpu.matmul %12, %14, %cst_13 {dimension_numbers = #tpu.dot_dimension_numbers<[1], [0], [0], [1], [0, 0, 1, 1], [], []>} : vector<252x28xbf16>, vector<28x512xbf16>, vector<252x512xf32> -> vector<252x512xf32>
    %16 = arith.addf %10, %15 : vector<252x512xf32>
    %c3 = arith.constant 3 : index
    %c0_14 = arith.constant 0 : index
    %17 = vector.load %arg1[%c3, %c0_14] : memref<256x28xf32, #tpu.memory_space<vmem>>, vector<252x28xf32>
    %18 = arith.truncf %17 : vector<252x28xf32> to vector<252x28xbf16>
    %c3_15 = arith.constant 3 : index
    %c0_16 = arith.constant 0 : index
    %c0_17 = arith.constant 0 : index
    %19 = vector.load %arg2[%c3_15, %c0_16, %c0_17] : memref<5x28x512xbf16, #tpu.memory_space<vmem>>, vector<1x28x512xbf16>
    %20 = vector.shape_cast %19 : vector<1x28x512xbf16> to vector<28x512xbf16>
    %cst_18 = arith.constant dense<0.000000e+00> : vector<252x512xf32>
    %21 = tpu.matmul %18, %20, %cst_18 {dimension_numbers = #tpu.dot_dimension_numbers<[1], [0], [0], [1], [0, 0, 1, 1], [], []>} : vector<252x28xbf16>, vector<28x512xbf16>, vector<252x512xf32> -> vector<252x512xf32>
    %22 = arith.addf %16, %21 : vector<252x512xf32>
    %c4 = arith.constant 4 : index
    %c0_19 = arith.constant 0 : index
    %23 = vector.load %arg1[%c4, %c0_19] : memref<256x28xf32, #tpu.memory_space<vmem>>, vector<252x28xf32>
    %24 = arith.truncf %23 : vector<252x28xf32> to vector<252x28xbf16>
    %c4_20 = arith.constant 4 : index
    %c0_21 = arith.constant 0 : index
    %c0_22 = arith.constant 0 : index
    %25 = vector.load %arg2[%c4_20, %c0_21, %c0_22] : memref<5x28x512xbf16, #tpu.memory_space<vmem>>, vector<1x28x512xbf16>
    %26 = vector.shape_cast %25 : vector<1x28x512xbf16> to vector<28x512xbf16>
    %cst_23 = arith.constant dense<0.000000e+00> : vector<252x512xf32>
    %27 = tpu.matmul %24, %26, %cst_23 {dimension_numbers = #tpu.dot_dimension_numbers<[1], [0], [0], [1], [0, 0, 1, 1], [], []>} : vector<252x28xbf16>, vector<28x512xbf16>, vector<252x512xf32> -> vector<252x512xf32>
    %28 = arith.addf %22, %27 : vector<252x512xf32>
    %29 = vector.extract_strided_slice %28 {offsets = [0, 0], sizes = [252, 256], strides = [1, 1]} : vector<252x512xf32> to vector<252x256xf32>
    %30 = vector.extract_strided_slice %28 {offsets = [0, 256], sizes = [252, 256], strides = [1, 1]} : vector<252x512xf32> to vector<252x256xf32>
    %31 = arith.maximumf %29, %30 : vector<252x256xf32>
    %c0_24 = arith.constant 0 : index
    %c0_25 = arith.constant 0 : index
    %32 = vector.load %arg3[%c0_24, %c0_25] : memref<1x256xf32, #tpu.memory_space<vmem>>, vector<1x256xf32>
    %33 = vector.broadcast %32 : vector<1x256xf32> to vector<252x256xf32>
    %34 = arith.addf %31, %33 : vector<252x256xf32>
    %cst_26 = arith.constant 0.000000e+00 : f32
    %35 = vector.broadcast %cst_26 : f32 to vector<252x256xf32>
    %36 = arith.maximumf %34, %35 : vector<252x256xf32>
    %37 = arith.truncf %36 : vector<252x256xf32> to vector<252x256xbf16>
    %c0_27 = arith.constant 0 : index
    %c0_28 = arith.constant 0 : index
    %c0_29 = arith.constant 0 : index
    %38 = vector.load %arg6[%c0_27, %c0_28, %c0_29] : memref<2x136x252xbf16, #tpu.memory_space<vmem>>, vector<1x136x252xbf16>
    %39 = vector.shape_cast %38 : vector<1x136x252xbf16> to vector<136x252xbf16>
    %cst_30 = arith.constant dense<0.000000e+00> : vector<136x256xf32>
    %40 = tpu.matmul %39, %37, %cst_30 {dimension_numbers = #tpu.dot_dimension_numbers<[1], [0], [0], [1], [0, 0, 1, 1], [], []>} : vector<136x252xbf16>, vector<252x256xbf16>, vector<136x256xf32> -> vector<136x256xf32>
    %c1_31 = arith.constant 1 : index
    %c0_32 = arith.constant 0 : index
    %c0_33 = arith.constant 0 : index
    %41 = vector.load %arg6[%c1_31, %c0_32, %c0_33] : memref<2x136x252xbf16, #tpu.memory_space<vmem>>, vector<1x136x252xbf16>
    %42 = vector.shape_cast %41 : vector<1x136x252xbf16> to vector<136x252xbf16>
    %cst_34 = arith.constant dense<0.000000e+00> : vector<136x256xf32>
    %43 = tpu.matmul %42, %37, %cst_34 {dimension_numbers = #tpu.dot_dimension_numbers<[1], [0], [0], [1], [0, 0, 1, 1], [], []>} : vector<136x252xbf16>, vector<252x256xbf16>, vector<136x256xf32> -> vector<136x256xf32>
    %44 = arith.maximumf %40, %43 : vector<136x256xf32>
    %45 = vector.extract_strided_slice %44 {offsets = [0, 0], sizes = [128, 256], strides = [1, 1]} : vector<136x256xf32> to vector<128x256xf32>
    %46 = arith.truncf %45 : vector<128x256xf32> to vector<128x256xbf16>
    %c0_35 = arith.constant 0 : index
    %c0_36 = arith.constant 0 : index
    %c0_37 = arith.constant 0 : index
    %47 = vector.load %arg4[%c0_35, %c0_36, %c0_37] : memref<5x256x512xbf16, #tpu.memory_space<vmem>>, vector<1x256x512xbf16>
    %48 = vector.shape_cast %47 : vector<1x256x512xbf16> to vector<256x512xbf16>
    %cst_38 = arith.constant dense<0.000000e+00> : vector<128x512xf32>
    %49 = tpu.matmul %46, %48, %cst_38 {dimension_numbers = #tpu.dot_dimension_numbers<[1], [0], [0], [1], [0, 0, 1, 1], [], []>} : vector<128x256xbf16>, vector<256x512xbf16>, vector<128x512xf32> -> vector<128x512xf32>
    %50 = vector.extract_strided_slice %44 {offsets = [1, 0], sizes = [128, 256], strides = [1, 1]} : vector<136x256xf32> to vector<128x256xf32>
    %51 = arith.truncf %50 : vector<128x256xf32> to vector<128x256xbf16>
    %c1_39 = arith.constant 1 : index
    %c0_40 = arith.constant 0 : index
    %c0_41 = arith.constant 0 : index
    %52 = vector.load %arg4[%c1_39, %c0_40, %c0_41] : memref<5x256x512xbf16, #tpu.memory_space<vmem>>, vector<1x256x512xbf16>
    %53 = vector.shape_cast %52 : vector<1x256x512xbf16> to vector<256x512xbf16>
    %cst_42 = arith.constant dense<0.000000e+00> : vector<128x512xf32>
    %54 = tpu.matmul %51, %53, %cst_42 {dimension_numbers = #tpu.dot_dimension_numbers<[1], [0], [0], [1], [0, 0, 1, 1], [], []>} : vector<128x256xbf16>, vector<256x512xbf16>, vector<128x512xf32> -> vector<128x512xf32>
    %55 = arith.addf %49, %54 : vector<128x512xf32>
    %56 = vector.extract_strided_slice %44 {offsets = [2, 0], sizes = [128, 256], strides = [1, 1]} : vector<136x256xf32> to vector<128x256xf32>
    %57 = arith.truncf %56 : vector<128x256xf32> to vector<128x256xbf16>
    %c2_43 = arith.constant 2 : index
    %c0_44 = arith.constant 0 : index
    %c0_45 = arith.constant 0 : index
    %58 = vector.load %arg4[%c2_43, %c0_44, %c0_45] : memref<5x256x512xbf16, #tpu.memory_space<vmem>>, vector<1x256x512xbf16>
    %59 = vector.shape_cast %58 : vector<1x256x512xbf16> to vector<256x512xbf16>
    %cst_46 = arith.constant dense<0.000000e+00> : vector<128x512xf32>
    %60 = tpu.matmul %57, %59, %cst_46 {dimension_numbers = #tpu.dot_dimension_numbers<[1], [0], [0], [1], [0, 0, 1, 1], [], []>} : vector<128x256xbf16>, vector<256x512xbf16>, vector<128x512xf32> -> vector<128x512xf32>
    %61 = arith.addf %55, %60 : vector<128x512xf32>
    %62 = vector.extract_strided_slice %44 {offsets = [3, 0], sizes = [128, 256], strides = [1, 1]} : vector<136x256xf32> to vector<128x256xf32>
    %63 = arith.truncf %62 : vector<128x256xf32> to vector<128x256xbf16>
    %c3_47 = arith.constant 3 : index
    %c0_48 = arith.constant 0 : index
    %c0_49 = arith.constant 0 : index
    %64 = vector.load %arg4[%c3_47, %c0_48, %c0_49] : memref<5x256x512xbf16, #tpu.memory_space<vmem>>, vector<1x256x512xbf16>
    %65 = vector.shape_cast %64 : vector<1x256x512xbf16> to vector<256x512xbf16>
    %cst_50 = arith.constant dense<0.000000e+00> : vector<128x512xf32>
    %66 = tpu.matmul %63, %65, %cst_50 {dimension_numbers = #tpu.dot_dimension_numbers<[1], [0], [0], [1], [0, 0, 1, 1], [], []>} : vector<128x256xbf16>, vector<256x512xbf16>, vector<128x512xf32> -> vector<128x512xf32>
    %67 = arith.addf %61, %66 : vector<128x512xf32>
    %68 = vector.extract_strided_slice %44 {offsets = [4, 0], sizes = [128, 256], strides = [1, 1]} : vector<136x256xf32> to vector<128x256xf32>
    %69 = arith.truncf %68 : vector<128x256xf32> to vector<128x256xbf16>
    %c4_51 = arith.constant 4 : index
    %c0_52 = arith.constant 0 : index
    %c0_53 = arith.constant 0 : index
    %70 = vector.load %arg4[%c4_51, %c0_52, %c0_53] : memref<5x256x512xbf16, #tpu.memory_space<vmem>>, vector<1x256x512xbf16>
    %71 = vector.shape_cast %70 : vector<1x256x512xbf16> to vector<256x512xbf16>
    %cst_54 = arith.constant dense<0.000000e+00> : vector<128x512xf32>
    %72 = tpu.matmul %69, %71, %cst_54 {dimension_numbers = #tpu.dot_dimension_numbers<[1], [0], [0], [1], [0, 0, 1, 1], [], []>} : vector<128x256xbf16>, vector<256x512xbf16>, vector<128x512xf32> -> vector<128x512xf32>
    %73 = arith.addf %67, %72 : vector<128x512xf32>
    %74 = vector.extract_strided_slice %73 {offsets = [0, 0], sizes = [128, 256], strides = [1, 1]} : vector<128x512xf32> to vector<128x256xf32>
    %75 = vector.extract_strided_slice %73 {offsets = [0, 256], sizes = [128, 256], strides = [1, 1]} : vector<128x512xf32> to vector<128x256xf32>
    %76 = arith.maximumf %74, %75 : vector<128x256xf32>
    %77 = arith.truncf %76 : vector<128x256xf32> to vector<128x256xbf16>
    %c0_55 = arith.constant 0 : index
    %c0_56 = arith.constant 0 : index
    %c0_57 = arith.constant 0 : index
    %78 = vector.load %arg7[%c0_55, %c0_56, %c0_57] : memref<2x56x128xbf16, #tpu.memory_space<vmem>>, vector<1x56x128xbf16>
    %79 = vector.shape_cast %78 : vector<1x56x128xbf16> to vector<56x128xbf16>
    %cst_58 = arith.constant dense<0.000000e+00> : vector<56x256xf32>
    %80 = tpu.matmul %79, %77, %cst_58 {dimension_numbers = #tpu.dot_dimension_numbers<[1], [0], [0], [1], [0, 0, 1, 1], [], []>} : vector<56x128xbf16>, vector<128x256xbf16>, vector<56x256xf32> -> vector<56x256xf32>
    %c1_59 = arith.constant 1 : index
    %c0_60 = arith.constant 0 : index
    %c0_61 = arith.constant 0 : index
    %81 = vector.load %arg7[%c1_59, %c0_60, %c0_61] : memref<2x56x128xbf16, #tpu.memory_space<vmem>>, vector<1x56x128xbf16>
    %82 = vector.shape_cast %81 : vector<1x56x128xbf16> to vector<56x128xbf16>
    %cst_62 = arith.constant dense<0.000000e+00> : vector<56x256xf32>
    %83 = tpu.matmul %82, %77, %cst_62 {dimension_numbers = #tpu.dot_dimension_numbers<[1], [0], [0], [1], [0, 0, 1, 1], [], []>} : vector<56x128xbf16>, vector<128x256xbf16>, vector<56x256xf32> -> vector<56x256xf32>
    %84 = arith.maximumf %80, %83 : vector<56x256xf32>
    %c0_63 = arith.constant 0 : index
    %c0_64 = arith.constant 0 : index
    %85 = vector.load %arg5[%c0_63, %c0_64] : memref<1x256xf32, #tpu.memory_space<vmem>>, vector<1x256xf32>
    %86 = vector.broadcast %85 : vector<1x256xf32> to vector<56x256xf32>
    %87 = arith.addf %84, %86 : vector<56x256xf32>
    %cst_65 = arith.constant 0.000000e+00 : f32
    %88 = vector.broadcast %cst_65 : f32 to vector<56x256xf32>
    %89 = arith.maximumf %87, %88 : vector<56x256xf32>
    %c0_66 = arith.constant 0 : index
    %c0_67 = arith.constant 0 : index
    %90 = vector.load %arg10[%c0_66, %c0_67] : memref<56x256xf32, #tpu.memory_space<vmem>>, vector<56x256xf32>
    tpu.vector_store %arg10[%c0_66, %c0_67], %89 {strides = array<i32>} : memref<56x256xf32, #tpu.memory_space<vmem>>, vector<56x256xf32>,
    %91 = arith.truncf %89 : vector<56x256xf32> to vector<56x256xbf16>
    %92 = vector.extract_strided_slice %91 {offsets = [0, 0], sizes = [8, 256], strides = [1, 1]} : vector<56x256xbf16> to vector<8x256xbf16>
    %c0_68 = arith.constant 0 : index
    %c0_69 = arith.constant 0 : index
    %c0_70 = arith.constant 0 : index
    %93 = vector.load %arg8[%c0_68, %c0_69, %c0_70] : memref<7x256x128xbf16, #tpu.memory_space<vmem>>, vector<1x256x128xbf16>
    %94 = vector.shape_cast %93 : vector<1x256x128xbf16> to vector<256x128xbf16>
    %cst_71 = arith.constant dense<0.000000e+00> : vector<8x128xf32>
    %95 = tpu.matmul %92, %94, %cst_71 {dimension_numbers = #tpu.dot_dimension_numbers<[1], [0], [0], [1], [0, 0, 1, 1], [], []>} : vector<8x256xbf16>, vector<256x128xbf16>, vector<8x128xf32> -> vector<8x128xf32>
    %96 = vector.extract_strided_slice %91 {offsets = [8, 0], sizes = [8, 256], strides = [1, 1]} : vector<56x256xbf16> to vector<8x256xbf16>
    %c1_72 = arith.constant 1 : index
    %c0_73 = arith.constant 0 : index
    %c0_74 = arith.constant 0 : index
    %97 = vector.load %arg8[%c1_72, %c0_73, %c0_74] : memref<7x256x128xbf16, #tpu.memory_space<vmem>>, vector<1x256x128xbf16>
    %98 = vector.shape_cast %97 : vector<1x256x128xbf16> to vector<256x128xbf16>
    %cst_75 = arith.constant dense<0.000000e+00> : vector<8x128xf32>
    %99 = tpu.matmul %96, %98, %cst_75 {dimension_numbers = #tpu.dot_dimension_numbers<[1], [0], [0], [1], [0, 0, 1, 1], [], []>} : vector<8x256xbf16>, vector<256x128xbf16>, vector<8x128xf32> -> vector<8x128xf32>
    %100 = arith.addf %95, %99 : vector<8x128xf32>
    %101 = vector.extract_strided_slice %91 {offsets = [16, 0], sizes = [8, 256], strides = [1, 1]} : vector<56x256xbf16> to vector<8x256xbf16>
    %c2_76 = arith.constant 2 : index
    %c0_77 = arith.constant 0 : index
    %c0_78 = arith.constant 0 : index
    %102 = vector.load %arg8[%c2_76, %c0_77, %c0_78] : memref<7x256x128xbf16, #tpu.memory_space<vmem>>, vector<1x256x128xbf16>
    %103 = vector.shape_cast %102 : vector<1x256x128xbf16> to vector<256x128xbf16>
    %cst_79 = arith.constant dense<0.000000e+00> : vector<8x128xf32>
    %104 = tpu.matmul %101, %103, %cst_79 {dimension_numbers = #tpu.dot_dimension_numbers<[1], [0], [0], [1], [0, 0, 1, 1], [], []>} : vector<8x256xbf16>, vector<256x128xbf16>, vector<8x128xf32> -> vector<8x128xf32>
    %105 = arith.addf %100, %104 : vector<8x128xf32>
    %106 = vector.extract_strided_slice %91 {offsets = [24, 0], sizes = [8, 256], strides = [1, 1]} : vector<56x256xbf16> to vector<8x256xbf16>
    %c3_80 = arith.constant 3 : index
    %c0_81 = arith.constant 0 : index
    %c0_82 = arith.constant 0 : index
    %107 = vector.load %arg8[%c3_80, %c0_81, %c0_82] : memref<7x256x128xbf16, #tpu.memory_space<vmem>>, vector<1x256x128xbf16>
    %108 = vector.shape_cast %107 : vector<1x256x128xbf16> to vector<256x128xbf16>
    %cst_83 = arith.constant dense<0.000000e+00> : vector<8x128xf32>
    %109 = tpu.matmul %106, %108, %cst_83 {dimension_numbers = #tpu.dot_dimension_numbers<[1], [0], [0], [1], [0, 0, 1, 1], [], []>} : vector<8x256xbf16>, vector<256x128xbf16>, vector<8x128xf32> -> vector<8x128xf32>
    %110 = arith.addf %105, %109 : vector<8x128xf32>
    %111 = vector.extract_strided_slice %91 {offsets = [32, 0], sizes = [8, 256], strides = [1, 1]} : vector<56x256xbf16> to vector<8x256xbf16>
    %c4_84 = arith.constant 4 : index
    %c0_85 = arith.constant 0 : index
    %c0_86 = arith.constant 0 : index
    %112 = vector.load %arg8[%c4_84, %c0_85, %c0_86] : memref<7x256x128xbf16, #tpu.memory_space<vmem>>, vector<1x256x128xbf16>
    %113 = vector.shape_cast %112 : vector<1x256x128xbf16> to vector<256x128xbf16>
    %cst_87 = arith.constant dense<0.000000e+00> : vector<8x128xf32>
    %114 = tpu.matmul %111, %113, %cst_87 {dimension_numbers = #tpu.dot_dimension_numbers<[1], [0], [0], [1], [0, 0, 1, 1], [], []>} : vector<8x256xbf16>, vector<256x128xbf16>, vector<8x128xf32> -> vector<8x128xf32>
    %115 = arith.addf %110, %114 : vector<8x128xf32>
    %116 = vector.extract_strided_slice %91 {offsets = [40, 0], sizes = [8, 256], strides = [1, 1]} : vector<56x256xbf16> to vector<8x256xbf16>
    %c5 = arith.constant 5 : index
    %c0_88 = arith.constant 0 : index
    %c0_89 = arith.constant 0 : index
    %117 = vector.load %arg8[%c5, %c0_88, %c0_89] : memref<7x256x128xbf16, #tpu.memory_space<vmem>>, vector<1x256x128xbf16>
    %118 = vector.shape_cast %117 : vector<1x256x128xbf16> to vector<256x128xbf16>
    %cst_90 = arith.constant dense<0.000000e+00> : vector<8x128xf32>
    %119 = tpu.matmul %116, %118, %cst_90 {dimension_numbers = #tpu.dot_dimension_numbers<[1], [0], [0], [1], [0, 0, 1, 1], [], []>} : vector<8x256xbf16>, vector<256x128xbf16>, vector<8x128xf32> -> vector<8x128xf32>
    %120 = arith.addf %115, %119 : vector<8x128xf32>
    %121 = vector.extract_strided_slice %91 {offsets = [48, 0], sizes = [8, 256], strides = [1, 1]} : vector<56x256xbf16> to vector<8x256xbf16>
    %c6 = arith.constant 6 : index
    %c0_91 = arith.constant 0 : index
    %c0_92 = arith.constant 0 : index
    %122 = vector.load %arg8[%c6, %c0_91, %c0_92] : memref<7x256x128xbf16, #tpu.memory_space<vmem>>, vector<1x256x128xbf16>
    %123 = vector.shape_cast %122 : vector<1x256x128xbf16> to vector<256x128xbf16>
    %cst_93 = arith.constant dense<0.000000e+00> : vector<8x128xf32>
    %124 = tpu.matmul %121, %123, %cst_93 {dimension_numbers = #tpu.dot_dimension_numbers<[1], [0], [0], [1], [0, 0, 1, 1], [], []>} : vector<8x256xbf16>, vector<256x128xbf16>, vector<8x128xf32> -> vector<8x128xf32>
    %125 = arith.addf %120, %124 : vector<8x128xf32>
    %c0_94 = arith.constant 0 : index
    %c0_95 = arith.constant 0 : index
    %126 = vector.load %arg9[%c0_94, %c0_95] : memref<1x128xf32, #tpu.memory_space<vmem>>, vector<1x128xf32>
    %127 = vector.broadcast %126 : vector<1x128xf32> to vector<8x128xf32>
    %128 = arith.addf %125, %127 : vector<8x128xf32>
    %c0_96 = arith.constant 0 : index
    %c0_97 = arith.constant 0 : index
    %129 = vector.load %arg11[%c0_96, %c0_97] : memref<8x128xf32, #tpu.memory_space<vmem>>, vector<8x128xf32>
    tpu.vector_store %arg11[%c0_96, %c0_97], %128 {strides = array<i32>} : memref<8x128xf32, #tpu.memory_space<vmem>>, vector<8x128xf32>,
    return
  }
  func.func @transform_0(%arg0: i32) -> (i32, i32) {
    %c0_i32 = arith.constant 0 : i32
    %c0_i32_0 = arith.constant 0 : i32
    return %arg0, %c0_i32 : i32, i32
  }
  func.func @transform_1(%arg0: i32) -> (i32, i32, i32) {
    %c0_i32 = arith.constant 0 : i32
    %c0_i32_0 = arith.constant 0 : i32
    %c0_i32_1 = arith.constant 0 : i32
    %c0_i32_2 = arith.constant 0 : i32
    return %c0_i32, %c0_i32_0, %c0_i32_1 : i32, i32, i32
  }
  func.func @transform_2(%arg0: i32) -> (i32, i32) {
    %c0_i32 = arith.constant 0 : i32
    %c0_i32_0 = arith.constant 0 : i32
    %c0_i32_1 = arith.constant 0 : i32
    return %c0_i32, %c0_i32_0 : i32, i32
  }
  func.func @transform_3(%arg0: i32) -> (i32, i32, i32) {
    %c0_i32 = arith.constant 0 : i32
    %c0_i32_0 = arith.constant 0 : i32
    %c0_i32_1 = arith.constant 0 : i32
    %c0_i32_2 = arith.constant 0 : i32
    return %c0_i32, %c0_i32_0, %c0_i32_1 : i32, i32, i32
  }
  func.func @transform_4(%arg0: i32) -> (i32, i32) {
    %c0_i32 = arith.constant 0 : i32
    %c0_i32_0 = arith.constant 0 : i32
    %c0_i32_1 = arith.constant 0 : i32
    return %c0_i32, %c0_i32_0 : i32, i32
  }
  func.func @transform_5(%arg0: i32) -> (i32, i32, i32) {
    %c0_i32 = arith.constant 0 : i32
    %c0_i32_0 = arith.constant 0 : i32
    %c0_i32_1 = arith.constant 0 : i32
    %c0_i32_2 = arith.constant 0 : i32
    return %c0_i32, %c0_i32_0, %c0_i32_1 : i32, i32, i32
  }
  func.func @transform_6(%arg0: i32) -> (i32, i32, i32) {
    %c0_i32 = arith.constant 0 : i32
    %c0_i32_0 = arith.constant 0 : i32
    %c0_i32_1 = arith.constant 0 : i32
    %c0_i32_2 = arith.constant 0 : i32
    return %c0_i32, %c0_i32_0, %c0_i32_1 : i32, i32, i32
  }
  func.func @transform_7(%arg0: i32) -> (i32, i32, i32) {
    %c0_i32 = arith.constant 0 : i32
    %c0_i32_0 = arith.constant 0 : i32
    %c0_i32_1 = arith.constant 0 : i32
    %c0_i32_2 = arith.constant 0 : i32
    return %c0_i32, %c0_i32_0, %c0_i32_1 : i32, i32, i32
  }
  func.func @transform_8(%arg0: i32) -> (i32, i32) {
    %c0_i32 = arith.constant 0 : i32
    %c0_i32_0 = arith.constant 0 : i32
    %c0_i32_1 = arith.constant 0 : i32
    return %c0_i32, %c0_i32_0 : i32, i32
  }
  func.func @transform_9(%arg0: i32) -> (i32, i32) {
    %c0_i32 = arith.constant 0 : i32
    %c0_i32_0 = arith.constant 0 : i32
    return %arg0, %c0_i32 : i32, i32
  }
  func.func @transform_10(%arg0: i32) -> (i32, i32) {
    %c0_i32 = arith.constant 0 : i32
    %c0_i32_0 = arith.constant 0 : i32
    return %arg0, %c0_i32 : i32, i32
  }
}

</mosaic_0001>

<bundles_post_ra>
// kernel: cnn_forward.1
= control target key start
LH: loop header
LB: loop body
LE: loop exit
PB: predicated region body
PF: predicated region fallthrough
CT: control target
= control target key end

     0   :  { %s15850_s0 = inlined_call_operand.vmem [shape: f32[512,28], index: 0, kind: input, shape index: {}]   ;;  %s15851_s1 = inlined_call_operand.hbm [shape: bf16[5,28,512], index: 1, kind: input, shape index: {}]   ;;  %s15852_s2 = inlined_call_operand.hbm [shape: f32[1,256], index: 2, kind: input, shape index: {}]   ;;  %s15853_s3 = inlined_call_operand.hbm [shape: bf16[5,256,512], index: 3, kind: input, shape index: {}]   ;;  %s15854_s4 = inlined_call_operand.hbm [shape: f32[1,256], index: 4, kind: input, shape index: {}]   ;;  %s15855_s5 = inlined_call_operand.hbm [shape: bf16[2,136,252], index: 5, kind: input, shape index: {}]   ;;  %s15856_s6 = inlined_call_operand.hbm [shape: bf16[2,56,128], index: 6, kind: input, shape index: {}]   ;;  %s15857_s7 = inlined_call_operand.hbm [shape: bf16[7,256,128], index: 7, kind: input, shape index: {}]   ;;  %s15858_s8 = inlined_call_operand.hbm [shape: f32[1,128], index: 8, kind: input, shape index: {}]   ;;  %s15859_s9 = inlined_call_operand.vmem [shape: f32[112,256], index: 9, kind: output, shape index: {0}]   ;;  %s15860_s10 = inlined_call_operand.hbm [shape: f32[16,128], index: 10, kind: output, shape index: {1}]  }
   0x1   :  { %15881 = sst [smem:[#allocation218_spill]] %s15852_s2 }
   0x2   :  { %15882 = sst [smem:[#allocation219_spill]] %s15854_s4 }
   0x3   :  { %15883 = sst [smem:[#allocation220_spill]] %s15856_s6 }
   0x4   :  { %16 = vsyncpa [#allocation3], 0 }
   0x5   :  { %17 = vsyncpa [#allocation6], 0 }
   0x6   :  { %18 = vsyncpa [#allocation9], 0 }
   0x7   :  { %19 = vsyncpa [#allocation12], 0 }
   0x8   :  { %20 = vsyncpa [#allocation15], 0 }
   0x9   :  { %21 = vsyncpa [#allocation4], 0 }
   0xa   :  { %23 = vsyncpa [#allocation4 + $0x1], 0  ;;  %s11782_s13 = smov 0   ;;  %s11784_s14 = smov 0  }
   0xb   :  { %s11786_s15 = smov 0   ;;  %s11788_s16 = smov 0  }
   0xc LB: > { %s11803_s17 = sadd.s32 4294967295, %s11709_s16   ;;  %s9687_s18 = sadd.s32 4294967294, %s11709_s16   ;;  %s11709_s16 = sphi %s11788_s16, %s16813_s16   ;;  %s11705_s15 = sphi %s11786_s15, %s16812_s15   ;;  %s11701_s14 = sphi %s11784_s14, %s16811_s14   ;;  %s11697_s13 = sphi %s11782_s13, %s16810_s13  }
   0xd   : > { %s11807_s19 = sadd.s32 1, %s11709_s16   ;;  %s256_s20 = sadd.s32 1, %s11705_s15 }
   0xe   : > { %s253_s21 = ssub.s32 %s11709_s16, %s11807_s19  ;;  %p266_p0 = scmp.ne.s32.totalorder %s11705_s15, %s11701_s14 }
   0xf   : > { %p254_p1 = scmp.eq.s32.totalorder %s253_s21, 0  ;;  %p267_p2 = scmp.eq.s32.totalorder %s11803_s17, 1 }
  0x10   : > { %p272_p3 = scmp.ne.s32.totalorder %s11701_s14, %s11697_s13  ;;  %p273_p4 = scmp.eq.s32.totalorder %s9687_s18, 1 }
  0x11   : > { %s11818_s22 = scalar_select %p254_p1, %s11705_s15, %s256_s20  }
  0x12   : > { %p11820_p5 = por %p267_p2, %p266_p0  ;;  %p11824_p6 = por %p273_p4, %p272_p3 }
  0x13   : > { %p9688_p7 = scmp.ge.s32.totalorder %s11709_s16, 1  ;;  %p280_p8 = scmp.lt.s32.totalorder %s11709_s16, 3 }
  0x14   : > { %s15884_s23 = scalar_select %p11820_p5, 1, 0 }
  0x15   : > { %s15885_s24 = scalar_select %p11824_p6, 1, 0 }
  0x16   : > { %p15861_p9 = scmp.eq.s32.totalorder %s11803_s17, 0  ;;  %p11831_p10 = pnand %p9688_p7, %p280_p8 }
  0x17   : > { %s11711_s26 = smov [#allocation5]   ;;  %s11712_s28 = smov [#allocation8]  }
  0x18   : > { %s15886_s25 = scalar_select %p11831_p10, 1, 0 }
  0x19   : > { %s306_s27 = sshll.u32 %s11711_s26, 4  ;;  %p10616_p11 = pneg %p11831_p10  ;;  %s307_s27 = int_to_ptr.vmem [resolvable:$true] %s306_s27 }
  0x1a   : > { %s330_s29 = sshll.u32 %s11712_s28, 4  ;;  %s11713_s11 = smov [#allocation11]   ;;  %s331_s29 = int_to_ptr.vmem [resolvable:$true] %s330_s29 }
  0x1b   : > { %p11839_p12 = pnand %p15861_p9, %p10616_p11  ;;  %s353_s12 = sshll.u32 %s11713_s11, 4  ;;  %s11843_s12 = int_to_ptr.vmem [resolvable:$true] %s353_s12 }
  0x1c   : > { %s11432_s20 = scalar_lea.vmem %s307_s27, 32  ;;  %p11440_p3 = scmp.lt.s32.totalorder %s307_s27, %s307_s27 }
  0x1d   : > { %p11847_p13 = pneg %p11839_p12  ;;  %p11433_p0 = scmp.ne.s32.totalorder %s307_s27, %s11432_s20 }
  0x1e   : > { %p11441_p4 = scmp.lt.s32.totalorder %s11432_s20, %s11432_s20 }
  0x1f   : > { %p11435_p1 = pnand %p11433_p0, %p11847_p13 }
  0x20   : > { %p11442_p7 = por %p11441_p4, %p11440_p3 }
  0x21   : > { %p11436_p2 = pneg %p11435_p1 }
  0x23   : > { %p11443_p8 = pnand %p11442_p7, %p11436_p2 }
  0x25   : > { %11446 = shalt.err (!%p11443_p8)
}
  0x26   : > { %s15889_s2 = sld [smem:[#allocation218_spill]]  ;;  %s11458_s28 = scalar_lea.vmem %s331_s29, 32 }
  0x27   : > { %p11459_p11 = scmp.ne.s32.totalorder %s331_s29, %s11458_s28  ;;  %p11466_p5 = scmp.lt.s32.totalorder %s331_s29, %s331_s29 }
  0x28   : > { %p11467_p0 = scmp.lt.s32.totalorder %s11458_s28, %s11458_s28 }
  0x29   : > { %p11461_p9 = pnand %p11459_p11, %p11847_p13 }
  0x2a   : > { %p11468_p1 = por %p11467_p0, %p11466_p5 }
  0x2b   : > { %p11462_p6 = pneg %p11461_p9 }
  0x2c   : > { %10622 = dma.hbm_to_vmem [thread:$0]  (!%p11839_p12), %s15889_s2, 32, %s307_s27, [#allocation6]  }
  0x2d   : > { %p11469_p10 = pnand %p11468_p1, %p11462_p6 }
  0x2f   : > { %11472 = shalt.err (!%p11469_p10)
}
  0x30   : > { %s15890_s4 = sld [smem:[#allocation219_spill]]  ;;  %s11484_s27 = scalar_lea.vmem %s11843_s12, 896 }
  0x31   : > { %p11485_p2 = scmp.ne.s32.totalorder %s11843_s12, %s11484_s27  ;;  %p11492_p4 = scmp.lt.s32.totalorder %s11843_s12, %s11843_s12 }
  0x32   : > { %p11493_p5 = scmp.lt.s32.totalorder %s11484_s27, %s11484_s27 }
  0x33   : > { %p11487_p3 = pnand %p11485_p2, %p11847_p13 }
  0x34   : > { %p11494_p6 = por %p11493_p5, %p11492_p4 }
  0x35   : > { %p11488_p9 = pneg %p11487_p3 }
  0x36   : > { %10628 = dma.hbm_to_vmem [thread:$0]  (!%p11839_p12), %s15890_s4, 32, %s331_s29, [#allocation9]  }
  0x37   : > { %p11495_p10 = pnand %p11494_p6, %p11488_p9 }
  0x39   : > { %11498 = shalt.err (!%p11495_p10)
}
  0x3a   : > { %s15864_s21 = smov 64   ;;  %s15865_s26 = smov 4  }
  0x3b   : > { %s15891_s6 = sld [smem:[#allocation220_spill]]  ;;  %s11716_s11 = smov [#allocation2]  }
  0x3c   : > { %s292_s20 = sshll.u32 %s11716_s11, 4  ;;  %s293_s20 = int_to_ptr.vmem [resolvable:$true] %s292_s20 }
  0x3d   : > { %s11510_s27 = scalar_lea.vmem %s293_s20, 5120  ;;  %p11518_p0 = scmp.lt.s32.totalorder %s293_s20, %s293_s20 }
  0x3e   : > { %p11511_p7 = scmp.ne.s32.totalorder %s293_s20, %s11510_s27  ;;  %p11519_p1 = scmp.lt.s32.totalorder %s11510_s27, %s11510_s27 }
  0x40   : > { %p11513_p8 = pnand %p11511_p7, %p11847_p13  ;;  %p11520_p2 = por %p11519_p1, %p11518_p0 }
  0x41   : > { %10634 = dma.hbm_to_vmem [thread:$0]  (!%p11839_p12), %s15891_s6, 896, %s11843_s12, [#allocation12], %s15864_s21, %s15864_s21, %s15865_s26  }
  0x42   : > { %p11514_p11 = pneg %p11513_p8 }
  0x44   : > { %p11521_p3 = pnand %p11520_p2, %p11514_p11 }
  0x46   : > { %11524 = shalt.err (!%p11521_p3)
}
  0x47   : > { %s11717_s2 = smov 256   ;;  %s11718_s4 = smov 16  }
  0x48   : > { %10619 = dma.hbm_to_vmem [thread:$0]  (!%p11839_p12), %s15851_s1, 5120, %s293_s20, [#allocation3], %s11717_s2, %s11717_s2, %s11718_s4  }
  0x49   : > { %s11719_s28 = smov [#allocation7]   ;;  %s11720_s21 = smov [#allocation10]  }
  0x4a   : > { %s316_s11 = sshll.u32 %s11719_s28, 4  ;;  %s340_s26 = sshll.u32 %s11720_s21, 4  ;;  %s317_s11 = int_to_ptr.vmem [resolvable:$true] %s316_s11  ;;  %s341_s26 = int_to_ptr.vmem [resolvable:$true] %s340_s26 }
  0x4b   : > { %s11536_s6 = scalar_lea.vmem %s317_s11, 40960  ;;  %p11544_p6 = scmp.lt.s32.totalorder %s317_s11, %s317_s11 }
  0x4c   : > { %p11537_p9 = scmp.ne.s32.totalorder %s317_s11, %s11536_s6  ;;  %p11545_p10 = scmp.lt.s32.totalorder %s11536_s6, %s11536_s6 }
  0x4e   : > { %p11539_p4 = pnand %p11537_p9, %p11847_p13  ;;  %p11546_p7 = por %p11545_p10, %p11544_p6 }
  0x50   : > { %p11540_p5 = pneg %p11539_p4 }
  0x52   : > { %p11547_p8 = pnand %p11546_p7, %p11540_p5 }
  0x54   : > { %11550 = shalt.err (!%p11547_p8)
}
  0x55   : > { %10625 = dma.hbm_to_vmem [thread:$0]  (!%p11839_p12), %s15853_s3, 40960, %s317_s11, [#allocation6], %s11717_s2, %s11717_s2, %s11718_s4  }
  0x56   : > { %s11562_s21 = scalar_lea.vmem %s341_s26, 4352  ;;  %p11570_p2 = scmp.lt.s32.totalorder %s341_s26, %s341_s26 }
  0x57   : > { %p11563_p11 = scmp.ne.s32.totalorder %s341_s26, %s11562_s21  ;;  %p11571_p3 = scmp.lt.s32.totalorder %s11562_s21, %s11562_s21 }
  0x59   : > { %p11565_p0 = pnand %p11563_p11, %p11847_p13  ;;  %p11572_p9 = por %p11571_p3, %p11570_p2 }
  0x5b   : > { %p11566_p1 = pneg %p11565_p0 }
  0x5d   : > { %p11573_p4 = pnand %p11572_p9, %p11566_p1 }
  0x5f   : > { %11576 = shalt.err (!%p11573_p4)
}
  0x60   : > { %s11721_s6 = smov 128   ;;  %s11722_s29 = smov 8  }
  0x61   : > { %10631 = dma.hbm_to_vmem [thread:$0]  (!%p11839_p12), %s15855_s5, 4352, %s341_s26, [#allocation9], %s11721_s6, %s11721_s6, %s11722_s29  }
  0x62   : > { %s11723_s2 = smov [#allocation13]   ;;  %s11724_s11 = smov [#allocation14]  }
  0x63   : > { %s366_s4 = sshll.u32 %s11723_s2, 4  ;;  %s380_s27 = sshll.u32 %s11724_s11, 4  ;;  %s367_s4 = int_to_ptr.vmem [resolvable:$true] %s366_s4  ;;  %s381_s27 = int_to_ptr.vmem [resolvable:$true] %s380_s27 }
  0x64   : > { %s11588_s20 = scalar_lea.vmem %s367_s4, 14336  ;;  %p11596_p7 = scmp.lt.s32.totalorder %s367_s4, %s367_s4 }
  0x65   : > { %p11589_p5 = scmp.ne.s32.totalorder %s367_s4, %s11588_s20  ;;  %p11597_p8 = scmp.lt.s32.totalorder %s11588_s20, %s11588_s20 }
  0x67   : > { %p11591_p6 = pnand %p11589_p5, %p11847_p13  ;;  %p11598_p11 = por %p11597_p8, %p11596_p7 }
  0x69   : > { %p11592_p10 = pneg %p11591_p6 }
  0x6b   : > { %p11599_p0 = pnand %p11598_p11, %p11592_p10 }
  0x6d   : > { %11602 = shalt.err (!%p11599_p0)
}
  0x6e   : > { %s15892_s21 = smov 4   ;;  %s15893_s26 = smov 64  }
  0x6f   : > { %10637 = dma.hbm_to_vmem [thread:$0]  (!%p11839_p12), %s15857_s7, 14336, %s367_s4, [#allocation12], %s15893_s26, %s15893_s26, %s15892_s21  }
  0x70   : > { %s11614_s12 = scalar_lea.vmem %s381_s27, 16  ;;  %s11621_s28 = scalar_lea.vmem %s381_s27, 32 }
  0x71   : > { %p11615_p1 = scmp.ne.s32.totalorder %s381_s27, %s11614_s12  ;;  %p11622_p9 = scmp.lt.s32.totalorder %s381_s27, %s381_s27 }
  0x72   : > { %p11623_p4 = scmp.lt.s32.totalorder %s11621_s28, %s11614_s12 }
  0x73   : > { %p11617_p2 = pnand %p11615_p1, %p11847_p13 }
  0x74   : > { %p11624_p5 = por %p11623_p4, %p11622_p9 }
  0x75   : > { %p11618_p3 = pneg %p11617_p2 }
  0x77   : > { %p11625_p6 = pnand %p11624_p5, %p11618_p3 }
  0x79   : > { %11628 = shalt.err (!%p11625_p6)
}
  0x7a   : > { %10640 = dma.hbm_to_vmem [thread:$0]  (!%p11839_p12), %s15858_s8, 16, %s381_s27, [#allocation15]  }
  0x7b   : > { %p15894_p10 = scmp.ne.s32.totalorder %s15886_s25, 0 }
  0x7d   : > { %402 = sbr.rel (%p15894_p10) target bundleno = 2334 (0x91e), region = 56 }
  0x82   : > { %p15895_p7 = scmp.eq.s32.totalorder %s11803_s17, 0 }
  0x84   : > { %11672 = dma.done.wait (%p15895_p7), [#allocation3], 5120   ;;  %p15896_p13 = pmov %p15895_p7 }
  0x85   : > { %p15897_p8 = pmov %p15895_p7 }
  0x86   : > { %11674 = vsyncadd (%p15896_p13), [#allocation3], 4294962176 }
  0x87   : > { %11676 = dma.done.wait (%p15897_p8), [#allocation6], 40992   ;;  %p15898_p11 = pmov %p15895_p7 }
  0x88   : > { %p15899_p0 = pmov %p15895_p7 }
  0x89   : > { %11678 = vsyncadd (%p15898_p11), [#allocation6], 4294926304 }
  0x8a   : > { %11680 = dma.done.wait (%p15899_p0), [#allocation9], 4384   ;;  %p15900_p12 = pmov %p15899_p0 }
  0x8b   : > { %p15901_p1 = pmov %p15899_p0 }
  0x8c   : > { %11682 = vsyncadd (%p15900_p12), [#allocation9], 4294962912 }
  0x8d   : > { %11684 = dma.done.wait (%p15901_p1), [#allocation12], 15232   ;;  %p15902_p2 = pmov %p15899_p0 }
  0x8e   : > { %p15903_p3 = pmov %p15899_p0 }
  0x8f   : > { %11686 = vsyncadd (%p15902_p2), [#allocation12], 4294952064 }
  0x90   : > { %11688 = dma.done.wait (%p15903_p3), [#allocation15], 16   ;;  %p15904_p9 = pmov %p15899_p0 }
  0x91   : > { %s9708_s25 = sshll.u32 %s11803_s17, 5  ;;  %v15866_v0 = vmov 0   ;;  %vm686_vm0 = vcmask 1045504   ;;  %v10709_v1 = vld [vmem:[#allocation2 + $0x64] ss:$16 sps:$4 sm:$0x3f]  }
  0x92   : > { %11690 = vsyncadd (%p15904_p9), [#allocation15], 4294967280  ;;  %731 = vmatprep.mubr.bf16.mxu0 %v15866_v0  ;;  %871 = vmatprep.mubr.bf16.mxu1 %v15866_v0  ;;  %p475_p4 = scmp.lt.s32.totalorder %s9708_s25, 63  ;;  %v10711_v2 = vld [vmem:[#allocation2 + $0x60] ss:$16 sps:$4 sm:$0x3f]  }
  0x93   : > { %9720 = vmatprep.subr.msk.bf16.mxu0 %vm686_vm0, %v10709_v1  ;;  %10578 = vmatprep.subr.msk.bf16.mxu1 %vm686_vm0, %v10709_v1  ;;  %v10712_v3 = vld [vmem:[#allocation2 + $0x44] ss:$16 sps:$4 sm:$0xff]   ;;  %v688_v4 = vsel %vm686_vm0, %v10711_v2, 0  ;;  %v10714_v5 = vld [vmem:[#allocation2 + $0x40] ss:$16 sps:$4 sm:$0xff]   ;;  %vm637_vm1 = vcmask 228352  }
  0x94   : > { %s16815_s25 = smov (!%p475_p4, %s9708_s25), 63  ;;  %712 = vmatpush1.bf16.msra.mxu0 %v688_v4  ;;  %10580 = vmatpush1.bf16.msra.mxu1 %v688_v4  ;;  %v10715_v10 = vld [vmem:[#allocation2 + $0x6c] ss:$16 sps:$4 sm:$0x3f]   ;;  %v10718_v20 = vld [vmem:[#allocation2 + $0x48] ss:$16 sps:$4 sm:$0xff]  }
  0x95   : > { %s9709_s30 = sshll.u32 %s16815_s25, 3  ;;  %713 = vmatprep.subr.bf16.mxu0 %v10712_v3  ;;  %10579 = vmatprep.subr.bf16.mxu1 %v10712_v3  ;;  %v10717_v11 = vld [vmem:[#allocation2 + $0x68] ss:$16 sps:$4 sm:$0x3f]   ;;  %v10720_v15 = vld [vmem:[#allocation2 + $0x4c] ss:$16 sps:$4 sm:$0xff]  }
  0x96   : > { %s11946_s27 = scalar_lea.vmem %s15850_s0, %s9709_s30  ;;  %v694_v14 = vsel %vm686_vm0, %v10717_v11, 0  ;;  %v10721_v21 = vld [vmem:[#allocation2 + $0x2c] ss:$16 sps:$4 sm:$0x3f]   ;;  %v10729_v29 = vld [vmem:[#allocation2 + $0x4] ss:$16 sps:$4 sm:$0xff]  }
  0x97   : > { %v544_v6 = vld [vmem:[%s11946_s27 + $0x1] sm:$0xff]  ;;  %v545_v7 = vld [vmem:[%s11946_s27 + $0x9] sm:$0xff]  ;;  %v546_v16 = vld [vmem:[%s11946_s27 + $0x11] sm:$0xff]  ;;  %vm3899_vm2 = vcmask 1014784   ;;  %vm4479_vm3 = vsmask.f32 7424 }
  0x98   : > { %v572_v8 = vld [vmem:[%s11946_s27 + $0xe1] sm:$0xff]  ;;  %v573_v9 = vld [vmem:[%s11946_s27 + $0xe9] sm:$0xff]  ;;  %v576_v12 = vpack.c.bf16 %v545_v7, %v544_v6  ;;  %714 = vmatpush1.bf16.msra.mxu0 %v10714_v5  ;;  %10581 = vmatpush1.bf16.msra.mxu1 %v10714_v5  ;;  %v547_v17 = vld [vmem:[%s11946_s27 + $0x19] sm:$0xff]  ;;  %vm6533_vm4 = vsmask.f32 6400  ;;  %vm5807_vm5 = vcmask 1046528  }
  0x99   : > { %v11955_v13 = vpack.c.bf16 %v573_v9, %v572_v8  ;;  %9737 = vmatprep.subr.msk.bf16.mxu1 %vm686_vm0, %v10715_v10  ;;  %v574_v18 = vld [vmem:[%s11946_s27 + $0xf1] sm:$0xff]  ;;  %v575_v19 = vld [vmem:[%s11946_s27 + $0xf9] sm:$0xf]  ;;  %v577_v22 = vpack.c.bf16 %v547_v17, %v546_v16  ;;  %v548_v27 = vld [vmem:[%s11946_s27 + $0x21] sm:$0xff]  ;;  %s480_s20 = smul.u32 7, %s11803_s17  ;;  %s471_s12 = sand.u32 1, %s11701_s14  }
  0x9a   : > { %v11968_v23 = vpack.c.bf16 %v575_v19, %v574_v18  ;;  %v10724_v24 = vld [vmem:[#allocation2 + $0x24] ss:$16 sps:$4 sm:$0x3f]   ;;  %v10726_v25 = vld [vmem:[#allocation2 + $0x20] ss:$16 sps:$4 sm:$0x3f]  }
  0x9b   : > { %9721 = vmatmul.mubr.msk.bf16.vlgmr.msra.gmra.mxu0 %vm637_vm1, %v576_v12  ;;  %9735 = vmatmul.mubr.msk.bf16.vlgmr.msra.gmra.mxu1 %vm637_vm1, %v11955_v13  ;;  %v1170_v26 = vsel %vm686_vm0, %v10726_v25, 0  ;;  %v549_v28 = vld [vmem:[%s11946_s27 + $0x29] sm:$0xff]  ;;  %v550_v34 = vld [vmem:[%s11946_s27 + $0x31] sm:$0xff]  ;;  %v551_v36 = vld [vmem:[%s11946_s27 + $0x39] sm:$0xff]  ;;  %p481_p5 = scmp.lt.s32.totalorder %s480_s20, 13  ;;  %s9707_s28 = sshll.u32 %s471_s12, 3 }
  0x9c   : > { %741 = vmatprep.mubr.bf16.mxu0 %v15866_v0  ;;  %881 = vmatprep.mubr.bf16.mxu1 %v15866_v0  ;;  %v10727_v30 = vld [vmem:[#allocation2] ss:$16 sps:$4 sm:$0xff]   ;;  %v10723_v31 = vld [vmem:[#allocation2 + $0x28] ss:$16 sps:$4 sm:$0x3f]   ;;  %v578_v32 = vpack.c.bf16 %v549_v28, %v548_v27  ;;  %v579_v38 = vpack.c.bf16 %v551_v36, %v550_v34  ;;  %s10420_s2 = sshll.u32 %s11803_s17, 7 }
  0x9d   : > { %905 = vmatpush1.bf16.msra.mxu1 %v694_v14  ;;  %9762 = vmatprep.subr.msk.bf16.mxu0 %vm686_vm0, %v10724_v24  ;;  %v10732_v33 = vld [vmem:[#allocation2 + $0xc] ss:$16 sps:$4 sm:$0xff]   ;;  %v1176_v35 = vsel %vm686_vm0, %v10723_v31, 0  ;;  %v10730_v37 = vld [vmem:[#allocation2 + $0x8] ss:$16 sps:$4 sm:$0xff]   ;;  %v488_v8 = vld [vmem:[%s11946_s27] sm:$0xff]  ;;  %s9521_s4 = scalar_lea.hbm %s15860_s10, %s10420_s2 }
  0x9e   : > { %906 = vmatprep.subr.bf16.mxu1 %v10720_v15  ;;  %1194 = vmatpush1.bf16.msra.mxu0 %v1170_v26  ;;  %v552_v39 = vld [vmem:[%s11946_s27 + $0x41] sm:$0xff]  ;;  %v553_v40 = vld [vmem:[%s11946_s27 + $0x49] sm:$0xff]  ;;  %v554_v42 = vld [vmem:[%s11946_s27 + $0x51] sm:$0xff]  ;;  %s16817_s20 = smov (!%p481_p5, %s480_s20), 13  ;;  %s473_s11 = scalar_lea.vmem [#allocation16], %s9707_s28 }
  0x9f   : > { %1195 = vmatprep.subr.bf16.mxu0 %v10729_v29  ;;  %v580_v41 = vpack.c.bf16 %v553_v40, %v552_v39  ;;  %v555_v43 = vld [vmem:[%s11946_s27 + $0x59] sm:$0xff]  ;;  %v556_v45 = vld [vmem:[%s11946_s27 + $0x61] sm:$0xff]  ;;  %v557_v46 = vld [vmem:[%s11946_s27 + $0x69] sm:$0xff]  ;;  %s10423_s21 = sshll.u32 %s16817_s20, 4  ;;  %s9523_s25 = sshll.u32 %s473_s11, 4  ;;  %s9524_s25 = int_to_ptr.vmem [resolvable:$true] %s9523_s25 }
  0xa0   : > { %v581_v44 = vpack.c.bf16 %v555_v43, %v554_v42  ;;  %v582_v47 = vpack.c.bf16 %v557_v46, %v556_v45  ;;  %v10733_v48 = vld [vmem:[#allocation2 + $0xa4] ss:$16 sps:$4 sm:$0x3f]   ;;  %v10735_v49 = vld [vmem:[#allocation2 + $0xac] ss:$16 sps:$4 sm:$0x3f]   ;;  %s15746_s29 = scalar_lea.vmem %s15859_s9, %s10423_s21 }
  0xa1   : > { %907 = vmatpush1.bf16.msra.mxu1 %v10718_v20  ;;  %v558_v50 = vld [vmem:[%s11946_s27 + $0x71] sm:$0xff]  ;;  %v559_v51 = vld [vmem:[%s11946_s27 + $0x79] sm:$0xff]  ;;  %v560_v53 = vld [vmem:[%s11946_s27 + $0x81] sm:$0xff]  ;;  %s11629_s20 = scalar_lea.vmem %s9524_s25, 128  ;;  %p16808_p10 = scmp.ne.s32.totalorder %s15884_s23, 0 }
  0xa2   : > { %9779 = vmatprep.subr.msk.bf16.mxu1 %vm686_vm0, %v10721_v21  ;;  %1196 = vmatpush1.bf16.msra.mxu0 %v10727_v30  ;;  %v583_v52 = vpack.c.bf16 %v559_v51, %v558_v50  ;;  %v561_v54 = vld [vmem:[%s11946_s27 + $0x89] sm:$0xff]  ;;  %v562_v56 = vld [vmem:[%s11946_s27 + $0x91] sm:$0xff]  ;;  %v563_v57 = vld [vmem:[%s11946_s27 + $0x99] sm:$0xff]  ;;  %p11630_p6 = scmp.ne.s32.totalorder %s9524_s25, %s11629_s20  ;;  %s11726_s21 = smov [#allocation16]  }
  0xa3   : > { %9722 = vmatmul.mubr.msk.bf16.gmra.mxu0 %vm637_vm1, %v577_v22  ;;  %9736 = vmatmul.mubr.msk.bf16.gmra.mxu1 %vm637_vm1, %v11968_v23  ;;  %v584_v55 = vpack.c.bf16 %v561_v54, %v560_v53  ;;  %v585_v58 = vpack.c.bf16 %v563_v57, %v562_v56  ;;  %v564_v59 = vld [vmem:[%s11946_s27 + $0xa1] sm:$0xff]  ;;  %v565_v60 = vld [vmem:[%s11946_s27 + $0xa9] sm:$0xff]  ;;  %v566_v62 = vld [vmem:[%s11946_s27 + $0xb1] sm:$0xff]  ;;  %s11633_s26 = sshll.u32 %s11726_s21, 4  ;;  %s11634_s26 = int_to_ptr.vmem [resolvable:$false] %s11633_s26 }
  0xa4   : > { %751 = vmatprep.mubr.bf16.mxu0 %v15866_v0  ;;  %924 = vmatprep.mubr.bf16.mxu1 %v15866_v0  ;;  %v586_v61 = vpack.c.bf16 %v565_v60, %v564_v59  ;;  %v567_v63 = vld [vmem:[%s11946_s27 + $0xb9] sm:$0xff]  ;;  %v568_v2 = vld [vmem:[%s11946_s27 + $0xc1] sm:$0xff]  ;;  %v569_v3 = vld [vmem:[%s11946_s27 + $0xc9] sm:$0xff]  ;;  %p11631_p7 = pnand %p11630_p6, %p16808_p10  ;;  %s11635_s17 = scalar_lea.vmem %s11634_s26, 256 }
  0xa5   : > { %9804 = vmatprep.subr.msk.bf16.mxu0 %vm686_vm0, %v10733_v48  ;;  %v587_v1 = vpack.c.bf16 %v567_v63, %v566_v62  ;;  %v588_v4 = vpack.c.bf16 %v569_v3, %v568_v2  ;;  %v570_v5 = vld [vmem:[%s11946_s27 + $0xd1] sm:$0xff]  ;;  %v571_v6 = vld [vmem:[%s11946_s27 + $0xd9] sm:$0xff]  ;;  %v489_v9 = vld [vmem:[%s11946_s27 + $0x8] sm:$0xff]  ;;  %p11636_p8 = scmp.lt.s32.totalorder %s9524_s25, %s11634_s26  ;;  %p11637_p11 = scmp.lt.s32.totalorder %s11635_s17, %s11629_s20 }
  0xa6   : > { %v589_v7 = vpack.c.bf16 %v571_v6, %v570_v5  ;;  %v10737_v10 = vld [vmem:[#allocation2 + $0xa0] ss:$16 sps:$4 sm:$0x3f]   ;;  %v520_v11 = vpack.c.bf16 %v489_v9, %v488_v8  ;;  %v491_v16 = vld [vmem:[%s11946_s27 + $0x18] sm:$0xff]  ;;  %v493_v20 = vld [vmem:[%s11946_s27 + $0x28] sm:$0xff]  ;;  %p11632_p13 = pneg %p11631_p7 }
  0xa7   : > { %v490_v14 = vld [vmem:[%s11946_s27 + $0x10] sm:$0xff]  ;;  %v1709_v15 = vsel %vm686_vm0, %v10737_v10, 0  ;;  %v492_v19 = vld [vmem:[%s11946_s27 + $0x20] sm:$0xff]  ;;  %v495_v24 = vld [vmem:[%s11946_s27 + $0x38] sm:$0xff]  ;;  %p11638_p0 = por %p11637_p11, %p11636_p8 }
  0xa8   : > { %v10739_v17 = vld [vmem:[#allocation2 + $0x80] ss:$16 sps:$4 sm:$0xff]   ;;  %v521_v18 = vpack.c.bf16 %v491_v16, %v490_v14  ;;  %v522_v21 = vpack.c.bf16 %v493_v20, %v492_v19  ;;  %v497_v27 = vld [vmem:[%s11946_s27 + $0x48] sm:$0xff]  ;;  %v499_v31 = vld [vmem:[%s11946_s27 + $0x58] sm:$0xff] }
  0xa9   : > { %v496_v26 = vld [vmem:[%s11946_s27 + $0x40] sm:$0xff]  ;;  %v10744_v29 = vld [vmem:[#allocation2 + $0x8c] ss:$16 sps:$4 sm:$0xff]   ;;  %v498_v30 = vld [vmem:[%s11946_s27 + $0x50] sm:$0xff]  ;;  %p11639_p12 = pnand %p11638_p0, %p11632_p13 }
  0xaa   : > { %v524_v28 = vpack.c.bf16 %v497_v27, %v496_v26  ;;  %v500_v34 = vld [vmem:[%s11946_s27 + $0x60] sm:$0xff]  ;;  %v506_v43 = vld [vmem:[%s11946_s27 + $0x90] sm:$0xff]  ;;  %v10747_v46 = vld [vmem:[#allocation2 + $0xec] ss:$16 sps:$4 sm:$0x3f]  }
  0xab   : > { %9723 = vmatmul.mubr.msk.bf16.gmra.mxu0 %vm637_vm1, %v578_v32  ;;  %9738 = vmatmul.mubr.msk.bf16.vlgmr.msra.gmra.mxu1 %vm637_vm1, %v576_v12  ;;  %v10741_v12 = vld [vmem:[#allocation2 + $0x84] ss:$16 sps:$4 sm:$0xff]   ;;  %v513_v63 = vld [vmem:[%s11946_s27 + $0xc8] sm:$0xff] }
  0xac   : > { %761 = vmatprep.mubr.bf16.mxu0 %v15866_v0  ;;  %934 = vmatprep.mubr.bf16.mxu1 %v15866_v0  ;;  %v504_v40 = vld [vmem:[%s11946_s27 + $0x80] sm:$0xff]  ;;  %v510_v51 = vld [vmem:[%s11946_s27 + $0xb0] sm:$0xff] }
  0xad   : > { %1387 = vmatpush1.bf16.msra.mxu1 %v1176_v35  ;;  %v501_v35 = vld [vmem:[%s11946_s27 + $0x68] sm:$0xff]  ;;  %v10745_v45 = vld [vmem:[#allocation2 + $0xe4] ss:$16 sps:$4 sm:$0x3f]  }
  0xae   : > { %1388 = vmatprep.subr.bf16.mxu1 %v10732_v33  ;;  %v525_v33 = vpack.c.bf16 %v499_v31, %v498_v30  ;;  %v526_v36 = vpack.c.bf16 %v501_v35, %v500_v34  ;;  %v508_v48 = vld [vmem:[%s11946_s27 + $0xa0] sm:$0xff]  ;;  %v514_v10 = vld [vmem:[%s11946_s27 + $0xd0] sm:$0xff] }
  0xaf   : > { %v512_v62 = vld [vmem:[%s11946_s27 + $0xc0] sm:$0xff] }
  0xb1   : > { %1389 = vmatpush1.bf16.msra.mxu1 %v10730_v37  ;;  %v502_v37 = vld [vmem:[%s11946_s27 + $0x70] sm:$0xff] }
  0xb2   : > { %9821 = vmatprep.subr.msk.bf16.mxu1 %vm686_vm0, %v10735_v49  ;;  %v509_v49 = vld [vmem:[%s11946_s27 + $0xa8] sm:$0xff] }
  0xb3   : > { %9724 = vmatmul.mubr.msk.bf16.gmra.mxu0 %vm637_vm1, %v579_v38  ;;  %9739 = vmatmul.mubr.msk.bf16.gmra.mxu1 %vm637_vm1, %v577_v22  ;;  %v494_v22 = vld [vmem:[%s11946_s27 + $0x30] sm:$0xff]  ;;  %v12121_v50 = vpack.c.bf16 %v509_v49, %v508_v48 }
  0xb4   : > { %771 = vmatprep.mubr.bf16.mxu0 %v15866_v0  ;;  %944 = vmatprep.mubr.bf16.mxu1 %v15866_v0  ;;  %v523_v25 = vpack.c.bf16 %v495_v24, %v494_v22  ;;  %v516_v22 = vld [vmem:[%s11946_s27 + $0xe0] sm:$0xff]  ;;  %v517_v24 = vld [vmem:[%s11946_s27 + $0xe8] sm:$0xff] }
  0xb5   : > { %v12217_v30 = vpack.c.bf16 %v517_v24, %v516_v22 }
  0xbb   : > { %9725 = vmatmul.mubr.msk.bf16.gmra.mxu0 %vm637_vm1, %v580_v41  ;;  %9740 = vmatmul.mubr.msk.bf16.gmra.mxu1 %vm637_vm1, %v578_v32 }
  0xbc   : > { %781 = vmatprep.mubr.bf16.mxu0 %v15866_v0  ;;  %954 = vmatprep.mubr.bf16.mxu1 %v15866_v0 }
  0xc3   : > { %9726 = vmatmul.mubr.msk.bf16.gmra.mxu0 %vm637_vm1, %v581_v44  ;;  %9741 = vmatmul.mubr.msk.bf16.gmra.mxu1 %vm637_vm1, %v579_v38  ;;  %v503_v38 = vld [vmem:[%s11946_s27 + $0x78] sm:$0xff] }
  0xc4   : > { %791 = vmatprep.mubr.bf16.mxu0 %v15866_v0  ;;  %964 = vmatprep.mubr.bf16.mxu1 %v15866_v0  ;;  %v527_v39 = vpack.c.bf16 %v503_v38, %v502_v37 }
  0xcb   : > { %9727 = vmatmul.mubr.msk.bf16.gmra.mxu0 %vm637_vm1, %v582_v47  ;;  %9742 = vmatmul.mubr.msk.bf16.gmra.mxu1 %vm637_vm1, %v580_v41  ;;  %v505_v41 = vld [vmem:[%s11946_s27 + $0x88] sm:$0xff] }
  0xcc   : > { %801 = vmatprep.mubr.bf16.mxu0 %v15866_v0  ;;  %974 = vmatprep.mubr.bf16.mxu1 %v15866_v0  ;;  %v528_v42 = vpack.c.bf16 %v505_v41, %v504_v40 }
  0xd3   : > { %9728 = vmatmul.mubr.msk.bf16.gmra.mxu0 %vm637_vm1, %v583_v52  ;;  %9743 = vmatmul.mubr.msk.bf16.gmra.mxu1 %vm637_vm1, %v581_v44  ;;  %v507_v44 = vld [vmem:[%s11946_s27 + $0x98] sm:$0xff] }
  0xd4   : > { %811 = vmatprep.mubr.bf16.mxu0 %v15866_v0  ;;  %984 = vmatprep.mubr.bf16.mxu1 %v15866_v0 }
  0xdb   : > { %9729 = vmatmul.mubr.msk.bf16.gmra.mxu0 %vm637_vm1, %v584_v55  ;;  %9744 = vmatmul.mubr.msk.bf16.gmra.mxu1 %vm637_vm1, %v582_v47  ;;  %v529_v47 = vpack.c.bf16 %v507_v44, %v506_v43  ;;  %v1567_v43 = vld [vmem:[%s11946_s27 + $0x2] sm:$0xff]  ;;  %v1568_v44 = vld [vmem:[%s11946_s27 + $0xa] sm:$0xff] }
  0xdc   : > { %821 = vmatprep.mubr.bf16.mxu0 %v15866_v0  ;;  %994 = vmatprep.mubr.bf16.mxu1 %v15866_v0 }
  0xe3   : > { %9730 = vmatmul.mubr.msk.bf16.gmra.mxu0 %vm637_vm1, %v585_v58  ;;  %9745 = vmatmul.mubr.msk.bf16.gmra.mxu1 %vm637_vm1, %v583_v52  ;;  %v511_v52 = vld [vmem:[%s11946_s27 + $0xb8] sm:$0xff] }
  0xe4   : > { %831 = vmatprep.mubr.bf16.mxu0 %v15866_v0  ;;  %1004 = vmatprep.mubr.bf16.mxu1 %v15866_v0  ;;  %v12142_v59 = vpack.c.bf16 %v511_v52, %v510_v51  ;;  %v12269_v52 = vpack.c.bf16 %v1568_v44, %v1567_v43 }
  0xeb   : > { %9731 = vmatmul.mubr.msk.bf16.gmra.mxu0 %vm637_vm1, %v586_v61  ;;  %9746 = vmatmul.mubr.msk.bf16.gmra.mxu1 %vm637_vm1, %v584_v55 }
  0xec   : > { %841 = vmatprep.mubr.bf16.mxu0 %v15866_v0  ;;  %1014 = vmatprep.mubr.bf16.mxu1 %v15866_v0 }
  0xf3   : > { %9732 = vmatmul.mubr.msk.bf16.gmra.mxu0 %vm637_vm1, %v587_v1  ;;  %9747 = vmatmul.mubr.msk.bf16.gmra.mxu1 %vm637_vm1, %v585_v58 }
  0xf4   : > { %851 = vmatprep.mubr.bf16.mxu0 %v15866_v0  ;;  %1024 = vmatprep.mubr.bf16.mxu1 %v15866_v0 }
  0xfb   : > { %9733 = vmatmul.mubr.msk.bf16.gmra.mxu0 %vm637_vm1, %v588_v4  ;;  %9748 = vmatmul.mubr.msk.bf16.gmra.mxu1 %vm637_vm1, %v586_v61 }
  0xfc   : > { %861 = vmatprep.mubr.bf16.mxu0 %v15866_v0  ;;  %1034 = vmatprep.mubr.bf16.mxu1 %v15866_v0 }
 0x103   : > { %9734 = vmatmul.mubr.msk.bf16.gmra.mxu0 %vm637_vm1, %v589_v7  ;;  %9749 = vmatmul.mubr.msk.bf16.gmra.mxu1 %vm637_vm1, %v587_v1 }
 0x104   : > { %1044 = vmatprep.mubr.bf16.mxu1 %v15866_v0  ;;  %1213 = vmatprep.mubr.bf16.mxu0 %v15866_v0 }
 0x10b   : > { %9750 = vmatmul.mubr.msk.bf16.gmra.mxu1 %vm637_vm1, %v588_v4  ;;  %9763 = vmatmul.mubr.msk.bf16.vlgmr.msra.gmra.mxu0 %vm637_vm1, %v520_v11 }
 0x10c   : > { %1054 = vmatprep.mubr.bf16.mxu1 %v15866_v0  ;;  %1223 = vmatprep.mubr.bf16.mxu0 %v15866_v0 }
 0x10d   : > { %1733 = vmatpush1.bf16.msra.mxu0 %v1709_v15 }
 0x10e   : > { %1734 = vmatprep.subr.bf16.mxu0 %v10741_v12 }
 0x111   : > { %1735 = vmatpush1.bf16.msra.mxu0 %v10739_v17 }
 0x112   : > { %9846 = vmatprep.subr.msk.bf16.mxu0 %vm686_vm0, %v10745_v45  ;;  %v10749_v45 = vld [vmem:[#allocation2 + $0xe0] ss:$16 sps:$4 sm:$0x3f]  }
 0x113   : > { %9751 = vmatmul.mubr.msk.bf16.gmra.mxu1 %vm637_vm1, %v589_v7  ;;  %9764 = vmatmul.mubr.msk.bf16.gmra.mxu0 %vm637_vm1, %v521_v18  ;;  %v12167_v7 = vpack.c.bf16 %v513_v63, %v512_v62  ;;  %v2376_v62 = vsel %vm686_vm0, %v10749_v45, 0  ;;  %v10753_v63 = vld [vmem:[#allocation2 + $0xc4] ss:$16 sps:$4 sm:$0xff]  }
 0x114   : > { %1064 = vmatprep.mubr.bf16.mxu1 %v15866_v0  ;;  %1233 = vmatprep.mubr.bf16.mxu0 %v15866_v0 }
 0x11b   : > { %9752 = vmatmul.mubr.msk.bf16.gmra.mxu1 %vm637_vm1, %v11955_v13  ;;  %9765 = vmatmul.mubr.msk.bf16.gmra.mxu0 %vm637_vm1, %v522_v21  ;;  %v10738_v13 = vld [vmem:[#allocation2 + $0xa8] ss:$16 sps:$4 sm:$0x3f]  }
 0x11c   : > { %1074 = vmatprep.mubr.bf16.mxu1 %v15866_v0  ;;  %1243 = vmatprep.mubr.bf16.mxu0 %v15866_v0  ;;  %v1715_v32 = vsel %vm686_vm0, %v10738_v13, 0 }
 0x123   : > { %9753 = vmatmul.mubr.msk.bf16.gmra.mxu1 %vm637_vm1, %v11968_v23  ;;  %9766 = vmatmul.mubr.msk.bf16.gmra.mxu0 %vm637_vm1, %v523_v25  ;;  %v10742_v23 = vld [vmem:[#allocation2 + $0x88] ss:$16 sps:$4 sm:$0xff]  }
 0x124   : > { %1253 = vmatprep.mubr.bf16.mxu0 %v15866_v0  ;;  %1406 = vmatprep.mubr.bf16.mxu1 %v15866_v0 }
 0x12b   : > { %9767 = vmatmul.mubr.msk.bf16.gmra.mxu0 %vm637_vm1, %v524_v28  ;;  %9780 = vmatmul.mubr.msk.bf16.vlgmr.msra.gmra.mxu1 %vm637_vm1, %v520_v11  ;;  %v515_v11 = vld [vmem:[%s11946_s27 + $0xd8] sm:$0xff] }
 0x12c   : > { %1263 = vmatprep.mubr.bf16.mxu0 %v15866_v0  ;;  %1416 = vmatprep.mubr.bf16.mxu1 %v15866_v0  ;;  %v12192_v19 = vpack.c.bf16 %v515_v11, %v514_v10  ;;  %v1569_v11 = vld [vmem:[%s11946_s27 + $0x12] sm:$0xff] }
 0x12d   : > { %1926 = vmatpush1.bf16.msra.mxu1 %v1715_v32 }
 0x12e   : > { %1927 = vmatprep.subr.bf16.mxu1 %v10744_v29 }
 0x131   : > { %1928 = vmatpush1.bf16.msra.mxu1 %v10742_v23  ;;  %v518_v23 = vld [vmem:[%s11946_s27 + $0xf0] sm:$0xff] }
 0x132   : > { %9863 = vmatprep.subr.msk.bf16.mxu1 %vm686_vm0, %v10747_v46 }
 0x133   : > { %9768 = vmatmul.mubr.msk.bf16.gmra.mxu0 %vm637_vm1, %v525_v33  ;;  %9781 = vmatmul.mubr.msk.bf16.gmra.mxu1 %vm637_vm1, %v521_v18 }
 0x134   : > { %1273 = vmatprep.mubr.bf16.mxu0 %v15866_v0  ;;  %1426 = vmatprep.mubr.bf16.mxu1 %v15866_v0 }
 0x13b   : > { %9769 = vmatmul.mubr.msk.bf16.gmra.mxu0 %vm637_vm1, %v526_v36  ;;  %9782 = vmatmul.mubr.msk.bf16.gmra.mxu1 %vm637_vm1, %v522_v21 }
 0x13c   : > { %1283 = vmatprep.mubr.bf16.mxu0 %v15866_v0  ;;  %1436 = vmatprep.mubr.bf16.mxu1 %v15866_v0 }
 0x143   : > { %9770 = vmatmul.mubr.msk.bf16.gmra.mxu0 %vm637_vm1, %v527_v39  ;;  %9783 = vmatmul.mubr.msk.bf16.gmra.mxu1 %vm637_vm1, %v523_v25 }
 0x144   : > { %1293 = vmatprep.mubr.bf16.mxu0 %v15866_v0  ;;  %1446 = vmatprep.mubr.bf16.mxu1 %v15866_v0 }
 0x14b   : > { %9771 = vmatmul.mubr.msk.bf16.gmra.mxu0 %vm637_vm1, %v528_v42  ;;  %9784 = vmatmul.mubr.msk.bf16.gmra.mxu1 %vm637_vm1, %v524_v28 }
 0x14c   : > { %1303 = vmatprep.mubr.bf16.mxu0 %v15866_v0  ;;  %1456 = vmatprep.mubr.bf16.mxu1 %v15866_v0 }
 0x153   : > { %9772 = vmatmul.mubr.msk.bf16.gmra.mxu0 %vm637_vm1, %v529_v47  ;;  %9785 = vmatmul.mubr.msk.bf16.gmra.mxu1 %vm637_vm1, %v525_v33  ;;  %v519_v33 = vld [vmem:[%s11946_s27 + $0xf8] sm:$0xf] }
 0x154   : > { %1313 = vmatprep.mubr.bf16.mxu0 %v15866_v0  ;;  %1466 = vmatprep.mubr.bf16.mxu1 %v15866_v0  ;;  %v12243_v40 = vpack.c.bf16 %v519_v33, %v518_v23  ;;  %v1570_v23 = vld [vmem:[%s11946_s27 + $0x1a] sm:$0xff] }
 0x155   : > { %v10751_v33 = vld [vmem:[#allocation2 + $0xc0] ss:$16 sps:$4 sm:$0xff]  }
 0x15b   : > { %v12125_v53 = vpop.f32.mrf.mxu0  ;;  %v12127_v54 = vpop.f32.mrf.mxu1  ;;  %9773 = vmatmul.mubr.msk.bf16.gmra.mxu0 %vm637_vm1, %v12121_v50  ;;  %9786 = vmatmul.mubr.msk.bf16.gmra.mxu1 %vm637_vm1, %v526_v36 }
 0x15c   : > { %15905 = vst [vmem:[#allocation23_spill] sm:$0xff] %v12127_v54  ;;  %1323 = vmatprep.mubr.bf16.mxu0 %v15866_v0  ;;  %1476 = vmatprep.mubr.bf16.mxu1 %v15866_v0 }
 0x15d   : > { %v12134_v55 = vpop.f32.mrf.mxu0  ;;  %v12136_v56 = vpop.f32.mrf.mxu1 }
 0x15e   : > { %15906 = vst [vmem:[#allocation24_spill] sm:$0xff] %v12136_v56 }
 0x15f   : > { %v12138_v57 = vpop.f32.mrf.mxu0  ;;  %v12140_v58 = vpop.f32.mrf.mxu1 }
 0x160   : > { %15907 = vst [vmem:[#allocation25_spill] sm:$0xff] %v12140_v58 }
 0x161   : > { %v12144_v60 = vpop.f32.mrf.mxu0  ;;  %v12146_v61 = vpop.f32.mrf.mxu1 }
 0x162   : > { %15908 = vst [vmem:[#allocation26_spill] sm:$0xff] %v12146_v61 }
 0x163   : > { %v12150_v1 = vpop.f32.mrf.mxu0  ;;  %v12152_v2 = vpop.f32.mrf.mxu1  ;;  %9774 = vmatmul.mubr.msk.bf16.gmra.mxu0 %vm637_vm1, %v12142_v59  ;;  %9787 = vmatmul.mubr.msk.bf16.gmra.mxu1 %vm637_vm1, %v527_v39 }
 0x164   : > { %15909 = vst [vmem:[#allocation27_spill] sm:$0xff] %v12152_v2  ;;  %1333 = vmatprep.mubr.bf16.mxu0 %v15866_v0  ;;  %1486 = vmatprep.mubr.bf16.mxu1 %v15866_v0 }
 0x165   : > { %v12159_v3 = vpop.f32.mrf.mxu0  ;;  %v12161_v4 = vpop.f32.mrf.mxu1 }
 0x166   : > { %15910 = vst [vmem:[#allocation28_spill] sm:$0xff] %v12161_v4 }
 0x167   : > { %v12163_v5 = vpop.f32.mrf.mxu0  ;;  %v12165_v6 = vpop.f32.mrf.mxu1 }
 0x168   : > { %15911 = vst [vmem:[#allocation29_spill] sm:$0xff] %v12165_v6 }
 0x169   : > { %v12169_v8 = vpop.f32.mrf.mxu0  ;;  %v12171_v9 = vpop.f32.mrf.mxu1 }
 0x16a   : > { %15912 = vst [vmem:[#allocation30_spill] sm:$0xff] %v12171_v9  ;;  %v12296_v9 = vpack.c.bf16 %v1570_v23, %v1569_v11  ;;  %v1572_v11 = vld [vmem:[%s11946_s27 + $0x2a] sm:$0xff] }
 0x16b   : > { %v12175_v12 = vpop.f32.mrf.mxu0  ;;  %v12177_v14 = vpop.f32.mrf.mxu1  ;;  %9775 = vmatmul.mubr.msk.bf16.gmra.mxu0 %vm637_vm1, %v12167_v7  ;;  %9788 = vmatmul.mubr.msk.bf16.gmra.mxu1 %vm637_vm1, %v528_v42 }
 0x16c   : > { %1343 = vmatprep.mubr.bf16.mxu0 %v15866_v0  ;;  %1496 = vmatprep.mubr.bf16.mxu1 %v15866_v0 }
 0x16d   : > { %v12184_v15 = vpop.f32.mrf.mxu0  ;;  %v12186_v16 = vpop.f32.mrf.mxu1 }
 0x16f   : > { %v12188_v17 = vpop.f32.mrf.mxu0  ;;  %v12190_v18 = vpop.f32.mrf.mxu1 }
 0x171   : > { %v12194_v20 = vpop.f32.mrf.mxu0  ;;  %v12196_v21 = vpop.f32.mrf.mxu1 }
 0x172   : > { %15913 = vst [vmem:[#allocation31_spill] sm:$0xff] %v12196_v21 }
 0x173   : > { %v12200_v25 = vpop.f32.mrf.mxu0  ;;  %v12202_v26 = vpop.f32.mrf.mxu1  ;;  %9776 = vmatmul.mubr.msk.bf16.gmra.mxu0 %vm637_vm1, %v12192_v19  ;;  %9789 = vmatmul.mubr.msk.bf16.gmra.mxu1 %vm637_vm1, %v529_v47 }
 0x174   : > { %15914 = vst [vmem:[#allocation32_spill] sm:$0xff] %v12202_v26  ;;  %1353 = vmatprep.mubr.bf16.mxu0 %v15866_v0  ;;  %1506 = vmatprep.mubr.bf16.mxu1 %v15866_v0 }
 0x175   : > { %v12209_v27 = vpop.f32.mrf.mxu0  ;;  %v12211_v13 = vpop.f32.mrf.mxu1 }
 0x176   : > { %15915 = vst [vmem:[#allocation33_spill] sm:$0xff] %v12211_v13 }
 0x177   : > { %v12213_v28 = vpop.f32.mrf.mxu0  ;;  %v12215_v29 = vpop.f32.mrf.mxu1 }
 0x178   : > { %15916 = vst [vmem:[#allocation34_spill] sm:$0xff] %v12215_v29 }
 0x179   : > { %v12219_v31 = vpop.f32.mrf.mxu0  ;;  %v12221_v32 = vpop.f32.mrf.mxu1 }
 0x17a   : > { %15917 = vst [vmem:[#allocation35_spill] sm:$0xff] %v12221_v32 }
 0x17b   : > { %v12225_v34 = vpop.f32.mrf.mxu0  ;;  %v12227_v35 = vpop.f32.mrf.mxu1  ;;  %9777 = vmatmul.mubr.msk.bf16.gmra.mxu0 %vm637_vm1, %v12217_v30  ;;  %9790 = vmatmul.mubr.msk.bf16.gmra.mxu1 %vm637_vm1, %v12121_v50 }
 0x17c   : > { %15918 = vst [vmem:[#allocation36_spill] sm:$0xff] %v12227_v35  ;;  %1363 = vmatprep.mubr.bf16.mxu0 %v15866_v0  ;;  %1516 = vmatprep.mubr.bf16.mxu1 %v15866_v0 }
 0x17d   : > { %v12235_v36 = vpop.f32.mrf.mxu0  ;;  %v12237_v37 = vpop.f32.mrf.mxu1 }
 0x17e   : > { %15919 = vst [vmem:[#allocation37_spill] sm:$0xff] %v12237_v37 }
 0x17f   : > { %v12239_v38 = vpop.f32.mrf.mxu0  ;;  %v12241_v39 = vpop.f32.mrf.mxu1 }
 0x180   : > { %15920 = vst [vmem:[#allocation38_spill] sm:$0xff] %v12241_v39 }
 0x181   : > { %v12245_v41 = vpop.f32.mrf.mxu0  ;;  %v12247_v42 = vpop.f32.mrf.mxu1 }
 0x182   : > { %15921 = vst [vmem:[#allocation39_spill] sm:$0xff] %v12247_v42 }
 0x183   : > { %v12251_v46 = vpop.f32.mrf.mxu0  ;;  %v12253_v47 = vpop.f32.mrf.mxu1  ;;  %9778 = vmatmul.mubr.msk.bf16.gmra.mxu0 %vm637_vm1, %v12243_v40  ;;  %9791 = vmatmul.mubr.msk.bf16.gmra.mxu1 %vm637_vm1, %v12142_v59 }
 0x184   : > { %15922 = vst [vmem:[#allocation40_spill] sm:$0xff] %v12251_v46  ;;  %15923 = vst [vmem:[#allocation41_spill] sm:$0xff] %v12253_v47  ;;  %1526 = vmatprep.mubr.bf16.mxu1 %v15866_v0  ;;  %1752 = vmatprep.mubr.bf16.mxu0 %v15866_v0 }
 0x185   : > { %v12261_v48 = vpop.f32.mrf.mxu0  ;;  %v12263_v49 = vpop.f32.mrf.mxu1 }
 0x186   : > { %15924 = vst [vmem:[#allocation42_spill] sm:$0xff] %v12261_v48  ;;  %15925 = vst [vmem:[#allocation43_spill] sm:$0xff] %v12263_v49 }
 0x187   : > { %v12265_v50 = vpop.f32.mrf.mxu0  ;;  %v12267_v51 = vpop.f32.mrf.mxu1 }
 0x188   : > { %15926 = vst [vmem:[#allocation44_spill] sm:$0xff] %v12265_v50  ;;  %15927 = vst [vmem:[#allocation45_spill] sm:$0xff] %v12267_v51 }
 0x189   : > { %v12272_v10 = vpop.f32.mrf.mxu0  ;;  %v12274_v59 = vpop.f32.mrf.mxu1 }
 0x18a   : > { %15928 = vst [vmem:[#allocation46_spill] sm:$0xff] %v12272_v10  ;;  %15929 = vst [vmem:[#allocation47_spill] sm:$0xff] %v12274_v59  ;;  %v10756_v59 = vld [vmem:[#allocation2 + $0xcc] ss:$16 sps:$4 sm:$0xff]  }
 0x18b   : > { %v12277_v22 = vpop.f32.mrf.mxu0  ;;  %v12279_v24 = vpop.f32.mrf.mxu1  ;;  %9792 = vmatmul.mubr.msk.bf16.gmra.mxu1 %vm637_vm1, %v12167_v7  ;;  %9805 = vmatmul.mubr.msk.bf16.vlgmr.msra.gmra.mxu0 %vm637_vm1, %v12269_v52 }
 0x18c   : > { %15930 = vst [vmem:[#allocation48_spill] sm:$0xff] %v12277_v22  ;;  %15931 = vst [vmem:[#allocation49_spill] sm:$0xff] %v12279_v24  ;;  %1536 = vmatprep.mubr.bf16.mxu1 %v15866_v0  ;;  %1762 = vmatprep.mubr.bf16.mxu0 %v15866_v0 }
 0x18d   : > { %v12288_v43 = vpop.f32.mrf.mxu0  ;;  %v12290_v44 = vpop.f32.mrf.mxu1  ;;  %2400 = vmatpush1.bf16.msra.mxu0 %v2376_v62  ;;  %v15940_v62 = vmov 0  }
 0x18e   : > { %15932 = vst [vmem:[#allocation50_spill] sm:$0xff] %v12288_v43  ;;  %15933 = vst [vmem:[#allocation51_spill] sm:$0xff] %v12290_v44  ;;  %2401 = vmatprep.subr.bf16.mxu0 %v10753_v63  ;;  %v1571_v63 = vld [vmem:[%s11946_s27 + $0x22] sm:$0xff] }
 0x18f   : > { %v12292_v45 = vpop.f32.mrf.mxu0  ;;  %v12294_v7 = vpop.f32.mrf.mxu1 }
 0x190   : > { %15934 = vst [vmem:[#allocation52_spill] sm:$0xff] %v12292_v45  ;;  %15935 = vst [vmem:[#allocation53_spill] sm:$0xff] %v12294_v7 }
 0x191   : > { %v12298_v6 = vpop.f32.mrf.mxu0  ;;  %v12300_v4 = vpop.f32.mrf.mxu1  ;;  %2402 = vmatpush1.bf16.msra.mxu0 %v10751_v33 }
 0x192   : > { %15936 = vst [vmem:[#allocation54_spill] sm:$0xff] %v12298_v6  ;;  %15937 = vst [vmem:[#allocation55_spill] sm:$0xff] %v12300_v4 }
 0x193   : > { %v12302_v0 = vpop.f32.mrf.mxu0  ;;  %v12304_v2 = vpop.f32.mrf.mxu1  ;;  %9793 = vmatmul.mubr.msk.bf16.gmra.mxu1 %vm637_vm1, %v12192_v19  ;;  %9806 = vmatmul.mubr.msk.bf16.gmra.mxu0 %vm637_vm1, %v12296_v9  ;;  %v12322_v19 = vpack.c.bf16 %v1572_v11, %v1571_v63  ;;  %v1573_v63 = vld [vmem:[%s11946_s27 + $0x32] sm:$0xff]  ;;  %v1574_v11 = vld [vmem:[%s11946_s27 + $0x3a] sm:$0xff] }
 0x194   : > { %15938 = vst [vmem:[#allocation56_spill] sm:$0xff] %v12302_v0  ;;  %15939 = vst [vmem:[#allocation57_spill] sm:$0xff] %v12304_v2  ;;  %1546 = vmatprep.mubr.bf16.mxu1 %v15940_v62  ;;  %1772 = vmatprep.mubr.bf16.mxu0 %v15940_v62 }
 0x195   : > { %v12314_v23 = vpop.f32.mrf.mxu0  ;;  %v12316_v33 = vpop.f32.mrf.mxu1 }
 0x196   : > { %15941 = vst [vmem:[#allocation58_spill] sm:$0xff] %v12314_v23  ;;  %15942 = vst [vmem:[#allocation59_spill] sm:$0xff] %v12316_v33 }
 0x197   : > { %v12318_v61 = vpop.f32.mrf.mxu0  ;;  %v12320_v58 = vpop.f32.mrf.mxu1 }
 0x198   : > { %15943 = vst [vmem:[#allocation60_spill] sm:$0xff] %v12318_v61  ;;  %15944 = vst [vmem:[#allocation61_spill] sm:$0xff] %v12320_v58 }
 0x199   : > { %v12324_v56 = vpop.f32.mrf.mxu0  ;;  %v12326_v54 = vpop.f32.mrf.mxu1 }
 0x19a   : > { %15945 = vst [vmem:[#allocation62_spill] sm:$0xff] %v12324_v56  ;;  %15946 = vst [vmem:[#allocation63_spill] sm:$0xff] %v12326_v54 }
 0x19b   : > { %v12328_v2 = vpop.f32.mrf.mxu0  ;;  %v12330_v4 = vpop.f32.mrf.mxu1  ;;  %9794 = vmatmul.mubr.msk.bf16.gmra.mxu1 %vm637_vm1, %v12217_v30  ;;  %9807 = vmatmul.mubr.msk.bf16.gmra.mxu0 %vm637_vm1, %v12322_v19  ;;  %v12348_v30 = vpack.c.bf16 %v1574_v11, %v1573_v63  ;;  %v1575_v63 = vld [vmem:[%s11946_s27 + $0x42] sm:$0xff]  ;;  %v1576_v11 = vld [vmem:[%s11946_s27 + $0x4a] sm:$0xff] }
 0x19c   : > { %15947 = vst [vmem:[#allocation64_spill] sm:$0xff] %v12328_v2  ;;  %15948 = vst [vmem:[#allocation65_spill] sm:$0xff] %v12330_v4  ;;  %1556 = vmatprep.mubr.bf16.mxu1 %v15940_v62  ;;  %1782 = vmatprep.mubr.bf16.mxu0 %v15940_v62 }
 0x19d   : > { %v12340_v58 = vpop.f32.mrf.mxu0  ;;  %v12342_v54 = vpop.f32.mrf.mxu1 }
 0x19e   : > { %15949 = vst [vmem:[#allocation66_spill] sm:$0xff] %v12340_v58  ;;  %15950 = vst [vmem:[#allocation67_spill] sm:$0xff] %v12342_v54  ;;  %v10750_v54 = vld [vmem:[#allocation2 + $0xe8] ss:$16 sps:$4 sm:$0x3f]  }
 0x19f   : > { %v12344_v33 = vpop.f32.mrf.mxu0  ;;  %v12346_v4 = vpop.f32.mrf.mxu1  ;;  %v2382_v58 = vsel %vm686_vm0, %v10750_v54, 0 }
 0x1a0   : > { %15951 = vst [vmem:[#allocation68_spill] sm:$0xff] %v12344_v33  ;;  %15952 = vst [vmem:[#allocation69_spill] sm:$0xff] %v12346_v4 }
 0x1a1   : > { %v12350_v7 = vpop.f32.mrf.mxu0  ;;  %v12352_v44 = vpop.f32.mrf.mxu1 }
 0x1a2   : > { %15953 = vst [vmem:[#allocation70_spill] sm:$0xff] %v12350_v7  ;;  %15954 = vst [vmem:[#allocation71_spill] sm:$0xff] %v12352_v44 }
 0x1a3   : > { %v12354_v24 = vpop.f32.mrf.mxu0  ;;  %v12356_v2 = vpop.f32.mrf.mxu1  ;;  %9795 = vmatmul.mubr.msk.bf16.gmra.mxu1 %vm637_vm1, %v12243_v40  ;;  %9808 = vmatmul.mubr.msk.bf16.gmra.mxu0 %vm637_vm1, %v12348_v30  ;;  %v12374_v40 = vpack.c.bf16 %v1576_v11, %v1575_v63  ;;  %v1577_v63 = vld [vmem:[%s11946_s27 + $0x52] sm:$0xff]  ;;  %v1578_v11 = vld [vmem:[%s11946_s27 + $0x5a] sm:$0xff] }
 0x1a4   : > { %15955 = vst [vmem:[#allocation72_spill] sm:$0xff] %v12354_v24  ;;  %15956 = vst [vmem:[#allocation73_spill] sm:$0xff] %v12356_v2  ;;  %1792 = vmatprep.mubr.bf16.mxu0 %v15940_v62  ;;  %1945 = vmatprep.mubr.bf16.mxu1 %v15940_v62 }
 0x1a5   : > { %v12366_v4 = vpop.f32.mrf.mxu0  ;;  %v12368_v44 = vpop.f32.mrf.mxu1 }
 0x1a6   : > { %15957 = vst [vmem:[#allocation74_spill] sm:$0xff] %v12366_v4  ;;  %15958 = vst [vmem:[#allocation75_spill] sm:$0xff] %v12368_v44 }
 0x1a7   : > { %v12370_v2 = vpop.f32.mrf.mxu0  ;;  %v12372_v24 = vpop.f32.mrf.mxu1 }
 0x1a8   : > { %15959 = vst [vmem:[#allocation76_spill] sm:$0xff] %v12370_v2  ;;  %15960 = vst [vmem:[#allocation77_spill] sm:$0xff] %v12372_v24 }
 0x1a9   : > { %v12376_v7 = vpop.f32.mrf.mxu0  ;;  %v12378_v33 = vpop.f32.mrf.mxu1 }
 0x1aa   : > { %15961 = vst [vmem:[#allocation78_spill] sm:$0xff] %v12376_v7  ;;  %15962 = vst [vmem:[#allocation79_spill] sm:$0xff] %v12378_v33 }
 0x1ab   : > { %v12381_v56 = vpop.f32.mrf.mxu0  ;;  %v12383_v4 = vpop.f32.mrf.mxu1  ;;  %9809 = vmatmul.mubr.msk.bf16.gmra.mxu0 %vm637_vm1, %v12374_v40  ;;  %9822 = vmatmul.mubr.msk.bf16.vlgmr.msra.gmra.mxu1 %vm637_vm1, %v12269_v52  ;;  %v12401_v52 = vpack.c.bf16 %v1578_v11, %v1577_v63 }
 0x1ac   : > { %15963 = vst [vmem:[#allocation80_spill] sm:$0xff] %v12381_v56  ;;  %15964 = vst [vmem:[#allocation81_spill] sm:$0xff] %v12383_v4  ;;  %1802 = vmatprep.mubr.bf16.mxu0 %v15940_v62  ;;  %1955 = vmatprep.mubr.bf16.mxu1 %v15940_v62  ;;  %v10754_v4 = vld [vmem:[#allocation2 + $0xc8] ss:$16 sps:$4 sm:$0xff]  }
 0x1ad   : > { %v12393_v33 = vpop.f32.mrf.mxu0  ;;  %v12395_v54 = vpop.f32.mrf.mxu1  ;;  %2593 = vmatpush1.bf16.msra.mxu1 %v2382_v58  ;;  %v1579_v58 = vld [vmem:[%s11946_s27 + $0x62] sm:$0xff] }
 0x1ae   : > { %15965 = vst [vmem:[#allocation82_spill] sm:$0xff] %v12393_v33  ;;  %15966 = vst [vmem:[#allocation83_spill] sm:$0xff] %v12395_v54  ;;  %2594 = vmatprep.subr.bf16.mxu1 %v10756_v59  ;;  %v1580_v59 = vld [vmem:[%s11946_s27 + $0x6a] sm:$0xff] }
 0x1af   : > { %v12397_v24 = vpop.f32.mrf.mxu0  ;;  %v12399_v44 = vpop.f32.mrf.mxu1 }
 0x1b0   : > { %15967 = vst [vmem:[#allocation84_spill] sm:$0xff] %v12397_v24  ;;  %15968 = vst [vmem:[#allocation85_spill] sm:$0xff] %v12399_v44 }
 0x1b1   : > { %v12403_v56 = vpop.f32.mrf.mxu0  ;;  %v12405_v7 = vpop.f32.mrf.mxu1  ;;  %2595 = vmatpush1.bf16.msra.mxu1 %v10754_v4 }
 0x1b2   : > { %15969 = vst [vmem:[#allocation86_spill] sm:$0xff] %v12403_v56  ;;  %15970 = vst [vmem:[#allocation87_spill] sm:$0xff] %v12405_v7  ;;  %v12427_v7 = vpack.c.bf16 %v1580_v59, %v1579_v58  ;;  %v1581_v58 = vld [vmem:[%s11946_s27 + $0x72] sm:$0xff]  ;;  %v1582_v59 = vld [vmem:[%s11946_s27 + $0x7a] sm:$0xff] }
 0x1b3   : > { %v12407_v2 = vpop.f32.mrf.mxu0  ;;  %v12409_v33 = vpop.f32.mrf.mxu1  ;;  %9810 = vmatmul.mubr.msk.bf16.gmra.mxu0 %vm637_vm1, %v12401_v52  ;;  %9823 = vmatmul.mubr.msk.bf16.gmra.mxu1 %vm637_vm1, %v12296_v9 }
 0x1b4   : > { %15971 = vst [vmem:[#allocation88_spill] sm:$0xff] %v12407_v2  ;;  %15972 = vst [vmem:[#allocation89_spill] sm:$0xff] %v12409_v33  ;;  %1812 = vmatprep.mubr.bf16.mxu0 %v15940_v62  ;;  %1965 = vmatprep.mubr.bf16.mxu1 %v15940_v62 }
 0x1b5   : > { %v12419_v63 = vpop.f32.mrf.mxu0  ;;  %v12421_v4 = vpop.f32.mrf.mxu1 }
 0x1b6   : > { %15973 = vst [vmem:[#allocation90_spill] sm:$0xff] %v12419_v63  ;;  %15974 = vst [vmem:[#allocation91_spill] sm:$0xff] %v12421_v4 }
 0x1b7   : > { %v12423_v11 = vpop.f32.mrf.mxu0  ;;  %v12425_v33 = vpop.f32.mrf.mxu1 }
 0x1b8   : > { %15975 = vst [vmem:[#allocation92_spill] sm:$0xff] %v12423_v11  ;;  %15976 = vst [vmem:[#allocation93_spill] sm:$0xff] %v12425_v33 }
 0x1b9   : > { %v12429_v44 = vpop.f32.mrf.mxu0  ;;  %v12431_v9 = vpop.f32.mrf.mxu1 }
 0x1ba   : > { %15977 = vst [vmem:[#allocation94_spill] sm:$0xff] %v12429_v44  ;;  %15978 = vst [vmem:[#allocation95_spill] sm:$0xff] %v12431_v9 }
 0x1bb   : > { %v12433_v54 = vpop.f32.mrf.mxu0  ;;  %v12435_v2 = vpop.f32.mrf.mxu1  ;;  %9811 = vmatmul.mubr.msk.bf16.gmra.mxu0 %vm637_vm1, %v12427_v7  ;;  %9824 = vmatmul.mubr.msk.bf16.gmra.mxu1 %vm637_vm1, %v12322_v19 }
 0x1bc   : > { %15979 = vst [vmem:[#allocation96_spill] sm:$0xff] %v12433_v54  ;;  %15980 = vst [vmem:[#allocation97_spill] sm:$0xff] %v12435_v2  ;;  %1822 = vmatprep.mubr.bf16.mxu0 %v15940_v62  ;;  %1975 = vmatprep.mubr.bf16.mxu1 %v15940_v62  ;;  %v12453_v54 = vpack.c.bf16 %v1582_v59, %v1581_v58  ;;  %v1583_v58 = vld [vmem:[%s11946_s27 + $0x82] sm:$0xff]  ;;  %v1584_v59 = vld [vmem:[%s11946_s27 + $0x8a] sm:$0xff] }
 0x1bd   : > { %v12445_v33 = vpop.f32.mrf.mxu0  ;;  %v12447_v9 = vpop.f32.mrf.mxu1 }
 0x1be   : > { %15981 = vst [vmem:[#allocation98_spill] sm:$0xff] %v12445_v33  ;;  %15982 = vst [vmem:[#allocation99_spill] sm:$0xff] %v12447_v9 }
 0x1bf   : > { %v12449_v4 = vpop.f32.mrf.mxu0  ;;  %v12451_v2 = vpop.f32.mrf.mxu1 }
 0x1c0   : > { %15983 = vst [vmem:[#allocation100_spill] sm:$0xff] %v12449_v4  ;;  %15984 = vst [vmem:[#allocation101_spill] sm:$0xff] %v12451_v2 }
 0x1c1   : > { %v12455_v44 = vpop.f32.mrf.mxu0  ;;  %v12457_v19 = vpop.f32.mrf.mxu1 }
 0x1c2   : > { %15985 = vst [vmem:[#allocation102_spill] sm:$0xff] %v12455_v44  ;;  %15986 = vst [vmem:[#allocation103_spill] sm:$0xff] %v12457_v19 }
 0x1c3   : > { %v12459_v11 = vpop.f32.mrf.mxu0  ;;  %v12461_v63 = vpop.f32.mrf.mxu1  ;;  %9812 = vmatmul.mubr.msk.bf16.gmra.mxu0 %vm637_vm1, %v12453_v54  ;;  %9825 = vmatmul.mubr.msk.bf16.gmra.mxu1 %vm637_vm1, %v12348_v30 }
 0x1c4   : > { %15987 = vst [vmem:[#allocation104_spill] sm:$0xff] %v12459_v11  ;;  %15988 = vst [vmem:[#allocation105_spill] sm:$0xff] %v12461_v63  ;;  %1832 = vmatprep.mubr.bf16.mxu0 %v15940_v62  ;;  %1985 = vmatprep.mubr.bf16.mxu1 %v15940_v62  ;;  %v12479_v11 = vpack.c.bf16 %v1584_v59, %v1583_v58  ;;  %v10757_v58 = vld [vmem:[#allocation2 + $0x124] ss:$16 sps:$4 sm:$0x3f]  }
 0x1c5   : > { %v12471_v2 = vpop.f32.mrf.mxu0  ;;  %v12473_v19 = vpop.f32.mrf.mxu1  ;;  %v10759_v59 = vld [vmem:[#allocation2 + $0x12c] ss:$16 sps:$4 sm:$0x3f]   ;;  %9888 = vmatprep.subr.msk.bf16.mxu0 %vm686_vm0, %v10757_v58 }
 0x1c6   : > { %15989 = vst [vmem:[#allocation106_spill] sm:$0xff] %v12471_v2  ;;  %15990 = vst [vmem:[#allocation107_spill] sm:$0xff] %v12473_v19  ;;  %v1585_v19 = vld [vmem:[%s11946_s27 + $0x92] sm:$0xff]  ;;  %9905 = vmatprep.subr.msk.bf16.mxu1 %vm686_vm0, %v10759_v59 }
 0x1c7   : > { %v12475_v9 = vpop.f32.mrf.mxu0  ;;  %v12477_v63 = vpop.f32.mrf.mxu1 }
 0x1c8   : > { %15991 = vst [vmem:[#allocation108_spill] sm:$0xff] %v12475_v9  ;;  %15992 = vst [vmem:[#allocation109_spill] sm:$0xff] %v12477_v63  ;;  %v1586_v9 = vld [vmem:[%s11946_s27 + $0x9a] sm:$0xff] }
 0x1c9   : > { %v12481_v44 = vpop.f32.mrf.mxu0  ;;  %v12483_v30 = vpop.f32.mrf.mxu1 }
 0x1ca   : > { %15993 = vst [vmem:[#allocation110_spill] sm:$0xff] %v12481_v44  ;;  %15994 = vst [vmem:[#allocation111_spill] sm:$0xff] %v12483_v30  ;;  %v12507_v44 = vpack.c.bf16 %v1586_v9, %v1585_v19  ;;  %v1587_v9 = vld [vmem:[%s11946_s27 + $0xa2] sm:$0xff]  ;;  %v1588_v19 = vld [vmem:[%s11946_s27 + $0xaa] sm:$0xff] }
 0x1cb   : > { %v12485_v4 = vpop.f32.mrf.mxu1  ;;  %v12487_v33 = vpop.f32.mrf.mxu0  ;;  %9813 = vmatmul.mubr.msk.bf16.gmra.mxu0 %vm637_vm1, %v12479_v11  ;;  %9826 = vmatmul.mubr.msk.bf16.gmra.mxu1 %vm637_vm1, %v12374_v40 }
 0x1cc   : > { %15995 = vst [vmem:[#allocation112_spill] sm:$0xff] %v12485_v4  ;;  %1842 = vmatprep.mubr.bf16.mxu0 %v15940_v62  ;;  %1995 = vmatprep.mubr.bf16.mxu1 %v15940_v62 }
 0x1cd   : > { %v12497_v30 = vpop.f32.mrf.mxu1  ;;  %v12499_v4 = vpop.f32.mrf.mxu0 }
 0x1ce   : > { %15996 = vst [vmem:[#allocation113_spill] sm:$0xff] %v12497_v30 }
 0x1cf   : > { %v12503_v63 = vpop.f32.mrf.mxu1  ;;  %v12505_v40 = vpop.f32.mrf.mxu0 }
 0x1d0   : > { %15997 = vst [vmem:[#allocation114_spill] sm:$0xff] %v12503_v63  ;;  %v12533_v63 = vpack.c.bf16 %v1588_v19, %v1587_v9  ;;  %v1589_v9 = vld [vmem:[%s11946_s27 + $0xb2] sm:$0xff]  ;;  %v1590_v19 = vld [vmem:[%s11946_s27 + $0xba] sm:$0xff] }
 0x1d1   : > { %v12509_v2 = vpop.f32.mrf.mxu1  ;;  %v12511_v56 = vpop.f32.mrf.mxu0  ;;  %v12559_v23 = vpack.c.bf16 %v1590_v19, %v1589_v9  ;;  %v1591_v9 = vld [vmem:[%s11946_s27 + $0xc2] sm:$0xff]  ;;  %v1592_v19 = vld [vmem:[%s11946_s27 + $0xca] sm:$0xff] }
 0x1d2   : > { %15998 = vst [vmem:[#allocation115_spill] sm:$0xff] %v12509_v2  ;;  %v12585_v6 = vpack.c.bf16 %v1592_v19, %v1591_v9  ;;  %v1593_v9 = vld [vmem:[%s11946_s27 + $0xd2] sm:$0xff]  ;;  %v1594_v19 = vld [vmem:[%s11946_s27 + $0xda] sm:$0xff] }
 0x1d3   : > { %v12513_v24 = vpop.f32.mrf.mxu1  ;;  %v12515_v30 = vpop.f32.mrf.mxu0  ;;  %9814 = vmatmul.mubr.msk.bf16.gmra.mxu0 %vm637_vm1, %v12507_v44  ;;  %9827 = vmatmul.mubr.msk.bf16.gmra.mxu1 %vm637_vm1, %v12401_v52  ;;  %v12611_v35 = vpack.c.bf16 %v1594_v19, %v1593_v9  ;;  %v1595_v9 = vld [vmem:[%s11946_s27 + $0xe2] sm:$0xff]  ;;  %v1596_v19 = vld [vmem:[%s11946_s27 + $0xea] sm:$0xff] }
 0x1d4   : > { %15999 = vst [vmem:[#allocation116_spill] sm:$0xff] %v12513_v24  ;;  %1852 = vmatprep.mubr.bf16.mxu0 %v15940_v62  ;;  %2005 = vmatprep.mubr.bf16.mxu1 %v15940_v62 }
 0x1d5   : > { %v12525_v58 = vpop.f32.mrf.mxu1  ;;  %v12527_v59 = vpop.f32.mrf.mxu0 }
 0x1d6   : > { %16000 = vst [vmem:[#allocation117_spill] sm:$0xff] %v12525_v58 }
 0x1d7   : > { %v12529_v24 = vpop.f32.mrf.mxu1  ;;  %v12531_v2 = vpop.f32.mrf.mxu0 }
 0x1d8   : > { %16001 = vst [vmem:[#allocation118_spill] sm:$0xff] %v12529_v24 }
 0x1d9   : > { %v12535_v51 = vpop.f32.mrf.mxu1  ;;  %v12537_v52 = vpop.f32.mrf.mxu0 }
 0x1da   : > { %16002 = vst [vmem:[#allocation119_spill] sm:$0xff] %v12535_v51 }
 0x1db   : > { %v12539_v61 = vpop.f32.mrf.mxu1  ;;  %v12541_v49 = vpop.f32.mrf.mxu0  ;;  %9815 = vmatmul.mubr.msk.bf16.gmra.mxu0 %vm637_vm1, %v12533_v63  ;;  %9828 = vmatmul.mubr.msk.bf16.gmra.mxu1 %vm637_vm1, %v12427_v7 }
 0x1dc   : > { %16003 = vst [vmem:[#allocation120_spill] sm:$0xff] %v12539_v61  ;;  %1862 = vmatprep.mubr.bf16.mxu0 %v15940_v62  ;;  %2015 = vmatprep.mubr.bf16.mxu1 %v15940_v62 }
 0x1dd   : > { %v12551_v51 = vpop.f32.mrf.mxu1  ;;  %v12553_v24 = vpop.f32.mrf.mxu0 }
 0x1de   : > { %16004 = vst [vmem:[#allocation121_spill] sm:$0xff] %v12551_v51 }
 0x1df   : > { %v12555_v61 = vpop.f32.mrf.mxu1  ;;  %v12557_v58 = vpop.f32.mrf.mxu0 }
 0x1e0   : > { %16005 = vst [vmem:[#allocation122_spill] sm:$0xff] %v12555_v61 }
 0x1e1   : > { %v12561_v47 = vpop.f32.mrf.mxu1  ;;  %v12563_v7 = vpop.f32.mrf.mxu0 }
 0x1e2   : > { %16006 = vst [vmem:[#allocation123_spill] sm:$0xff] %v12561_v47 }
 0x1e3   : > { %v12565_v0 = vpop.f32.mrf.mxu1  ;;  %v12567_v42 = vpop.f32.mrf.mxu0  ;;  %9816 = vmatmul.mubr.msk.bf16.gmra.mxu0 %vm637_vm1, %v12559_v23  ;;  %9829 = vmatmul.mubr.msk.bf16.gmra.mxu1 %vm637_vm1, %v12453_v54 }
 0x1e4   : > { %16007 = vst [vmem:[#allocation124_spill] sm:$0xff] %v12565_v0  ;;  %1872 = vmatprep.mubr.bf16.mxu0 %v15940_v62  ;;  %2025 = vmatprep.mubr.bf16.mxu1 %v15940_v62 }
 0x1e5   : > { %v12577_v47 = vpop.f32.mrf.mxu1  ;;  %v12579_v61 = vpop.f32.mrf.mxu0 }
 0x1e6   : > { %16008 = vst [vmem:[#allocation125_spill] sm:$0xff] %v12577_v47 }
 0x1e7   : > { %v12581_v0 = vpop.f32.mrf.mxu1  ;;  %v12583_v51 = vpop.f32.mrf.mxu0 }
 0x1e8   : > { %16009 = vst [vmem:[#allocation126_spill] sm:$0xff] %v12581_v0 }
 0x1e9   : > { %v12587_v39 = vpop.f32.mrf.mxu1  ;;  %v12589_v54 = vpop.f32.mrf.mxu0 }
 0x1ea   : > { %16010 = vst [vmem:[#allocation127_spill] sm:$0xff] %v12587_v39 }
 0x1eb   : > { %v12591_v45 = vpop.f32.mrf.mxu0  ;;  %v12593_v37 = vpop.f32.mrf.mxu1  ;;  %9817 = vmatmul.mubr.msk.bf16.gmra.mxu0 %vm637_vm1, %v12585_v6  ;;  %9830 = vmatmul.mubr.msk.bf16.gmra.mxu1 %vm637_vm1, %v12479_v11 }
 0x1ec   : > { %1882 = vmatprep.mubr.bf16.mxu0 %v15940_v62  ;;  %2035 = vmatprep.mubr.bf16.mxu1 %v15940_v62 }
 0x1ed   : > { %v12603_v39 = vpop.f32.mrf.mxu0  ;;  %v12605_v0 = vpop.f32.mrf.mxu1 }
 0x1ef   : > { %v12607_v47 = vpop.f32.mrf.mxu0  ;;  %v12609_v43 = vpop.f32.mrf.mxu1 }
 0x1f1   : > { %v12613_v22 = vpop.f32.mrf.mxu0  ;;  %v12615_v11 = vpop.f32.mrf.mxu1 }
 0x1f2   : > { %16011 = vst [vmem:[#allocation128_spill] sm:$0xff] %v12615_v11  ;;  %v10765_v11 = vld [vmem:[#allocation2 + $0x104] ss:$16 sps:$4 sm:$0xff]  }
 0x1f3   : > { %v12617_v32 = vpop.f32.mrf.mxu0  ;;  %v12619_v10 = vpop.f32.mrf.mxu1  ;;  %9818 = vmatmul.mubr.msk.bf16.gmra.mxu0 %vm637_vm1, %v12611_v35  ;;  %9831 = vmatmul.mubr.msk.bf16.gmra.mxu1 %vm637_vm1, %v12507_v44 }
 0x1f4   : > { %16012 = vst [vmem:[#allocation129_spill] sm:$0xff] %v12617_v32  ;;  %16013 = vst [vmem:[#allocation130_spill] sm:$0xff] %v12619_v10  ;;  %1892 = vmatprep.mubr.bf16.mxu0 %v15940_v62  ;;  %2045 = vmatprep.mubr.bf16.mxu1 %v15940_v62  ;;  %v12637_v10 = vpack.c.bf16 %v1596_v19, %v1595_v9  ;;  %v1597_v9 = vld [vmem:[%s11946_s27 + $0xf2] sm:$0xff]  ;;  %v1598_v19 = vld [vmem:[%s11946_s27 + $0xfa] sm:$0xf] }
 0x1f5   : > { %v12629_v29 = vpop.f32.mrf.mxu0  ;;  %v12631_v50 = vpop.f32.mrf.mxu1 }
 0x1f6   : > { %16014 = vst [vmem:[#allocation131_spill] sm:$0xff] %v12629_v29  ;;  %16015 = vst [vmem:[#allocation132_spill] sm:$0xff] %v12631_v50 }
 0x1f7   : > { %v12633_v13 = vpop.f32.mrf.mxu0  ;;  %v12635_v48 = vpop.f32.mrf.mxu1 }
 0x1f8   : > { %16016 = vst [vmem:[#allocation133_spill] sm:$0xff] %v12633_v13  ;;  %16017 = vst [vmem:[#allocation134_spill] sm:$0xff] %v12635_v48  ;;  %v12663_v48 = vpack.c.bf16 %v1598_v19, %v1597_v9  ;;  %v2234_v9 = vld [vmem:[%s11946_s27 + $0x3] sm:$0xff]  ;;  %v2235_v19 = vld [vmem:[%s11946_s27 + $0xb] sm:$0xff] }
 0x1f9   : > { %v12639_v26 = vpop.f32.mrf.mxu0  ;;  %v12641_v44 = vpop.f32.mrf.mxu1 }
 0x1fa   : > { %16018 = vst [vmem:[#allocation135_spill] sm:$0xff] %v12639_v26  ;;  %16019 = vst [vmem:[#allocation136_spill] sm:$0xff] %v12641_v44 }
 0x1fb   : > { %v12643_v32 = vpop.f32.mrf.mxu0  ;;  %v12645_v46 = vpop.f32.mrf.mxu1  ;;  %9819 = vmatmul.mubr.msk.bf16.gmra.mxu0 %vm637_vm1, %v12637_v10  ;;  %9832 = vmatmul.mubr.msk.bf16.gmra.mxu1 %vm637_vm1, %v12533_v63 }
 0x1fc   : > { %16020 = vst [vmem:[#allocation137_spill] sm:$0xff] %v12643_v32  ;;  %16021 = vst [vmem:[#allocation138_spill] sm:$0xff] %v12645_v46  ;;  %1902 = vmatprep.mubr.bf16.mxu0 %v15940_v62  ;;  %2055 = vmatprep.mubr.bf16.mxu1 %v15940_v62 }
 0x1fd   : > { %v12655_v26 = vpop.f32.mrf.mxu0  ;;  %v12657_v44 = vpop.f32.mrf.mxu1 }
 0x1fe   : > { %16022 = vst [vmem:[#allocation139_spill] sm:$0xff] %v12655_v26  ;;  %16023 = vst [vmem:[#allocation140_spill] sm:$0xff] %v12657_v44 }
 0x1ff   : > { %v12659_v32 = vpop.f32.mrf.mxu0  ;;  %v12661_v46 = vpop.f32.mrf.mxu1 }
 0x200   : > { %16024 = vst [vmem:[#allocation141_spill] sm:$0xff] %v12659_v32  ;;  %16025 = vst [vmem:[#allocation142_spill] sm:$0xff] %v12661_v46  ;;  %v12689_v32 = vpack.c.bf16 %v2235_v19, %v2234_v9  ;;  %v2236_v9 = vld [vmem:[%s11946_s27 + $0x13] sm:$0xff]  ;;  %v2237_v19 = vld [vmem:[%s11946_s27 + $0x1b] sm:$0xff] }
 0x201   : > { %v12665_v13 = vpop.f32.mrf.mxu0  ;;  %v12667_v63 = vpop.f32.mrf.mxu1 }
 0x202   : > { %16026 = vst [vmem:[#allocation143_spill] sm:$0xff] %v12665_v13  ;;  %16027 = vst [vmem:[#allocation144_spill] sm:$0xff] %v12667_v63 }
 0x203   : > { %v12669_v50 = vpop.f32.mrf.mxu0  ;;  %v12671_v29 = vpop.f32.mrf.mxu1  ;;  %9820 = vmatmul.mubr.msk.bf16.gmra.mxu0 %vm637_vm1, %v12663_v48  ;;  %9833 = vmatmul.mubr.msk.bf16.gmra.mxu1 %vm637_vm1, %v12559_v23 }
 0x204   : > { %16028 = vst [vmem:[#allocation145_spill] sm:$0xff] %v12669_v50  ;;  %16029 = vst [vmem:[#allocation146_spill] sm:$0xff] %v12671_v29  ;;  %2065 = vmatprep.mubr.bf16.mxu1 %v15940_v62  ;;  %2419 = vmatprep.mubr.bf16.mxu0 %v15940_v62  ;;  %v10761_v50 = vld [vmem:[#allocation2 + $0x120] ss:$16 sps:$4 sm:$0x3f]  }
 0x205   : > { %v12681_v46 = vpop.f32.mrf.mxu0  ;;  %v12683_v63 = vpop.f32.mrf.mxu1  ;;  %v3043_v26 = vsel %vm686_vm0, %v10761_v50, 0 }
 0x206   : > { %16030 = vst [vmem:[#allocation147_spill] sm:$0xff] %v12681_v46  ;;  %16031 = vst [vmem:[#allocation148_spill] sm:$0xff] %v12683_v63 }
 0x207   : > { %v12685_v29 = vpop.f32.mrf.mxu0  ;;  %v12687_v13 = vpop.f32.mrf.mxu1 }
 0x208   : > { %16032 = vst [vmem:[#allocation149_spill] sm:$0xff] %v12685_v29  ;;  %16033 = vst [vmem:[#allocation150_spill] sm:$0xff] %v12687_v13 }
 0x209   : > { %v12691_v23 = vpop.f32.mrf.mxu0  ;;  %v12693_v44 = vpop.f32.mrf.mxu1 }
 0x20a   : > { %16034 = vst [vmem:[#allocation151_spill] sm:$0xff] %v12691_v23  ;;  %16035 = vst [vmem:[#allocation152_spill] sm:$0xff] %v12693_v44  ;;  %v12716_v23 = vpack.c.bf16 %v2237_v19, %v2236_v9 }
 0x20b   : > { %v12696_v21 = vpop.f32.mrf.mxu0  ;;  %v12698_v46 = vpop.f32.mrf.mxu1  ;;  %9834 = vmatmul.mubr.msk.bf16.gmra.mxu1 %vm637_vm1, %v12585_v6  ;;  %9847 = vmatmul.mubr.msk.bf16.vlgmr.msra.gmra.mxu0 %vm637_vm1, %v12689_v32 }
 0x20c   : > { %16036 = vst [vmem:[#allocation153_spill] sm:$0xff] %v12696_v21  ;;  %16037 = vst [vmem:[#allocation154_spill] sm:$0xff] %v12698_v46  ;;  %2075 = vmatprep.mubr.bf16.mxu1 %v15940_v62  ;;  %2429 = vmatprep.mubr.bf16.mxu0 %v15940_v62  ;;  %v10763_v46 = vld [vmem:[#allocation2 + $0x100] ss:$16 sps:$4 sm:$0xff]  }
 0x20d   : > { %v12708_v44 = vpop.f32.mrf.mxu0  ;;  %v12710_v50 = vpop.f32.mrf.mxu1  ;;  %3067 = vmatpush1.bf16.msra.mxu0 %v3043_v26  ;;  %v2238_v26 = vld [vmem:[%s11946_s27 + $0x23] sm:$0xff] }
 0x20e   : > { %16038 = vst [vmem:[#allocation155_spill] sm:$0xff] %v12708_v44  ;;  %16039 = vst [vmem:[#allocation156_spill] sm:$0xff] %v12710_v50  ;;  %3068 = vmatprep.subr.bf16.mxu0 %v10765_v11  ;;  %v2239_v11 = vld [vmem:[%s11946_s27 + $0x2b] sm:$0xff] }
 0x20f   : > { %v12712_v21 = vpop.f32.mrf.mxu0  ;;  %v12714_v6 = vpop.f32.mrf.mxu1 }
 0x210   : > { %16040 = vst [vmem:[#allocation157_spill] sm:$0xff] %v12712_v21  ;;  %16041 = vst [vmem:[#allocation158_spill] sm:$0xff] %v12714_v6  ;;  %v10768_v21 = vld [vmem:[#allocation2 + $0x10c] ss:$16 sps:$4 sm:$0xff]  }
 0x211   : > { %v12718_v13 = vpop.f32.mrf.mxu0  ;;  %v12720_v29 = vpop.f32.mrf.mxu1  ;;  %3069 = vmatpush1.bf16.msra.mxu0 %v10763_v46 }
 0x212   : > { %16042 = vst [vmem:[#allocation159_spill] sm:$0xff] %v12718_v13  ;;  %16043 = vst [vmem:[#allocation160_spill] sm:$0xff] %v12720_v29 }
 0x213   : > { %v12722_v63 = vpop.f32.mrf.mxu0  ;;  %v12724_v44 = vpop.f32.mrf.mxu1  ;;  %9835 = vmatmul.mubr.msk.bf16.gmra.mxu1 %vm637_vm1, %v12611_v35  ;;  %9848 = vmatmul.mubr.msk.bf16.gmra.mxu0 %vm637_vm1, %v12716_v23  ;;  %v12742_v35 = vpack.c.bf16 %v2239_v11, %v2238_v26  ;;  %v2240_v26 = vld [vmem:[%s11946_s27 + $0x33] sm:$0xff]  ;;  %v2241_v11 = vld [vmem:[%s11946_s27 + $0x3b] sm:$0xff] }
 0x214   : > { %16044 = vst [vmem:[#allocation161_spill] sm:$0xff] %v12722_v63  ;;  %16045 = vst [vmem:[#allocation162_spill] sm:$0xff] %v12724_v44  ;;  %2085 = vmatprep.mubr.bf16.mxu1 %v15940_v62  ;;  %2439 = vmatprep.mubr.bf16.mxu0 %v15940_v62 }
 0x215   : > { %v12734_v9 = vpop.f32.mrf.mxu0  ;;  %v12736_v46 = vpop.f32.mrf.mxu1 }
 0x216   : > { %16046 = vst [vmem:[#allocation163_spill] sm:$0xff] %v12734_v9  ;;  %16047 = vst [vmem:[#allocation164_spill] sm:$0xff] %v12736_v46 }
 0x217   : > { %v12738_v19 = vpop.f32.mrf.mxu0  ;;  %v12740_v44 = vpop.f32.mrf.mxu1 }
 0x218   : > { %16048 = vst [vmem:[#allocation165_spill] sm:$0xff] %v12738_v19  ;;  %16049 = vst [vmem:[#allocation166_spill] sm:$0xff] %v12740_v44 }
 0x219   : > { %v12744_v63 = vpop.f32.mrf.mxu0  ;;  %v12746_v29 = vpop.f32.mrf.mxu1 }
 0x21a   : > { %16050 = vst [vmem:[#allocation167_spill] sm:$0xff] %v12744_v63  ;;  %16051 = vst [vmem:[#allocation168_spill] sm:$0xff] %v12746_v29 }
 0x21b   : > { %v12748_v13 = vpop.f32.mrf.mxu0  ;;  %v12750_v6 = vpop.f32.mrf.mxu1  ;;  %9836 = vmatmul.mubr.msk.bf16.gmra.mxu1 %vm637_vm1, %v12637_v10  ;;  %9849 = vmatmul.mubr.msk.bf16.gmra.mxu0 %vm637_vm1, %v12742_v35  ;;  %v12768_v10 = vpack.c.bf16 %v2241_v11, %v2240_v26  ;;  %v2242_v26 = vld [vmem:[%s11946_s27 + $0x43] sm:$0xff]  ;;  %v2243_v11 = vld [vmem:[%s11946_s27 + $0x4b] sm:$0xff] }
 0x21c   : > { %16052 = vst [vmem:[#allocation169_spill] sm:$0xff] %v12748_v13  ;;  %16053 = vst [vmem:[#allocation170_spill] sm:$0xff] %v12750_v6  ;;  %2095 = vmatprep.mubr.bf16.mxu1 %v15940_v62  ;;  %2449 = vmatprep.mubr.bf16.mxu0 %v15940_v62 }
 0x21d   : > { %v12760_v63 = vpop.f32.mrf.mxu0  ;;  %v12762_v29 = vpop.f32.mrf.mxu1 }
 0x21e   : > { %16054 = vst [vmem:[#allocation171_spill] sm:$0xff] %v12760_v63  ;;  %16055 = vst [vmem:[#allocation172_spill] sm:$0xff] %v12762_v29 }
 0x21f   : > { %v12764_v13 = vpop.f32.mrf.mxu0  ;;  %v12766_v6 = vpop.f32.mrf.mxu1 }
 0x220   : > { %16056 = vst [vmem:[#allocation173_spill] sm:$0xff] %v12764_v13  ;;  %16057 = vst [vmem:[#allocation174_spill] sm:$0xff] %v12766_v6 }
 0x221   : > { %v12770_v44 = vpop.f32.mrf.mxu0  ;;  %v12772_v19 = vpop.f32.mrf.mxu1 }
 0x222   : > { %16058 = vst [vmem:[#allocation175_spill] sm:$0xff] %v12770_v44  ;;  %16059 = vst [vmem:[#allocation176_spill] sm:$0xff] %v12772_v19 }
 0x223   : > { %v12774_v46 = vpop.f32.mrf.mxu0  ;;  %v12776_v9 = vpop.f32.mrf.mxu1  ;;  %9837 = vmatmul.mubr.msk.bf16.gmra.mxu1 %vm637_vm1, %v12663_v48  ;;  %9850 = vmatmul.mubr.msk.bf16.gmra.mxu0 %vm637_vm1, %v12768_v10  ;;  %v12794_v48 = vpack.c.bf16 %v2243_v11, %v2242_v26  ;;  %v2244_v26 = vld [vmem:[%s11946_s27 + $0x53] sm:$0xff]  ;;  %v2245_v11 = vld [vmem:[%s11946_s27 + $0x5b] sm:$0xff] }
 0x224   : > { %16060 = vst [vmem:[#allocation177_spill] sm:$0xff] %v12774_v46  ;;  %16061 = vst [vmem:[#allocation178_spill] sm:$0xff] %v12776_v9  ;;  %2459 = vmatprep.mubr.bf16.mxu0 %v15940_v62  ;;  %2612 = vmatprep.mubr.bf16.mxu1 %v15940_v62  ;;  %v10762_v46 = vld [vmem:[#allocation2 + $0x128] ss:$16 sps:$4 sm:$0x3f]  }
 0x225   : > { %v12786_v6 = vpop.f32.mrf.mxu0  ;;  %v12788_v19 = vpop.f32.mrf.mxu1  ;;  %v3049_v63 = vsel %vm686_vm0, %v10762_v46, 0 }
 0x226   : > { %16062 = vst [vmem:[#allocation179_spill] sm:$0xff] %v12786_v6  ;;  %16063 = vst [vmem:[#allocation180_spill] sm:$0xff] %v12788_v19 }
 0x227   : > { %v12790_v9 = vpop.f32.mrf.mxu0  ;;  %v12792_v44 = vpop.f32.mrf.mxu1 }
 0x228   : > { %16064 = vst [vmem:[#allocation181_spill] sm:$0xff] %v12790_v9  ;;  %16065 = vst [vmem:[#allocation182_spill] sm:$0xff] %v12792_v44 }
 0x229   : > { %v12796_v13 = vpop.f32.mrf.mxu0  ;;  %v12798_v29 = vpop.f32.mrf.mxu1 }
 0x22a   : > { %16066 = vst [vmem:[#allocation183_spill] sm:$0xff] %v12796_v13  ;;  %16067 = vst [vmem:[#allocation184_spill] sm:$0xff] %v12798_v29 }
 0x22b   : > { %v12801_v50 = vpop.f32.mrf.mxu0  ;;  %v12803_v6 = vpop.f32.mrf.mxu1  ;;  %9851 = vmatmul.mubr.msk.bf16.gmra.mxu0 %vm637_vm1, %v12794_v48  ;;  %9864 = vmatmul.mubr.msk.bf16.vlgmr.msra.gmra.mxu1 %vm637_vm1, %v12689_v32  ;;  %v12821_v32 = vpack.c.bf16 %v2245_v11, %v2244_v26 }
 0x22c   : > { %16068 = vst [vmem:[#allocation185_spill] sm:$0xff] %v12801_v50  ;;  %16069 = vst [vmem:[#allocation186_spill] sm:$0xff] %v12803_v6  ;;  %2469 = vmatprep.mubr.bf16.mxu0 %v15940_v62  ;;  %2622 = vmatprep.mubr.bf16.mxu1 %v15940_v62  ;;  %v10766_v6 = vld [vmem:[#allocation2 + $0x108] ss:$16 sps:$4 sm:$0xff]  }
 0x22d   : > { %v12813_v29 = vpop.f32.mrf.mxu0  ;;  %v12815_v46 = vpop.f32.mrf.mxu1  ;;  %3260 = vmatpush1.bf16.msra.mxu1 %v3049_v63  ;;  %v2247_v63 = vld [vmem:[%s11946_s27 + $0x6b] sm:$0xff] }
 0x22e   : > { %16070 = vst [vmem:[#allocation187_spill] sm:$0xff] %v12813_v29  ;;  %3261 = vmatprep.subr.bf16.mxu1 %v10768_v21  ;;  %v2246_v21 = vld [vmem:[%s11946_s27 + $0x63] sm:$0xff] }
 0x22f   : > { %v12817_v50 = vpop.f32.mrf.mxu0  ;;  %v12819_v13 = vpop.f32.mrf.mxu1 }
 0x230   : > { %16071 = vst [vmem:[#allocation188_spill] sm:$0xff] %v12819_v13 }
 0x231   : > { %v12823_v44 = vpop.f32.mrf.mxu0  ;;  %v12825_v9 = vpop.f32.mrf.mxu1  ;;  %3262 = vmatpush1.bf16.msra.mxu1 %v10766_v6 }
 0x232   : > { %16072 = vst [vmem:[#allocation189_spill] sm:$0xff] %v12823_v44  ;;  %16073 = vst [vmem:[#allocation190_spill] sm:$0xff] %v12825_v9 }
 0x233   : > { %v12827_v19 = vpop.f32.mrf.mxu0  ;;  %v12829_v29 = vpop.f32.mrf.mxu1  ;;  %9852 = vmatmul.mubr.msk.bf16.gmra.mxu0 %vm637_vm1, %v12821_v32  ;;  %9865 = vmatmul.mubr.msk.bf16.gmra.mxu1 %vm637_vm1, %v12716_v23 }
 0x234   : > { %16074 = vst [vmem:[#allocation191_spill] sm:$0xff] %v12827_v19  ;;  %16075 = vst [vmem:[#allocation192_spill] sm:$0xff] %v12829_v29  ;;  %2479 = vmatprep.mubr.bf16.mxu0 %v15940_v62  ;;  %2632 = vmatprep.mubr.bf16.mxu1 %v15940_v62  ;;  %v12847_v19 = vpack.c.bf16 %v2247_v63, %v2246_v21  ;;  %v2248_v21 = vld [vmem:[%s11946_s27 + $0x73] sm:$0xff]  ;;  %v2249_v63 = vld [vmem:[%s11946_s27 + $0x7b] sm:$0xff] }
 0x235   : > { %v12839_v26 = vpop.f32.mrf.mxu0  ;;  %v12841_v6 = vpop.f32.mrf.mxu1 }
 0x236   : > { %16076 = vst [vmem:[#allocation193_spill] sm:$0xff] %v12839_v26  ;;  %16077 = vst [vmem:[#allocation194_spill] sm:$0xff] %v12841_v6 }
 0x237   : > { %v12843_v11 = vpop.f32.mrf.mxu0  ;;  %v12845_v29 = vpop.f32.mrf.mxu1 }
 0x238   : > { %16078 = vst [vmem:[#allocation195_spill] sm:$0xff] %v12843_v11  ;;  %16079 = vst [vmem:[#allocation196_spill] sm:$0xff] %v12845_v29  ;;  %v12873_v29 = vpack.c.bf16 %v2249_v63, %v2248_v21  ;;  %v2250_v21 = vld [vmem:[%s11946_s27 + $0x83] sm:$0xff]  ;;  %v2251_v63 = vld [vmem:[%s11946_s27 + $0x8b] sm:$0xff] }
 0x239   : > { %v12849_v9 = vpop.f32.mrf.mxu0  ;;  %v12851_v23 = vpop.f32.mrf.mxu1 }
 0x23a   : > { %16080 = vst [vmem:[#allocation197_spill] sm:$0xff] %v12849_v9  ;;  %16081 = vst [vmem:[#allocation198_spill] sm:$0xff] %v12851_v23 }
 0x23b   : > { %v12853_v44 = vpop.f32.mrf.mxu0  ;;  %v12855_v13 = vpop.f32.mrf.mxu1  ;;  %9853 = vmatmul.mubr.msk.bf16.gmra.mxu0 %vm637_vm1, %v12847_v19  ;;  %9866 = vmatmul.mubr.msk.bf16.gmra.mxu1 %vm637_vm1, %v12742_v35 }
 0x23c   : > { %16082 = vst [vmem:[#allocation199_spill] sm:$0xff] %v12853_v44  ;;  %16083 = vst [vmem:[#allocation200_spill] sm:$0xff] %v12855_v13  ;;  %2489 = vmatprep.mubr.bf16.mxu0 %v15940_v62  ;;  %2642 = vmatprep.mubr.bf16.mxu1 %v15940_v62 }
 0x23d   : > { %v12865_v9 = vpop.f32.mrf.mxu0  ;;  %v12867_v23 = vpop.f32.mrf.mxu1 }
 0x23e   : > { %16084 = vst [vmem:[#allocation201_spill] sm:$0xff] %v12865_v9  ;;  %16085 = vst [vmem:[#allocation202_spill] sm:$0xff] %v12867_v23  ;;  %v1216_v23 = vadd.f32 %v12487_v33, %v12125_v53  ;;  %v2253_v53 = vld [vmem:[%s11946_s27 + $0x9b] sm:$0xff] }
 0x23f   : > { %v12869_v44 = vpop.f32.mrf.mxu0  ;;  %v12871_v13 = vpop.f32.mrf.mxu1 }
 0x240   : > { %16086 = vst [vmem:[#allocation203_spill] sm:$0xff] %v12869_v44  ;;  %16087 = vst [vmem:[#allocation204_spill] sm:$0xff] %v12871_v13 }
 0x241   : > { %v12875_v11 = vpop.f32.mrf.mxu0  ;;  %v12877_v35 = vpop.f32.mrf.mxu1 }
 0x242   : > { %16088 = vst [vmem:[#allocation205_spill] sm:$0xff] %v12875_v11  ;;  %16089 = vst [vmem:[#allocation206_spill] sm:$0xff] %v12877_v35  ;;  %v12899_v11 = vpack.c.bf16 %v2251_v63, %v2250_v21  ;;  %v1218_v21 = vadd.f32 %v12499_v4, %v12134_v55 }
 0x243   : > { %v12879_v6 = vpop.f32.mrf.mxu0  ;;  %v12881_v26 = vpop.f32.mrf.mxu1  ;;  %9854 = vmatmul.mubr.msk.bf16.gmra.mxu0 %vm637_vm1, %v12873_v29  ;;  %9867 = vmatmul.mubr.msk.bf16.gmra.mxu1 %vm637_vm1, %v12768_v10 }
 0x244   : > { %16090 = vst [vmem:[#allocation207_spill] sm:$0xff] %v12879_v6  ;;  %16091 = vst [vmem:[#allocation208_spill] sm:$0xff] %v12881_v26  ;;  %2499 = vmatprep.mubr.bf16.mxu0 %v15940_v62  ;;  %2652 = vmatprep.mubr.bf16.mxu1 %v15940_v62 }
 0x245   : > { %v12891_v13 = vpop.f32.mrf.mxu0  ;;  %v12893_v35 = vpop.f32.mrf.mxu1 }
 0x246   : > { %16092 = vst [vmem:[#allocation209_spill] sm:$0xff] %v12891_v13 }
 0x247   : > { %v12895_v6 = vpop.f32.mrf.mxu0  ;;  %v12897_v26 = vpop.f32.mrf.mxu1 }
 0x248   : > { %16093 = vst [vmem:[#allocation210_spill] sm:$0xff] %v12895_v6  ;;  %16094 = vst [vmem:[#allocation211_spill] sm:$0xff] %v12897_v26 }
 0x249   : > { %v12901_v44 = vpop.f32.mrf.mxu0  ;;  %v12903_v10 = vpop.f32.mrf.mxu1 }
 0x24a   : > { %16095 = vst [vmem:[#allocation212_spill] sm:$0xff] %v12901_v44  ;;  %16096 = vst [vmem:[#allocation213_spill] sm:$0xff] %v12903_v10  ;;  %v2252_v10 = vld [vmem:[%s11946_s27 + $0x93] sm:$0xff]  ;;  %v1220_v44 = vadd.f32 %v12505_v40, %v12138_v57  ;;  %v1226_v57 = vadd.f32 %v12515_v30, %v12150_v1  ;;  %v2254_v1 = vld [vmem:[%s11946_s27 + $0xa3] sm:$0xff] }
 0x24b   : > { %v12907_v9 = vpop.f32.mrf.mxu1  ;;  %v1754_v13 = vpop.f32.mrf.mxu0  ;;  %9855 = vmatmul.mubr.msk.bf16.gmra.mxu0 %vm637_vm1, %v12899_v11  ;;  %9868 = vmatmul.mubr.msk.bf16.gmra.mxu1 %vm637_vm1, %v12794_v48  ;;  %v12929_v55 = vpack.c.bf16 %v2253_v53, %v2252_v10  ;;  %v2255_v30 = vld [vmem:[%s11946_s27 + $0xab] sm:$0xff]  ;;  %v1230_v10 = vadd.f32 %v12531_v2, %v12163_v5  ;;  %v1236_v2 = vadd.f32 %v12541_v49, %v12175_v12  ;;  %v2256_v12 = vld [vmem:[%s11946_s27 + $0xb3] sm:$0xff]  ;;  %v2257_v49 = vld [vmem:[%s11946_s27 + $0xbb] sm:$0xff] }
 0x24c   : > { %16097 = vst [vmem:[#allocation214_spill] sm:$0xff] %v12907_v9  ;;  %v12915_v63 = vadd.f32 %v1754_v13, %v1216_v23  ;;  %2509 = vmatprep.mubr.bf16.mxu0 %v15940_v62  ;;  %2662 = vmatprep.mubr.bf16.mxu1 %v15940_v62  ;;  %v1222_v13 = vadd.f32 %v12511_v56, %v12144_v60 }
 0x24d   : > { %v12921_v33 = vpop.f32.mrf.mxu1  ;;  %v1756_v9 = vpop.f32.mrf.mxu0  ;;  %v1228_v56 = vadd.f32 %v12527_v59, %v12159_v3  ;;  %v12963_v3 = vpack.c.bf16 %v2255_v30, %v2254_v1  ;;  %v1232_v59 = vadd.f32 %v12537_v52, %v12169_v8  ;;  %v1238_v8 = vadd.f32 %v12553_v24, %v12184_v15 }
 0x24e   : > { %16098 = vst [vmem:[#allocation215_spill] sm:$0xff] %v12915_v63  ;;  %v12925_v26 = vadd.f32 %v1756_v9, %v1218_v21  ;;  %v12997_v15 = vpack.c.bf16 %v2257_v49, %v2256_v12  ;;  %v1242_v24 = vadd.f32 %v12563_v7, %v12194_v20  ;;  %v1248_v20 = vadd.f32 %v12579_v61, %v12209_v27 }
 0x24f   : > { %v12927_v48 = vpop.f32.mrf.mxu1  ;;  %v1758_v6 = vpop.f32.mrf.mxu0  ;;  %v1252_v27 = vadd.f32 %v12589_v54, %v12219_v31  ;;  %v1411_v54 = vadd.f32 %v12605_v0, %v12186_v16 }
 0x250   : > { %v12933_v4 = vadd.f32 %v1758_v6, %v1220_v44 }
 0x251   : > { %v12935_v23 = vpop.f32.mrf.mxu1  ;;  %v1760_v63 = vpop.f32.mrf.mxu0 }
 0x252   : > { %v12939_v40 = vadd.f32 %v1760_v63, %v1222_v13 }
 0x253   : > { %v12941_v9 = vpop.f32.mrf.mxu1  ;;  %v1764_v21 = vpop.f32.mrf.mxu0  ;;  %9856 = vmatmul.mubr.msk.bf16.gmra.mxu0 %vm637_vm1, %v12929_v55  ;;  %9869 = vmatmul.mubr.msk.bf16.gmra.mxu1 %vm637_vm1, %v12821_v32 }
 0x254   : > { %v12949_v60 = vadd.f32 %v1764_v21, %v1226_v57  ;;  %2519 = vmatprep.mubr.bf16.mxu0 %v15940_v62  ;;  %2672 = vmatprep.mubr.bf16.mxu1 %v15940_v62 }
 0x255   : > { %v12955_v44 = vpop.f32.mrf.mxu1  ;;  %v1766_v6 = vpop.f32.mrf.mxu0 }
 0x256   : > { %v12959_v63 = vadd.f32 %v1766_v6, %v1228_v56 }
 0x257   : > { %v12961_v32 = vpop.f32.mrf.mxu1  ;;  %v1768_v53 = vpop.f32.mrf.mxu0 }
 0x258   : > { %v12967_v13 = vadd.f32 %v1768_v53, %v1230_v10  ;;  %v1240_v10 = vadd.f32 %v12557_v58, %v12188_v17  ;;  %v1246_v17 = vadd.f32 %v12567_v42, %v12200_v25  ;;  %v2258_v25 = vld [vmem:[%s11946_s27 + $0xc3] sm:$0xff]  ;;  %v2259_v42 = vld [vmem:[%s11946_s27 + $0xcb] sm:$0xff] }
 0x259   : > { %v12969_v57 = vpop.f32.mrf.mxu1  ;;  %v1770_v21 = vpop.f32.mrf.mxu0  ;;  %v13031_v61 = vpack.c.bf16 %v2259_v42, %v2258_v25  ;;  %v1258_v25 = vadd.f32 %v12603_v39, %v12235_v36  ;;  %v2261_v36 = vld [vmem:[%s11946_s27 + $0xdb] sm:$0xff] }
 0x25a   : > { %v12973_v5 = vadd.f32 %v1770_v21, %v1232_v59 }
 0x25b   : > { %v12975_v56 = vpop.f32.mrf.mxu1  ;;  %v1774_v6 = vpop.f32.mrf.mxu0  ;;  %9857 = vmatmul.mubr.msk.bf16.gmra.mxu0 %vm637_vm1, %v12963_v3  ;;  %9870 = vmatmul.mubr.msk.bf16.gmra.mxu1 %vm637_vm1, %v12847_v19 }
 0x25c   : > { %v12983_v52 = vadd.f32 %v1774_v6, %v1236_v2  ;;  %2529 = vmatprep.mubr.bf16.mxu0 %v15940_v62  ;;  %2682 = vmatprep.mubr.bf16.mxu1 %v15940_v62 }
 0x25d   : > { %v12989_v1 = vpop.f32.mrf.mxu1  ;;  %v1776_v30 = vpop.f32.mrf.mxu0 }
 0x25e   : > { %v12993_v53 = vadd.f32 %v1776_v30, %v1238_v8 }
 0x25f   : > { %v12995_v19 = vpop.f32.mrf.mxu1  ;;  %v1778_v59 = vpop.f32.mrf.mxu0 }
 0x260   : > { %v13001_v21 = vadd.f32 %v1778_v59, %v1240_v10  ;;  %v1250_v10 = vadd.f32 %v12583_v51, %v12213_v28  ;;  %v1256_v28 = vadd.f32 %v12591_v45, %v12225_v34  ;;  %v1409_v51 = vadd.f32 %v12593_v37, %v12177_v14  ;;  %v2260_v14 = vld [vmem:[%s11946_s27 + $0xd3] sm:$0xff] }
 0x261   : > { %v13003_v2 = vpop.f32.mrf.mxu1  ;;  %v1780_v6 = vpop.f32.mrf.mxu0 }
 0x262   : > { %v13007_v58 = vadd.f32 %v1780_v6, %v1242_v24 }
 0x263   : > { %v13009_v8 = vpop.f32.mrf.mxu1  ;;  %v1784_v30 = vpop.f32.mrf.mxu0  ;;  %9858 = vmatmul.mubr.msk.bf16.gmra.mxu0 %vm637_vm1, %v12997_v15  ;;  %9871 = vmatmul.mubr.msk.bf16.gmra.mxu1 %vm637_vm1, %v12873_v29 }
 0x264   : > { %v13017_v7 = vadd.f32 %v1784_v30, %v1246_v17  ;;  %2539 = vmatprep.mubr.bf16.mxu0 %v15940_v62  ;;  %2692 = vmatprep.mubr.bf16.mxu1 %v15940_v62 }
 0x265   : > { %v13023_v12 = vpop.f32.mrf.mxu1  ;;  %v1786_v49 = vpop.f32.mrf.mxu0 }
 0x266   : > { %v13027_v59 = vadd.f32 %v1786_v49, %v1248_v20  ;;  %v1260_v49 = vadd.f32 %v12607_v47, %v12239_v38 }
 0x267   : > { %v13029_v29 = vpop.f32.mrf.mxu1  ;;  %v1788_v24 = vpop.f32.mrf.mxu0 }
 0x268   : > { %v13035_v6 = vadd.f32 %v1788_v24, %v1250_v10 }
 0x269   : > { %v13037_v17 = vpop.f32.mrf.mxu1  ;;  %v1790_v30 = vpop.f32.mrf.mxu0 }
 0x26a   : > { %v13043_v20 = vadd.f32 %v1790_v30, %v1252_v27  ;;  %v13069_v27 = vpack.c.bf16 %v2261_v36, %v2260_v14  ;;  %v1262_v30 = vadd.f32 %v12613_v22, %v12245_v41  ;;  %v16108_v14 = vld [vmem:[#allocation130_spill] sm:$0xff] }
 0x26b   : > { %v1794_v42 = vpop.f32.mrf.mxu0  ;;  %v1947_v31 = vpop.f32.mrf.mxu1  ;;  %9859 = vmatmul.mubr.msk.bf16.gmra.mxu0 %vm637_vm1, %v13031_v61  ;;  %9872 = vmatmul.mubr.msk.bf16.gmra.mxu1 %vm637_vm1, %v12899_v11  ;;  %v1413_v11 = vadd.f32 %v12609_v43, %v12190_v18  ;;  %v16105_v43 = vld [vmem:[#allocation40_spill] sm:$0xff]  ;;  %v16111_v22 = vld [vmem:[#allocation42_spill] sm:$0xff] }
 0x26c   : > { %v13053_v34 = vadd.f32 %v1794_v42, %v1256_v28  ;;  %v13055_v45 = vadd.f32 %v1947_v31, %v1409_v51  ;;  %2549 = vmatprep.mubr.bf16.mxu0 %v15940_v62  ;;  %2702 = vmatprep.mubr.bf16.mxu1 %v15940_v62  ;;  %v16101_v28 = vld [vmem:[#allocation31_spill] sm:$0xff]  ;;  %v16102_v51 = vld [vmem:[#allocation128_spill] sm:$0xff] }
 0x26d   : > { %v1796_v37 = vpop.f32.mrf.mxu0  ;;  %v1949_v39 = vpop.f32.mrf.mxu1  ;;  %v1415_v42 = vadd.f32 %v16102_v51, %v16101_v28  ;;  %v16112_v28 = vld [vmem:[#allocation131_spill] sm:$0xff]  ;;  %v16114_v51 = vld [vmem:[#allocation132_spill] sm:$0xff] }
 0x26e   : > { %v13065_v10 = vadd.f32 %v1796_v37, %v1258_v25  ;;  %v13067_v0 = vadd.f32 %v1949_v39, %v1411_v54  ;;  %v16106_v25 = vld [vmem:[#allocation129_spill] sm:$0xff]  ;;  %v16107_v37 = vld [vmem:[#allocation32_spill] sm:$0xff] }
 0x26f   : > { %v1798_v16 = vpop.f32.mrf.mxu0  ;;  %v1951_v24 = vpop.f32.mrf.mxu1  ;;  %v1266_v54 = vadd.f32 %v16106_v25, %v16105_v43  ;;  %v1419_v36 = vadd.f32 %v16108_v14, %v16107_v37  ;;  %v16117_v14 = vld [vmem:[#allocation44_spill] sm:$0xff] }
 0x270   : > { %16099 = vst [vmem:[#allocation216_spill] sm:$0xff] %v13065_v10  ;;  %16100 = vst [vmem:[#allocation217_spill] sm:$0xff] %v13067_v0  ;;  %v13075_v31 = vadd.f32 %v1798_v16, %v1260_v49  ;;  %v13077_v38 = vadd.f32 %v1951_v24, %v1413_v11  ;;  %v1268_v49 = vadd.f32 %v16112_v28, %v16111_v22  ;;  %v16113_v24 = vld [vmem:[#allocation33_spill] sm:$0xff] }
 0x271   : > { %v1800_v47 = vpop.f32.mrf.mxu0  ;;  %v1953_v18 = vpop.f32.mrf.mxu1  ;;  %v1421_v43 = vadd.f32 %v16114_v51, %v16113_v24  ;;  %v16118_v22 = vld [vmem:[#allocation133_spill] sm:$0xff]  ;;  %v16123_v24 = vld [vmem:[#allocation46_spill] sm:$0xff]  ;;  %v16124_v51 = vld [vmem:[#allocation135_spill] sm:$0xff] }
 0x272   : > { %16103 = vst [vmem:[#allocation31_spill] sm:$0xff] %v13075_v31  ;;  %16104 = vst [vmem:[#allocation128_spill] sm:$0xff] %v13077_v38  ;;  %v13083_v39 = vadd.f32 %v1800_v47, %v1262_v30  ;;  %v13085_v41 = vadd.f32 %v1953_v18, %v1415_v42  ;;  %v2262_v42 = vld [vmem:[%s11946_s27 + $0xe3] sm:$0xff]  ;;  %v2263_v47 = vld [vmem:[%s11946_s27 + $0xeb] sm:$0xff]  ;;  %v1270_v28 = vadd.f32 %v16118_v22, %v16117_v14 }
 0x273   : > { %v1804_v16 = vpop.f32.mrf.mxu0  ;;  %v1957_v11 = vpop.f32.mrf.mxu1  ;;  %9860 = vmatmul.mubr.msk.bf16.gmra.mxu0 %vm637_vm1, %v13069_v27  ;;  %9873 = vmatmul.mubr.msk.bf16.gmra.mxu1 %vm637_vm1, %v12929_v55  ;;  %v16120_v55 = vld [vmem:[#allocation134_spill] sm:$0xff]  ;;  %v16126_v31 = vld [vmem:[#allocation136_spill] sm:$0xff] }
 0x274   : > { %16109 = vst [vmem:[#allocation40_spill] sm:$0xff] %v13083_v39  ;;  %16110 = vst [vmem:[#allocation129_spill] sm:$0xff] %v13085_v41  ;;  %v13095_v25 = vadd.f32 %v1804_v16, %v1266_v54  ;;  %v13097_v30 = vadd.f32 %v1957_v11, %v1419_v36  ;;  %2559 = vmatprep.mubr.bf16.mxu0 %v15940_v62  ;;  %2712 = vmatprep.mubr.bf16.mxu1 %v15940_v62  ;;  %v16119_v39 = vld [vmem:[#allocation34_spill] sm:$0xff] }
 0x275   : > { %v1806_v18 = vpop.f32.mrf.mxu0  ;;  %v1959_v37 = vpop.f32.mrf.mxu1  ;;  %v1423_v41 = vadd.f32 %v16120_v55, %v16119_v39  ;;  %v13111_v11 = vpack.c.bf16 %v2263_v47, %v2262_v42  ;;  %v16132_v42 = vld [vmem:[#allocation138_spill] sm:$0xff] }
 0x276   : > { %16115 = vst [vmem:[#allocation32_spill] sm:$0xff] %v13095_v25  ;;  %16116 = vst [vmem:[#allocation130_spill] sm:$0xff] %v13097_v30  ;;  %v13107_v38 = vadd.f32 %v1806_v18, %v1268_v49  ;;  %v13109_v54 = vadd.f32 %v1959_v37, %v1421_v43  ;;  %v1272_v30 = vadd.f32 %v16124_v51, %v16123_v24  ;;  %v16125_v25 = vld [vmem:[#allocation35_spill] sm:$0xff]  ;;  %v16129_v49 = vld [vmem:[#allocation48_spill] sm:$0xff] }
 0x277   : > { %v1808_v36 = vpop.f32.mrf.mxu0  ;;  %v1961_v16 = vpop.f32.mrf.mxu1  ;;  %v1425_v0 = vadd.f32 %v16126_v31, %v16125_v25  ;;  %v16130_v43 = vld [vmem:[#allocation137_spill] sm:$0xff]  ;;  %v16131_v37 = vld [vmem:[#allocation36_spill] sm:$0xff]  ;;  %v16135_v51 = vld [vmem:[#allocation50_spill] sm:$0xff] }
 0x278   : > { %16121 = vst [vmem:[#allocation42_spill] sm:$0xff] %v13107_v38  ;;  %16122 = vst [vmem:[#allocation131_spill] sm:$0xff] %v13109_v54  ;;  %v13117_v10 = vadd.f32 %v1808_v36, %v1270_v28  ;;  %v13119_v14 = vadd.f32 %v1961_v16, %v1423_v41  ;;  %v1276_v18 = vadd.f32 %v16130_v43, %v16129_v49  ;;  %v16136_v31 = vld [vmem:[#allocation139_spill] sm:$0xff]  ;;  %v16137_v36 = vld [vmem:[#allocation37_spill] sm:$0xff] }
 0x279   : > { %v1810_v22 = vpop.f32.mrf.mxu0  ;;  %v1963_v39 = vpop.f32.mrf.mxu1  ;;  %v1429_v47 = vadd.f32 %v16132_v42, %v16131_v37  ;;  %v1278_v25 = vadd.f32 %v16136_v31, %v16135_v51  ;;  %v16138_v16 = vld [vmem:[#allocation140_spill] sm:$0xff]  ;;  %v16142_v51 = vld [vmem:[#allocation141_spill] sm:$0xff] }
 0x27a   : > { %16127 = vst [vmem:[#allocation33_spill] sm:$0xff] %v13117_v10  ;;  %16128 = vst [vmem:[#allocation132_spill] sm:$0xff] %v13119_v14  ;;  %v13125_v55 = vadd.f32 %v1810_v22, %v1272_v30  ;;  %v13127_v24 = vadd.f32 %v1963_v39, %v1425_v0  ;;  %v1431_v49 = vadd.f32 %v16138_v16, %v16137_v36  ;;  %v2264_v0 = vld [vmem:[%s11946_s27 + $0xf3] sm:$0xff]  ;;  %v2265_v22 = vld [vmem:[%s11946_s27 + $0xfb] sm:$0xf] }
 0x27b   : > { %v1814_v28 = vpop.f32.mrf.mxu0  ;;  %v1967_v41 = vpop.f32.mrf.mxu1  ;;  %9861 = vmatmul.mubr.msk.bf16.gmra.mxu0 %vm637_vm1, %v13111_v11  ;;  %9874 = vmatmul.mubr.msk.bf16.gmra.mxu1 %vm637_vm1, %v12963_v3  ;;  %v16141_v42 = vld [vmem:[#allocation52_spill] sm:$0xff]  ;;  %v16144_v3 = vld [vmem:[#allocation142_spill] sm:$0xff]  ;;  %v16148_v16 = vld [vmem:[#allocation143_spill] sm:$0xff] }
 0x27c   : > { %16133 = vst [vmem:[#allocation44_spill] sm:$0xff] %v13125_v55  ;;  %16134 = vst [vmem:[#allocation133_spill] sm:$0xff] %v13127_v24  ;;  %v13137_v43 = vadd.f32 %v1814_v28, %v1276_v18  ;;  %v13139_v30 = vadd.f32 %v1967_v41, %v1429_v47  ;;  %2569 = vmatprep.mubr.bf16.mxu0 %v15940_v62  ;;  %2722 = vmatprep.mubr.bf16.mxu1 %v15940_v62  ;;  %v16143_v55 = vld [vmem:[#allocation38_spill] sm:$0xff]  ;;  %v16150_v10 = vld [vmem:[#allocation144_spill] sm:$0xff] }
 0x27d   : > { %v1816_v39 = vpop.f32.mrf.mxu0  ;;  %v1969_v37 = vpop.f32.mrf.mxu1  ;;  %v1280_v31 = vadd.f32 %v16142_v51, %v16141_v42  ;;  %v1433_v24 = vadd.f32 %v16144_v3, %v16143_v55  ;;  %v13153_v41 = vpack.c.bf16 %v2265_v22, %v2264_v0  ;;  %v16147_v36 = vld [vmem:[#allocation54_spill] sm:$0xff] }
 0x27e   : > { %16139 = vst [vmem:[#allocation34_spill] sm:$0xff] %v13137_v43  ;;  %16140 = vst [vmem:[#allocation134_spill] sm:$0xff] %v13139_v30  ;;  %v13149_v14 = vadd.f32 %v1816_v39, %v1278_v25  ;;  %v13151_v18 = vadd.f32 %v1969_v37, %v1431_v49  ;;  %v1282_v30 = vadd.f32 %v16148_v16, %v16147_v36  ;;  %v16149_v43 = vld [vmem:[#allocation39_spill] sm:$0xff]  ;;  %v16153_v25 = vld [vmem:[#allocation56_spill] sm:$0xff] }
 0x27f   : > { %v1818_v47 = vpop.f32.mrf.mxu0  ;;  %v1971_v28 = vpop.f32.mrf.mxu1  ;;  %v1435_v54 = vadd.f32 %v16150_v10, %v16149_v43  ;;  %v16154_v49 = vld [vmem:[#allocation145_spill] sm:$0xff]  ;;  %v16156_v0 = vld [vmem:[#allocation146_spill] sm:$0xff]  ;;  %v16160_v10 = vld [vmem:[#allocation147_spill] sm:$0xff] }
 0x280   : > { %16145 = vst [vmem:[#allocation46_spill] sm:$0xff] %v13149_v14  ;;  %16146 = vst [vmem:[#allocation135_spill] sm:$0xff] %v13151_v18  ;;  %v13159_v38 = vadd.f32 %v1818_v47, %v1280_v31  ;;  %v13161_v42 = vadd.f32 %v1971_v28, %v1433_v24  ;;  %v1286_v39 = vadd.f32 %v16154_v49, %v16153_v25  ;;  %v16155_v37 = vld [vmem:[#allocation41_spill] sm:$0xff]  ;;  %v16159_v16 = vld [vmem:[#allocation58_spill] sm:$0xff] }
 0x281   : > { %v1820_v51 = vpop.f32.mrf.mxu0  ;;  %v1973_v55 = vpop.f32.mrf.mxu1  ;;  %v1439_v22 = vadd.f32 %v16156_v0, %v16155_v37  ;;  %v1288_v43 = vadd.f32 %v16160_v10, %v16159_v16  ;;  %v16161_v47 = vld [vmem:[#allocation43_spill] sm:$0xff]  ;;  %v16162_v28 = vld [vmem:[#allocation148_spill] sm:$0xff]  ;;  %v16166_v16 = vld [vmem:[#allocation149_spill] sm:$0xff] }
 0x282   : > { %16151 = vst [vmem:[#allocation35_spill] sm:$0xff] %v13159_v38  ;;  %16152 = vst [vmem:[#allocation136_spill] sm:$0xff] %v13161_v42  ;;  %v13167_v3 = vadd.f32 %v1820_v51, %v1282_v30  ;;  %v13169_v36 = vadd.f32 %v1973_v55, %v1435_v54  ;;  %v1441_v25 = vadd.f32 %v16162_v28, %v16161_v47  ;;  %v2901_v54 = vld [vmem:[%s11946_s27 + $0x4] sm:$0xff]  ;;  %v2902_v51 = vld [vmem:[%s11946_s27 + $0xc] sm:$0xff] }
 0x283   : > { %v1824_v31 = vpop.f32.mrf.mxu0  ;;  %v1977_v24 = vpop.f32.mrf.mxu1  ;;  %9862 = vmatmul.mubr.msk.bf16.gmra.mxu0 %vm637_vm1, %v13153_v41  ;;  %9875 = vmatmul.mubr.msk.bf16.gmra.mxu1 %vm637_vm1, %v12997_v15  ;;  %v16165_v0 = vld [vmem:[#allocation60_spill] sm:$0xff]  ;;  %v16168_v15 = vld [vmem:[#allocation150_spill] sm:$0xff]  ;;  %v16172_v28 = vld [vmem:[#allocation151_spill] sm:$0xff] }
 0x284   : > { %16157 = vst [vmem:[#allocation48_spill] sm:$0xff] %v13167_v3  ;;  %16158 = vst [vmem:[#allocation137_spill] sm:$0xff] %v13169_v36  ;;  %v13179_v49 = vadd.f32 %v1824_v31, %v1286_v39  ;;  %v13181_v30 = vadd.f32 %v1977_v24, %v1439_v22  ;;  %2732 = vmatprep.mubr.bf16.mxu1 %v15940_v62  ;;  %3086 = vmatprep.mubr.bf16.mxu0 %v15940_v62  ;;  %v16167_v3 = vld [vmem:[#allocation45_spill] sm:$0xff]  ;;  %v16171_v47 = vld [vmem:[#allocation62_spill] sm:$0xff] }
 0x285   : > { %v1826_v55 = vpop.f32.mrf.mxu0  ;;  %v1979_v37 = vpop.f32.mrf.mxu1  ;;  %v1290_v10 = vadd.f32 %v16166_v16, %v16165_v0  ;;  %v1443_v36 = vadd.f32 %v16168_v15, %v16167_v3  ;;  %v13195_v24 = vpack.c.bf16 %v2902_v51, %v2901_v54  ;;  %v16174_v38 = vld [vmem:[#allocation152_spill] sm:$0xff]  ;;  %v16180_v54 = vld [vmem:[#allocation154_spill] sm:$0xff] }
 0x286   : > { %16163 = vst [vmem:[#allocation36_spill] sm:$0xff] %v13179_v49  ;;  %16164 = vst [vmem:[#allocation138_spill] sm:$0xff] %v13181_v30  ;;  %v13191_v42 = vadd.f32 %v1826_v55, %v1288_v43  ;;  %v13193_v39 = vadd.f32 %v1979_v37, %v1441_v25  ;;  %v1292_v30 = vadd.f32 %v16172_v28, %v16171_v47  ;;  %v16173_v49 = vld [vmem:[#allocation47_spill] sm:$0xff]  ;;  %v16177_v43 = vld [vmem:[#allocation64_spill] sm:$0xff] }
 0x287   : > { %v1828_v22 = vpop.f32.mrf.mxu0  ;;  %v1981_v31 = vpop.f32.mrf.mxu1  ;;  %v1445_v18 = vadd.f32 %v16174_v38, %v16173_v49  ;;  %v16178_v25 = vld [vmem:[#allocation153_spill] sm:$0xff]  ;;  %v16183_v28 = vld [vmem:[#allocation66_spill] sm:$0xff]  ;;  %v16184_v38 = vld [vmem:[#allocation155_spill] sm:$0xff] }
 0x288   : > { %16169 = vst [vmem:[#allocation50_spill] sm:$0xff] %v13191_v42  ;;  %16170 = vst [vmem:[#allocation139_spill] sm:$0xff] %v13193_v39  ;;  %v13201_v14 = vadd.f32 %v1828_v22, %v1290_v10  ;;  %v13203_v0 = vadd.f32 %v1981_v31, %v1443_v36  ;;  %v1296_v55 = vadd.f32 %v16178_v25, %v16177_v43  ;;  %v16179_v37 = vld [vmem:[#allocation49_spill] sm:$0xff]  ;;  %v16185_v22 = vld [vmem:[#allocation51_spill] sm:$0xff] }
 0x289   : > { %v1830_v16 = vpop.f32.mrf.mxu0  ;;  %v1983_v3 = vpop.f32.mrf.mxu1  ;;  %v1449_v51 = vadd.f32 %v16180_v54, %v16179_v37  ;;  %v1298_v49 = vadd.f32 %v16184_v38, %v16183_v28  ;;  %v16186_v31 = vld [vmem:[#allocation156_spill] sm:$0xff]  ;;  %v16191_v38 = vld [vmem:[#allocation53_spill] sm:$0xff] }
 0x28a   : > { %16175 = vst [vmem:[#allocation37_spill] sm:$0xff] %v13201_v14  ;;  %16176 = vst [vmem:[#allocation140_spill] sm:$0xff] %v13203_v0  ;;  %v13209_v15 = vadd.f32 %v1830_v16, %v1292_v30  ;;  %v13211_v47 = vadd.f32 %v1983_v3, %v1445_v18  ;;  %v1451_v43 = vadd.f32 %v16186_v31, %v16185_v22  ;;  %v2903_v18 = vld [vmem:[%s11946_s27 + $0x14] sm:$0xff]  ;;  %v2904_v16 = vld [vmem:[%s11946_s27 + $0x1c] sm:$0xff] }
 0x28b   : > { %v1834_v10 = vpop.f32.mrf.mxu0  ;;  %v1987_v36 = vpop.f32.mrf.mxu1  ;;  %9876 = vmatmul.mubr.msk.bf16.gmra.mxu1 %vm637_vm1, %v13031_v61  ;;  %9889 = vmatmul.mubr.msk.bf16.vlgmr.msra.gmra.mxu0 %vm637_vm1, %v13195_v24  ;;  %v16189_v54 = vld [vmem:[#allocation68_spill] sm:$0xff]  ;;  %v16190_v61 = vld [vmem:[#allocation157_spill] sm:$0xff]  ;;  %v16195_v22 = vld [vmem:[#allocation70_spill] sm:$0xff] }
 0x28c   : > { %16181 = vst [vmem:[#allocation52_spill] sm:$0xff] %v13209_v15  ;;  %16182 = vst [vmem:[#allocation141_spill] sm:$0xff] %v13211_v47  ;;  %v13221_v25 = vadd.f32 %v1834_v10, %v1296_v55  ;;  %v13223_v30 = vadd.f32 %v1987_v36, %v1449_v51  ;;  %2742 = vmatprep.mubr.bf16.mxu1 %v15940_v62  ;;  %3096 = vmatprep.mubr.bf16.mxu0 %v15940_v62  ;;  %v16192_v15 = vld [vmem:[#allocation158_spill] sm:$0xff]  ;;  %v16196_v31 = vld [vmem:[#allocation159_spill] sm:$0xff] }
 0x28d   : > { %v1836_v3 = vpop.f32.mrf.mxu0  ;;  %v1989_v37 = vpop.f32.mrf.mxu1  ;;  %v1300_v28 = vadd.f32 %v16190_v61, %v16189_v54  ;;  %v1453_v47 = vadd.f32 %v16192_v15, %v16191_v38  ;;  %v13237_v36 = vpack.c.bf16 %v2904_v16, %v2903_v18  ;;  %v16198_v14 = vld [vmem:[#allocation160_spill] sm:$0xff]  ;;  %v16204_v18 = vld [vmem:[#allocation162_spill] sm:$0xff] }
 0x28e   : > { %16187 = vst [vmem:[#allocation38_spill] sm:$0xff] %v13221_v25  ;;  %16188 = vst [vmem:[#allocation142_spill] sm:$0xff] %v13223_v30  ;;  %v13233_v0 = vadd.f32 %v1836_v3, %v1298_v49  ;;  %v13235_v55 = vadd.f32 %v1989_v37, %v1451_v43  ;;  %v1302_v30 = vadd.f32 %v16196_v31, %v16195_v22  ;;  %v16197_v25 = vld [vmem:[#allocation55_spill] sm:$0xff]  ;;  %v16201_v49 = vld [vmem:[#allocation72_spill] sm:$0xff] }
 0x28f   : > { %v1838_v51 = vpop.f32.mrf.mxu0  ;;  %v1991_v10 = vpop.f32.mrf.mxu1  ;;  %v1455_v39 = vadd.f32 %v16198_v14, %v16197_v25  ;;  %v16202_v43 = vld [vmem:[#allocation161_spill] sm:$0xff]  ;;  %v16207_v31 = vld [vmem:[#allocation74_spill] sm:$0xff]  ;;  %v16208_v14 = vld [vmem:[#allocation163_spill] sm:$0xff] }
 0x290   : > { %16193 = vst [vmem:[#allocation54_spill] sm:$0xff] %v13233_v0  ;;  %16194 = vst [vmem:[#allocation143_spill] sm:$0xff] %v13235_v55  ;;  %v13243_v42 = vadd.f32 %v1838_v51, %v1300_v28  ;;  %v13245_v54 = vadd.f32 %v1991_v10, %v1453_v47  ;;  %v1306_v3 = vadd.f32 %v16202_v43, %v16201_v49  ;;  %v16203_v37 = vld [vmem:[#allocation57_spill] sm:$0xff]  ;;  %v16209_v51 = vld [vmem:[#allocation59_spill] sm:$0xff] }
 0x291   : > { %v1840_v61 = vpop.f32.mrf.mxu0  ;;  %v1993_v15 = vpop.f32.mrf.mxu1  ;;  %v1459_v16 = vadd.f32 %v16204_v18, %v16203_v37  ;;  %v1308_v25 = vadd.f32 %v16208_v14, %v16207_v31  ;;  %v16210_v10 = vld [vmem:[#allocation164_spill] sm:$0xff]  ;;  %v16215_v14 = vld [vmem:[#allocation61_spill] sm:$0xff] }
 0x292   : > { %16199 = vst [vmem:[#allocation39_spill] sm:$0xff] %v13243_v42  ;;  %16200 = vst [vmem:[#allocation144_spill] sm:$0xff] %v13245_v54  ;;  %v13251_v38 = vadd.f32 %v1840_v61, %v1302_v30  ;;  %v13253_v22 = vadd.f32 %v1993_v15, %v1455_v39  ;;  %v1461_v49 = vadd.f32 %v16210_v10, %v16209_v51  ;;  %v2905_v39 = vld [vmem:[%s11946_s27 + $0x24] sm:$0xff]  ;;  %v2906_v61 = vld [vmem:[%s11946_s27 + $0x2c] sm:$0xff] }
 0x293   : > { %v1844_v28 = vpop.f32.mrf.mxu0  ;;  %v1997_v47 = vpop.f32.mrf.mxu1  ;;  %9877 = vmatmul.mubr.msk.bf16.gmra.mxu1 %vm637_vm1, %v13069_v27  ;;  %9890 = vmatmul.mubr.msk.bf16.gmra.mxu0 %vm637_vm1, %v13237_v36  ;;  %v16213_v18 = vld [vmem:[#allocation76_spill] sm:$0xff]  ;;  %v16214_v27 = vld [vmem:[#allocation165_spill] sm:$0xff]  ;;  %v16219_v51 = vld [vmem:[#allocation78_spill] sm:$0xff] }
 0x294   : > { %16205 = vst [vmem:[#allocation56_spill] sm:$0xff] %v13251_v38  ;;  %16206 = vst [vmem:[#allocation145_spill] sm:$0xff] %v13253_v22  ;;  %v13263_v43 = vadd.f32 %v1844_v28, %v1306_v3  ;;  %v13265_v30 = vadd.f32 %v1997_v47, %v1459_v16  ;;  %2752 = vmatprep.mubr.bf16.mxu1 %v15940_v62  ;;  %3106 = vmatprep.mubr.bf16.mxu0 %v15940_v62  ;;  %v16216_v38 = vld [vmem:[#allocation166_spill] sm:$0xff]  ;;  %v16220_v10 = vld [vmem:[#allocation167_spill] sm:$0xff] }
 0x295   : > { %v1846_v15 = vpop.f32.mrf.mxu0  ;;  %v1999_v37 = vpop.f32.mrf.mxu1  ;;  %v1310_v31 = vadd.f32 %v16214_v27, %v16213_v18  ;;  %v1463_v22 = vadd.f32 %v16216_v38, %v16215_v14  ;;  %v13279_v47 = vpack.c.bf16 %v2906_v61, %v2905_v39  ;;  %v16222_v42 = vld [vmem:[#allocation168_spill] sm:$0xff]  ;;  %v16228_v39 = vld [vmem:[#allocation170_spill] sm:$0xff] }
 0x296   : > { %16211 = vst [vmem:[#allocation41_spill] sm:$0xff] %v13263_v43  ;;  %16212 = vst [vmem:[#allocation146_spill] sm:$0xff] %v13265_v30  ;;  %v13275_v54 = vadd.f32 %v1846_v15, %v1308_v25  ;;  %v13277_v3 = vadd.f32 %v1999_v37, %v1461_v49  ;;  %v1312_v30 = vadd.f32 %v16220_v10, %v16219_v51  ;;  %v16221_v43 = vld [vmem:[#allocation63_spill] sm:$0xff]  ;;  %v16225_v25 = vld [vmem:[#allocation80_spill] sm:$0xff] }
 0x297   : > { %v1848_v16 = vpop.f32.mrf.mxu0  ;;  %v2001_v28 = vpop.f32.mrf.mxu1  ;;  %v1465_v55 = vadd.f32 %v16222_v42, %v16221_v43  ;;  %v16226_v49 = vld [vmem:[#allocation169_spill] sm:$0xff]  ;;  %v16231_v10 = vld [vmem:[#allocation82_spill] sm:$0xff]  ;;  %v16232_v42 = vld [vmem:[#allocation171_spill] sm:$0xff] }
 0x298   : > { %16217 = vst [vmem:[#allocation58_spill] sm:$0xff] %v13275_v54  ;;  %16218 = vst [vmem:[#allocation147_spill] sm:$0xff] %v13277_v3  ;;  %v13285_v0 = vadd.f32 %v1848_v16, %v1310_v31  ;;  %v13287_v18 = vadd.f32 %v2001_v28, %v1463_v22  ;;  %v1316_v15 = vadd.f32 %v16226_v49, %v16225_v25  ;;  %v16227_v37 = vld [vmem:[#allocation65_spill] sm:$0xff]  ;;  %v16233_v16 = vld [vmem:[#allocation67_spill] sm:$0xff] }
 0x299   : > { %v1850_v27 = vpop.f32.mrf.mxu0  ;;  %v2003_v38 = vpop.f32.mrf.mxu1  ;;  %v1469_v61 = vadd.f32 %v16228_v39, %v16227_v37  ;;  %v1318_v43 = vadd.f32 %v16232_v42, %v16231_v10  ;;  %v16234_v28 = vld [vmem:[#allocation172_spill] sm:$0xff]  ;;  %v16239_v42 = vld [vmem:[#allocation69_spill] sm:$0xff] }
 0x29a   : > { %16223 = vst [vmem:[#allocation43_spill] sm:$0xff] %v13285_v0  ;;  %16224 = vst [vmem:[#allocation148_spill] sm:$0xff] %v13287_v18  ;;  %v13293_v14 = vadd.f32 %v1850_v27, %v1312_v30  ;;  %v13295_v51 = vadd.f32 %v2003_v38, %v1465_v55  ;;  %v1471_v25 = vadd.f32 %v16234_v28, %v16233_v16  ;;  %v2907_v55 = vld [vmem:[%s11946_s27 + $0x34] sm:$0xff]  ;;  %v2908_v27 = vld [vmem:[%s11946_s27 + $0x3c] sm:$0xff] }
 0x29b   : > { %v1854_v31 = vpop.f32.mrf.mxu0  ;;  %v2007_v22 = vpop.f32.mrf.mxu1  ;;  %9878 = vmatmul.mubr.msk.bf16.gmra.mxu1 %vm637_vm1, %v13111_v11  ;;  %9891 = vmatmul.mubr.msk.bf16.gmra.mxu0 %vm637_vm1, %v13279_v47  ;;  %v16237_v39 = vld [vmem:[#allocation84_spill] sm:$0xff]  ;;  %v16238_v11 = vld [vmem:[#allocation173_spill] sm:$0xff]  ;;  %v16243_v16 = vld [vmem:[#allocation86_spill] sm:$0xff] }
 0x29c   : > { %16229 = vst [vmem:[#allocation60_spill] sm:$0xff] %v13293_v14  ;;  %16230 = vst [vmem:[#allocation149_spill] sm:$0xff] %v13295_v51  ;;  %v13305_v49 = vadd.f32 %v1854_v31, %v1316_v15  ;;  %v13307_v30 = vadd.f32 %v2007_v22, %v1469_v61  ;;  %2762 = vmatprep.mubr.bf16.mxu1 %v15940_v62  ;;  %3116 = vmatprep.mubr.bf16.mxu0 %v15940_v62  ;;  %v16240_v14 = vld [vmem:[#allocation174_spill] sm:$0xff]  ;;  %v16244_v28 = vld [vmem:[#allocation175_spill] sm:$0xff] }
 0x29d   : > { %v1856_v38 = vpop.f32.mrf.mxu0  ;;  %v2009_v37 = vpop.f32.mrf.mxu1  ;;  %v1320_v10 = vadd.f32 %v16238_v11, %v16237_v39  ;;  %v1473_v51 = vadd.f32 %v16240_v14, %v16239_v42  ;;  %v13321_v22 = vpack.c.bf16 %v2908_v27, %v2907_v55  ;;  %v16246_v0 = vld [vmem:[#allocation176_spill] sm:$0xff]  ;;  %v16252_v55 = vld [vmem:[#allocation178_spill] sm:$0xff] }
 0x29e   : > { %16235 = vst [vmem:[#allocation45_spill] sm:$0xff] %v13305_v49  ;;  %16236 = vst [vmem:[#allocation150_spill] sm:$0xff] %v13307_v30  ;;  %v13317_v18 = vadd.f32 %v1856_v38, %v1318_v43  ;;  %v13319_v15 = vadd.f32 %v2009_v37, %v1471_v25  ;;  %v1322_v30 = vadd.f32 %v16244_v28, %v16243_v16  ;;  %v16245_v49 = vld [vmem:[#allocation71_spill] sm:$0xff]  ;;  %v16249_v43 = vld [vmem:[#allocation88_spill] sm:$0xff] }
 0x29f   : > { %v1858_v61 = vpop.f32.mrf.mxu0  ;;  %v2011_v31 = vpop.f32.mrf.mxu1  ;;  %v1475_v3 = vadd.f32 %v16246_v0, %v16245_v49  ;;  %v16250_v25 = vld [vmem:[#allocation177_spill] sm:$0xff]  ;;  %v16255_v28 = vld [vmem:[#allocation90_spill] sm:$0xff]  ;;  %v16256_v0 = vld [vmem:[#allocation179_spill] sm:$0xff] }
 0x2a0   : > { %16241 = vst [vmem:[#allocation62_spill] sm:$0xff] %v13317_v18  ;;  %16242 = vst [vmem:[#allocation151_spill] sm:$0xff] %v13319_v15  ;;  %v13327_v54 = vadd.f32 %v1858_v61, %v1320_v10  ;;  %v13329_v39 = vadd.f32 %v2011_v31, %v1473_v51  ;;  %v1326_v38 = vadd.f32 %v16250_v25, %v16249_v43  ;;  %v16251_v37 = vld [vmem:[#allocation73_spill] sm:$0xff]  ;;  %v16257_v61 = vld [vmem:[#allocation75_spill] sm:$0xff] }
 0x2a1   : > { %v1860_v11 = vpop.f32.mrf.mxu0  ;;  %v2013_v14 = vpop.f32.mrf.mxu1  ;;  %v1479_v27 = vadd.f32 %v16252_v55, %v16251_v37  ;;  %v1328_v49 = vadd.f32 %v16256_v0, %v16255_v28  ;;  %v16258_v31 = vld [vmem:[#allocation180_spill] sm:$0xff]  ;;  %v16263_v0 = vld [vmem:[#allocation77_spill] sm:$0xff] }
 0x2a2   : > { %16247 = vst [vmem:[#allocation47_spill] sm:$0xff] %v13327_v54  ;;  %16248 = vst [vmem:[#allocation152_spill] sm:$0xff] %v13329_v39  ;;  %v13335_v42 = vadd.f32 %v1860_v11, %v1322_v30  ;;  %v13337_v16 = vadd.f32 %v2013_v14, %v1475_v3  ;;  %v1481_v43 = vadd.f32 %v16258_v31, %v16257_v61  ;;  %v2909_v3 = vld [vmem:[%s11946_s27 + $0x44] sm:$0xff]  ;;  %v2910_v11 = vld [vmem:[%s11946_s27 + $0x4c] sm:$0xff] }
 0x2a3   : > { %v1864_v10 = vpop.f32.mrf.mxu0  ;;  %v2017_v51 = vpop.f32.mrf.mxu1  ;;  %9879 = vmatmul.mubr.msk.bf16.gmra.mxu1 %vm637_vm1, %v13153_v41  ;;  %9892 = vmatmul.mubr.msk.bf16.gmra.mxu0 %vm637_vm1, %v13321_v22  ;;  %v16261_v55 = vld [vmem:[#allocation92_spill] sm:$0xff]  ;;  %v16262_v41 = vld [vmem:[#allocation181_spill] sm:$0xff]  ;;  %v16265_v61 = vld [vmem:[#allocation94_spill] sm:$0xff] }
 0x2a4   : > { %16253 = vst [vmem:[#allocation64_spill] sm:$0xff] %v13335_v42  ;;  %16254 = vst [vmem:[#allocation153_spill] sm:$0xff] %v13337_v16  ;;  %v13347_v25 = vadd.f32 %v1864_v10, %v1326_v38  ;;  %v13349_v30 = vadd.f32 %v2017_v51, %v1479_v27  ;;  %3126 = vmatprep.mubr.bf16.mxu0 %v15940_v62  ;;  %3279 = vmatprep.mubr.bf16.mxu1 %v15940_v62  ;;  %v16264_v42 = vld [vmem:[#allocation182_spill] sm:$0xff]  ;;  %v16266_v31 = vld [vmem:[#allocation183_spill] sm:$0xff] }
 0x2a5   : > { %v1866_v14 = vpop.f32.mrf.mxu0  ;;  %v2019_v37 = vpop.f32.mrf.mxu1  ;;  %v1330_v28 = vadd.f32 %v16262_v41, %v16261_v55  ;;  %v1483_v16 = vadd.f32 %v16264_v42, %v16263_v0  ;;  %v13363_v51 = vpack.c.bf16 %v2910_v11, %v2909_v3  ;;  %v16268_v54 = vld [vmem:[#allocation184_spill] sm:$0xff]  ;;  %v16274_v3 = vld [vmem:[#allocation186_spill] sm:$0xff] }
 0x2a6   : > { %16259 = vst [vmem:[#allocation49_spill] sm:$0xff] %v13347_v25  ;;  %16260 = vst [vmem:[#allocation154_spill] sm:$0xff] %v13349_v30  ;;  %v13359_v39 = vadd.f32 %v1866_v14, %v1328_v49  ;;  %v13361_v38 = vadd.f32 %v2019_v37, %v1481_v43  ;;  %v1332_v30 = vadd.f32 %v16266_v31, %v16265_v61  ;;  %v16267_v25 = vld [vmem:[#allocation79_spill] sm:$0xff]  ;;  %v16271_v49 = vld [vmem:[#allocation96_spill] sm:$0xff] }
 0x2a7   : > { %v1868_v27 = vpop.f32.mrf.mxu0  ;;  %v2021_v10 = vpop.f32.mrf.mxu1  ;;  %v1485_v15 = vadd.f32 %v16268_v54, %v16267_v25  ;;  %v16272_v43 = vld [vmem:[#allocation185_spill] sm:$0xff]  ;;  %v16277_v31 = vld [vmem:[#allocation98_spill] sm:$0xff]  ;;  %v16278_v54 = vld [vmem:[#allocation187_spill] sm:$0xff] }
 0x2a8   : > { %v13369_v18 = vadd.f32 %v1868_v27, %v1330_v28  ;;  %v13371_v55 = vadd.f32 %v2021_v10, %v1483_v16  ;;  %v1336_v14 = vadd.f32 %v16272_v43, %v16271_v49  ;;  %v16273_v37 = vld [vmem:[#allocation81_spill] sm:$0xff]  ;;  %v1338_v25 = vadd.f32 %v16278_v54, %v16277_v31  ;;  %v16279_v27 = vld [vmem:[#allocation83_spill] sm:$0xff] }
 0x2a9   : > { %v1870_v41 = vpop.f32.mrf.mxu0  ;;  %v2023_v42 = vpop.f32.mrf.mxu1  ;;  %v1489_v11 = vadd.f32 %v16274_v3, %v16273_v37  ;;  %v1491_v10 = vadd.f32 %v12815_v46, %v16279_v27  ;;  %v16282_v37 = vld [vmem:[#allocation100_spill] sm:$0xff]  ;;  %v16283_v31 = vld [vmem:[#allocation85_spill] sm:$0xff] }
 0x2aa   : > { %16269 = vst [vmem:[#allocation66_spill] sm:$0xff] %v13369_v18  ;;  %16270 = vst [vmem:[#allocation155_spill] sm:$0xff] %v13371_v55  ;;  %v13377_v0 = vadd.f32 %v1870_v41, %v1332_v30  ;;  %v13379_v61 = vadd.f32 %v2023_v42, %v1485_v15  ;;  %v2911_v15 = vld [vmem:[%s11946_s27 + $0x54] sm:$0xff]  ;;  %v2912_v41 = vld [vmem:[%s11946_s27 + $0x5c] sm:$0xff]  ;;  %v1340_v3 = vadd.f32 %v12817_v50, %v16282_v37 }
 0x2ab   : > { %v1874_v28 = vpop.f32.mrf.mxu0  ;;  %v2027_v16 = vpop.f32.mrf.mxu1  ;;  %9893 = vmatmul.mubr.msk.bf16.gmra.mxu0 %vm637_vm1, %v13363_v51  ;;  %9906 = vmatmul.mubr.msk.bf16.vlgmr.msra.gmra.mxu1 %vm637_vm1, %v13195_v24  ;;  %v16284_v24 = vld [vmem:[#allocation188_spill] sm:$0xff]  ;;  %v16288_v27 = vld [vmem:[#allocation189_spill] sm:$0xff] }
 0x2ac   : > { %16275 = vst [vmem:[#allocation51_spill] sm:$0xff] %v13377_v0  ;;  %16276 = vst [vmem:[#allocation156_spill] sm:$0xff] %v13379_v61  ;;  %v13389_v49 = vadd.f32 %v1874_v28, %v1336_v14  ;;  %v13391_v30 = vadd.f32 %v2027_v16, %v1489_v11  ;;  %3136 = vmatprep.mubr.bf16.mxu0 %v15940_v62  ;;  %3289 = vmatprep.mubr.bf16.mxu1 %v15940_v62  ;;  %v16287_v16 = vld [vmem:[#allocation102_spill] sm:$0xff] }
 0x2ad   : > { %v1876_v42 = vpop.f32.mrf.mxu0  ;;  %v2029_v43 = vpop.f32.mrf.mxu1  ;;  %v1493_v54 = vadd.f32 %v16284_v24, %v16283_v31  ;;  %v13405_v28 = vpack.c.bf16 %v2912_v41, %v2911_v15  ;;  %v1342_v61 = vadd.f32 %v16288_v27, %v16287_v16  ;;  %v16295_v31 = vld [vmem:[#allocation89_spill] sm:$0xff]  ;;  %v16296_v15 = vld [vmem:[#allocation192_spill] sm:$0xff]  ;;  %v16299_v27 = vld [vmem:[#allocation106_spill] sm:$0xff] }
 0x2ae   : > { %16280 = vst [vmem:[#allocation68_spill] sm:$0xff] %v13389_v49  ;;  %16281 = vst [vmem:[#allocation157_spill] sm:$0xff] %v13391_v30  ;;  %v13401_v0 = vadd.f32 %v1876_v42, %v1338_v25  ;;  %v13403_v46 = vadd.f32 %v2029_v43, %v1491_v10  ;;  %v16289_v30 = vld [vmem:[#allocation87_spill] sm:$0xff]  ;;  %v16290_v49 = vld [vmem:[#allocation190_spill] sm:$0xff]  ;;  %v1499_v41 = vadd.f32 %v16296_v15, %v16295_v31 }
 0x2af   : > { %v1878_v14 = vpop.f32.mrf.mxu0  ;;  %v2031_v11 = vpop.f32.mrf.mxu1  ;;  %v1495_v55 = vadd.f32 %v16290_v49, %v16289_v30  ;;  %v16293_v42 = vld [vmem:[#allocation104_spill] sm:$0xff]  ;;  %v16294_v10 = vld [vmem:[#allocation191_spill] sm:$0xff]  ;;  %v16300_v49 = vld [vmem:[#allocation193_spill] sm:$0xff] }
 0x2b0   : > { %16285 = vst [vmem:[#allocation53_spill] sm:$0xff] %v13401_v0  ;;  %16286 = vst [vmem:[#allocation158_spill] sm:$0xff] %v13403_v46  ;;  %v13411_v18 = vadd.f32 %v1878_v14, %v1340_v3  ;;  %v13413_v50 = vadd.f32 %v2031_v11, %v1493_v54  ;;  %v1346_v43 = vadd.f32 %v16294_v10, %v16293_v42  ;;  %v16301_v14 = vld [vmem:[#allocation91_spill] sm:$0xff]  ;;  %v16302_v11 = vld [vmem:[#allocation194_spill] sm:$0xff] }
 0x2b1   : > { %v1880_v37 = vpop.f32.mrf.mxu0  ;;  %v2033_v25 = vpop.f32.mrf.mxu1  ;;  %v1348_v30 = vadd.f32 %v16300_v49, %v16299_v27  ;;  %v1501_v42 = vadd.f32 %v16302_v11, %v16301_v14  ;;  %v16305_v15 = vld [vmem:[#allocation108_spill] sm:$0xff]  ;;  %v16306_v27 = vld [vmem:[#allocation195_spill] sm:$0xff]  ;;  %v16311_v14 = vld [vmem:[#allocation110_spill] sm:$0xff] }
 0x2b2   : > { %16291 = vst [vmem:[#allocation70_spill] sm:$0xff] %v13411_v18  ;;  %16292 = vst [vmem:[#allocation159_spill] sm:$0xff] %v13413_v50  ;;  %v13419_v24 = vadd.f32 %v1880_v37, %v1342_v61  ;;  %v13421_v16 = vadd.f32 %v2033_v25, %v1495_v55  ;;  %v2913_v55 = vld [vmem:[%s11946_s27 + $0x64] sm:$0xff]  ;;  %v2914_v37 = vld [vmem:[%s11946_s27 + $0x6c] sm:$0xff]  ;;  %v1350_v49 = vadd.f32 %v16306_v27, %v16305_v15 }
 0x2b3   : > { %v1884_v3 = vpop.f32.mrf.mxu0  ;;  %v2037_v54 = vpop.f32.mrf.mxu1  ;;  %9894 = vmatmul.mubr.msk.bf16.gmra.mxu0 %vm637_vm1, %v13405_v28  ;;  %9907 = vmatmul.mubr.msk.bf16.gmra.mxu1 %vm637_vm1, %v13237_v36  ;;  %v16308_v36 = vld [vmem:[#allocation196_spill] sm:$0xff]  ;;  %v16312_v11 = vld [vmem:[#allocation197_spill] sm:$0xff]  ;;  %v16314_v18 = vld [vmem:[#allocation198_spill] sm:$0xff] }
 0x2b4   : > { %16297 = vst [vmem:[#allocation55_spill] sm:$0xff] %v13419_v24  ;;  %16298 = vst [vmem:[#allocation160_spill] sm:$0xff] %v13421_v16  ;;  %v13431_v10 = vadd.f32 %v1884_v3, %v1346_v43  ;;  %v13433_v61 = vadd.f32 %v2037_v54, %v1499_v41  ;;  %3146 = vmatprep.mubr.bf16.mxu0 %v15940_v62  ;;  %3299 = vmatprep.mubr.bf16.mxu1 %v15940_v62  ;;  %v16307_v24 = vld [vmem:[#allocation93_spill] sm:$0xff] }
 0x2b5   : > { %v1886_v25 = vpop.f32.mrf.mxu0  ;;  %v2039_v31 = vpop.f32.mrf.mxu1  ;;  %v1503_v16 = vadd.f32 %v16308_v36, %v16307_v24  ;;  %v13447_v54 = vpack.c.bf16 %v2914_v37, %v2913_v55  ;;  %v16320_v55 = vld [vmem:[#allocation200_spill] sm:$0xff] }
 0x2b6   : > { %16303 = vst [vmem:[#allocation72_spill] sm:$0xff] %v13431_v10  ;;  %16304 = vst [vmem:[#allocation161_spill] sm:$0xff] %v13433_v61  ;;  %v13443_v50 = vadd.f32 %v1886_v25, %v1348_v30  ;;  %v13445_v43 = vadd.f32 %v2039_v31, %v1501_v42  ;;  %v1352_v61 = vadd.f32 %v16312_v11, %v16311_v14  ;;  %v16313_v10 = vld [vmem:[#allocation95_spill] sm:$0xff]  ;;  %v16319_v31 = vld [vmem:[#allocation97_spill] sm:$0xff] }
 0x2b7   : > { %v1888_v41 = vpop.f32.mrf.mxu0  ;;  %v2041_v3 = vpop.f32.mrf.mxu1  ;;  %v1505_v46 = vadd.f32 %v16314_v18, %v16313_v10  ;;  %v16317_v30 = vld [vmem:[#allocation23_spill] sm:$0xff]  ;;  %v1509_v37 = vadd.f32 %v16320_v55, %v16319_v31  ;;  %v16323_v11 = vld [vmem:[#allocation24_spill] sm:$0xff]  ;;  %v16324_v18 = vld [vmem:[#allocation201_spill] sm:$0xff] }
 0x2b8   : > { %16309 = vst [vmem:[#allocation57_spill] sm:$0xff] %v13443_v50  ;;  %16310 = vst [vmem:[#allocation162_spill] sm:$0xff] %v13445_v43  ;;  %v13453_v0 = vadd.f32 %v1888_v41, %v1350_v49  ;;  %v13455_v15 = vadd.f32 %v2041_v3, %v1503_v16  ;;  %v16318_v42 = vld [vmem:[#allocation199_spill] sm:$0xff]  ;;  %v1358_v10 = vadd.f32 %v16324_v18, %v16323_v11  ;;  %v16326_v3 = vld [vmem:[#allocation202_spill] sm:$0xff] }
 0x2b9   : > { %v1890_v27 = vpop.f32.mrf.mxu0  ;;  %v2043_v24 = vpop.f32.mrf.mxu1  ;;  %v1356_v25 = vadd.f32 %v16318_v42, %v16317_v30  ;;  %v16325_v41 = vld [vmem:[#allocation99_spill] sm:$0xff]  ;;  %v16329_v55 = vld [vmem:[#allocation25_spill] sm:$0xff] }
 0x2ba   : > { %16315 = vst [vmem:[#allocation74_spill] sm:$0xff] %v13453_v0  ;;  %16316 = vst [vmem:[#allocation163_spill] sm:$0xff] %v13455_v15  ;;  %v13461_v36 = vadd.f32 %v1890_v27, %v1352_v61  ;;  %v13463_v14 = vadd.f32 %v2043_v24, %v1505_v46  ;;  %v1511_v30 = vadd.f32 %v16326_v3, %v16325_v41  ;;  %v2915_v46 = vld [vmem:[%s11946_s27 + $0x74] sm:$0xff]  ;;  %v2916_v27 = vld [vmem:[%s11946_s27 + $0x7c] sm:$0xff] }
 0x2bb   : > { %v1894_v49 = vpop.f32.mrf.mxu0  ;;  %v2047_v16 = vpop.f32.mrf.mxu1  ;;  %9895 = vmatmul.mubr.msk.bf16.gmra.mxu0 %vm637_vm1, %v13447_v54  ;;  %9908 = vmatmul.mubr.msk.bf16.gmra.mxu1 %vm637_vm1, %v13279_v47  ;;  %v16330_v11 = vld [vmem:[#allocation203_spill] sm:$0xff]  ;;  %v16332_v47 = vld [vmem:[#allocation204_spill] sm:$0xff]  ;;  %v16334_v41 = vld [vmem:[#allocation26_spill] sm:$0xff] }
 0x2bc   : > { %16321 = vst [vmem:[#allocation59_spill] sm:$0xff] %v13461_v36  ;;  %16322 = vst [vmem:[#allocation164_spill] sm:$0xff] %v13463_v14  ;;  %v13473_v42 = vadd.f32 %v1894_v49, %v1356_v25  ;;  %v13475_v61 = vadd.f32 %v2047_v16, %v1509_v37  ;;  %3156 = vmatprep.mubr.bf16.mxu0 %v15940_v62  ;;  %3309 = vmatprep.mubr.bf16.mxu1 %v15940_v62  ;;  %v16331_v36 = vld [vmem:[#allocation101_spill] sm:$0xff]  ;;  %v16337_v0 = vld [vmem:[#allocation206_spill] sm:$0xff] }
 0x2bd   : > { %v1896_v24 = vpop.f32.mrf.mxu0  ;;  %v2049_v31 = vpop.f32.mrf.mxu1  ;;  %v1360_v18 = vadd.f32 %v16330_v11, %v16329_v55  ;;  %v1513_v14 = vadd.f32 %v16332_v47, %v16331_v36  ;;  %v13489_v16 = vpack.c.bf16 %v2916_v27, %v2915_v46  ;;  %v16335_v3 = vld [vmem:[#allocation205_spill] sm:$0xff]  ;;  %v16343_v46 = vld [vmem:[#allocation208_spill] sm:$0xff] }
 0x2be   : > { %16327 = vst [vmem:[#allocation76_spill] sm:$0xff] %v13473_v42  ;;  %16328 = vst [vmem:[#allocation165_spill] sm:$0xff] %v13475_v61  ;;  %v13485_v15 = vadd.f32 %v1896_v24, %v1358_v10  ;;  %v13487_v25 = vadd.f32 %v2049_v31, %v1511_v30  ;;  %v1362_v61 = vadd.f32 %v16335_v3, %v16334_v41  ;;  %v16336_v42 = vld [vmem:[#allocation103_spill] sm:$0xff]  ;;  %v16342_v31 = vld [vmem:[#allocation105_spill] sm:$0xff] }
 0x2bf   : > { %v1898_v37 = vpop.f32.mrf.mxu0  ;;  %v2051_v49 = vpop.f32.mrf.mxu1  ;;  %v1515_v43 = vadd.f32 %v16337_v0, %v16336_v42  ;;  %v16340_v10 = vld [vmem:[#allocation27_spill] sm:$0xff]  ;;  %v1519_v27 = vadd.f32 %v16343_v46, %v16342_v31  ;;  %v16346_v3 = vld [vmem:[#allocation28_spill] sm:$0xff]  ;;  %v16347_v0 = vld [vmem:[#allocation209_spill] sm:$0xff] }
 0x2c0   : > { %16333 = vst [vmem:[#allocation61_spill] sm:$0xff] %v13487_v25  ;;  %v13495_v50 = vadd.f32 %v1898_v37, %v1360_v18  ;;  %v13497_v55 = vadd.f32 %v2051_v49, %v1513_v14  ;;  %v16341_v30 = vld [vmem:[#allocation207_spill] sm:$0xff]  ;;  %v1368_v42 = vadd.f32 %v16347_v0, %v16346_v3  ;;  %v16351_v31 = vld [vmem:[#allocation29_spill] sm:$0xff]  ;;  %v16352_v46 = vld [vmem:[#allocation210_spill] sm:$0xff] }
 0x2c1   : > { %v1900_v11 = vpop.f32.mrf.mxu0  ;;  %v2053_v36 = vpop.f32.mrf.mxu1  ;;  %v1366_v24 = vadd.f32 %v16341_v30, %v16340_v10  ;;  %v16348_v37 = vld [vmem:[#allocation107_spill] sm:$0xff]  ;;  %v1370_v3 = vadd.f32 %v16352_v46, %v16351_v31  ;;  %v16353_v0 = vld [vmem:[#allocation109_spill] sm:$0xff] }
 0x2c2   : > { %16338 = vst [vmem:[#allocation166_spill] sm:$0xff] %v13495_v50  ;;  %16339 = vst [vmem:[#allocation78_spill] sm:$0xff] %v13497_v55  ;;  %v13503_v47 = vadd.f32 %v1900_v11, %v1362_v61  ;;  %v13505_v41 = vadd.f32 %v2053_v36, %v1515_v43  ;;  %v1521_v49 = vadd.f32 %v12893_v35, %v16348_v37  ;;  %v2917_v43 = vld [vmem:[%s11946_s27 + $0x84] sm:$0xff]  ;;  %v2918_v11 = vld [vmem:[%s11946_s27 + $0x8c] sm:$0xff] }
 0x2c3   : > { %v1904_v18 = vpop.f32.mrf.mxu0  ;;  %v2057_v14 = vpop.f32.mrf.mxu1  ;;  %9896 = vmatmul.mubr.msk.bf16.gmra.mxu0 %vm637_vm1, %v13489_v16  ;;  %9909 = vmatmul.mubr.msk.bf16.gmra.mxu1 %vm637_vm1, %v13321_v22  ;;  %v16354_v22 = vld [vmem:[#allocation211_spill] sm:$0xff]  ;;  %v16356_v37 = vld [vmem:[#allocation212_spill] sm:$0xff]  ;;  %v16358_v55 = vld [vmem:[#allocation213_spill] sm:$0xff] }
 0x2c4   : > { %16344 = vst [vmem:[#allocation167_spill] sm:$0xff] %v13503_v47  ;;  %16345 = vst [vmem:[#allocation63_spill] sm:$0xff] %v13505_v41  ;;  %v13515_v10 = vadd.f32 %v1904_v18, %v1366_v24  ;;  %v13517_v61 = vadd.f32 %v2057_v14, %v1519_v27  ;;  %3166 = vmatprep.mubr.bf16.mxu0 %v15940_v62  ;;  %3319 = vmatprep.mubr.bf16.mxu1 %v15940_v62  ;;  %v16355_v14 = vld [vmem:[#allocation30_spill] sm:$0xff] }
 0x2c5   : > { %v1906_v36 = vpop.f32.mrf.mxu0  ;;  %v2059_v30 = vpop.f32.mrf.mxu1  ;;  %v1523_v47 = vadd.f32 %v16354_v22, %v16353_v0  ;;  %v13531_v18 = vpack.c.bf16 %v2918_v11, %v2917_v43 }
 0x2c6   : > { %16349 = vst [vmem:[#allocation168_spill] sm:$0xff] %v13515_v10  ;;  %16350 = vst [vmem:[#allocation80_spill] sm:$0xff] %v13517_v61  ;;  %v13527_v41 = vadd.f32 %v1906_v36, %v1368_v42  ;;  %v13529_v35 = vadd.f32 %v2059_v30, %v1521_v49  ;;  %v1372_v61 = vadd.f32 %v16356_v37, %v16355_v14  ;;  %v16357_v10 = vld [vmem:[#allocation111_spill] sm:$0xff]  ;;  %v16359_v49 = vld [vmem:[#allocation112_spill] sm:$0xff] }
 0x2c7   : > { %v1908_v24 = vpop.f32.mrf.mxu0  ;;  %v2061_v27 = vpop.f32.mrf.mxu1  ;;  %v1525_v50 = vadd.f32 %v16358_v55, %v16357_v10  ;;  %v16360_v30 = vld [vmem:[#allocation214_spill] sm:$0xff]  ;;  %v16363_v55 = vld [vmem:[#allocation113_spill] sm:$0xff] }
 0x2c8   : > { %v13537_v25 = vadd.f32 %v1908_v24, %v1370_v3  ;;  %v13539_v31 = vadd.f32 %v2061_v27, %v1523_v47  ;;  %v1529_v46 = vadd.f32 %v16360_v30, %v16359_v49  ;;  %v1531_v47 = vadd.f32 %v12921_v33, %v16363_v55  ;;  %v16364_v3 = vld [vmem:[#allocation215_spill] sm:$0xff]  ;;  %v16365_v37 = vld [vmem:[#allocation114_spill] sm:$0xff] }
 0x2c9   : > { %v1910_v42 = vpop.f32.mrf.mxu0  ;;  %v2063_v36 = vpop.f32.mrf.mxu1 }
 0x2ca   : > { %v13543_v0 = vadd.f32 %v1910_v42, %v1372_v61  ;;  %v13545_v43 = vadd.f32 %v2063_v36, %v1525_v50  ;;  %v2919_v50 = vld [vmem:[%s11946_s27 + $0x94] sm:$0xff]  ;;  %v2920_v61 = vld [vmem:[%s11946_s27 + $0x9c] sm:$0xff]  ;;  %v1533_v42 = vadd.f32 %v12927_v48, %v16365_v37 }
 0x2cb   : > { %v2067_v11 = vpop.f32.mrf.mxu1  ;;  %v2421_v22 = vpop.f32.mrf.mxu0  ;;  %9897 = vmatmul.mubr.msk.bf16.gmra.mxu0 %vm637_vm1, %v13531_v18  ;;  %9910 = vmatmul.mubr.msk.bf16.gmra.mxu1 %vm637_vm1, %v13363_v51  ;;  %v13569_v30 = vpack.c.bf16 %v2920_v61, %v2919_v50 }
 0x2cc   : > { %16361 = vst [vmem:[#allocation169_spill] sm:$0xff] %v13543_v0  ;;  %16362 = vst [vmem:[#allocation65_spill] sm:$0xff] %v13545_v43  ;;  %v13553_v10 = vadd.f32 %v2067_v11, %v1529_v46  ;;  %v13556_v24 = vadd.f32 %v2421_v22, %v16364_v3  ;;  %3176 = vmatprep.mubr.bf16.mxu0 %v15940_v62  ;;  %3329 = vmatprep.mubr.bf16.mxu1 %v15940_v62  ;;  %v16366_v46 = vld [vmem:[#allocation115_spill] sm:$0xff]  ;;  %v16367_v3 = vld [vmem:[#allocation116_spill] sm:$0xff] }
 0x2cd   : > { %v2069_v27 = vpop.f32.mrf.mxu1  ;;  %v2423_v14 = vpop.f32.mrf.mxu0  ;;  %v1535_v11 = vadd.f32 %v12935_v23, %v16366_v46  ;;  %v16370_v46 = vld [vmem:[#allocation118_spill] sm:$0xff]  ;;  %v16404_v43 = vld [vmem:[#allocation132_spill] sm:$0xff] }
 0x2ce   : > { %v13564_v51 = vadd.f32 %v2069_v27, %v1531_v47  ;;  %v13567_v33 = vadd.f32 %v2423_v14, %v12925_v26  ;;  %v1539_v26 = vadd.f32 %v12941_v9, %v16367_v3  ;;  %v16371_v3 = vld [vmem:[#allocation119_spill] sm:$0xff]  ;;  %v16399_v0 = vld [vmem:[#allocation42_spill] sm:$0xff] }
 0x2cf   : > { %v2071_v36 = vpop.f32.mrf.mxu1  ;;  %v2425_v49 = vpop.f32.mrf.mxu0 }
 0x2d0   : > { %v13573_v22 = vadd.f32 %v2071_v36, %v1533_v42  ;;  %v13576_v55 = vadd.f32 %v2425_v49, %v12933_v4  ;;  %v16369_v4 = vld [vmem:[#allocation117_spill] sm:$0xff] }
 0x2d1   : > { %v2073_v48 = vpop.f32.mrf.mxu1  ;;  %v2427_v47 = vpop.f32.mrf.mxu0  ;;  %v1541_v23 = vadd.f32 %v12955_v44, %v16369_v4  ;;  %v2922_v42 = vld [vmem:[%s11946_s27 + $0xac] sm:$0xff] }
 0x2d2   : > { %v13580_v27 = vadd.f32 %v2073_v48, %v1535_v11  ;;  %v13583_v50 = vadd.f32 %v2427_v47, %v12939_v40  ;;  %v2921_v40 = vld [vmem:[%s11946_s27 + $0xa4] sm:$0xff]  ;;  %v1543_v11 = vadd.f32 %v12961_v32, %v16370_v46 }
 0x2d3   : > { %v2077_v61 = vpop.f32.mrf.mxu1  ;;  %v2431_v14 = vpop.f32.mrf.mxu0  ;;  %9898 = vmatmul.mubr.msk.bf16.gmra.mxu0 %vm637_vm1, %v13569_v30  ;;  %9911 = vmatmul.mubr.msk.bf16.gmra.mxu1 %vm637_vm1, %v13405_v28 }
 0x2d4   : > { %16368 = vst [vmem:[#allocation170_spill] sm:$0xff] %v13580_v27  ;;  %v13591_v37 = vadd.f32 %v2077_v61, %v1539_v26  ;;  %v13594_v9 = vadd.f32 %v2431_v14, %v12949_v60  ;;  %3186 = vmatprep.mubr.bf16.mxu0 %v15940_v62  ;;  %3339 = vmatprep.mubr.bf16.mxu1 %v15940_v62 }
 0x2d5   : > { %v2079_v36 = vpop.f32.mrf.mxu1  ;;  %v2433_v49 = vpop.f32.mrf.mxu0  ;;  %v13607_v60 = vpack.c.bf16 %v2922_v42, %v2921_v40  ;;  %v1545_v26 = vadd.f32 %v12969_v57, %v16371_v3  ;;  %v16375_v3 = vld [vmem:[#allocation122_spill] sm:$0xff] }
 0x2d6   : > { %v13602_v28 = vadd.f32 %v2079_v36, %v1541_v23  ;;  %v13605_v44 = vadd.f32 %v2433_v49, %v12959_v63  ;;  %v16372_v23 = vld [vmem:[#allocation120_spill] sm:$0xff] }
 0x2d7   : > { %v2081_v48 = vpop.f32.mrf.mxu1  ;;  %v2435_v47 = vpop.f32.mrf.mxu0  ;;  %v1549_v63 = vadd.f32 %v12975_v56, %v16372_v23  ;;  %v16376_v23 = vld [vmem:[#allocation123_spill] sm:$0xff] }
 0x2d8   : > { %v13611_v61 = vadd.f32 %v2081_v48, %v1543_v11  ;;  %v13614_v14 = vadd.f32 %v2435_v47, %v12967_v13  ;;  %v16374_v13 = vld [vmem:[#allocation121_spill] sm:$0xff]  ;;  %v2924_v11 = vld [vmem:[%s11946_s27 + $0xbc] sm:$0xff] }
 0x2d9   : > { %v2083_v32 = vpop.f32.mrf.mxu1  ;;  %v2437_v4 = vpop.f32.mrf.mxu0  ;;  %v1551_v57 = vadd.f32 %v12989_v1, %v16374_v13 }
 0x2da   : > { %v13618_v36 = vadd.f32 %v2083_v32, %v1545_v26  ;;  %v13621_v40 = vadd.f32 %v2437_v4, %v12973_v5  ;;  %v2923_v5 = vld [vmem:[%s11946_s27 + $0xb4] sm:$0xff]  ;;  %v1553_v26 = vadd.f32 %v12995_v19, %v16375_v3 }
 0x2db   : > { %v2087_v42 = vpop.f32.mrf.mxu1  ;;  %v2441_v49 = vpop.f32.mrf.mxu0  ;;  %9899 = vmatmul.mubr.msk.bf16.gmra.mxu0 %vm637_vm1, %v13607_v60  ;;  %9912 = vmatmul.mubr.msk.bf16.gmra.mxu1 %vm637_vm1, %v13447_v54 }
 0x2dc   : > { %16373 = vst [vmem:[#allocation82_spill] sm:$0xff] %v13618_v36  ;;  %v13629_v46 = vadd.f32 %v2087_v42, %v1549_v63  ;;  %v13632_v56 = vadd.f32 %v2441_v49, %v12983_v52  ;;  %3196 = vmatprep.mubr.bf16.mxu0 %v15940_v62  ;;  %3349 = vmatprep.mubr.bf16.mxu1 %v15940_v62  ;;  %v16401_v36 = vld [vmem:[#allocation131_spill] sm:$0xff] }
 0x2dd   : > { %v2089_v48 = vpop.f32.mrf.mxu1  ;;  %v2443_v47 = vpop.f32.mrf.mxu0  ;;  %v13645_v52 = vpack.c.bf16 %v2924_v11, %v2923_v5  ;;  %v1555_v63 = vadd.f32 %v13003_v2, %v16376_v23  ;;  %v16381_v23 = vld [vmem:[#allocation126_spill] sm:$0xff] }
 0x2de   : > { %v13640_v54 = vadd.f32 %v2089_v48, %v1551_v57  ;;  %v13643_v1 = vadd.f32 %v2443_v47, %v12993_v53  ;;  %v16377_v57 = vld [vmem:[#allocation124_spill] sm:$0xff] }
 0x2df   : > { %v2091_v32 = vpop.f32.mrf.mxu1  ;;  %v2445_v4 = vpop.f32.mrf.mxu0  ;;  %v1559_v53 = vadd.f32 %v13009_v8, %v16377_v57  ;;  %v16383_v57 = vld [vmem:[#allocation127_spill] sm:$0xff] }
 0x2e0   : > { %v13649_v42 = vadd.f32 %v2091_v32, %v1553_v26  ;;  %v13652_v49 = vadd.f32 %v2445_v4, %v13001_v21  ;;  %v16379_v21 = vld [vmem:[#allocation125_spill] sm:$0xff] }
 0x2e1   : > { %v2093_v19 = vpop.f32.mrf.mxu1  ;;  %v2447_v13 = vpop.f32.mrf.mxu0  ;;  %v1561_v2 = vadd.f32 %v13023_v12, %v16379_v21  ;;  %v2926_v26 = vld [vmem:[%s11946_s27 + $0xcc] sm:$0xff] }
 0x2e2   : > { %v13656_v48 = vadd.f32 %v2093_v19, %v1555_v63  ;;  %v13659_v5 = vadd.f32 %v2447_v13, %v13007_v58  ;;  %v2925_v58 = vld [vmem:[%s11946_s27 + $0xc4] sm:$0xff]  ;;  %v1563_v63 = vadd.f32 %v13029_v29, %v16381_v23 }
 0x2e3   : > { %v2097_v11 = vpop.f32.mrf.mxu1  ;;  %v2451_v47 = vpop.f32.mrf.mxu0  ;;  %9900 = vmatmul.mubr.msk.bf16.gmra.mxu0 %vm637_vm1, %v13645_v52  ;;  %9913 = vmatmul.mubr.msk.bf16.gmra.mxu1 %vm637_vm1, %v13489_v16 }
 0x2e4   : > { %16378 = vst [vmem:[#allocation171_spill] sm:$0xff] %v13656_v48  ;;  %v13667_v3 = vadd.f32 %v2097_v11, %v1559_v53  ;;  %v13670_v8 = vadd.f32 %v2451_v47, %v13017_v7  ;;  %3206 = vmatprep.mubr.bf16.mxu0 %v15940_v62  ;;  %3359 = vmatprep.mubr.bf16.mxu1 %v15940_v62 }
 0x2e5   : > { %v2099_v32 = vpop.f32.mrf.mxu1  ;;  %v2453_v4 = vpop.f32.mrf.mxu0  ;;  %v13683_v7 = vpack.c.bf16 %v2926_v26, %v2925_v58  ;;  %v1565_v53 = vadd.f32 %v13037_v17, %v16383_v57  ;;  %v2928_v26 = vld [vmem:[%s11946_s27 + $0xdc] sm:$0xff] }
 0x2e6   : > { %16380 = vst [vmem:[#allocation67_spill] sm:$0xff] %v13670_v8  ;;  %v13678_v16 = vadd.f32 %v2099_v32, %v1561_v2  ;;  %v13681_v12 = vadd.f32 %v2453_v4, %v13027_v59 }
 0x2e7   : > { %v2101_v19 = vpop.f32.mrf.mxu1  ;;  %v2455_v13 = vpop.f32.mrf.mxu0 }
 0x2e8   : > { %16382 = vst [vmem:[#allocation172_spill] sm:$0xff] %v13681_v12  ;;  %v13687_v11 = vadd.f32 %v2101_v19, %v1563_v63  ;;  %v13690_v47 = vadd.f32 %v2455_v13, %v13035_v6  ;;  %v16388_v63 = vld [vmem:[#allocation216_spill] sm:$0xff]  ;;  %v16390_v13 = vld [vmem:[#allocation217_spill] sm:$0xff] }
 0x2e9   : > { %v2103_v29 = vpop.f32.mrf.mxu1  ;;  %v2457_v21 = vpop.f32.mrf.mxu0  ;;  %v16417_v12 = vld [vmem:[#allocation137_spill] sm:$0xff] }
 0x2ea   : > { %16384 = vst [vmem:[#allocation84_spill] sm:$0xff] %v13690_v47  ;;  %v13692_v2 = vadd.f32 %v2103_v29, %v1565_v53  ;;  %v13695_v59 = vadd.f32 %v2457_v21, %v13043_v20  ;;  %v2927_v20 = vld [vmem:[%s11946_s27 + $0xd4] sm:$0xff]  ;;  %v16391_v53 = vld [vmem:[#allocation31_spill] sm:$0xff]  ;;  %v16393_v21 = vld [vmem:[#allocation128_spill] sm:$0xff] }
 0x2eb   : > { %v2461_v32 = vpop.f32.mrf.mxu0  ;;  %v2614_v58 = vpop.f32.mrf.mxu1  ;;  %9901 = vmatmul.mubr.msk.bf16.gmra.mxu0 %vm637_vm1, %v13683_v7  ;;  %9914 = vmatmul.mubr.msk.bf16.gmra.mxu1 %vm637_vm1, %v13531_v18 }
 0x2ec   : > { %16385 = vst [vmem:[#allocation173_spill] sm:$0xff] %v13692_v2  ;;  %16386 = vst [vmem:[#allocation69_spill] sm:$0xff] %v13695_v59  ;;  %v13702_v17 = vadd.f32 %v2461_v32, %v13053_v34  ;;  %v13705_v6 = vadd.f32 %v2614_v58, %v13055_v45  ;;  %3216 = vmatprep.mubr.bf16.mxu0 %v15940_v62  ;;  %3369 = vmatprep.mubr.bf16.mxu1 %v15940_v62 }
 0x2ed   : > { %v2463_v4 = vpop.f32.mrf.mxu0  ;;  %v2616_v23 = vpop.f32.mrf.mxu1  ;;  %v13717_v45 = vpack.c.bf16 %v2928_v26, %v2927_v20  ;;  %v16396_v20 = vld [vmem:[#allocation32_spill] sm:$0xff] }
 0x2ee   : > { %16387 = vst [vmem:[#allocation174_spill] sm:$0xff] %v13702_v17  ;;  %v13712_v19 = vadd.f32 %v2463_v4, %v16388_v63  ;;  %v13715_v57 = vadd.f32 %v2616_v23, %v16390_v13  ;;  %v16395_v4 = vld [vmem:[#allocation129_spill] sm:$0xff] }
 0x2ef   : > { %v2465_v18 = vpop.f32.mrf.mxu0  ;;  %v2618_v34 = vpop.f32.mrf.mxu1 }
 0x2f0   : > { %16389 = vst [vmem:[#allocation86_spill] sm:$0xff] %v13712_v19  ;;  %v13720_v29 = vadd.f32 %v2465_v18, %v16391_v53  ;;  %v13723_v32 = vadd.f32 %v2618_v34, %v16393_v21  ;;  %v16398_v18 = vld [vmem:[#allocation130_spill] sm:$0xff]  ;;  %v2930_v53 = vld [vmem:[%s11946_s27 + $0xec] sm:$0xff] }
 0x2f1   : > { %v13725_v58 = vpop.f32.mrf.mxu0  ;;  %v2620_v2 = vpop.f32.mrf.mxu1 }
 0x2f2   : > { %16392 = vst [vmem:[#allocation175_spill] sm:$0xff] %v13720_v29  ;;  %16394 = vst [vmem:[#allocation71_spill] sm:$0xff] %v13725_v58  ;;  %v13728_v63 = vadd.f32 %v2620_v2, %v16395_v4  ;;  %v2929_v2 = vld [vmem:[%s11946_s27 + $0xe4] sm:$0xff] }
 0x2f3   : > { %v2471_v23 = vpop.f32.mrf.mxu0  ;;  %v2624_v13 = vpop.f32.mrf.mxu1  ;;  %9902 = vmatmul.mubr.msk.bf16.gmra.mxu0 %vm637_vm1, %v13717_v45  ;;  %9915 = vmatmul.mubr.msk.bf16.gmra.mxu1 %vm637_vm1, %v13569_v30 }
 0x2f4   : > { %v13735_v26 = vadd.f32 %v2471_v23, %v16396_v20  ;;  %v13738_v34 = vadd.f32 %v2624_v13, %v16398_v18  ;;  %3226 = vmatprep.mubr.bf16.mxu0 %v15940_v62  ;;  %3379 = vmatprep.mubr.bf16.mxu1 %v15940_v62  ;;  %v13750_v13 = vpack.c.bf16 %v2930_v53, %v2929_v2  ;;  %v16402_v20 = vld [vmem:[#allocation33_spill] sm:$0xff]  ;;  %v16407_v2 = vld [vmem:[#allocation34_spill] sm:$0xff] }
 0x2f5   : > { %v2473_v21 = vpop.f32.mrf.mxu0  ;;  %v2626_v4 = vpop.f32.mrf.mxu1 }
 0x2f6   : > { %16397 = vst [vmem:[#allocation176_spill] sm:$0xff] %v13735_v26  ;;  %v13745_v48 = vadd.f32 %v2473_v21, %v16399_v0  ;;  %v13748_v27 = vadd.f32 %v2626_v4, %v16401_v36  ;;  %v16406_v0 = vld [vmem:[#allocation133_spill] sm:$0xff] }
 0x2f7   : > { %v2475_v30 = vpop.f32.mrf.mxu0  ;;  %v2628_v23 = vpop.f32.mrf.mxu1 }
 0x2f8   : > { %16400 = vst [vmem:[#allocation88_spill] sm:$0xff] %v13745_v48  ;;  %v13753_v18 = vadd.f32 %v2475_v30, %v16402_v20  ;;  %v13756_v26 = vadd.f32 %v2628_v23, %v16404_v43  ;;  %v16409_v30 = vld [vmem:[#allocation134_spill] sm:$0xff]  ;;  %v16412_v48 = vld [vmem:[#allocation135_spill] sm:$0xff] }
 0x2f9   : > { %v13758_v29 = vpop.f32.mrf.mxu0  ;;  %v2630_v19 = vpop.f32.mrf.mxu1  ;;  %v2932_v23 = vld [vmem:[%s11946_s27 + $0xfc] sm:$0xf] }
 0x2fa   : > { %16403 = vst [vmem:[#allocation177_spill] sm:$0xff] %v13753_v18  ;;  %16405 = vst [vmem:[#allocation73_spill] sm:$0xff] %v13758_v29  ;;  %v13761_v21 = vadd.f32 %v2630_v19, %v16406_v0  ;;  %v2931_v19 = vld [vmem:[%s11946_s27 + $0xf4] sm:$0xff]  ;;  %s9506_s27 = scalar_lea.sflag [#allocation4], %s471_s12 }
 0x2fb   : > { %v2481_v36 = vpop.f32.mrf.mxu0  ;;  %v2634_v4 = vpop.f32.mrf.mxu1  ;;  %9903 = vmatmul.mubr.msk.bf16.gmra.mxu0 %vm637_vm1, %v13750_v13  ;;  %9916 = vmatmul.mubr.msk.bf16.gmra.mxu1 %vm637_vm1, %v13607_v60  ;;  %v16410_v18 = vld [vmem:[#allocation46_spill] sm:$0xff] }
 0x2fc   : > { %v13768_v53 = vadd.f32 %v2481_v36, %v16407_v2  ;;  %v13771_v43 = vadd.f32 %v2634_v4, %v16409_v30  ;;  %3236 = vmatprep.mubr.bf16.mxu0 %v15940_v62  ;;  %3389 = vmatprep.mubr.bf16.mxu1 %v15940_v62  ;;  %v13783_v2 = vpack.c.bf16 %v2932_v23, %v2931_v19  ;;  %v16413_v4 = vld [vmem:[#allocation35_spill] sm:$0xff]  ;;  %v16421_v23 = vld [vmem:[#allocation138_spill] sm:$0xff] }
 0x2fd   : > { %v2483_v20 = vpop.f32.mrf.mxu0  ;;  %v2636_v0 = vpop.f32.mrf.mxu1 }
 0x2fe   : > { %16408 = vst [vmem:[#allocation178_spill] sm:$0xff] %v13768_v53  ;;  %v13778_v29 = vadd.f32 %v2483_v20, %v16410_v18  ;;  %v13781_v58 = vadd.f32 %v2636_v0, %v16412_v48  ;;  %v16415_v53 = vld [vmem:[#allocation136_spill] sm:$0xff] }
 0x2ff   : > { %v2485_v60 = vpop.f32.mrf.mxu0  ;;  %v2638_v36 = vpop.f32.mrf.mxu1  ;;  %v16419_v48 = vld [vmem:[#allocation36_spill] sm:$0xff] }
 0x300   : > { %16411 = vst [vmem:[#allocation90_spill] sm:$0xff] %v13778_v29  ;;  %v13786_v30 = vadd.f32 %v2485_v60, %v16413_v4  ;;  %v13789_v17 = vadd.f32 %v2638_v36, %v16415_v53  ;;  %v16425_v36 = vld [vmem:[#allocation139_spill] sm:$0xff]  ;;  %v16426_v29 = vld [vmem:[#allocation37_spill] sm:$0xff] }
 0x301   : > { %v13791_v59 = vpop.f32.mrf.mxu0  ;;  %v2640_v47 = vpop.f32.mrf.mxu1 }
 0x302   : > { %16414 = vst [vmem:[#allocation179_spill] sm:$0xff] %v13786_v30  ;;  %16416 = vst [vmem:[#allocation75_spill] sm:$0xff] %v13791_v59  ;;  %v13794_v8 = vadd.f32 %v2640_v47, %v16417_v12  ;;  %v16423_v12 = vld [vmem:[#allocation50_spill] sm:$0xff] }
 0x303   : > { %v2491_v18 = vpop.f32.mrf.mxu0  ;;  %v2644_v20 = vpop.f32.mrf.mxu1  ;;  %9904 = vmatmul.mubr.msk.bf16.gmra.mxu0 %vm637_vm1, %v13783_v2  ;;  %9917 = vmatmul.mubr.msk.bf16.gmra.mxu1 %vm637_vm1, %v13645_v52 }
 0x304   : > { %16418 = vst [vmem:[#allocation180_spill] sm:$0xff] %v13794_v8  ;;  %v13801_v19 = vadd.f32 %v2491_v18, %v16419_v48  ;;  %v13804_v53 = vadd.f32 %v2644_v20, %v16421_v23  ;;  %3399 = vmatprep.mubr.bf16.mxu1 %v15940_v62  ;;  %v16428_v18 = vld [vmem:[#allocation140_spill] sm:$0xff] }
 0x305   : > { %v2493_v0 = vpop.f32.mrf.mxu0  ;;  %v2646_v60 = vpop.f32.mrf.mxu1 }
 0x306   : > { %16420 = vst [vmem:[#allocation92_spill] sm:$0xff] %v13801_v19  ;;  %16422 = vst [vmem:[#allocation181_spill] sm:$0xff] %v13804_v53  ;;  %v13808_v47 = vadd.f32 %v2493_v0, %v16423_v12  ;;  %v13811_v4 = vadd.f32 %v2646_v60, %v16425_v36  ;;  %v16430_v19 = vld [vmem:[#allocation141_spill] sm:$0xff]  ;;  %v16432_v60 = vld [vmem:[#allocation38_spill] sm:$0xff] }
 0x307   : > { %v2495_v30 = vpop.f32.mrf.mxu0  ;;  %v2648_v59 = vpop.f32.mrf.mxu1  ;;  %v16434_v36 = vld [vmem:[#allocation142_spill] sm:$0xff] }
 0x308   : > { %16424 = vst [vmem:[#allocation77_spill] sm:$0xff] %v13808_v47  ;;  %v13814_v52 = vadd.f32 %v2495_v30, %v16426_v29  ;;  %v13817_v48 = vadd.f32 %v2648_v59, %v16428_v18  ;;  %v16436_v18 = vld [vmem:[#allocation54_spill] sm:$0xff] }
 0x309   : > { %v13819_v20 = vpop.f32.mrf.mxu0  ;;  %v2650_v23 = vpop.f32.mrf.mxu1 }
 0x30a   : > { %16427 = vst [vmem:[#allocation182_spill] sm:$0xff] %v13814_v52  ;;  %16429 = vst [vmem:[#allocation94_spill] sm:$0xff] %v13819_v20  ;;  %v13822_v53 = vadd.f32 %v2650_v23, %v16430_v19  ;;  %v16437_v19 = vld [vmem:[#allocation143_spill] sm:$0xff] }
 0x30b   : > { %v2501_v8 = vpop.f32.mrf.mxu0  ;;  %v2654_v0 = vpop.f32.mrf.mxu1  ;;  %9918 = vmatmul.mubr.msk.bf16.gmra.mxu1 %vm637_vm1, %v13683_v7 }
 0x30c   : > { %16431 = vst [vmem:[#allocation183_spill] sm:$0xff] %v13822_v53  ;;  %v13827_v12 = vadd.f32 %v2501_v8, %v16432_v60  ;;  %v13830_v29 = vadd.f32 %v2654_v0, %v16434_v36  ;;  %3409 = vmatprep.mubr.bf16.mxu1 %v15940_v62  ;;  %v16439_v53 = vld [vmem:[#allocation39_spill] sm:$0xff]  ;;  %v16441_v8 = vld [vmem:[#allocation144_spill] sm:$0xff] }
 0x30d   : > { %v2503_v59 = vpop.f32.mrf.mxu0  ;;  %v2656_v30 = vpop.f32.mrf.mxu1 }
 0x30e   : > { %16433 = vst [vmem:[#allocation79_spill] sm:$0xff] %v13827_v12  ;;  %16435 = vst [vmem:[#allocation184_spill] sm:$0xff] %v13830_v29  ;;  %v13834_v52 = vadd.f32 %v2503_v59, %v16436_v18  ;;  %v13837_v23 = vadd.f32 %v2656_v30, %v16437_v19  ;;  %v16445_v59 = vld [vmem:[#allocation41_spill] sm:$0xff]  ;;  %v16447_v18 = vld [vmem:[#allocation146_spill] sm:$0xff] }
 0x30f   : > { %v2505_v20 = vpop.f32.mrf.mxu0  ;;  %v2658_v47 = vpop.f32.mrf.mxu1 }
 0x310   : > { %16438 = vst [vmem:[#allocation96_spill] sm:$0xff] %v13837_v23  ;;  %v13840_v7 = vadd.f32 %v2505_v20, %v16439_v53  ;;  %v13843_v60 = vadd.f32 %v2658_v47, %v16441_v8  ;;  %v16449_v20 = vld [vmem:[#allocation58_spill] sm:$0xff]  ;;  %v16452_v23 = vld [vmem:[#allocation43_spill] sm:$0xff] }
 0x311   : > { %v13845_v0 = vpop.f32.mrf.mxu0  ;;  %v13847_v36 = vpop.f32.mrf.mxu1 }
 0x312   : > { %16440 = vst [vmem:[#allocation185_spill] sm:$0xff] %v13840_v7  ;;  %16442 = vst [vmem:[#allocation81_spill] sm:$0xff] %v13843_v60 }
 0x313   : > { %16443 = vst [vmem:[#allocation186_spill] sm:$0xff] %v13845_v0  ;;  %16444 = vst [vmem:[#allocation98_spill] sm:$0xff] %v13847_v36  ;;  %v2511_v29 = vpop.f32.mrf.mxu0  ;;  %v2664_v12 = vpop.f32.mrf.mxu1  ;;  %9919 = vmatmul.mubr.msk.bf16.gmra.mxu1 %vm637_vm1, %v13717_v45  ;;  %v16450_v0 = vld [vmem:[#allocation147_spill] sm:$0xff] }
 0x314   : > { %v13852_v30 = vadd.f32 %v2511_v29, %v16445_v59  ;;  %v13855_v19 = vadd.f32 %v2664_v12, %v16447_v18  ;;  %3419 = vmatprep.mubr.bf16.mxu1 %v15940_v62  ;;  %v16454_v29 = vld [vmem:[#allocation148_spill] sm:$0xff] }
 0x315   : > { %v2513_v53 = vpop.f32.mrf.mxu0  ;;  %v2666_v47 = vpop.f32.mrf.mxu1 }
 0x316   : > { %16446 = vst [vmem:[#allocation187_spill] sm:$0xff] %v13852_v30  ;;  %16448 = vst [vmem:[#allocation83_spill] sm:$0xff] %v13855_v19  ;;  %v13859_v8 = vadd.f32 %v2513_v53, %v16449_v20  ;;  %v13862_v60 = vadd.f32 %v2666_v47, %v16450_v0  ;;  %v16458_v53 = vld [vmem:[#allocation45_spill] sm:$0xff]  ;;  %v16459_v47 = vld [vmem:[#allocation150_spill] sm:$0xff] }
 0x317   : > { %v2515_v7 = vpop.f32.mrf.mxu0  ;;  %v2668_v36 = vpop.f32.mrf.mxu1 }
 0x318   : > { %16451 = vst [vmem:[#allocation100_spill] sm:$0xff] %v13862_v60  ;;  %v13865_v45 = vadd.f32 %v2515_v7, %v16452_v23  ;;  %v13868_v59 = vadd.f32 %v2668_v36, %v16454_v29  ;;  %v16461_v36 = vld [vmem:[#allocation62_spill] sm:$0xff]  ;;  %v16464_v60 = vld [vmem:[#allocation47_spill] sm:$0xff] }
 0x319   : > { %v13870_v12 = vpop.f32.mrf.mxu0  ;;  %v13872_v18 = vpop.f32.mrf.mxu1 }
 0x31a   : > { %16453 = vst [vmem:[#allocation85_spill] sm:$0xff] %v13865_v45  ;;  %16455 = vst [vmem:[#allocation188_spill] sm:$0xff] %v13868_v59 }
 0x31b   : > { %16456 = vst [vmem:[#allocation102_spill] sm:$0xff] %v13870_v12  ;;  %16457 = vst [vmem:[#allocation189_spill] sm:$0xff] %v13872_v18  ;;  %v2521_v19 = vpop.f32.mrf.mxu0  ;;  %v2674_v30 = vpop.f32.mrf.mxu1  ;;  %9920 = vmatmul.mubr.msk.bf16.gmra.mxu1 %vm637_vm1, %v13750_v13  ;;  %v16463_v12 = vld [vmem:[#allocation151_spill] sm:$0xff] }
 0x31c   : > { %v13877_v0 = vadd.f32 %v2521_v19, %v16458_v53  ;;  %v13880_v20 = vadd.f32 %v2674_v30, %v16459_v47  ;;  %3429 = vmatprep.mubr.bf16.mxu1 %v15940_v62  ;;  %v16466_v19 = vld [vmem:[#allocation152_spill] sm:$0xff] }
 0x31d   : > { %v2523_v23 = vpop.f32.mrf.mxu0  ;;  %v2676_v7 = vpop.f32.mrf.mxu1 }
 0x31e   : > { %16460 = vst [vmem:[#allocation87_spill] sm:$0xff] %v13880_v20  ;;  %v13884_v29 = vadd.f32 %v2523_v23, %v16461_v36  ;;  %v13887_v59 = vadd.f32 %v2676_v7, %v16463_v12  ;;  %v16470_v23 = vld [vmem:[#allocation49_spill] sm:$0xff]  ;;  %v16472_v7 = vld [vmem:[#allocation154_spill] sm:$0xff] }
 0x31f   : > { %v2525_v45 = vpop.f32.mrf.mxu0  ;;  %v2678_v18 = vpop.f32.mrf.mxu1 }
 0x320   : > { %16462 = vst [vmem:[#allocation190_spill] sm:$0xff] %v13884_v29  ;;  %v13890_v13 = vadd.f32 %v2525_v45, %v16464_v60  ;;  %v13893_v53 = vadd.f32 %v2678_v18, %v16466_v19  ;;  %v16476_v29 = vld [vmem:[#allocation66_spill] sm:$0xff] }
 0x321   : > { %v13895_v30 = vpop.f32.mrf.mxu0  ;;  %v13897_v47 = vpop.f32.mrf.mxu1 }
 0x322   : > { %16465 = vst [vmem:[#allocation104_spill] sm:$0xff] %v13890_v13  ;;  %16467 = vst [vmem:[#allocation191_spill] sm:$0xff] %v13893_v53 }
 0x323   : > { %16468 = vst [vmem:[#allocation89_spill] sm:$0xff] %v13895_v30  ;;  %16469 = vst [vmem:[#allocation192_spill] sm:$0xff] %v13897_v47  ;;  %v2531_v62 = vpop.f32.mrf.mxu0  ;;  %v2684_v20 = vpop.f32.mrf.mxu1  ;;  %9921 = vmatmul.mubr.msk.bf16.gmra.mxu1 %vm637_vm1, %v13783_v2  ;;  %v16478_v2 = vld [vmem:[#allocation155_spill] sm:$0xff] }
 0x324   : > { %v13902_v12 = vadd.f32 %v2531_v62, %v16470_v23  ;;  %v13905_v36 = vadd.f32 %v2684_v20, %v16472_v7 }
 0x325   : > { %v2533_v60 = vpop.f32.mrf.mxu0  ;;  %v2686_v45 = vpop.f32.mrf.mxu1 }
 0x326   : > { %16471 = vst [vmem:[#allocation106_spill] sm:$0xff] %v13902_v12  ;;  %16473 = vst [vmem:[#allocation193_spill] sm:$0xff] %v13905_v36  ;;  %v13908_v18 = vadd.f32 %v2533_v60, %v13359_v39  ;;  %v13911_v19 = vadd.f32 %v2686_v45, %v13361_v38  ;;  %v16482_v12 = vld [vmem:[#allocation68_spill] sm:$0xff]  ;;  %v16484_v60 = vld [vmem:[#allocation157_spill] sm:$0xff] }
 0x327   : > { %v2535_v13 = vpop.f32.mrf.mxu0  ;;  %v2688_v30 = vpop.f32.mrf.mxu1 }
 0x328   : > { %16474 = vst [vmem:[#allocation91_spill] sm:$0xff] %v13908_v18  ;;  %16475 = vst [vmem:[#allocation194_spill] sm:$0xff] %v13911_v19  ;;  %v13914_v47 = vadd.f32 %v2535_v13, %v16476_v29  ;;  %v13917_v53 = vadd.f32 %v2688_v30, %v16478_v2  ;;  %v16486_v19 = vld [vmem:[#allocation53_spill] sm:$0xff]  ;;  %v16488_v13 = vld [vmem:[#allocation158_spill] sm:$0xff] }
 0x329   : > { %v13919_v62 = vpop.f32.mrf.mxu0  ;;  %v13921_v20 = vpop.f32.mrf.mxu1 }
 0x32a   : > { %16477 = vst [vmem:[#allocation108_spill] sm:$0xff] %v13914_v47  ;;  %16479 = vst [vmem:[#allocation195_spill] sm:$0xff] %v13917_v53 }
 0x32b   : > { %16480 = vst [vmem:[#allocation93_spill] sm:$0xff] %v13919_v62  ;;  %16481 = vst [vmem:[#allocation196_spill] sm:$0xff] %v13921_v20  ;;  %v2541_v23 = vpop.f32.mrf.mxu0  ;;  %v2694_v7 = vpop.f32.mrf.mxu1  ;;  %v16490_v62 = vld [vmem:[#allocation70_spill] sm:$0xff]  ;;  %v16492_v20 = vld [vmem:[#allocation159_spill] sm:$0xff] }
 0x32c   : > { %v13924_v39 = vadd.f32 %v2541_v23, %v16482_v12  ;;  %v13927_v38 = vadd.f32 %v2694_v7, %v16484_v60 }
 0x32d   : > { %v2543_v45 = vpop.f32.mrf.mxu0  ;;  %v2696_v18 = vpop.f32.mrf.mxu1 }
 0x32e   : > { %16483 = vst [vmem:[#allocation110_spill] sm:$0xff] %v13924_v39  ;;  %16485 = vst [vmem:[#allocation197_spill] sm:$0xff] %v13927_v38  ;;  %v13930_v29 = vadd.f32 %v2543_v45, %v16486_v19  ;;  %v13933_v30 = vadd.f32 %v2696_v18, %v16488_v13  ;;  %v16496_v39 = vld [vmem:[#allocation72_spill] sm:$0xff]  ;;  %v16498_v45 = vld [vmem:[#allocation161_spill] sm:$0xff] }
 0x32f   : > { %v2545_v2 = vpop.f32.mrf.mxu0  ;;  %v2698_v47 = vpop.f32.mrf.mxu1 }
 0x330   : > { %16487 = vst [vmem:[#allocation95_spill] sm:$0xff] %v13930_v29  ;;  %16489 = vst [vmem:[#allocation198_spill] sm:$0xff] %v13933_v30  ;;  %v13936_v53 = vadd.f32 %v2545_v2, %v16490_v62  ;;  %v13939_v36 = vadd.f32 %v2698_v47, %v16492_v20  ;;  %v16499_v30 = vld [vmem:[#allocation57_spill] sm:$0xff]  ;;  %v16501_v2 = vld [vmem:[#allocation162_spill] sm:$0xff] }
 0x331   : > { %v13941_v12 = vpop.f32.mrf.mxu0  ;;  %v13943_v23 = vpop.f32.mrf.mxu1 }
 0x332   : > { %16491 = vst [vmem:[#allocation23_spill] sm:$0xff] %v13936_v53  ;;  %16493 = vst [vmem:[#allocation199_spill] sm:$0xff] %v13939_v36  ;;  %v16505_v36 = vld [vmem:[#allocation163_spill] sm:$0xff] }
 0x333   : > { %16494 = vst [vmem:[#allocation97_spill] sm:$0xff] %v13941_v12  ;;  %16495 = vst [vmem:[#allocation200_spill] sm:$0xff] %v13943_v23  ;;  %v2551_v7 = vpop.f32.mrf.mxu0  ;;  %v2704_v60 = vpop.f32.mrf.mxu1  ;;  %v16503_v12 = vld [vmem:[#allocation74_spill] sm:$0xff] }
 0x334   : > { %v13946_v19 = vadd.f32 %v2551_v7, %v16496_v39  ;;  %v13949_v18 = vadd.f32 %v2704_v60, %v16498_v45 }
 0x335   : > { %v2553_v13 = vpop.f32.mrf.mxu0  ;;  %v2706_v29 = vpop.f32.mrf.mxu1 }
 0x336   : > { %16497 = vst [vmem:[#allocation24_spill] sm:$0xff] %v13946_v19  ;;  %v13952_v62 = vadd.f32 %v2553_v13, %v16499_v30  ;;  %v13955_v47 = vadd.f32 %v2706_v29, %v16501_v2  ;;  %v16509_v19 = vld [vmem:[#allocation76_spill] sm:$0xff]  ;;  %v16511_v13 = vld [vmem:[#allocation165_spill] sm:$0xff] }
 0x337   : > { %v2555_v20 = vpop.f32.mrf.mxu0  ;;  %v2708_v53 = vpop.f32.mrf.mxu1 }
 0x338   : > { %16500 = vst [vmem:[#allocation201_spill] sm:$0xff] %v13952_v62  ;;  %16502 = vst [vmem:[#allocation99_spill] sm:$0xff] %v13955_v47  ;;  %v13958_v23 = vadd.f32 %v2555_v20, %v16503_v12  ;;  %v13961_v38 = vadd.f32 %v2708_v53, %v16505_v36  ;;  %v16513_v20 = vld [vmem:[#allocation61_spill] sm:$0xff] }
 0x339   : > { %v13963_v39 = vpop.f32.mrf.mxu0  ;;  %v13965_v7 = vpop.f32.mrf.mxu1 }
 0x33a   : > { %16504 = vst [vmem:[#allocation202_spill] sm:$0xff] %v13958_v23  ;;  %16506 = vst [vmem:[#allocation25_spill] sm:$0xff] %v13961_v38 }
 0x33b   : > { %16507 = vst [vmem:[#allocation203_spill] sm:$0xff] %v13963_v39  ;;  %16508 = vst [vmem:[#allocation101_spill] sm:$0xff] %v13965_v7  ;;  %v2561_v60 = vpop.f32.mrf.mxu0  ;;  %v2714_v45 = vpop.f32.mrf.mxu1  ;;  %v16514_v39 = vld [vmem:[#allocation166_spill] sm:$0xff] }
 0x33c   : > { %v13968_v30 = vadd.f32 %v2561_v60, %v16509_v19  ;;  %v13971_v29 = vadd.f32 %v2714_v45, %v16511_v13  ;;  %v16516_v7 = vld [vmem:[#allocation78_spill] sm:$0xff] }
 0x33d   : > { %v2563_v2 = vpop.f32.mrf.mxu0  ;;  %v2716_v62 = vpop.f32.mrf.mxu1 }
 0x33e   : > { %16510 = vst [vmem:[#allocation204_spill] sm:$0xff] %v13968_v30  ;;  %v13974_v12 = vadd.f32 %v2563_v2, %v13485_v15  ;;  %v13977_v53 = vadd.f32 %v2716_v62, %v16513_v20  ;;  %v16518_v30 = vld [vmem:[#allocation168_spill] sm:$0xff] }
 0x33f   : > { %v2565_v36 = vpop.f32.mrf.mxu0  ;;  %v2718_v23 = vpop.f32.mrf.mxu1  ;;  %v16520_v2 = vld [vmem:[#allocation80_spill] sm:$0xff] }
 0x340   : > { %16512 = vst [vmem:[#allocation26_spill] sm:$0xff] %v13974_v12  ;;  %v13980_v38 = vadd.f32 %v2565_v36, %v16514_v39  ;;  %v13983_v47 = vadd.f32 %v2718_v23, %v16516_v7 }
 0x341   : > { %v13985_v19 = vpop.f32.mrf.mxu0  ;;  %v13987_v60 = vpop.f32.mrf.mxu1 }
 0x342   : > { %16515 = vst [vmem:[#allocation205_spill] sm:$0xff] %v13980_v38  ;;  %16517 = vst [vmem:[#allocation103_spill] sm:$0xff] %v13985_v19 }
 0x343   : > { %v2571_v45 = vpop.f32.mrf.mxu0  ;;  %v2724_v13 = vpop.f32.mrf.mxu1 }
 0x344   : > { %v13990_v15 = vadd.f32 %v2571_v45, %v16518_v30  ;;  %v13993_v62 = vadd.f32 %v2724_v13, %v16520_v2 }
 0x345   : > { %v2573_v20 = vpop.f32.mrf.mxu0  ;;  %v2726_v12 = vpop.f32.mrf.mxu1 }
 0x346   : > { %16519 = vst [vmem:[#allocation206_spill] sm:$0xff] %v13990_v15  ;;  %v13996_v39 = vadd.f32 %v2573_v20, %v13527_v41  ;;  %v13999_v23 = vadd.f32 %v2726_v12, %v13529_v35 }
 0x347   : > { %v2575_v7 = vpop.f32.mrf.mxu0  ;;  %v2728_v36 = vpop.f32.mrf.mxu1 }
 0x348   : > { %16521 = vst [vmem:[#allocation27_spill] sm:$0xff] %v13996_v39  ;;  %v14002_v38 = vadd.f32 %v2575_v7, %v13537_v25  ;;  %v14005_v19 = vadd.f32 %v2728_v36, %v13539_v31 }
 0x349   : > { %v14007_v30 = vpop.f32.mrf.mxu0  ;;  %v14009_v45 = vpop.f32.mrf.mxu1 }
 0x34a   : > { %16522 = vst [vmem:[#allocation207_spill] sm:$0xff] %v14002_v38  ;;  %16523 = vst [vmem:[#allocation105_spill] sm:$0xff] %v14007_v30 }
 0x34b   : > { %v2734_v13 = vpop.f32.mrf.mxu1  ;;  %v3088_v2 = vpop.f32.mrf.mxu0 }
 0x34c   : > { %v14012_v41 = vadd.f32 %v2734_v13, %v13553_v10  ;;  %v14015_v35 = vadd.f32 %v3088_v2, %v13556_v24 }
 0x34d   : > { %v2736_v12 = vpop.f32.mrf.mxu1  ;;  %v3090_v20 = vpop.f32.mrf.mxu0 }
 0x34e   : > { %16524 = vst [vmem:[#allocation208_spill] sm:$0xff] %v14012_v41  ;;  %v14018_v25 = vadd.f32 %v2736_v12, %v13564_v51  ;;  %v14021_v31 = vadd.f32 %v3090_v20, %v13567_v33 }
 0x34f   : > { %v2738_v7 = vpop.f32.mrf.mxu1  ;;  %v3092_v36 = vpop.f32.mrf.mxu0 }
 0x350   : > { %16525 = vst [vmem:[#allocation28_spill] sm:$0xff] %v14018_v25  ;;  %v14024_v38 = vadd.f32 %v2738_v7, %v13573_v22  ;;  %v14027_v30 = vadd.f32 %v3092_v36, %v13576_v55 }
 0x351   : > { %v14029_v10 = vpop.f32.mrf.mxu1  ;;  %v3094_v24 = vpop.f32.mrf.mxu0 }
 0x352   : > { %16526 = vst [vmem:[#allocation209_spill] sm:$0xff] %v14024_v38  ;;  %16527 = vst [vmem:[#allocation107_spill] sm:$0xff] %v14029_v10 }
 0x353   : > { %v2744_v13 = vpop.f32.mrf.mxu1  ;;  %v3098_v2 = vpop.f32.mrf.mxu0 }
 0x354   : > { %v14032_v39 = vadd.f32 %v2744_v13, %v13591_v37  ;;  %v14035_v51 = vadd.f32 %v3098_v2, %v13594_v9 }
 0x355   : > { %v2746_v33 = vpop.f32.mrf.mxu1  ;;  %v3100_v12 = vpop.f32.mrf.mxu0 }
 0x356   : > { %16528 = vst [vmem:[#allocation29_spill] sm:$0xff] %v14032_v39  ;;  %v14038_v20 = vadd.f32 %v2746_v33, %v13602_v28  ;;  %v14041_v22 = vadd.f32 %v3100_v12, %v13605_v44 }
 0x357   : > { %v2748_v55 = vpop.f32.mrf.mxu1  ;;  %v3102_v7 = vpop.f32.mrf.mxu0 }
 0x358   : > { %16529 = vst [vmem:[#allocation210_spill] sm:$0xff] %v14038_v20  ;;  %v14044_v36 = vadd.f32 %v2748_v55, %v13611_v61  ;;  %v14047_v15 = vadd.f32 %v3102_v7, %v13614_v14  ;;  %v3632_v20 = vld [vmem:[#allocation5] sm:$0x3] }
 0x359   : > { %v14049_v37 = vpop.f32.mrf.mxu1  ;;  %v14051_v9 = vpop.f32.mrf.mxu0 }
 0x35a   : > { %16530 = vst [vmem:[#allocation109_spill] sm:$0xff] %v14044_v36  ;;  %16531 = vst [vmem:[#allocation211_spill] sm:$0xff] %v14049_v37 }
 0x35b   : > { %v2754_v13 = vpop.f32.mrf.mxu1  ;;  %v3108_v2 = vpop.f32.mrf.mxu0 }
 0x35c   : > { %v14054_v28 = vadd.f32 %v2754_v13, %v13629_v46  ;;  %v14057_v44 = vadd.f32 %v3108_v2, %v13632_v56  ;;  %v3634_v56 = vlaneseq }
 0x35d   : > { %v2756_v33 = vpop.f32.mrf.mxu1  ;;  %v14059_v12 = vpop.f32.mrf.mxu0 }
 0x35e   : > { %16532 = vst [vmem:[#allocation30_spill] sm:$0xff] %v14054_v28  ;;  %v14062_v61 = vadd.f32 %v2756_v33, %v13640_v54 }
 0x35f   : > { %v2758_v14 = vpop.f32.mrf.mxu1  ;;  %v3112_v55 = vpop.f32.mrf.mxu0 }
 0x360   : > { %16533 = vst [vmem:[#allocation212_spill] sm:$0xff] %v14062_v61  ;;  %v14065_v7 = vadd.f32 %v2758_v14, %v13649_v42  ;;  %v14068_v36 = vadd.f32 %v3112_v55, %v13652_v49  ;;  %v14084_v14 = vshrl.u32 %v3634_v56, 7 }
 0x361   : > { %v14070_v37 = vpop.f32.mrf.mxu1  ;;  %v14072_v46 = vpop.f32.mrf.mxu0 }
 0x362   : > { %16534 = vst [vmem:[#allocation111_spill] sm:$0xff] %v14065_v7  ;;  %16535 = vst [vmem:[#allocation213_spill] sm:$0xff] %v14070_v37 }
 0x363   : > { %v2764_v13 = vpop.f32.mrf.mxu1  ;;  %v14074_v2 = vpop.f32.mrf.mxu0  ;;  %16538 = vst [vmem:[#allocation113_spill] sm:$0xff] %v14084_v14 }
 0x364   : > { %v14077_v28 = vadd.f32 %v2764_v13, %v13667_v3  ;;  %v15869_v3 = vsub.s32 0, %v14084_v14 }
 0x365   : > { %v2766_v54 = vpop.f32.mrf.mxu1  ;;  %v14079_v33 = vpop.f32.mrf.mxu0 }
 0x366   : > { %16536 = vst [vmem:[#allocation112_spill] sm:$0xff] %v14077_v28  ;;  %v14082_v42 = vadd.f32 %v2766_v54, %v13678_v16 }
 0x367   : > { %v2768_v49 = vpop.f32.mrf.mxu1  ;;  %v14086_v55 = vpop.f32.mrf.mxu0 }
 0x368   : > { %16537 = vst [vmem:[#allocation214_spill] sm:$0xff] %v14082_v42  ;;  %v14089_v7 = vadd.f32 %v2768_v49, %v13687_v11  ;;  %v15870_v42 = vsub.s32 1, %v14084_v14  ;;  %v14105_v49 = vrot.slane %v3632_v20, %v15869_v3 }
 0x369   : > { %v14091_v37 = vpop.f32.mrf.mxu1  ;;  %v14093_v61 = vpop.f32.mrf.mxu0 }
 0x36a   : > { %16539 = vst [vmem:[#allocation215_spill] sm:$0xff] %v14089_v7  ;;  %16540 = vst [vmem:[#allocation114_spill] sm:$0xff] %v14091_v37 }
 0x36b   : > { %v14096_v13 = vpop.f32.mrf.mxu0  ;;  %v3281_v28 = vpop.f32.mrf.mxu1 }
 0x36c   : > { %v3442_v16 = vadd.f32 %v3281_v28, %v13705_v6  ;;  %v14114_v28 = vrot.slane %v3632_v20, %v15870_v42 }
 0x36d   : > { %v14099_v56 = vpop.f32.mrf.mxu0  ;;  %v3283_v54 = vpop.f32.mrf.mxu1 }
 0x36e   : > { %v3568_v11 = vmax.f32 %v14015_v35, %v3442_v16  ;;  %v3443_v7 = vadd.f32 %v3283_v54, %v13715_v57  ;;  %v3445_v57 = vadd.f32 %v3094_v24, %v13583_v50 }
 0x36f   : > { %v14108_v37 = vpop.f32.mrf.mxu0  ;;  %v3285_v39 = vpop.f32.mrf.mxu1 }
 0x370   : > { %v3569_v38 = vmax.f32 %v14021_v31, %v3443_v7  ;;  %v3446_v6 = vadd.f32 %v3285_v39, %v13723_v32  ;;  %v3644_v16 = vadd.f32 %v14105_v49, %v3568_v11 }
 0x371   : > { %v14116_v10 = vpop.f32.mrf.mxu0  ;;  %v3287_v35 = vpop.f32.mrf.mxu1 }
 0x372   : > { %v3570_v3 = vmax.f32 %v14027_v30, %v3446_v6  ;;  %v3447_v54 = vadd.f32 %v3287_v35, %v13728_v63  ;;  %v3645_v20 = vadd.f32 %v14114_v28, %v3569_v38  ;;  %v3708_v11 = vmax.f32 %v3644_v16, 0.0 }
 0x373   : > { %v14122_v25 = vpop.f32.mrf.mxu0  ;;  %v3291_v31 = vpop.f32.mrf.mxu1 }
 0x374   : > { %v3646_v32 = vadd.f32 %v14105_v49, %v3570_v3  ;;  %v3450_v39 = vadd.f32 %v3291_v31, %v13738_v34  ;;  %v3571_v7 = vmax.f32 %v3445_v57, %v3447_v54  ;;  %v3709_v38 = vmax.f32 %v3645_v20, 0.0 }
 0x375   : > { %v14127_v42 = vpop.f32.mrf.mxu0  ;;  %v3293_v14 = vpop.f32.mrf.mxu1 }
 0x376   : > { %v3710_v41 = vmax.f32 %v3646_v32, 0.0  ;;  %v3572_v30 = vmax.f32 %v14035_v51, %v3450_v39  ;;  %v3451_v50 = vadd.f32 %v3293_v14, %v13748_v27  ;;  %v3647_v63 = vadd.f32 %v14114_v28, %v3571_v7 }
 0x377   : > { %v14132_v24 = vpop.f32.mrf.mxu0  ;;  %v3295_v6 = vpop.f32.mrf.mxu1  ;;  %v3453_v51 = vadd.f32 %v14051_v9, %v13621_v40 }
 0x378   : > { %v14134_v3 = vpack.c.bf16 %v3710_v41, %v3708_v11  ;;  %v3573_v34 = vmax.f32 %v14041_v22, %v3451_v50  ;;  %v3454_v35 = vadd.f32 %v3295_v6, %v13756_v26  ;;  %v3711_v54 = vmax.f32 %v3647_v63, 0.0 }
 0x379   : > { %v14138_v57 = vpop.f32.mrf.mxu0  ;;  %v3297_v16 = vpop.f32.mrf.mxu1  ;;  %v3648_v14 = vadd.f32 %v14105_v49, %v3572_v30 }
 0x37a   : > { %16541 = vst [vmem:[#allocation115_spill] sm:$0xff] %v14134_v3  ;;  %v3455_v27 = vadd.f32 %v3297_v16, %v13761_v21  ;;  %v3574_v31 = vmax.f32 %v14047_v15, %v3454_v35  ;;  %v14147_v22 = vpack.c.bf16 %v3711_v54, %v3709_v38  ;;  %v3649_v20 = vadd.f32 %v14114_v28, %v3573_v34 }
 0x37b   : > { %v14145_v41 = vpop.f32.mrf.mxu0  ;;  %v3301_v32 = vpop.f32.mrf.mxu1  ;;  %v3457_v21 = vadd.f32 %v14059_v12, %v13643_v1  ;;  %v3712_v50 = vmax.f32 %v3648_v14, 0.0 }
 0x37c   : > { %16542 = vst [vmem:[#allocation116_spill] sm:$0xff] %v14147_v22  ;;  %v3575_v39 = vmax.f32 %v3453_v51, %v3455_v27  ;;  %v3458_v26 = vadd.f32 %v3301_v32, %v13771_v43  ;;  %v3650_v7 = vadd.f32 %v14105_v49, %v3574_v31  ;;  %v3713_v35 = vmax.f32 %v3649_v20, 0.0  ;;  %v16543_v27 = vld [vmem:[#allocation180_spill] sm:$0xff] }
 0x37d   : > { %v14152_v11 = vpop.f32.mrf.mxu0  ;;  %v3303_v40 = vpop.f32.mrf.mxu1 }
 0x37e   : > { %v3651_v15 = vadd.f32 %v14114_v28, %v3575_v39  ;;  %v3576_v9 = vmax.f32 %v14057_v44, %v3458_v26  ;;  %v3459_v30 = vadd.f32 %v3303_v40, %v13781_v58  ;;  %v3714_v63 = vmax.f32 %v3650_v7, 0.0  ;;  %v16544_v39 = vld [vmem:[#allocation67_spill] sm:$0xff]  ;;  %v16545_v7 = vld [vmem:[#allocation181_spill] sm:$0xff] }
 0x37f   : > { %v14159_v6 = vpop.f32.mrf.mxu0  ;;  %v3305_v43 = vpop.f32.mrf.mxu1  ;;  %v3461_v58 = vadd.f32 %v14072_v46, %v13659_v5  ;;  %v3464_v26 = vadd.f32 %v14074_v2, %v16544_v39  ;;  %v16549_v39 = vld [vmem:[#allocation183_spill] sm:$0xff] }
 0x380   : > { %v3577_v34 = vmax.f32 %v3457_v21, %v3459_v30  ;;  %v3462_v38 = vadd.f32 %v3305_v43, %v13789_v17  ;;  %v14162_v16 = vpack.c.bf16 %v3714_v63, %v3712_v50  ;;  %v3715_v12 = vmax.f32 %v3651_v15, 0.0  ;;  %v16546_v21 = vld [vmem:[#allocation172_spill] sm:$0xff] }
 0x381   : > { %v14164_v54 = vpop.f32.mrf.mxu0  ;;  %v3307_v1 = vpop.f32.mrf.mxu1  ;;  %v3652_v51 = vadd.f32 %v14105_v49, %v3576_v9 }
 0x382   : > { %v3578_v44 = vmax.f32 %v14068_v36, %v3462_v38  ;;  %v3463_v14 = vadd.f32 %v3307_v1, %v16543_v27  ;;  %v14173_v17 = vpack.c.bf16 %v3715_v12, %v3713_v35  ;;  %v3465_v36 = vadd.f32 %v14079_v33, %v16546_v21  ;;  %v16547_v33 = vld [vmem:[#allocation84_spill] sm:$0xff] }
 0x383   : > { %v14171_v31 = vpop.f32.mrf.mxu0  ;;  %v3311_v32 = vpop.f32.mrf.mxu1  ;;  %v3653_v15 = vadd.f32 %v14114_v28, %v3577_v34  ;;  %v3716_v30 = vmax.f32 %v3652_v51, 0.0  ;;  %v3468_v34 = vadd.f32 %v14086_v55, %v16547_v33  ;;  %v16555_v33 = vld [vmem:[#allocation86_spill] sm:$0xff] }
 0x384   : > { %v3654_v20 = vadd.f32 %v14105_v49, %v3578_v44  ;;  %v3466_v40 = vadd.f32 %v3311_v32, %v16545_v7  ;;  %v3579_v5 = vmax.f32 %v3461_v58, %v3463_v14  ;;  %v16548_v32 = vld [vmem:[#allocation69_spill] sm:$0xff] }
 0x385   : > { %v14182_v46 = vpop.f32.mrf.mxu0  ;;  %v3313_v9 = vpop.f32.mrf.mxu1  ;;  %v3717_v44 = vmax.f32 %v3653_v15, 0.0 }
 0x386   : > { %v3718_v50 = vmax.f32 %v3654_v20, 0.0  ;;  %v3580_v63 = vmax.f32 %v3464_v26, %v3466_v40  ;;  %v3467_v43 = vadd.f32 %v3313_v9, %v13811_v4  ;;  %v3655_v2 = vadd.f32 %v14114_v28, %v3579_v5  ;;  %v16550_v20 = vld [vmem:[#allocation174_spill] sm:$0xff]  ;;  %v16551_v9 = vld [vmem:[#allocation79_spill] sm:$0xff] }
 0x387   : > { %v14186_v38 = vpop.f32.mrf.mxu0  ;;  %v3315_v35 = vpop.f32.mrf.mxu1  ;;  %v3469_v4 = vadd.f32 %v14093_v61, %v16548_v32  ;;  %v3472_v7 = vadd.f32 %v14096_v13, %v16550_v20  ;;  %v3473_v13 = vadd.f32 %v14099_v56, %v16555_v33  ;;  %v16559_v20 = vld [vmem:[#allocation175_spill] sm:$0xff] }
 0x388   : > { %v14188_v1 = vpack.c.bf16 %v3718_v50, %v3716_v30  ;;  %v3581_v12 = vmax.f32 %v3465_v36, %v3467_v43  ;;  %v3470_v58 = vadd.f32 %v3315_v35, %v13817_v48  ;;  %v3719_v14 = vmax.f32 %v3655_v2, 0.0  ;;  %v16552_v50 = vld [vmem:[#allocation184_spill] sm:$0xff]  ;;  %v16554_v2 = vld [vmem:[#allocation71_spill] sm:$0xff] }
 0x389   : > { %v14193_v27 = vpop.f32.mrf.mxu0  ;;  %v3317_v51 = vpop.f32.mrf.mxu1  ;;  %v3656_v40 = vadd.f32 %v14105_v49, %v3580_v63  ;;  %v16553_v43 = vld [vmem:[#allocation40_spill] sm:$0xff] }
 0x38a   : > { %v3471_v26 = vadd.f32 %v3317_v51, %v16549_v39  ;;  %v3582_v21 = vmax.f32 %v3468_v34, %v3470_v58  ;;  %v14201_v15 = vpack.c.bf16 %v3719_v14, %v3717_v44  ;;  %v3657_v48 = vadd.f32 %v14114_v28, %v3581_v12  ;;  %v16556_v14 = vld [vmem:[#allocation96_spill] sm:$0xff]  ;;  %v16558_v39 = vld [vmem:[#allocation98_spill] sm:$0xff] }
 0x38b   : > { %v3168_v36 = vpop.f32.mrf.mxu0  ;;  %v3321_v55 = vpop.f32.mrf.mxu1  ;;  %v2810_v35 = vadd.f32 %v16554_v2, %v16553_v43  ;;  %v16560_v2 = vld [vmem:[#allocation185_spill] sm:$0xff] }
 0x38c   : > { %v3583_v5 = vmax.f32 %v3469_v4, %v3471_v26  ;;  %v14205_v30 = vadd.f32 %v3168_v36, %v16551_v9  ;;  %v3474_v61 = vadd.f32 %v3321_v55, %v16552_v50  ;;  %v3658_v63 = vadd.f32 %v14105_v49, %v3582_v21  ;;  %v16557_v4 = vld [vmem:[#allocation145_spill] sm:$0xff] }
 0x38d   : > { %v3170_v34 = vpop.f32.mrf.mxu0  ;;  %v3323_v58 = vpop.f32.mrf.mxu1  ;;  %v2812_v26 = vadd.f32 %v16558_v39, %v16557_v4  ;;  %v3476_v36 = vadd.f32 %v14108_v37, %v16559_v20  ;;  %v3720_v55 = vmax.f32 %v3656_v40, 0.0  ;;  %v3721_v50 = vmax.f32 %v3657_v48, 0.0  ;;  %v10771_v37 = vld [vmem:[#allocation10 + $0x4] ss:$8 sps:$4 sm:$0xff]  }
 0x38e   : > { %v3659_v44 = vadd.f32 %v14114_v28, %v3583_v5  ;;  %v3584_v51 = vmax.f32 %v3472_v7, %v3474_v61  ;;  %v14215_v12 = vadd.f32 %v3170_v34, %v13834_v52  ;;  %v3475_v32 = vadd.f32 %v3323_v58, %v16556_v14  ;;  %v16561_v7 = vld [vmem:[#allocation81_spill] sm:$0xff]  ;;  %9941 = vmatprep.mubr.msk.bf16.mxu0 %vm3899_vm2, %v10771_v37  ;;  %v16562_v20 = vld [vmem:[#allocation176_spill] sm:$0xff] }
 0x38f   : > { %v3722_v56 = vmax.f32 %v3658_v63, 0.0  ;;  %v3172_v9 = vpop.f32.mrf.mxu0  ;;  %v3325_v21 = vpop.f32.mrf.mxu1  ;;  %v10774_v63 = vld [vmem:[#allocation10 + $0x8c] ss:$8 sps:$4 sm:$0xff]   ;;  %v3477_v48 = vadd.f32 %v14116_v10, %v2810_v35  ;;  %v16565_v10 = vld [vmem:[#allocation88_spill] sm:$0xff] }
 0x390   : > { %v3585_v43 = vmax.f32 %v3473_v13, %v3475_v32  ;;  %v14223_v5 = vadd.f32 %v3172_v9, %v16560_v2  ;;  %v3478_v52 = vadd.f32 %v3325_v21, %v16561_v7  ;;  %v3660_v33 = vadd.f32 %v14105_v49, %v3584_v51  ;;  %v16564_v9 = vld [vmem:[#allocation83_spill] sm:$0xff]  ;;  %9969 = vmatprep.mubr.msk.bf16.mxu1 %vm3899_vm2, %v10774_v63 }
 0x391   : > { %v14226_v61 = vpack.c.bf16 %v3722_v56, %v3720_v55  ;;  %v14229_v34 = vpop.f32.mrf.mxu0  ;;  %v3327_v58 = vpop.f32.mrf.mxu1  ;;  %v3723_v14 = vmax.f32 %v3659_v44, 0.0  ;;  %v3480_v51 = vadd.f32 %v14122_v25, %v16562_v20  ;;  %v16563_v56 = vld [vmem:[#allocation187_spill] sm:$0xff]  ;;  %v3481_v35 = vadd.f32 %v14127_v42, %v16565_v10  ;;  %v16573_v10 = vld [vmem:[#allocation188_spill] sm:$0xff] }
 0x392   : > { %v3586_v40 = vmax.f32 %v3476_v36, %v3478_v52  ;;  %v3479_v13 = vadd.f32 %v3327_v58, %v2812_v26  ;;  %v3724_v26 = vmax.f32 %v3660_v33, 0.0  ;;  %v3661_v21 = vadd.f32 %v14114_v28, %v3585_v43  ;;  %v16569_v33 = vld [vmem:[#allocation149_spill] sm:$0xff] }
 0x393   : > { %v3178_v32 = vpop.f32.mrf.mxu0  ;;  %v3331_v4 = vpop.f32.mrf.mxu1  ;;  %v14232_v39 = vpack.c.bf16 %v3723_v14, %v3721_v50  ;;  %v16566_v14 = vld [vmem:[#allocation100_spill] sm:$0xff] }
 0x394   : > { %v3662_v55 = vadd.f32 %v14105_v49, %v3586_v40  ;;  %v14239_v44 = vadd.f32 %v3178_v32, %v16563_v56  ;;  %v3482_v36 = vadd.f32 %v3331_v4, %v16564_v9  ;;  %v3587_v50 = vmax.f32 %v3477_v48, %v3479_v13  ;;  %v16567_v40 = vld [vmem:[#allocation44_spill] sm:$0xff]  ;;  %v16568_v32 = vld [vmem:[#allocation73_spill] sm:$0xff] }
 0x395   : > { %v3180_v2 = vpop.f32.mrf.mxu0  ;;  %v3333_v7 = vpop.f32.mrf.mxu1  ;;  %v2818_v4 = vadd.f32 %v16568_v32, %v16567_v40  ;;  %v16570_v56 = vld [vmem:[#allocation189_spill] sm:$0xff] }
 0x396   : > { %v3726_v52 = vmax.f32 %v3662_v55, 0.0  ;;  %v3588_v25 = vmax.f32 %v3480_v51, %v3482_v36  ;;  %v14247_v58 = vadd.f32 %v3180_v2, %v13859_v8  ;;  %v3483_v37 = vadd.f32 %v3333_v7, %v16566_v14  ;;  %v16571_v55 = vld [vmem:[#allocation85_spill] sm:$0xff] }
 0x397   : > { %v3663_v63 = vadd.f32 %v14114_v28, %v3587_v50  ;;  %v3182_v20 = vpop.f32.mrf.mxu0  ;;  %v3335_v42 = vpop.f32.mrf.mxu1  ;;  %v2820_v43 = vadd.f32 %v16570_v56, %v16569_v33  ;;  %v16572_v8 = vld [vmem:[#allocation177_spill] sm:$0xff]  ;;  %v3725_v36 = vmax.f32 %v3661_v21, 0.0  ;;  %v3485_v40 = vadd.f32 %v14138_v57, %v2818_v4  ;;  %v16574_v33 = vld [vmem:[#allocation178_spill] sm:$0xff]  ;;  %v16575_v56 = vld [vmem:[#allocation87_spill] sm:$0xff] }
 0x398   : > { %v14255_v48 = vpack.c.bf16 %v3726_v52, %v3724_v26  ;;  %v3589_v13 = vmax.f32 %v3481_v35, %v3483_v37  ;;  %v14258_v51 = vadd.f32 %v3182_v20, %v16571_v55  ;;  %v3484_v9 = vadd.f32 %v14132_v24, %v16572_v8 }
 0x399   : > { %v3486_v2 = vadd.f32 %v3335_v42, %v16573_v10  ;;  %v14263_v7 = vpop.f32.mrf.mxu0  ;;  %v3337_v50 = vpop.f32.mrf.mxu1  ;;  %v3727_v14 = vmax.f32 %v3663_v63, 0.0  ;;  %v3664_v26 = vadd.f32 %v14105_v49, %v3588_v25  ;;  %v3488_v24 = vadd.f32 %v14145_v41, %v16574_v33 }
 0x39a   : > { %v3487_v32 = vadd.f32 %v3337_v50, %v2820_v43  ;;  %v3665_v63 = vadd.f32 %v14114_v28, %v3589_v13  ;;  %v16576_v43 = vld [vmem:[#allocation90_spill] sm:$0xff]  ;;  %v16578_v13 = vld [vmem:[#allocation75_spill] sm:$0xff] }
 0x39b   : > { %v3590_v52 = vmax.f32 %v3484_v9, %v3486_v2  ;;  %v3188_v35 = vpop.f32.mrf.mxu0  ;;  %v3341_v37 = vpop.f32.mrf.mxu1  ;;  %v14267_v20 = vpack.c.bf16 %v3727_v14, %v3725_v36  ;;  %v3489_v8 = vadd.f32 %v14152_v11, %v16576_v43  ;;  %v3728_v10 = vmax.f32 %v3664_v26, 0.0  ;;  %v16577_v14 = vld [vmem:[#allocation48_spill] sm:$0xff]  ;;  %v16581_v11 = vld [vmem:[#allocation153_spill] sm:$0xff] }
 0x39c   : > { %v3591_v21 = vmax.f32 %v3485_v40, %v3487_v32  ;;  %v14272_v42 = vadd.f32 %v3188_v35, %v13877_v0  ;;  %v3490_v55 = vadd.f32 %v3341_v37, %v16575_v56  ;;  %v2826_v40 = vadd.f32 %v16578_v13, %v16577_v14  ;;  %v16579_v32 = vld [vmem:[#allocation179_spill] sm:$0xff]  ;;  %v16582_v56 = vld [vmem:[#allocation192_spill] sm:$0xff] }
 0x39d   : > { %v3666_v57 = vadd.f32 %v14105_v49, %v3590_v52  ;;  %v14277_v4 = vpop.f32.mrf.mxu0  ;;  %v3343_v25 = vpop.f32.mrf.mxu1  ;;  %v3492_v52 = vadd.f32 %v14159_v6, %v16579_v32  ;;  %v16580_v37 = vld [vmem:[#allocation191_spill] sm:$0xff] }
 0x39e   : > { %v3667_v9 = vadd.f32 %v14114_v28, %v3591_v21  ;;  %v3592_v36 = vmax.f32 %v3488_v24, %v3490_v55  ;;  %v3491_v41 = vadd.f32 %v3343_v25, %v13887_v59  ;;  %v2828_v21 = vadd.f32 %v16582_v56, %v16581_v11 }
 0x39f   : > { %v3730_v0 = vmax.f32 %v3666_v57, 0.0  ;;  %v14283_v2 = vpop.f32.mrf.mxu0  ;;  %v3345_v50 = vpop.f32.mrf.mxu1  ;;  %v3729_v24 = vmax.f32 %v3665_v63, 0.0  ;;  %v3493_v14 = vadd.f32 %v14164_v54, %v2826_v40 }
 0x3a0   : > { %v3593_v35 = vmax.f32 %v3489_v8, %v3491_v41  ;;  %v3494_v33 = vadd.f32 %v3345_v50, %v16580_v37  ;;  %v3731_v57 = vmax.f32 %v3667_v9, 0.0  ;;  %v3668_v25 = vadd.f32 %v14105_v49, %v3592_v36  ;;  %v16583_v50 = vld [vmem:[#allocation92_spill] sm:$0xff]  ;;  %v16585_v37 = vld [vmem:[#allocation77_spill] sm:$0xff] }
 0x3a1   : > { %v14292_v55 = vpack.c.bf16 %v3730_v0, %v3728_v10  ;;  %v14294_v59 = vpop.f32.mrf.mxu0  ;;  %v3347_v26 = vpop.f32.mrf.mxu1  ;;  %v3496_v63 = vadd.f32 %v14171_v31, %v16583_v50  ;;  %v16584_v0 = vld [vmem:[#allocation193_spill] sm:$0xff]  ;;  %v3497_v9 = vadd.f32 %v14182_v46, %v16585_v37  ;;  %v16589_v46 = vld [vmem:[#allocation156_spill] sm:$0xff]  ;;  %v16591_v37 = vld [vmem:[#allocation182_spill] sm:$0xff] }
 0x3a2   : > { %v3594_v43 = vmax.f32 %v3492_v52, %v3494_v33  ;;  %v3495_v13 = vadd.f32 %v3347_v26, %v2828_v21  ;;  %v14300_v41 = vpack.c.bf16 %v3731_v57, %v3729_v24  ;;  %v3669_v36 = vadd.f32 %v14114_v28, %v3593_v35  ;;  %v16586_v21 = vld [vmem:[#allocation194_spill] sm:$0xff] }
 0x3a3   : > { %v14298_v6 = vpop.f32.mrf.mxu0  ;;  %v3351_v8 = vpop.f32.mrf.mxu1  ;;  %v3732_v33 = vmax.f32 %v3668_v25, 0.0  ;;  %v3500_v25 = vadd.f32 %v14186_v38, %v16591_v37 }
 0x3a4   : > { %v3670_v10 = vadd.f32 %v14105_v49, %v3594_v43  ;;  %v3498_v32 = vadd.f32 %v3351_v8, %v16584_v0  ;;  %v3595_v52 = vmax.f32 %v3493_v14, %v3495_v13  ;;  %v16587_v43 = vld [vmem:[#allocation52_spill] sm:$0xff]  ;;  %v16588_v8 = vld [vmem:[#allocation94_spill] sm:$0xff] }
 0x3a5   : > { %v14309_v54 = vpop.f32.mrf.mxu0  ;;  %v3353_v40 = vpop.f32.mrf.mxu1  ;;  %v2834_v50 = vadd.f32 %v16588_v8, %v16587_v43  ;;  %v16590_v0 = vld [vmem:[#allocation196_spill] sm:$0xff] }
 0x3a6   : > { %v3734_v11 = vmax.f32 %v3670_v10, 0.0  ;;  %v3596_v56 = vmax.f32 %v3496_v63, %v3498_v32  ;;  %v3499_v24 = vadd.f32 %v3353_v40, %v16586_v21  ;;  %v3671_v31 = vadd.f32 %v14114_v28, %v3595_v52  ;;  %v16592_v10 = vld [vmem:[#allocation195_spill] sm:$0xff] }
 0x3a7   : > { %v14313_v26 = vpop.f32.mrf.mxu0  ;;  %v3355_v57 = vpop.f32.mrf.mxu1  ;;  %v2836_v35 = vadd.f32 %v16590_v0, %v16589_v46  ;;  %v3733_v63 = vmax.f32 %v3669_v36, 0.0  ;;  %v3501_v3 = vadd.f32 %v14193_v27, %v2834_v50  ;;  %v16594_v50 = vld [vmem:[#allocation198_spill] sm:$0xff] }
 0x3a8   : > { %v14319_v14 = vpack.c.bf16 %v3734_v11, %v3732_v33  ;;  %v3597_v13 = vmax.f32 %v3497_v9, %v3499_v24  ;;  %v3502_v32 = vadd.f32 %v3355_v57, %v16592_v10  ;;  %v3735_v21 = vmax.f32 %v3671_v31, 0.0  ;;  %v16593_v24 = vld [vmem:[#allocation197_spill] sm:$0xff] }
 0x3a9   : > { %v14324_v40 = vpop.f32.mrf.mxu0  ;;  %v3357_v52 = vpop.f32.mrf.mxu1  ;;  %v3672_v43 = vadd.f32 %v14105_v49, %v3596_v56 }
 0x3aa   : > { %v3503_v22 = vadd.f32 %v3357_v52, %v2836_v35  ;;  %v3598_v8 = vmax.f32 %v3500_v25, %v3502_v32  ;;  %v3785_v9 = vpack.c.bf16 %v3735_v21, %v3733_v63  ;;  %v3673_v36 = vadd.f32 %v14114_v28, %v3597_v13  ;;  %v16595_v63 = vld [vmem:[#allocation56_spill] sm:$0xff]  ;;  %v16597_v13 = vld [vmem:[#allocation199_spill] sm:$0xff] }
 0x3ab   : > { %v14328_v46 = vpop.f32.mrf.mxu0  ;;  %v3361_v33 = vpop.f32.mrf.mxu1  ;;  %v3736_v56 = vmax.f32 %v3672_v43, 0.0  ;;  %v16598_v21 = vld [vmem:[#allocation160_spill] sm:$0xff] }
 0x3ac   : > { %v3599_v11 = vmax.f32 %v3501_v3, %v3503_v22  ;;  %v3506_v38 = vadd.f32 %v3361_v33, %v16593_v24  ;;  %v3674_v57 = vadd.f32 %v14105_v49, %v3598_v8  ;;  %v16596_v3 = vld [vmem:[#allocation186_spill] sm:$0xff]  ;;  %v16599_v8 = vld [vmem:[#allocation200_spill] sm:$0xff] }
 0x3ad   : > { %v3363_v0 = vpop.f32.mrf.mxu1  ;;  %v14336_v25 = vpop.f32.mrf.mxu0  ;;  %v2842_v22 = vadd.f32 %v16596_v3, %v16595_v63  ;;  %v2844_v33 = vadd.f32 %v16599_v8, %v16598_v21  ;;  %v16602_v21 = vld [vmem:[#allocation102_spill] sm:$0xff] }
 0x3ae   : > { %v3675_v31 = vadd.f32 %v14114_v28, %v3599_v11  ;;  %v3600_v27 = vmax.f32 %v14205_v30, %v3506_v38  ;;  %v3507_v35 = vadd.f32 %v3363_v0, %v16594_v50  ;;  %v3738_v37 = vmax.f32 %v3674_v57, 0.0 }
 0x3af   : > { %v3365_v10 = vpop.f32.mrf.mxu1  ;;  %v3737_v11 = vmax.f32 %v3673_v36, 0.0  ;;  %v3509_v0 = vadd.f32 %v14229_v34, %v2842_v22  ;;  %v14347_v50 = vpop.f32.mrf.mxu0  ;;  %v16600_v34 = vld [vmem:[#allocation99_spill] sm:$0xff] }
 0x3b0   : > { %v3601_v32 = vmax.f32 %v14215_v12, %v3507_v35  ;;  %v3510_v52 = vadd.f32 %v3365_v10, %v16597_v13  ;;  %v3786_v24 = vpack.c.bf16 %v3738_v37, %v3736_v56  ;;  %v3739_v38 = vmax.f32 %v3675_v31, 0.0 }
 0x3b1   : > { %v3367_v30 = vpop.f32.mrf.mxu1  ;;  %v3676_v43 = vadd.f32 %v14105_v49, %v3600_v27  ;;  %v14354_v13 = vpop.f32.mrf.mxu0 }
 0x3b2   : > { %v3602_v57 = vmax.f32 %v14223_v5, %v3510_v52  ;;  %v3511_v63 = vadd.f32 %v3367_v30, %v2844_v33  ;;  %v3787_v12 = vpack.c.bf16 %v3739_v38, %v3737_v11  ;;  %v3677_v36 = vadd.f32 %v14114_v28, %v3601_v32  ;;  %v16601_v32 = vld [vmem:[#allocation60_spill] sm:$0xff]  ;;  %v16604_v11 = vld [vmem:[#allocation101_spill] sm:$0xff] }
 0x3b3   : > { %v3371_v3 = vpop.f32.mrf.mxu1  ;;  %v3740_v27 = vmax.f32 %v3676_v43, 0.0  ;;  %v2850_v8 = vadd.f32 %v16602_v21, %v16601_v32  ;;  %v16603_v33 = vld [vmem:[#allocation164_spill] sm:$0xff]  ;;  %v16608_v21 = vld [vmem:[#allocation89_spill] sm:$0xff] }
 0x3b4   : > { %v3678_v35 = vadd.f32 %v14105_v49, %v3602_v57  ;;  %v3514_v10 = vadd.f32 %v3371_v3, %v13949_v18  ;;  %v3603_v56 = vmax.f32 %v3509_v0, %v3511_v63  ;;  %3933 = vmatprep.subr.bf16.mxu0 %v3787_v12  ;;  %4177 = vmatprep.subr.bf16.mxu1 %v3787_v12  ;;  %v3741_v43 = vmax.f32 %v3677_v36, 0.0  ;;  %v16605_v57 = vld [vmem:[#allocation25_spill] sm:$0xff]  ;;  %v16607_v32 = vld [vmem:[#allocation64_spill] sm:$0xff] }
 0x3b5   : > { %v3373_v31 = vpop.f32.mrf.mxu1  ;;  %3934 = vmatpush1.bf16.msra.mxu0 %v3786_v24  ;;  %4178 = vmatpush1.bf16.msra.mxu1 %v3786_v24  ;;  %v2852_v30 = vadd.f32 %v16604_v11, %v16603_v33  ;;  %v3517_v3 = vadd.f32 %v14263_v7, %v2850_v8  ;;  %v16609_v8 = vld [vmem:[#allocation104_spill] sm:$0xff]  ;;  %v16610_v11 = vld [vmem:[#allocation63_spill] sm:$0xff] }
 0x3b6   : > { %v3742_v37 = vmax.f32 %v3678_v35, 0.0  ;;  %v3604_v5 = vmax.f32 %v14239_v44, %v3514_v10  ;;  %v3515_v22 = vadd.f32 %v3373_v31, %v16600_v34  ;;  %v3679_v52 = vadd.f32 %v14114_v28, %v3603_v56  ;;  %3935 = vmatprep.subr.bf16.mxu0 %v3785_v9  ;;  %4179 = vmatprep.subr.bf16.mxu1 %v3785_v9  ;;  %v14368_v9 = vpop.f32.mrf.mxu0 }
 0x3b7   : > { %v3375_v18 = vpop.f32.mrf.mxu1  ;;  %v3524_v33 = vadd.f32 %v14283_v2, %v16609_v8 }
 0x3b8   : > { %v14361_v38 = vpack.c.bf16 %v3742_v37, %v3740_v27  ;;  %v3605_v44 = vmax.f32 %v14247_v58, %v3515_v22  ;;  %v3518_v24 = vadd.f32 %v3375_v18, %v16605_v57  ;;  %v3743_v63 = vmax.f32 %v3679_v52, 0.0  ;;  %v16606_v37 = vld [vmem:[#allocation190_spill] sm:$0xff]  ;;  %v14385_v52 = vpop.f32.mrf.mxu0 }
 0x3b9   : > { %v3377_v0 = vpop.f32.mrf.mxu1  ;;  %3936 = vmatpush1.bf16.msra.mxu0 %v14319_v14  ;;  %4180 = vmatpush1.bf16.msra.mxu1 %v14319_v14  ;;  %v3680_v35 = vadd.f32 %v14105_v49, %v3604_v5  ;;  %v3521_v5 = vadd.f32 %v14277_v4, %v16606_v37  ;;  %v2858_v4 = vadd.f32 %v16608_v21, %v16607_v32 }
 0x3ba   : > { %v3519_v12 = vadd.f32 %v3377_v0, %v2852_v30  ;;  %v3606_v10 = vmax.f32 %v14258_v51, %v3518_v24  ;;  %3937 = vmatprep.subr.bf16.mxu0 %v14300_v41  ;;  %4181 = vmatprep.subr.bf16.mxu1 %v14300_v41  ;;  %v14374_v36 = vpack.c.bf16 %v3743_v63, %v3741_v43  ;;  %v14402_v63 = vpop.f32.mrf.mxu0 }
 0x3bb   : > { %v3381_v58 = vpop.f32.mrf.mxu1  ;;  %v3681_v31 = vadd.f32 %v14114_v28, %v3605_v44  ;;  %v3744_v22 = vmax.f32 %v3680_v35, 0.0  ;;  %v2860_v30 = vadd.f32 %v13987_v60, %v16610_v11  ;;  %v3525_v2 = vadd.f32 %v14294_v59, %v2858_v4  ;;  %v16612_v59 = vld [vmem:[#allocation91_spill] sm:$0xff] }
 0x3bc   : > { %v3607_v56 = vmax.f32 %v3517_v3, %v3519_v12  ;;  %v3522_v7 = vadd.f32 %v3381_v58, %v13971_v29  ;;  %v3682_v14 = vadd.f32 %v14105_v49, %v3606_v10  ;;  %v16611_v3 = vld [vmem:[#allocation106_spill] sm:$0xff]  ;;  %v3529_v58 = vadd.f32 %v14309_v54, %v16612_v59  ;;  %v16613_v54 = vld [vmem:[#allocation51_spill] sm:$0xff] }
 0x3bd   : > { %v3383_v27 = vpop.f32.mrf.mxu1  ;;  %3938 = vmatpush1.bf16.msra.mxu0 %v14292_v55  ;;  %4182 = vmatpush1.bf16.msra.mxu1 %v14292_v55  ;;  %v3745_v44 = vmax.f32 %v3681_v31, 0.0  ;;  %v3528_v12 = vadd.f32 %v14298_v6, %v16611_v3  ;;  %v14418_v6 = vpop.f32.mrf.mxu0 }
 0x3be   : > { %v3683_v51 = vadd.f32 %v14114_v28, %v3607_v56  ;;  %v3608_v34 = vmax.f32 %v14272_v42, %v3522_v7  ;;  %v3523_v41 = vadd.f32 %v3383_v27, %v13977_v53  ;;  %v3746_v29 = vmax.f32 %v3682_v14, 0.0  ;;  %3939 = vmatprep.subr.bf16.mxu0 %v14267_v20  ;;  %4183 = vmatprep.subr.bf16.mxu1 %v14267_v20 }
 0x3bf   : > { %v3385_v18 = vpop.f32.mrf.mxu1 }
 0x3c0   : > { %v3609_v42 = vmax.f32 %v3521_v5, %v3523_v41  ;;  %v3526_v53 = vadd.f32 %v3385_v18, %v13983_v47  ;;  %v14397_v43 = vpack.c.bf16 %v3746_v29, %v3744_v22  ;;  %v3747_v57 = vmax.f32 %v3683_v51, 0.0  ;;  %v16614_v5 = vld [vmem:[#allocation93_spill] sm:$0xff]  ;;  %v16616_v29 = vld [vmem:[#allocation108_spill] sm:$0xff] }
 0x3c1   : > { %v3387_v55 = vpop.f32.mrf.mxu1  ;;  %v3684_v24 = vadd.f32 %v14105_v49, %v3608_v34  ;;  %3940 = vmatpush1.bf16.msra.mxu0 %v14255_v48  ;;  %4184 = vmatpush1.bf16.msra.mxu1 %v14255_v48  ;;  %v2866_v51 = vadd.f32 %v16614_v5, %v16613_v54  ;;  %v16615_v34 = vld [vmem:[#allocation65_spill] sm:$0xff]  ;;  %v3532_v18 = vadd.f32 %v14313_v26, %v16616_v29  ;;  %v16628_v29 = vld [vmem:[#allocation115_spill] sm:$0xff] }
 0x3c2   : > { %v3610_v0 = vmax.f32 %v3524_v33, %v3526_v53  ;;  %v3527_v20 = vadd.f32 %v3387_v55, %v2860_v30  ;;  %3941 = vmatprep.subr.bf16.mxu0 %v14232_v39  ;;  %v14406_v60 = vpack.c.bf16 %v3747_v57, %v3745_v44  ;;  %4185 = vmatprep.subr.bf16.mxu1 %v14232_v39 }
 0x3c3   : > { %v3391_v47 = vpop.f32.mrf.mxu1  ;;  %v3685_v56 = vadd.f32 %v14114_v28, %v3609_v42  ;;  %v3748_v31 = vmax.f32 %v3684_v24, 0.0  ;;  %v2868_v41 = vadd.f32 %v14009_v45, %v16615_v34  ;;  %v3533_v8 = vadd.f32 %v14324_v40, %v2866_v51  ;;  %v14435_v42 = vpop.f32.mrf.mxu0  ;;  %v16618_v40 = vld [vmem:[#allocation208_spill] sm:$0xff] }
 0x3c4   : > { %v3686_v35 = vadd.f32 %v14105_v49, %v3610_v0  ;;  %v3530_v10 = vadd.f32 %v3391_v47, %v13993_v62  ;;  %v3611_v48 = vmax.f32 %v3525_v2, %v3527_v20  ;;  %v16619_v0 = vld [vmem:[#allocation95_spill] sm:$0xff]  ;;  %v16620_v47 = vld [vmem:[#allocation28_spill] sm:$0xff] }
 0x3c5   : > { %v3393_v7 = vpop.f32.mrf.mxu1  ;;  %3942 = vmatpush1.bf16.msra.mxu0 %v14226_v61  ;;  %4186 = vmatpush1.bf16.msra.mxu1 %v14226_v61  ;;  %v3749_v32 = vmax.f32 %v3685_v56, 0.0 }
 0x3c6   : > { %v3750_v14 = vmax.f32 %v3686_v35, 0.0  ;;  %v3612_v27 = vmax.f32 %v3528_v12, %v3530_v10  ;;  %v3531_v37 = vadd.f32 %v3393_v7, %v13999_v23  ;;  %v3687_v39 = vadd.f32 %v14114_v28, %v3611_v48  ;;  %3943 = vmatprep.subr.bf16.mxu0 %v14201_v15  ;;  %4187 = vmatprep.subr.bf16.mxu1 %v14201_v15  ;;  %v16622_v12 = vld [vmem:[#allocation97_spill] sm:$0xff]  ;;  %v16623_v35 = vld [vmem:[#allocation170_spill] sm:$0xff]  ;;  %v16624_v10 = vld [vmem:[#allocation107_spill] sm:$0xff] }
 0x3c7   : > { %v3395_v62 = vpop.f32.mrf.mxu1  ;;  %v2876_v59 = vadd.f32 %v16624_v10, %v16623_v35  ;;  %v16625_v7 = vld [vmem:[#allocation116_spill] sm:$0xff]  ;;  %v16638_v35 = vld [vmem:[#allocation109_spill] sm:$0xff] }
 0x3c8   : > { %v14427_v22 = vpack.c.bf16 %v3750_v14, %v3748_v31  ;;  %v3613_v23 = vmax.f32 %v3529_v58, %v3531_v37  ;;  %v3534_v61 = vadd.f32 %v3395_v62, %v14005_v19  ;;  %v3751_v4 = vmax.f32 %v3687_v39, 0.0  ;;  %v16617_v19 = vld [vmem:[#allocation110_spill] sm:$0xff]  ;;  %v3230_v58 = vpop.f32.mrf.mxu0  ;;  %v16626_v31 = vld [vmem:[#allocation23_spill] sm:$0xff]  ;;  %v16627_v37 = vld [vmem:[#allocation209_spill] sm:$0xff] }
 0x3c9   : > { %v3397_v21 = vpop.f32.mrf.mxu1  ;;  %3944 = vmatpush1.bf16.msra.mxu0 %v14188_v1  ;;  %v3688_v45 = vadd.f32 %v14105_v49, %v3612_v27  ;;  %4188 = vmatpush1.bf16.msra.mxu1 %v14188_v1  ;;  %v3536_v11 = vadd.f32 %v14328_v46, %v16617_v19  ;;  %v3537_v1 = vadd.f32 %v14336_v25, %v16619_v0  ;;  %v16621_v46 = vld [vmem:[#allocation55_spill] sm:$0xff] }
 0x3ca   : > { %v3535_v33 = vadd.f32 %v3397_v21, %v2868_v41  ;;  %v3614_v53 = vmax.f32 %v3532_v18, %v3534_v61  ;;  %3945 = vmatprep.subr.bf16.mxu0 %v14173_v17  ;;  %v14440_v26 = vpack.c.bf16 %v3751_v4, %v3749_v32  ;;  %4189 = vmatprep.subr.bf16.mxu1 %v14173_v17  ;;  %v3232_v18 = vpop.f32.mrf.mxu0  ;;  %v16629_v61 = vld [vmem:[#allocation24_spill] sm:$0xff] }
 0x3cb   : > { %v3401_v15 = vpop.f32.mrf.mxu1  ;;  %v3689_v55 = vadd.f32 %v14114_v28, %v3613_v23  ;;  %v2874_v17 = vadd.f32 %v16622_v12, %v16621_v46  ;;  %v3752_v56 = vmax.f32 %v3688_v45, 0.0  ;;  %v3540_v14 = vadd.f32 %v14347_v50, %v16626_v31  ;;  %v16637_v46 = vld [vmem:[#allocation202_spill] sm:$0xff] }
 0x3cc   : > { %v3615_v30 = vmax.f32 %v3533_v8, %v3535_v33  ;;  %v3538_v44 = vadd.f32 %v3401_v15, %v16618_v40  ;;  %v3690_v57 = vadd.f32 %v14105_v49, %v3614_v53  ;;  %v3544_v21 = vadd.f32 %v14368_v9, %v16629_v61  ;;  %v16630_v33 = vld [vmem:[#allocation29_spill] sm:$0xff]  ;;  %v16634_v9 = vld [vmem:[#allocation203_spill] sm:$0xff] }
 0x3cd   : > { %v3403_v24 = vpop.f32.mrf.mxu1  ;;  %3946 = vmatpush1.bf16.msra.mxu0 %v14162_v16  ;;  %4190 = vmatpush1.bf16.msra.mxu1 %v14162_v16  ;;  %v3753_v54 = vmax.f32 %v3689_v55, 0.0  ;;  %v3541_v16 = vadd.f32 %v14354_v13, %v2874_v17  ;;  %v16631_v53 = vld [vmem:[#allocation201_spill] sm:$0xff]  ;;  %v16632_v55 = vld [vmem:[#allocation210_spill] sm:$0xff] }
 0x3ce   : > { %v3691_v2 = vadd.f32 %v14114_v28, %v3615_v30  ;;  %v3616_v20 = vmax.f32 %v3536_v11, %v3538_v44  ;;  %v3539_v3 = vadd.f32 %v3403_v24, %v16620_v47  ;;  %v3754_v48 = vmax.f32 %v3690_v57, 0.0  ;;  %3947 = vmatprep.subr.bf16.mxu0 %v16625_v7  ;;  %4191 = vmatprep.subr.bf16.mxu1 %v16625_v7  ;;  %v16633_v24 = vld [vmem:[#allocation59_spill] sm:$0xff]  ;;  %v3234_v47 = vpop.f32.mrf.mxu0 }
 0x3cf   : > { %v3405_v25 = vpop.f32.mrf.mxu1  ;;  %v3545_v13 = vadd.f32 %v14385_v52, %v16631_v53  ;;  %v2882_v0 = vadd.f32 %v16634_v9, %v16633_v24  ;;  %v3548_v52 = vadd.f32 %v14402_v63, %v16637_v46  ;;  %v16644_v53 = vld [vmem:[#allocation103_spill] sm:$0xff] }
 0x3d0   : > { %v3617_v27 = vmax.f32 %v3537_v1, %v3539_v3  ;;  %v3542_v39 = vadd.f32 %v3405_v25, %v16627_v37  ;;  %v3755_v62 = vmax.f32 %v3691_v2, 0.0  ;;  %v14463_v5 = vpack.c.bf16 %v3754_v48, %v3752_v56  ;;  %v16635_v1 = vld [vmem:[#allocation82_spill] sm:$0xff]  ;;  %v16636_v2 = vld [vmem:[#allocation211_spill] sm:$0xff] }
 0x3d1   : > { %v3692_v51 = vadd.f32 %v14105_v49, %v3616_v20  ;;  %v3407_v34 = vpop.f32.mrf.mxu1  ;;  %3948 = vmatpush1.bf16.msra.mxu0 %v16628_v29  ;;  %4192 = vmatpush1.bf16.msra.mxu1 %v16628_v29  ;;  %v2884_v20 = vadd.f32 %v16636_v2, %v16635_v1  ;;  %v3549_v25 = vadd.f32 %v14418_v6, %v2882_v0 }
 0x3d2   : > { %v3618_v41 = vmax.f32 %v3540_v14, %v3542_v39  ;;  %v3543_v23 = vadd.f32 %v3407_v34, %v2876_v59  ;;  %v14469_v32 = vpack.c.bf16 %v3755_v62, %v3753_v54  ;;  %v3693_v19 = vadd.f32 %v14114_v28, %v3617_v27  ;;  %v3238_v27 = vpop.f32.mrf.mxu0  ;;  %v16639_v62 = vld [vmem:[#allocation204_spill] sm:$0xff]  ;;  %v16640_v34 = vld [vmem:[#allocation30_spill] sm:$0xff] }
 0x3d3   : > { %v3411_v50 = vpop.f32.mrf.mxu1  ;;  %v3756_v15 = vmax.f32 %v3692_v51, 0.0  ;;  %v3552_v63 = vadd.f32 %v14435_v42, %v16639_v62 }
 0x3d4   : > { %v3694_v4 = vadd.f32 %v14105_v49, %v3618_v41  ;;  %v3619_v8 = vmax.f32 %v3541_v16, %v3543_v23  ;;  %v3546_v45 = vadd.f32 %v3411_v50, %v16630_v33  ;;  %v3757_v59 = vmax.f32 %v3693_v19, 0.0  ;;  %v16641_v41 = vld [vmem:[#allocation26_spill] sm:$0xff] }
 0x3d5   : > { %v3413_v11 = vpop.f32.mrf.mxu1  ;;  %v3553_v23 = vadd.f32 %v3230_v58, %v16641_v41  ;;  %v16654_v41 = vld [vmem:[#allocation105_spill] sm:$0xff] }
 0x3d6   : > { %v3758_v30 = vmax.f32 %v3694_v4, 0.0  ;;  %v3695_v40 = vadd.f32 %v14114_v28, %v3619_v8  ;;  %v3620_v44 = vmax.f32 %v3544_v21, %v3546_v45  ;;  %v3547_v57 = vadd.f32 %v3413_v11, %v16632_v55  ;;  %v16642_v8 = vld [vmem:[#allocation212_spill] sm:$0xff]  ;;  %v16643_v45 = vld [vmem:[#allocation167_spill] sm:$0xff]  ;;  %v3240_v11 = vpop.f32.mrf.mxu0 }
 0x3d7   : > { %v3415_v3 = vpop.f32.mrf.mxu1  ;;  %v2890_v42 = vadd.f32 %v16644_v53, %v16643_v45  ;;  %v16658_v45 = vld [vmem:[#allocation215_spill] sm:$0xff] }
 0x3d8   : > { %v14486_v12 = vpack.c.bf16 %v3758_v30, %v3756_v15  ;;  %v3621_v17 = vmax.f32 %v3545_v13, %v3547_v57  ;;  %v3550_v10 = vadd.f32 %v3415_v3, %v16638_v35  ;;  %v3696_v56 = vadd.f32 %v14105_v49, %v3620_v44  ;;  %v16645_v13 = vld [vmem:[#allocation171_spill] sm:$0xff]  ;;  %v16646_v15 = vld [vmem:[#allocation213_spill] sm:$0xff] }
 0x3d9   : > { %v3417_v48 = vpop.f32.mrf.mxu1  ;;  %v3759_v7 = vmax.f32 %v3695_v40, 0.0  ;;  %v2892_v19 = vadd.f32 %v16646_v15, %v16645_v13  ;;  %v16647_v40 = vld [vmem:[#allocation205_spill] sm:$0xff]  ;;  %v16648_v57 = vld [vmem:[#allocation111_spill] sm:$0xff] }
 0x3da   : > { %v3622_v31 = vmax.f32 %v3548_v52, %v3550_v10  ;;  %v3551_v14 = vadd.f32 %v3417_v48, %v2884_v20  ;;  %v3760_v29 = vmax.f32 %v3696_v56, 0.0  ;;  %v3697_v50 = vadd.f32 %v14114_v28, %v3621_v17  ;;  %v3242_v52 = vpop.f32.mrf.mxu0  ;;  %v16649_v10 = vld [vmem:[#allocation206_spill] sm:$0xff]  ;;  %v16650_v48 = vld [vmem:[#allocation112_spill] sm:$0xff] }
 0x3db   : > { %v3421_v37 = vpop.f32.mrf.mxu1  ;;  %v14491_v39 = vpack.c.bf16 %v3759_v7, %v3757_v59  ;;  %v3556_v58 = vadd.f32 %v3232_v18, %v16647_v40  ;;  %v3557_v20 = vadd.f32 %v3234_v47, %v2890_v42  ;;  %v3560_v59 = vadd.f32 %v3238_v27, %v16649_v10  ;;  %v10780_v10 = vld [vmem:[#allocation10 + $0x98] ss:$8 sps:$4 sm:$0xff]  }
 0x3dc   : > { %v3698_v54 = vadd.f32 %v14105_v49, %v3622_v31  ;;  %v3623_v51 = vmax.f32 %v3549_v25, %v3551_v14  ;;  %v3554_v16 = vadd.f32 %v3421_v37, %v16640_v34  ;;  %v3761_v9 = vmax.f32 %v3697_v50, 0.0  ;;  %v16651_v25 = vld [vmem:[#allocation27_spill] sm:$0xff] }
 0x3dd   : > { %v3423_v6 = vpop.f32.mrf.mxu1  ;;  %v3561_v31 = vadd.f32 %v3240_v11, %v16651_v25  ;;  %v10844_v25 = vld [vmem:[#allocation7 + $0x28c] ss:$16 sps:$4 sm:$0xff]  }
 0x3de   : > { %v3762_v61 = vmax.f32 %v3698_v54, 0.0  ;;  %v3699_v21 = vadd.f32 %v14114_v28, %v3623_v51  ;;  %v3624_v4 = vmax.f32 %v3552_v63, %v3554_v16  ;;  %v3555_v33 = vadd.f32 %v3423_v6, %v16642_v8  ;;  %v16652_v51 = vld [vmem:[#allocation214_spill] sm:$0xff]  ;;  %v16653_v16 = vld [vmem:[#allocation169_spill] sm:$0xff]  ;;  %v3244_v6 = vpop.f32.mrf.mxu0 }
 0x3df   : > { %v3425_v30 = vpop.f32.mrf.mxu1  ;;  %v2898_v27 = vadd.f32 %v16654_v41, %v16653_v16  ;;  %v10848_v16 = vld [vmem:[#allocation7 + $0x268] ss:$16 sps:$4 sm:$0xff]   ;;  %v10853_v41 = vld [vmem:[#allocation7 + $0x244] ss:$16 sps:$4 sm:$0xff]  }
 0x3e0   : > { %v3798_v44 = vpack.c.bf16 %v3762_v61, %v3760_v29  ;;  %v3625_v55 = vmax.f32 %v3553_v23, %v3555_v33  ;;  %v3558_v24 = vadd.f32 %v3425_v30, %v16648_v57  ;;  %v3700_v0 = vadd.f32 %v14105_v49, %v3624_v4  ;;  %v16655_v23 = vld [vmem:[#allocation173_spill] sm:$0xff]  ;;  %v16656_v29 = vld [vmem:[#allocation114_spill] sm:$0xff] }
 0x3e1   : > { %v3427_v1 = vpop.f32.mrf.mxu1  ;;  %v3763_v2 = vmax.f32 %v3699_v21, 0.0  ;;  %v2900_v50 = vadd.f32 %v16656_v29, %v16655_v23  ;;  %v16657_v21 = vld [vmem:[#allocation207_spill] sm:$0xff]  ;;  %v10854_v29 = vld [vmem:[#allocation7 + $0x248] ss:$16 sps:$4 sm:$0xff]  }
 0x3e2   : > { %v3626_v3 = vmax.f32 %v3556_v58, %v3558_v24  ;;  %v3559_v46 = vadd.f32 %v3427_v1, %v2892_v19  ;;  %v3764_v14 = vmax.f32 %v3700_v0, 0.0  ;;  %v3701_v37 = vadd.f32 %v14114_v28, %v3625_v55  ;;  %v10851_v23 = vld [vmem:[#allocation7 + $0x240] ss:$16 sps:$4 sm:$0xff]  }
 0x3e3   : > { %v3431_v17 = vpop.f32.mrf.mxu1  ;;  %v3799_v35 = vpack.c.bf16 %v3763_v2, %v3761_v9  ;;  %v3564_v4 = vadd.f32 %v3242_v52, %v16657_v21  ;;  %v3565_v19 = vadd.f32 %v3244_v6, %v2898_v27  ;;  %v10856_v27 = vld [vmem:[#allocation7 + $0x24c] ss:$16 sps:$4 sm:$0xff]  }
 0x3e4   : > { %v3702_v56 = vadd.f32 %v14105_v49, %v3626_v3  ;;  %v3627_v18 = vmax.f32 %v3557_v20, %v3559_v46  ;;  %v3562_v7 = vadd.f32 %v3431_v17, %v16650_v48  ;;  %v3765_v42 = vmax.f32 %v3701_v37, 0.0  ;;  %v10838_v17 = vld [vmem:[#allocation7 + $0x2ac] ss:$16 sps:$4 sm:$0xff]   ;;  %v10836_v48 = vld [vmem:[#allocation7 + $0x2a8] ss:$16 sps:$4 sm:$0xff]  }
 0x3e5   : > { %v3433_v62 = vpop.f32.mrf.mxu1  ;;  %v10847_v37 = vld [vmem:[#allocation7 + $0x264] ss:$16 sps:$4 sm:$0xff]   ;;  %v10862_v6 = vld [vmem:[#allocation7 + $0x22c] ss:$16 sps:$4 sm:$0xff]  }
 0x3e6   : > { %v3766_v63 = vmax.f32 %v3702_v56, 0.0  ;;  %v3703_v47 = vadd.f32 %v14114_v28, %v3627_v18  ;;  %v3628_v54 = vmax.f32 %v3560_v59, %v3562_v7  ;;  %v3563_v34 = vadd.f32 %v3433_v62, %v16652_v51  ;;  %v10781_v59 = vld [vmem:[#allocation10 + $0x24] ss:$8 sps:$4 sm:$0xff]   ;;  %v10792_v21 = vld [vmem:[#allocation10 + $0xb8] ss:$8 sps:$4 sm:$0xff]  }
 0x3e7   : > { %v3435_v61 = vpop.f32.mrf.mxu1  ;;  %v10783_v56 = vld [vmem:[#allocation10 + $0xac] ss:$8 sps:$4 sm:$0xff]   ;;  %v10789_v51 = vld [vmem:[#allocation10 + $0xbc] ss:$8 sps:$4 sm:$0xff]  }
 0x3e8   : > { %v3800_v8 = vpack.c.bf16 %v3766_v63, %v3764_v14  ;;  %v3629_v33 = vmax.f32 %v3561_v31, %v3563_v34  ;;  %v3566_v53 = vadd.f32 %v3435_v61, %v16658_v45  ;;  %v3767_v15 = vmax.f32 %v3703_v47, 0.0  ;;  %v10833_v18 = vld [vmem:[#allocation7 + $0x2a0] ss:$16 sps:$4 sm:$0xff]   ;;  %v10841_v7 = vld [vmem:[#allocation7 + $0x284] ss:$16 sps:$4 sm:$0xff]  }
 0x3e9   : > { %v3437_v13 = vpop.f32.mrf.mxu1  ;;  %v3704_v11 = vadd.f32 %v14105_v49, %v3628_v54  ;;  %v10839_v31 = vld [vmem:[#allocation7 + $0x280] ss:$16 sps:$4 sm:$0xff]   ;;  %v10842_v14 = vld [vmem:[#allocation7 + $0x288] ss:$16 sps:$4 sm:$0xff]   ;;  %v10850_v62 = vld [vmem:[#allocation7 + $0x26c] ss:$16 sps:$4 sm:$0xff]  }
 0x3ea   : > { %v3630_v30 = vmax.f32 %v3564_v4, %v3566_v53  ;;  %v3567_v40 = vadd.f32 %v3437_v13, %v2900_v50  ;;  %v3801_v58 = vpack.c.bf16 %v3767_v15, %v3765_v42  ;;  %v3705_v55 = vadd.f32 %v14114_v28, %v3629_v33  ;;  %v10785_v63 = vld [vmem:[#allocation10 + $0x20] ss:$8 sps:$4 sm:$0xff]   ;;  %v10787_v54 = vld [vmem:[#allocation10 + $0x34] ss:$8 sps:$4 sm:$0xff]   ;;  %v10791_v61 = vld [vmem:[#allocation10 + $0x30] ss:$8 sps:$4 sm:$0xff]  }
 0x3eb   : > { %v3768_v9 = vmax.f32 %v3704_v11, 0.0  ;;  %v10786_v47 = vld [vmem:[#allocation10 + $0xa8] ss:$8 sps:$4 sm:$0xff]   ;;  %v10793_v4 = vld [vmem:[#allocation10 + $0x44] ss:$8 sps:$4 sm:$0xff]  }
 0x3ec   : > { %v3706_v57 = vadd.f32 %v14105_v49, %v3630_v30  ;;  %v3631_v24 = vmax.f32 %v3565_v19, %v3567_v40  ;;  %v3769_v2 = vmax.f32 %v3705_v55, 0.0  ;;  %v10823_v49 = vld [vmem:[#allocation7 + $0x2e4] ss:$16 sps:$4 sm:$0xff]   ;;  %v10845_v34 = vld [vmem:[#allocation7 + $0x260] ss:$16 sps:$4 sm:$0xff]  }
 0x3ed   : > { %v10859_v50 = vld [vmem:[#allocation7 + $0x224] ss:$16 sps:$4 sm:$0xff]   ;;  %v10857_v33 = vld [vmem:[#allocation7 + $0x220] ss:$16 sps:$4 sm:$0xff]   ;;  %v10860_v45 = vld [vmem:[#allocation7 + $0x228] ss:$16 sps:$4 sm:$0xff]  }
 0x3ee   : > { %v3770_v0 = vmax.f32 %v3706_v57, 0.0  ;;  %v3707_v1 = vadd.f32 %v14114_v28, %v3631_v24  ;;  %v10826_v28 = vld [vmem:[#allocation7 + $0x2ec] ss:$16 sps:$4 sm:$0xff]   ;;  %v10865_v53 = vld [vmem:[#allocation7 + $0x204] ss:$16 sps:$4 sm:$0xff]  }
 0x3ef   : > { %v10868_v42 = vld [vmem:[#allocation7 + $0x20c] ss:$16 sps:$4 sm:$0xff]   ;;  %v10863_v13 = vld [vmem:[#allocation7 + $0x200] ss:$16 sps:$4 sm:$0xff]   ;;  %v10866_v15 = vld [vmem:[#allocation7 + $0x208] ss:$16 sps:$4 sm:$0xff]  }
 0x3f0   : > { %v3771_v20 = vmax.f32 %v3707_v1, 0.0  ;;  %v3802_v3 = vpack.c.bf16 %v3770_v0, %v3768_v9  ;;  %v10871_v19 = vld [vmem:[#allocation7 + $0x3e4] ss:$16 sps:$4 sm:$0xff]   ;;  %v10874_v11 = vld [vmem:[#allocation7 + $0x3ec] ss:$16 sps:$4 sm:$0xff]  }
 0x3f1   : > { %v10797_v30 = vld [vmem:[#allocation10 + $0x40] ss:$8 sps:$4 sm:$0xff]   ;;  %v10801_v55 = vld [vmem:[#allocation10 + $0xdc] ss:$8 sps:$4 sm:$0xff]  }
 0x3f2   : > { %v3803_v46 = vpack.c.bf16 %v3771_v20, %v3769_v2  ;;  %v3928_v52 = vsel %vm686_vm0, %v3802_v3, 0  ;;  %v10798_v40 = vld [vmem:[#allocation10 + $0xc8] ss:$8 sps:$4 sm:$0xff]   ;;  %v10804_v3 = vld [vmem:[#allocation10 + $0xd8] ss:$8 sps:$4 sm:$0xff]  }
 0x3f3   : > { %v10869_v57 = vld [vmem:[#allocation7 + $0x3e0] ss:$16 sps:$4 sm:$0xff]   ;;  %v10872_v24 = vld [vmem:[#allocation7 + $0x3e8] ss:$16 sps:$4 sm:$0xff]   ;;  %v10877_v9 = vld [vmem:[#allocation7 + $0x3c4] ss:$16 sps:$4 sm:$0xff]  }
 0x3f4   : > { %9940 = vmatprep.subr.msk.bf16.mxu0 %vm686_vm0, %v3803_v46  ;;  %9968 = vmatprep.subr.msk.bf16.mxu1 %vm686_vm0, %v3803_v46  ;;  %v10880_v0 = vld [vmem:[#allocation7 + $0x3cc] ss:$16 sps:$4 sm:$0xff]   ;;  %v10875_v1 = vld [vmem:[#allocation7 + $0x3c0] ss:$16 sps:$4 sm:$0xff]   ;;  %v10878_v2 = vld [vmem:[#allocation7 + $0x3c8] ss:$16 sps:$4 sm:$0xff]  }
 0x3f5   : > { %3950 = vmatpush2.bf16.msra.mxu0 %v3928_v52  ;;  %4194 = vmatpush2.bf16.msra.mxu1 %v3928_v52  ;;  %v10803_v20 = vld [vmem:[#allocation10 + $0x50] ss:$8 sps:$4 sm:$0xff]   ;;  %v10805_v46 = vld [vmem:[#allocation10 + $0x64] ss:$8 sps:$4 sm:$0xff]  }
 0x3f6   : > { %3951 = vmatprep.subr.bf16.mxu0 %v3801_v58  ;;  %4195 = vmatprep.subr.bf16.mxu1 %v3801_v58  ;;  %v10799_v58 = vld [vmem:[#allocation10 + $0x54] ss:$8 sps:$4 sm:$0xff]  }
 0x3f7   : > { %v10807_v52 = vld [vmem:[#allocation10 + $0xec] ss:$8 sps:$4 sm:$0xff]  }
 0x3f9   : > { %3952 = vmatpush2.bf16.msra.mxu0 %v3800_v8  ;;  %4196 = vmatpush2.bf16.msra.mxu1 %v3800_v8  ;;  %v10795_v8 = vld [vmem:[#allocation10 + $0xcc] ss:$8 sps:$4 sm:$0xff]  }
 0x3fa   : > { %3953 = vmatprep.subr.bf16.mxu0 %v3799_v35  ;;  %4197 = vmatprep.subr.bf16.mxu1 %v3799_v35  ;;  %v10779_v35 = vld [vmem:[#allocation10 + $0x10] ss:$8 sps:$4 sm:$0xff]  }
 0x3fd   : > { %3954 = vmatpush2.bf16.msra.mxu0 %v3798_v44  ;;  %4198 = vmatpush2.bf16.msra.mxu1 %v3798_v44  ;;  %v10830_v44 = vld [vmem:[#allocation7 + $0x2c8] ss:$16 sps:$4 sm:$0xff]  }
 0x3fe   : > { %3955 = vmatprep.subr.bf16.mxu0 %v14491_v39  ;;  %4199 = vmatprep.subr.bf16.mxu1 %v14491_v39  ;;  %v10829_v39 = vld [vmem:[#allocation7 + $0x2c4] ss:$16 sps:$4 sm:$0xff]  }
 0x401   : > { %3956 = vmatpush2.bf16.msra.mxu0 %v14486_v12  ;;  %4200 = vmatpush2.bf16.msra.mxu1 %v14486_v12  ;;  %v10821_v12 = vld [vmem:[#allocation7 + $0x2e0] ss:$16 sps:$4 sm:$0xff]  }
 0x402   : > { %3957 = vmatprep.subr.bf16.mxu0 %v14469_v32  ;;  %4201 = vmatprep.subr.bf16.mxu1 %v14469_v32  ;;  %v10777_v32 = vld [vmem:[#allocation10 + $0x9c] ss:$8 sps:$4 sm:$0xff]  }
 0x405   : > { %3958 = vmatpush2.bf16.msra.mxu0 %v14463_v5  ;;  %4202 = vmatpush2.bf16.msra.mxu1 %v14463_v5  ;;  %v10769_v5 = vld [vmem:[#allocation10] ss:$8 sps:$4 sm:$0xff]  }
 0x406   : > { %3959 = vmatprep.subr.bf16.mxu0 %v14440_v26  ;;  %4203 = vmatprep.subr.bf16.mxu1 %v14440_v26  ;;  %v10772_v26 = vld [vmem:[#allocation10 + $0x88] ss:$8 sps:$4 sm:$0xff]  }
 0x409   : > { %3960 = vmatpush2.bf16.msra.mxu0 %v14427_v22  ;;  %4204 = vmatpush2.bf16.msra.mxu1 %v14427_v22  ;;  %v10775_v22 = vld [vmem:[#allocation10 + $0x14] ss:$8 sps:$4 sm:$0xff]  }
 0x40a   : > { %3961 = vmatprep.subr.bf16.mxu0 %v14406_v60  ;;  %4205 = vmatprep.subr.bf16.mxu1 %v14406_v60  ;;  %v10824_v60 = vld [vmem:[#allocation7 + $0x2e8] ss:$16 sps:$4 sm:$0xff]  }
 0x40d   : > { %3962 = vmatpush2.bf16.msra.mxu0 %v14397_v43  ;;  %4206 = vmatpush2.bf16.msra.mxu1 %v14397_v43  ;;  %v10832_v43 = vld [vmem:[#allocation7 + $0x2cc] ss:$16 sps:$4 sm:$0xff]  }
 0x40e   : > { %3963 = vmatprep.subr.bf16.mxu0 %v14374_v36  ;;  %4207 = vmatprep.subr.bf16.mxu1 %v14374_v36  ;;  %v10827_v36 = vld [vmem:[#allocation7 + $0x2c0] ss:$16 sps:$4 sm:$0xff]  }
 0x411   : > { %3964 = vmatpush2.bf16.msra.mxu0 %v14361_v38  ;;  %4208 = vmatpush2.bf16.msra.mxu1 %v14361_v38  ;;  %v10835_v38 = vld [vmem:[#allocation7 + $0x2a4] ss:$16 sps:$4 sm:$0xff]  }
 0x412   : > { %4952 = vmatprep.subr.bf16.mxu0 %v10823_v49  ;;  %5065 = vmatprep.subr.bf16.mxu1 %v10826_v28  ;;  %v10809_v49 = vld [vmem:[#allocation10 + $0x60] ss:$8 sps:$4 sm:$0xff]  }
 0x413   : > { %v10810_v28 = vld [vmem:[#allocation10 + $0xe8] ss:$8 sps:$4 sm:$0xff]  }
 0x414   : > { %3966 = vmatmul.mubr.bf16.vlgmr.msra.gmra.mxu0 %v10769_v5  ;;  %4210 = vmatmul.mubr.bf16.vlgmr.msra.gmra.mxu1 %v10772_v26  ;;  %v10811_v5 = vld [vmem:[#allocation10 + $0x74] ss:$8 sps:$4 sm:$0xff]  }
 0x415   : > { %9942 = vmatprep.mubr.msk.bf16.mxu0 %vm3899_vm2, %v10775_v22  ;;  %9970 = vmatprep.mubr.msk.bf16.mxu1 %vm3899_vm2, %v10777_v32  ;;  %v10813_v26 = vld [vmem:[#allocation10 + $0xfc] ss:$8 sps:$4 sm:$0xff]   ;;  %v4071_v32 = vld [vmem:[#allocation10 + $0x108] sm:$0xff] }
 0x416   : > { %4953 = vmatpush1.bf16.msra.mxu0 %v10821_v12  ;;  %5066 = vmatpush1.bf16.msra.mxu1 %v10824_v60  ;;  %v3820_v22 = vld [vmem:[#allocation10 + $0x80] sm:$0xff]  ;;  %v10815_v12 = vld [vmem:[#allocation10 + $0x70] ss:$8 sps:$4 sm:$0xff]  }
 0x417   : > { %4954 = vmatprep.subr.bf16.mxu0 %v10829_v39  ;;  %5067 = vmatprep.subr.bf16.mxu1 %v10832_v43  ;;  %v10816_v60 = vld [vmem:[#allocation10 + $0xf8] ss:$8 sps:$4 sm:$0xff]   ;;  %v9939_v39 = vcombine.high %v3820_v22, %v3820_v22  ;;  %v9967_v43 = vcombine.high %v4071_v32, %v4071_v32 }
 0x41a   : > { %4955 = vmatpush1.bf16.msra.mxu0 %v10827_v36  ;;  %5068 = vmatpush1.bf16.msra.mxu1 %v10830_v44  ;;  %v9938_v36 = vcombine.low %v3820_v22, %v3820_v22  ;;  %v9966_v44 = vcombine.low %v4071_v32, %v4071_v32 }
 0x41b   : > { %4956 = vmatprep.subr.bf16.mxu0 %v10835_v38  ;;  %5069 = vmatprep.subr.bf16.mxu1 %v10838_v17  ;;  %v10881_v38 = vld [vmem:[#allocation7 + $0x3a0] ss:$16 sps:$4 sm:$0xff]   ;;  %v10883_v17 = vld [vmem:[#allocation7 + $0x3a4] ss:$16 sps:$4 sm:$0xff]  }
 0x41c   : > { %3976 = vmatmul.mubr.bf16.gmra.mxu0 %v10779_v35  ;;  %4220 = vmatmul.mubr.bf16.gmra.mxu1 %v10780_v10  ;;  %v10884_v35 = vld [vmem:[#allocation7 + $0x3a8] ss:$16 sps:$4 sm:$0xff]   ;;  %v10886_v10 = vld [vmem:[#allocation7 + $0x3ac] ss:$16 sps:$4 sm:$0xff]  }
 0x41d   : > { %9943 = vmatprep.mubr.msk.bf16.mxu0 %vm3899_vm2, %v10781_v59  ;;  %9971 = vmatprep.mubr.msk.bf16.mxu1 %vm3899_vm2, %v10783_v56  ;;  %v10889_v59 = vld [vmem:[#allocation7 + $0x384] ss:$16 sps:$4 sm:$0xff]   ;;  %v10892_v56 = vld [vmem:[#allocation7 + $0x38c] ss:$16 sps:$4 sm:$0xff]  }
 0x41e   : > { %4957 = vmatpush1.bf16.msra.mxu0 %v10833_v18  ;;  %5070 = vmatpush1.bf16.msra.mxu1 %v10836_v48  ;;  %v10887_v18 = vld [vmem:[#allocation7 + $0x380] ss:$16 sps:$4 sm:$0xff]   ;;  %v10890_v48 = vld [vmem:[#allocation7 + $0x388] ss:$16 sps:$4 sm:$0xff]  }
 0x41f   : > { %4958 = vmatprep.subr.bf16.mxu0 %v10841_v7  ;;  %5071 = vmatprep.subr.bf16.mxu1 %v10844_v25  ;;  %v10893_v7 = vld [vmem:[#allocation7 + $0x360] ss:$16 sps:$4 sm:$0xff]   ;;  %v10895_v25 = vld [vmem:[#allocation7 + $0x364] ss:$16 sps:$4 sm:$0xff]  }
 0x422   : > { %4959 = vmatpush1.bf16.msra.mxu0 %v10839_v31  ;;  %5072 = vmatpush1.bf16.msra.mxu1 %v10842_v14  ;;  %v10896_v31 = vld [vmem:[#allocation7 + $0x368] ss:$16 sps:$4 sm:$0xff]   ;;  %v10898_v14 = vld [vmem:[#allocation7 + $0x36c] ss:$16 sps:$4 sm:$0xff]  }
 0x423   : > { %4960 = vmatprep.subr.bf16.mxu0 %v10847_v37  ;;  %5073 = vmatprep.subr.bf16.mxu1 %v10850_v62  ;;  %v10901_v37 = vld [vmem:[#allocation7 + $0x344] ss:$16 sps:$4 sm:$0xff]   ;;  %v10904_v62 = vld [vmem:[#allocation7 + $0x34c] ss:$16 sps:$4 sm:$0xff]  }
 0x424   : > { %3986 = vmatmul.mubr.bf16.gmra.mxu0 %v10785_v63  ;;  %4230 = vmatmul.mubr.bf16.gmra.mxu1 %v10786_v47  ;;  %v10899_v63 = vld [vmem:[#allocation7 + $0x340] ss:$16 sps:$4 sm:$0xff]   ;;  %v10902_v47 = vld [vmem:[#allocation7 + $0x348] ss:$16 sps:$4 sm:$0xff]  }
 0x425   : > { %9944 = vmatprep.mubr.msk.bf16.mxu0 %vm3899_vm2, %v10787_v54  ;;  %9972 = vmatprep.mubr.msk.bf16.mxu1 %vm3899_vm2, %v10789_v51  ;;  %v10905_v54 = vld [vmem:[#allocation7 + $0x320] ss:$16 sps:$4 sm:$0xff]   ;;  %v10907_v51 = vld [vmem:[#allocation7 + $0x324] ss:$16 sps:$4 sm:$0xff]  }
 0x426   : > { %4961 = vmatpush1.bf16.msra.mxu0 %v10845_v34  ;;  %5074 = vmatpush1.bf16.msra.mxu1 %v10848_v16  ;;  %v10908_v34 = vld [vmem:[#allocation7 + $0x328] ss:$16 sps:$4 sm:$0xff]   ;;  %v10910_v16 = vld [vmem:[#allocation7 + $0x32c] ss:$16 sps:$4 sm:$0xff]  }
 0x427   : > { %4962 = vmatprep.subr.bf16.mxu0 %v10853_v41  ;;  %5075 = vmatprep.subr.bf16.mxu1 %v10856_v27  ;;  %v10913_v41 = vld [vmem:[#allocation7 + $0x304] ss:$16 sps:$4 sm:$0xff]   ;;  %v10916_v27 = vld [vmem:[#allocation7 + $0x30c] ss:$16 sps:$4 sm:$0xff]  }
 0x42a   : > { %4963 = vmatpush1.bf16.msra.mxu0 %v10851_v23  ;;  %5076 = vmatpush1.bf16.msra.mxu1 %v10854_v29  ;;  %v10911_v23 = vld [vmem:[#allocation7 + $0x300] ss:$16 sps:$4 sm:$0xff]   ;;  %v10914_v29 = vld [vmem:[#allocation7 + $0x308] ss:$16 sps:$4 sm:$0xff]  }
 0x42b   : > { %4964 = vmatprep.subr.bf16.mxu0 %v10859_v50  ;;  %5077 = vmatprep.subr.bf16.mxu1 %v10862_v6  ;;  %v10919_v50 = vld [vmem:[#allocation7 + $0xe4] ss:$16 sps:$4 sm:$0xff]   ;;  %v10922_v6 = vld [vmem:[#allocation7 + $0xec] ss:$16 sps:$4 sm:$0xff]  }
 0x42c   : > { %3996 = vmatmul.mubr.bf16.gmra.mxu0 %v10791_v61  ;;  %4240 = vmatmul.mubr.bf16.gmra.mxu1 %v10792_v21 }
 0x42d   : > { %9945 = vmatprep.mubr.msk.bf16.mxu0 %vm3899_vm2, %v10793_v4  ;;  %9973 = vmatprep.mubr.msk.bf16.mxu1 %vm3899_vm2, %v10795_v8 }
 0x42e   : > { %4965 = vmatpush1.bf16.msra.mxu0 %v10857_v33  ;;  %5078 = vmatpush1.bf16.msra.mxu1 %v10860_v45 }
 0x42f   : > { %4966 = vmatprep.subr.bf16.mxu0 %v10865_v53  ;;  %5079 = vmatprep.subr.bf16.mxu1 %v10868_v42 }
 0x432   : > { %4967 = vmatpush1.bf16.msra.mxu0 %v10863_v13  ;;  %5080 = vmatpush1.bf16.msra.mxu1 %v10866_v15 }
 0x433   : > { %4968 = vmatprep.subr.bf16.mxu0 %v10871_v19  ;;  %5081 = vmatprep.subr.bf16.mxu1 %v10874_v11 }
 0x434   : > { %4006 = vmatmul.mubr.bf16.gmra.mxu0 %v10797_v30  ;;  %4250 = vmatmul.mubr.bf16.gmra.mxu1 %v10798_v40 }
 0x435   : > { %9946 = vmatprep.mubr.msk.bf16.mxu0 %vm3899_vm2, %v10799_v58  ;;  %9974 = vmatprep.mubr.msk.bf16.mxu1 %vm3899_vm2, %v10801_v55 }
 0x436   : > { %4969 = vmatpush2.bf16.msra.mxu0 %v10869_v57  ;;  %5082 = vmatpush2.bf16.msra.mxu1 %v10872_v24 }
 0x437   : > { %4970 = vmatprep.subr.bf16.mxu0 %v10877_v9  ;;  %5083 = vmatprep.subr.bf16.mxu1 %v10880_v0 }
 0x43a   : > { %4971 = vmatpush2.bf16.msra.mxu0 %v10875_v1  ;;  %5084 = vmatpush2.bf16.msra.mxu1 %v10878_v2 }
 0x43b   : > { %4972 = vmatprep.subr.bf16.mxu0 %v10883_v17  ;;  %5085 = vmatprep.subr.bf16.mxu1 %v10886_v10 }
 0x43c   : > { %4016 = vmatmul.mubr.bf16.gmra.mxu0 %v10803_v20  ;;  %4260 = vmatmul.mubr.bf16.gmra.mxu1 %v10804_v3 }
 0x43d   : > { %9947 = vmatprep.mubr.msk.bf16.mxu0 %vm3899_vm2, %v10805_v46  ;;  %9975 = vmatprep.mubr.msk.bf16.mxu1 %vm3899_vm2, %v10807_v52 }
 0x43e   : > { %4973 = vmatpush2.bf16.msra.mxu0 %v10881_v38  ;;  %5086 = vmatpush2.bf16.msra.mxu1 %v10884_v35 }
 0x43f   : > { %4974 = vmatprep.subr.bf16.mxu0 %v10889_v59  ;;  %5087 = vmatprep.subr.bf16.mxu1 %v10892_v56 }
 0x442   : > { %4975 = vmatpush2.bf16.msra.mxu0 %v10887_v18  ;;  %5088 = vmatpush2.bf16.msra.mxu1 %v10890_v48 }
 0x443   : > { %4976 = vmatprep.subr.bf16.mxu0 %v10895_v25  ;;  %5089 = vmatprep.subr.bf16.mxu1 %v10898_v14 }
 0x444   : > { %4026 = vmatmul.mubr.bf16.gmra.mxu0 %v10809_v49  ;;  %4270 = vmatmul.mubr.bf16.gmra.mxu1 %v10810_v28 }
 0x445   : > { %9948 = vmatprep.mubr.msk.bf16.mxu0 %vm3899_vm2, %v10811_v5  ;;  %9976 = vmatprep.mubr.msk.bf16.mxu1 %vm3899_vm2, %v10813_v26 }
 0x446   : > { %4977 = vmatpush2.bf16.msra.mxu0 %v10893_v7  ;;  %5090 = vmatpush2.bf16.msra.mxu1 %v10896_v31 }
 0x447   : > { %4978 = vmatprep.subr.bf16.mxu0 %v10901_v37  ;;  %5091 = vmatprep.subr.bf16.mxu1 %v10904_v62 }
 0x44a   : > { %4979 = vmatpush2.bf16.msra.mxu0 %v10899_v63  ;;  %5092 = vmatpush2.bf16.msra.mxu1 %v10902_v47 }
 0x44b   : > { %4980 = vmatprep.subr.bf16.mxu0 %v10907_v51  ;;  %5093 = vmatprep.subr.bf16.mxu1 %v10910_v16 }
 0x44c   : > { %4036 = vmatmul.mubr.bf16.gmra.mxu0 %v10815_v12  ;;  %4280 = vmatmul.mubr.bf16.gmra.mxu1 %v10816_v60 }
 0x44d   : > { %9949 = vmatprep.mubr.msk.bf16.mxu0 %vm3899_vm2, %v9939_v39  ;;  %9977 = vmatprep.mubr.msk.bf16.mxu1 %vm3899_vm2, %v9967_v43 }
 0x44e   : > { %4981 = vmatpush2.bf16.msra.mxu0 %v10905_v54  ;;  %5094 = vmatpush2.bf16.msra.mxu1 %v10908_v34  ;;  %v10917_v34 = vld [vmem:[#allocation7 + $0xe0] ss:$16 sps:$4 sm:$0xff]  }
 0x44f   : > { %4982 = vmatprep.subr.bf16.mxu0 %v10913_v41  ;;  %5095 = vmatprep.subr.bf16.mxu1 %v10916_v27 }
 0x452   : > { %4983 = vmatpush2.bf16.msra.mxu0 %v10911_v23  ;;  %5096 = vmatpush2.bf16.msra.mxu1 %v10914_v29  ;;  %v10920_v23 = vld [vmem:[#allocation7 + $0xe8] ss:$16 sps:$4 sm:$0xff]  }
 0x453   : > { %5498 = vmatprep.subr.bf16.mxu0 %v10919_v50  ;;  %5611 = vmatprep.subr.bf16.mxu1 %v10922_v6 }
 0x454   : > { %4046 = vmatmul.mubr.bf16.gmra.mxu0 %v9938_v36  ;;  %4290 = vmatmul.mubr.bf16.gmra.mxu1 %v9966_v44 }
 0x4d4   : > { %v3967_v61 = vpop.f32.mrf.mxu0  ;;  %v4211_v21 = vpop.f32.mrf.mxu1 }
 0x4d5   : > { %v4298_v53 = vmax.f32 %v3967_v61, %v4211_v21 }
 0x4d6   : > { %v3969_v4 = vpop.f32.mrf.mxu0  ;;  %v4213_v8 = vpop.f32.mrf.mxu1 }
 0x4d7   : > { %v4299_v19 = vmax.f32 %v3969_v4, %v4213_v8 }
 0x4d8   : > { %v3971_v33 = vpop.f32.mrf.mxu0  ;;  %v4215_v45 = vpop.f32.mrf.mxu1 }
 0x4d9   : > { %v4300_v42 = vmax.f32 %v3971_v33, %v4215_v45  ;;  %v10925_v33 = vld [vmem:[#allocation7 + $0xc4] ss:$16 sps:$4 sm:$0xff]   ;;  %v10928_v45 = vld [vmem:[#allocation7 + $0xcc] ss:$16 sps:$4 sm:$0xff]  }
 0x4da   : > { %v3973_v13 = vpop.f32.mrf.mxu0  ;;  %v4217_v15 = vpop.f32.mrf.mxu1 }
 0x4db   : > { %v14564_v11 = vpack.c.bf16 %v4300_v42, %v4298_v53  ;;  %v4301_v30 = vmax.f32 %v3973_v13, %v4217_v15 }
 0x4dc   : > { %v3977_v40 = vpop.f32.mrf.mxu0  ;;  %v4221_v58 = vpop.f32.mrf.mxu1 }
 0x4dd   : > { %v14566_v55 = vpack.c.bf16 %v4301_v30, %v4299_v19  ;;  %v4481_v9 = vshrl.u32 %v14564_v11, 16  ;;  %v4483_v0 = vshll.u32 %v14564_v11, 16  ;;  %v4302_v46 = vmax.f32 %v3977_v40, %v4221_v58 }
 0x4de   : > { %v3979_v57 = vpop.f32.mrf.mxu0  ;;  %v4223_v24 = vpop.f32.mrf.mxu1 }
 0x4df   : > { %v4493_v1 = vshrl.u32 %v14566_v55, 16  ;;  %v4495_v2 = vshll.u32 %v14566_v55, 16  ;;  %v14576_v22 = vrot.slane %v4481_v9, 1  ;;  %v6535_v32 = vrot.slane %v4483_v0, 2 }
 0x4e0   : > { %v3981_v20 = vpop.f32.mrf.mxu0  ;;  %v4225_v3 = vpop.f32.mrf.mxu1  ;;  %v4303_v12 = vmax.f32 %v3979_v57, %v4223_v24  ;;  %v4485_v48 = vrot.slane %v4483_v0, 1  ;;  %v10926_v0 = vld [vmem:[#allocation7 + $0xc8] ss:$16 sps:$4 sm:$0xff]  }
 0x4e1   : > { %v4304_v52 = vmax.f32 %v3981_v20, %v4225_v3  ;;  %v14572_v5 = vrot.slane %v4493_v1, 1  ;;  %v14574_v26 = vrot.slane %v4495_v2, 2  ;;  %v6536_v38 = vor.u32 %v6535_v32, %v14576_v22  ;;  %v10931_v3 = vld [vmem:[#allocation7 + $0xa4] ss:$16 sps:$4 sm:$0xff]  }
 0x4e2   : > { %v3983_v49 = vpop.f32.mrf.mxu0  ;;  %v4227_v28 = vpop.f32.mrf.mxu1  ;;  %v4497_v35 = vrot.slane %v4495_v2, 1  ;;  %v4486_v27 = vor.u32 %v4485_v48, %v4481_v9  ;;  %v10923_v9 = vld [vmem:[#allocation7 + $0xc0] ss:$16 sps:$4 sm:$0xff]  }
 0x4e3   : > { %v14578_v60 = vpack.c.bf16 %v4304_v52, %v4302_v46  ;;  %v4305_v39 = vmax.f32 %v3983_v49, %v4227_v28  ;;  %v6543_v44 = vor.u32 %v14574_v26, %v14572_v5  ;;  %v10934_v46 = vld [vmem:[#allocation7 + $0xac] ss:$16 sps:$4 sm:$0xff]  }
 0x4e4   : > { %v3987_v43 = vpop.f32.mrf.mxu0  ;;  %v4231_v36 = vpop.f32.mrf.mxu1  ;;  %v4498_v54 = vor.u32 %v4497_v35, %v4493_v1 }
 0x4e5   : > { %v14583_v17 = vpack.c.bf16 %v4305_v39, %v4303_v12  ;;  %v4488_v10 = vshll.u32 %v14578_v60, 16  ;;  %v4504_v59 = vshrl.u32 %v14578_v60, 16  ;;  %v4306_v63 = vmax.f32 %v3987_v43, %v4231_v36 }
 0x4e6   : > { %v3989_v56 = vpop.f32.mrf.mxu0  ;;  %v4233_v18 = vpop.f32.mrf.mxu1 }
 0x4e7   : > { %v4500_v7 = vshll.u32 %v14583_v17, 16  ;;  %v4512_v25 = vshrl.u32 %v14583_v17, 16  ;;  %v4490_v37 = vrot.slane %v4488_v10, 1  ;;  %v6537_v62 = vrot.slane %v4504_v59, 1 }
 0x4e8   : > { %v3991_v31 = vpop.f32.mrf.mxu0  ;;  %v4235_v14 = vpop.f32.mrf.mxu1  ;;  %v6538_v6 = vrot.slane %v4488_v10, 2  ;;  %v4307_v61 = vmax.f32 %v3989_v56, %v4233_v18  ;;  %v10929_v10 = vld [vmem:[#allocation7 + $0xa0] ss:$16 sps:$4 sm:$0xff]   ;;  %v10932_v56 = vld [vmem:[#allocation7 + $0xa8] ss:$16 sps:$4 sm:$0xff]  }
 0x4e9   : > { %v4308_v47 = vmax.f32 %v3991_v31, %v4235_v14  ;;  %v4502_v51 = vrot.slane %v4500_v7, 1  ;;  %v6544_v29 = vrot.slane %v4512_v25, 1  ;;  %v6545_v50 = vrot.slane %v4500_v7, 2 }
 0x4ea   : > { %v3993_v16 = vpop.f32.mrf.mxu0  ;;  %v4237_v41 = vpop.f32.mrf.mxu1  ;;  %v4491_v13 = vsel %vm4479_vm3, %v4486_v27, %v4490_v37  ;;  %v6539_v19 = vor.u32 %v6538_v6, %v6537_v62  ;;  %v4506_v5 = vor.u32 %v4504_v59, %v4490_v37  ;;  %v10940_v37 = vld [vmem:[#allocation7 + $0x8c] ss:$16 sps:$4 sm:$0xff]  }
 0x4eb   : > { %v14589_v21 = vpack.c.bf16 %v4308_v47, %v4306_v63  ;;  %v4309_v4 = vmax.f32 %v3993_v16, %v4237_v41  ;;  %v4503_v8 = vsel %vm4479_vm3, %v4498_v54, %v4502_v51  ;;  %v14593_v15 = vor.u32 %v6545_v50, %v6544_v29  ;;  %v10935_v29 = vld [vmem:[#allocation7 + $0x80] ss:$16 sps:$4 sm:$0xff]   ;;  %v10938_v50 = vld [vmem:[#allocation7 + $0x88] ss:$16 sps:$4 sm:$0xff]  }
 0x4ec   : > { %v3997_v53 = vpop.f32.mrf.mxu0  ;;  %v4241_v42 = vpop.f32.mrf.mxu1  ;;  %4984 = vmatprep.mubr.bf16.mxu0 %v4503_v8  ;;  %5097 = vmatprep.mubr.bf16.mxu1 %v4503_v8  ;;  %v14604_v2 = vsel %vm6533_vm4, %v6536_v38, %v6539_v19  ;;  %v4514_v43 = vor.u32 %v4512_v25, %v4502_v51  ;;  %v10937_v25 = vld [vmem:[#allocation7 + $0x84] ss:$16 sps:$4 sm:$0xff]   ;;  %v10946_v8 = vld [vmem:[#allocation7 + $0x6c] ss:$16 sps:$4 sm:$0xff]  }
 0x4ed   : > { %v14595_v30 = vpack.c.bf16 %v4309_v4, %v4307_v61  ;;  %4985 = vmatmul.mubr.bf16.vlgmr.msra.gmra.mxu0 %v4491_v13  ;;  %5098 = vmatmul.mubr.bf16.vlgmr.msra.gmra.mxu1 %v4491_v13  ;;  %v4508_v40 = vshll.u32 %v14589_v21, 16  ;;  %v4520_v58 = vshrl.u32 %v14589_v21, 16  ;;  %v14601_v1 = vsel %vm6533_vm4, %v6543_v44, %v14593_v15  ;;  %v10943_v4 = vld [vmem:[#allocation7 + $0x64] ss:$16 sps:$4 sm:$0xff]  }
 0x4ee   : > { %v3999_v57 = vpop.f32.mrf.mxu0  ;;  %v4243_v24 = vpop.f32.mrf.mxu1  ;;  %5499 = vmatpush1.bf16.msra.mxu0 %v10917_v34  ;;  %5612 = vmatpush1.bf16.msra.mxu1 %v10920_v23  ;;  %v4310_v12 = vmax.f32 %v3997_v53, %v4241_v42 }
 0x4ef   : > { %5500 = vmatprep.subr.bf16.mxu0 %v10925_v33  ;;  %5613 = vmatprep.subr.bf16.mxu1 %v10928_v45  ;;  %v4516_v20 = vshll.u32 %v14595_v30, 16  ;;  %v4528_v52 = vshrl.u32 %v14595_v30, 16  ;;  %v4510_v26 = vrot.slane %v4508_v40, 1  ;;  %v6548_v22 = vrot.slane %v4520_v58, 1 }
 0x4f0   : > { %v4001_v49 = vpop.f32.mrf.mxu0  ;;  %v4245_v28 = vpop.f32.mrf.mxu1  ;;  %v6549_v32 = vrot.slane %v4508_v40, 2  ;;  %v4311_v44 = vmax.f32 %v3999_v57, %v4243_v24 }
 0x4f1   : > { %v4312_v39 = vmax.f32 %v4001_v49, %v4245_v28  ;;  %v4518_v36 = vrot.slane %v4516_v20, 1  ;;  %v6552_v18 = vrot.slane %v4528_v52, 1  ;;  %v6553_v48 = vrot.slane %v4516_v20, 2  ;;  %v10944_v49 = vld [vmem:[#allocation7 + $0x68] ss:$16 sps:$4 sm:$0xff]  }
 0x4f2   : > { %v4003_v38 = vpop.f32.mrf.mxu0  ;;  %v4247_v35 = vpop.f32.mrf.mxu1  ;;  %5501 = vmatpush1.bf16.msra.mxu0 %v10923_v9  ;;  %5614 = vmatpush1.bf16.msra.mxu1 %v10926_v0  ;;  %v14610_v7 = vor.u32 %v6549_v32, %v6548_v22  ;;  %v4511_v47 = vsel %vm4479_vm3, %v4506_v5, %v4510_v26  ;;  %v4522_v42 = vor.u32 %v4520_v58, %v4510_v26 }
 0x4f3   : > { %v14612_v59 = vpack.c.bf16 %v4312_v39, %v4310_v12  ;;  %v4313_v31 = vmax.f32 %v4003_v38, %v4247_v35  ;;  %v4519_v14 = vsel %vm4479_vm3, %v4514_v43, %v4518_v36  ;;  %5502 = vmatprep.subr.bf16.mxu0 %v10931_v3  ;;  %5615 = vmatprep.subr.bf16.mxu1 %v10934_v46  ;;  %v10941_v46 = vld [vmem:[#allocation7 + $0x60] ss:$16 sps:$4 sm:$0xff]   ;;  %v10952_v12 = vld [vmem:[#allocation7 + $0x4c] ss:$16 sps:$4 sm:$0xff]  }
 0x4f4   : > { %v4007_v62 = vpop.f32.mrf.mxu0  ;;  %v4251_v63 = vpop.f32.mrf.mxu1  ;;  %4994 = vmatprep.mubr.bf16.mxu0 %v4519_v14  ;;  %5107 = vmatprep.mubr.bf16.mxu1 %v4519_v14  ;;  %v14616_v54 = vor.u32 %v6553_v48, %v6552_v18  ;;  %v14620_v51 = vsel %vm6533_vm4, %v6539_v19, %v14610_v7  ;;  %v4530_v24 = vor.u32 %v4528_v52, %v4518_v36  ;;  %v10949_v52 = vld [vmem:[#allocation7 + $0x44] ss:$16 sps:$4 sm:$0xff]   ;;  %v10950_v14 = vld [vmem:[#allocation7 + $0x48] ss:$16 sps:$4 sm:$0xff]  }
 0x4f5   : > { %v14622_v34 = vpack.c.bf16 %v4313_v31, %v4311_v44  ;;  %4995 = vmatmul.mubr.bf16.gmra.mxu0 %v4511_v47  ;;  %5108 = vmatmul.mubr.bf16.gmra.mxu1 %v4511_v47  ;;  %v4524_v16 = vshll.u32 %v14612_v59, 16  ;;  %v4536_v41 = vshrl.u32 %v14612_v59, 16  ;;  %v10947_v31 = vld [vmem:[#allocation7 + $0x40] ss:$16 sps:$4 sm:$0xff]  }
 0x4f6   : > { %v4009_v27 = vpop.f32.mrf.mxu0  ;;  %v4253_v23 = vpop.f32.mrf.mxu1  ;;  %5503 = vmatpush1.bf16.msra.mxu0 %v10929_v10  ;;  %5616 = vmatpush1.bf16.msra.mxu1 %v10932_v56  ;;  %v14629_v6 = vsel %vm6533_vm4, %v14593_v15, %v14616_v54  ;;  %v4314_v15 = vmax.f32 %v4007_v62, %v4251_v63  ;;  %v10958_v62 = vld [vmem:[#allocation7 + $0x2c] ss:$16 sps:$4 sm:$0xff]  }
 0x4f7   : > { %5504 = vmatprep.subr.bf16.mxu0 %v10937_v25  ;;  %5617 = vmatprep.subr.bf16.mxu1 %v10940_v37  ;;  %v4532_v61 = vshll.u32 %v14622_v34, 16  ;;  %v4544_v33 = vshrl.u32 %v14622_v34, 16  ;;  %v4526_v13 = vrot.slane %v4524_v16, 1  ;;  %v6556_v19 = vrot.slane %v4536_v41, 1  ;;  %v10955_v37 = vld [vmem:[#allocation7 + $0x24] ss:$16 sps:$4 sm:$0xff]  }
 0x4f8   : > { %v4011_v45 = vpop.f32.mrf.mxu0  ;;  %v4255_v53 = vpop.f32.mrf.mxu1  ;;  %v6557_v40 = vrot.slane %v4524_v16, 2  ;;  %v4315_v0 = vmax.f32 %v4009_v27, %v4253_v23 }
 0x4f9   : > { %v4316_v57 = vmax.f32 %v4011_v45, %v4255_v53  ;;  %v4534_v9 = vrot.slane %v4532_v61, 1  ;;  %v6560_v28 = vrot.slane %v4544_v33, 1  ;;  %v6561_v5 = vrot.slane %v4532_v61, 2 }
 0x4fa   : > { %v4013_v20 = vpop.f32.mrf.mxu0  ;;  %v4257_v3 = vpop.f32.mrf.mxu1  ;;  %5505 = vmatpush1.bf16.msra.mxu0 %v10935_v29  ;;  %5618 = vmatpush1.bf16.msra.mxu1 %v10938_v50  ;;  %v14637_v22 = vor.u32 %v6557_v40, %v6556_v19  ;;  %v4527_v36 = vsel %vm4479_vm3, %v4522_v42, %v4526_v13  ;;  %v4538_v27 = vor.u32 %v4536_v41, %v4526_v13  ;;  %v10953_v19 = vld [vmem:[#allocation7 + $0x20] ss:$16 sps:$4 sm:$0xff]   ;;  %v10956_v40 = vld [vmem:[#allocation7 + $0x28] ss:$16 sps:$4 sm:$0xff]  }
 0x4fb   : > { %v14639_v58 = vpack.c.bf16 %v4316_v57, %v4314_v15  ;;  %v4317_v26 = vmax.f32 %v4013_v20, %v4257_v3  ;;  %v4535_v32 = vsel %vm4479_vm3, %v4530_v24, %v4534_v9  ;;  %5506 = vmatprep.subr.bf16.mxu0 %v10943_v4  ;;  %5619 = vmatprep.subr.bf16.mxu1 %v10946_v8 }
 0x4fc   : > { %v4017_v39 = vpop.f32.mrf.mxu0  ;;  %v4261_v43 = vpop.f32.mrf.mxu1  ;;  %5004 = vmatprep.mubr.bf16.mxu0 %v4535_v32  ;;  %5117 = vmatprep.mubr.bf16.mxu1 %v4535_v32  ;;  %v14643_v44 = vor.u32 %v6561_v5, %v6560_v28  ;;  %v14648_v38 = vsel %vm6533_vm4, %v14610_v7, %v14637_v22  ;;  %v4546_v4 = vor.u32 %v4544_v33, %v4534_v9  ;;  %v10961_v33 = vld [vmem:[#allocation7 + $0x4] ss:$16 sps:$4 sm:$0xff]   ;;  %v10964_v9 = vld [vmem:[#allocation7 + $0xc] ss:$16 sps:$4 sm:$0xff]  }
 0x4fd   : > { %v14650_v35 = vpack.c.bf16 %v4317_v26, %v4315_v0  ;;  %5005 = vmatmul.mubr.bf16.gmra.mxu0 %v4527_v36  ;;  %5118 = vmatmul.mubr.bf16.gmra.mxu1 %v4527_v36  ;;  %v4540_v10 = vshll.u32 %v14639_v58, 16  ;;  %v4552_v56 = vshrl.u32 %v14639_v58, 16 }
 0x4fe   : > { %v4019_v18 = vpop.f32.mrf.mxu0  ;;  %v4263_v48 = vpop.f32.mrf.mxu1  ;;  %5507 = vmatpush1.bf16.msra.mxu0 %v10941_v46  ;;  %5620 = vmatpush1.bf16.msra.mxu1 %v10944_v49  ;;  %v14657_v25 = vsel %vm6533_vm4, %v14616_v54, %v14643_v44  ;;  %v4318_v54 = vmax.f32 %v4017_v39, %v4261_v43  ;;  %v10959_v39 = vld [vmem:[#allocation7] ss:$16 sps:$4 sm:$0xff]   ;;  %v10962_v43 = vld [vmem:[#allocation7 + $0x8] ss:$16 sps:$4 sm:$0xff]  }
 0x4ff   : > { %5508 = vmatprep.subr.bf16.mxu0 %v10949_v52  ;;  %5621 = vmatprep.subr.bf16.mxu1 %v10952_v12  ;;  %v4548_v7 = vshll.u32 %v14650_v35, 16  ;;  %v4560_v63 = vshrl.u32 %v14650_v35, 16  ;;  %v4542_v23 = vrot.slane %v4540_v10, 1  ;;  %v6564_v29 = vrot.slane %v4552_v56, 1 }
 0x500   : > { %v4021_v47 = vpop.f32.mrf.mxu0  ;;  %v4265_v16 = vpop.f32.mrf.mxu1  ;;  %v6565_v50 = vrot.slane %v4540_v10, 2  ;;  %v4319_v45 = vmax.f32 %v4019_v18, %v4263_v48  ;;  %v10967_v10 = vld [vmem:[#allocation7 + $0x1e4] ss:$16 sps:$4 sm:$0xff]   ;;  %v10970_v18 = vld [vmem:[#allocation7 + $0x1ec] ss:$16 sps:$4 sm:$0xff]  }
 0x501   : > { %v4320_v61 = vmax.f32 %v4021_v47, %v4265_v16  ;;  %v4550_v8 = vrot.slane %v4548_v7, 1  ;;  %v6568_v15 = vrot.slane %v4560_v63, 1  ;;  %v6569_v57 = vrot.slane %v4548_v7, 2 }
 0x502   : > { %v4023_v53 = vpop.f32.mrf.mxu0  ;;  %v4267_v42 = vpop.f32.mrf.mxu1  ;;  %5509 = vmatpush1.bf16.msra.mxu0 %v10947_v31  ;;  %5622 = vmatpush1.bf16.msra.mxu1 %v10950_v14  ;;  %v14665_v24 = vor.u32 %v6565_v50, %v6564_v29  ;;  %v4543_v46 = vsel %vm4479_vm3, %v4538_v27, %v4542_v23  ;;  %v4554_v7 = vor.u32 %v4552_v56, %v4542_v23 }
 0x503   : > { %v14667_v41 = vpack.c.bf16 %v4320_v61, %v4318_v54  ;;  %v4321_v13 = vmax.f32 %v4023_v53, %v4267_v42  ;;  %v4551_v0 = vsel %vm4479_vm3, %v4546_v4, %v4550_v8  ;;  %5510 = vmatprep.subr.bf16.mxu0 %v10955_v37  ;;  %5623 = vmatprep.subr.bf16.mxu1 %v10958_v62  ;;  %v10965_v4 = vld [vmem:[#allocation7 + $0x1e0] ss:$16 sps:$4 sm:$0xff]  }
 0x504   : > { %v4027_v20 = vpop.f32.mrf.mxu0  ;;  %v4271_v3 = vpop.f32.mrf.mxu1  ;;  %5014 = vmatprep.mubr.bf16.mxu0 %v4551_v0  ;;  %5127 = vmatprep.mubr.bf16.mxu1 %v4551_v0  ;;  %v14671_v49 = vor.u32 %v6569_v57, %v6568_v15  ;;  %v14676_v28 = vsel %vm6533_vm4, %v14637_v22, %v14665_v24  ;;  %v4562_v27 = vor.u32 %v4560_v63, %v4550_v8  ;;  %v10973_v63 = vld [vmem:[#allocation7 + $0x1c4] ss:$16 sps:$4 sm:$0xff]   ;;  %v10976_v8 = vld [vmem:[#allocation7 + $0x1cc] ss:$16 sps:$4 sm:$0xff]  }
 0x505   : > { %v14678_v5 = vpack.c.bf16 %v4321_v13, %v4319_v45  ;;  %5015 = vmatmul.mubr.bf16.gmra.mxu0 %v4543_v46  ;;  %5128 = vmatmul.mubr.bf16.gmra.mxu1 %v4543_v46  ;;  %v4556_v26 = vshll.u32 %v14667_v41, 16  ;;  %v4568_v32 = vshrl.u32 %v14667_v41, 16  ;;  %v10968_v45 = vld [vmem:[#allocation7 + $0x1e8] ss:$16 sps:$4 sm:$0xff]  }
 0x506   : > { %v4029_v52 = vpop.f32.mrf.mxu0  ;;  %v4273_v12 = vpop.f32.mrf.mxu1  ;;  %5511 = vmatpush1.bf16.msra.mxu0 %v10953_v19  ;;  %5624 = vmatpush1.bf16.msra.mxu1 %v10956_v40  ;;  %v14685_v36 = vsel %vm6533_vm4, %v14643_v44, %v14671_v49  ;;  %v4322_v44 = vmax.f32 %v4027_v20, %v4271_v3 }
 0x507   : > { %5512 = vmatprep.subr.bf16.mxu0 %v10961_v33  ;;  %5625 = vmatprep.subr.bf16.mxu1 %v10964_v9  ;;  %v4564_v22 = vshll.u32 %v14678_v5, 16  ;;  %v4576_v48 = vshrl.u32 %v14678_v5, 16  ;;  %v4558_v37 = vrot.slane %v4556_v26, 1  ;;  %v6572_v62 = vrot.slane %v4568_v32, 1 }
 0x508   : > { %v4031_v31 = vpop.f32.mrf.mxu0  ;;  %v4275_v14 = vpop.f32.mrf.mxu1  ;;  %v6573_v47 = vrot.slane %v4556_v26, 2  ;;  %v4323_v50 = vmax.f32 %v4029_v52, %v4273_v12  ;;  %v10971_v52 = vld [vmem:[#allocation7 + $0x1c0] ss:$16 sps:$4 sm:$0xff]   ;;  %v10974_v12 = vld [vmem:[#allocation7 + $0x1c8] ss:$16 sps:$4 sm:$0xff]  }
 0x509   : > { %v4324_v16 = vmax.f32 %v4031_v31, %v4275_v14  ;;  %v4566_v29 = vrot.slane %v4564_v22, 1  ;;  %v6576_v53 = vrot.slane %v4576_v48, 1  ;;  %v6577_v42 = vrot.slane %v4564_v22, 2  ;;  %v10982_v22 = vld [vmem:[#allocation7 + $0x1ac] ss:$16 sps:$4 sm:$0xff]  }
 0x50a   : > { %v4033_v54 = vpop.f32.mrf.mxu0  ;;  %v4277_v61 = vpop.f32.mrf.mxu1  ;;  %5513 = vmatpush1.bf16.msra.mxu0 %v10959_v39  ;;  %5626 = vmatpush1.bf16.msra.mxu1 %v10962_v43  ;;  %v14693_v19 = vor.u32 %v6573_v47, %v6572_v62  ;;  %v4559_v13 = vsel %vm4479_vm3, %v4554_v7, %v4558_v37  ;;  %v10979_v43 = vld [vmem:[#allocation7 + $0x1a4] ss:$16 sps:$4 sm:$0xff]   ;;  %v4570_v14 = vor.u32 %v4568_v32, %v4558_v37 }
 0x50b   : > { %v14695_v56 = vpack.c.bf16 %v4324_v16, %v4322_v44  ;;  %v4325_v23 = vmax.f32 %v4033_v54, %v4277_v61  ;;  %v4567_v40 = vsel %vm4479_vm3, %v4562_v27, %v4566_v29  ;;  %5514 = vmatprep.subr.bf16.mxu0 %v10967_v10  ;;  %5627 = vmatprep.subr.bf16.mxu1 %v10970_v18 }
 0x50c   : > { %v4037_v15 = vpop.f32.mrf.mxu0  ;;  %v4281_v57 = vpop.f32.mrf.mxu1  ;;  %5024 = vmatprep.mubr.bf16.mxu0 %v4567_v40  ;;  %5137 = vmatprep.mubr.bf16.mxu1 %v4567_v40  ;;  %v14699_v0 = vor.u32 %v6577_v42, %v6576_v53  ;;  %v14704_v33 = vsel %vm6533_vm4, %v14665_v24, %v14693_v19  ;;  %v4578_v16 = vor.u32 %v4576_v48, %v4566_v29  ;;  %v10985_v48 = vld [vmem:[#allocation7 + $0x184] ss:$16 sps:$4 sm:$0xff]   ;;  %v10988_v29 = vld [vmem:[#allocation7 + $0x18c] ss:$16 sps:$4 sm:$0xff]  }
 0x50d   : > { %16659 = vst [vmem:[#allocation117_spill] sm:$0xff] %v14695_v56  ;;  %v14706_v9 = vpack.c.bf16 %v4325_v23, %v4323_v50  ;;  %5025 = vmatmul.mubr.bf16.gmra.mxu0 %v4559_v13  ;;  %5138 = vmatmul.mubr.bf16.gmra.mxu1 %v4559_v13  ;;  %v4572_v20 = vshll.u32 %v14695_v56, 16  ;;  %v4584_v3 = vshrl.u32 %v14695_v56, 16  ;;  %v4326_v47 = vmax.f32 %v4037_v15, %v4281_v57 }
 0x50e   : > { %v4039_v46 = vpop.f32.mrf.mxu0  ;;  %v4283_v26 = vpop.f32.mrf.mxu1  ;;  %5515 = vmatpush2.bf16.msra.mxu0 %v10965_v4  ;;  %5628 = vmatpush2.bf16.msra.mxu1 %v10968_v45  ;;  %v14713_v39 = vsel %vm6533_vm4, %v14671_v49, %v14699_v0  ;;  %v10977_v4 = vld [vmem:[#allocation7 + $0x1a0] ss:$16 sps:$4 sm:$0xff]   ;;  %v10980_v45 = vld [vmem:[#allocation7 + $0x1a8] ss:$16 sps:$4 sm:$0xff]  }
 0x50f   : > { %5516 = vmatprep.subr.bf16.mxu0 %v10973_v63  ;;  %5629 = vmatprep.subr.bf16.mxu1 %v10976_v8  ;;  %v4580_v24 = vshll.u32 %v14706_v9, 16  ;;  %v4592_v10 = vshrl.u32 %v14706_v9, 16  ;;  %v14719_v7 = vrot.slane %v4572_v20, 1  ;;  %v6580_v62 = vrot.slane %v4584_v3, 1 }
 0x510   : > { %v4041_v18 = vpop.f32.mrf.mxu0  ;;  %v4285_v31 = vpop.f32.mrf.mxu1  ;;  %v6581_v49 = vrot.slane %v4572_v20, 2  ;;  %v4327_v50 = vmax.f32 %v4039_v46, %v4283_v26 }
 0x511   : > { %v4328_v44 = vmax.f32 %v4041_v18, %v4285_v31  ;;  %v4582_v27 = vrot.slane %v4580_v24, 1  ;;  %v6584_v53 = vrot.slane %v4592_v10, 1  ;;  %v6585_v42 = vrot.slane %v4580_v24, 2  ;;  %v10983_v24 = vld [vmem:[#allocation7 + $0x180] ss:$16 sps:$4 sm:$0xff]  }
 0x512   : > { %v4043_v54 = vpop.f32.mrf.mxu0  ;;  %v4287_v61 = vpop.f32.mrf.mxu1  ;;  %5517 = vmatpush2.bf16.msra.mxu0 %v10971_v52  ;;  %5630 = vmatpush2.bf16.msra.mxu1 %v10974_v12  ;;  %v14723_v32 = vor.u32 %v6581_v49, %v6580_v62  ;;  %v4575_v15 = vsel %vm4479_vm3, %v4570_v14, %v14719_v7  ;;  %v10991_v14 = vld [vmem:[#allocation7 + $0x164] ss:$16 sps:$4 sm:$0xff]   ;;  %v10994_v62 = vld [vmem:[#allocation7 + $0x16c] ss:$16 sps:$4 sm:$0xff]  }
 0x513   : > { %v14725_v37 = vpack.c.bf16 %v4328_v44, %v4326_v47  ;;  %v4329_v23 = vmax.f32 %v4043_v54, %v4287_v61  ;;  %v4583_v40 = vsel %vm4479_vm3, %v4578_v16, %v4582_v27  ;;  %5518 = vmatprep.subr.bf16.mxu0 %v10979_v43  ;;  %5631 = vmatprep.subr.bf16.mxu1 %v10982_v22  ;;  %v10986_v43 = vld [vmem:[#allocation7 + $0x188] ss:$16 sps:$4 sm:$0xff]  }
 0x514   : > { %v4047_v63 = vpop.f32.mrf.mxu0  ;;  %v4291_v8 = vpop.f32.mrf.mxu1  ;;  %5034 = vmatprep.mubr.bf16.mxu0 %v4583_v40  ;;  %5147 = vmatprep.mubr.bf16.mxu1 %v4583_v40  ;;  %v14730_v57 = vor.u32 %v6585_v42, %v6584_v53  ;;  %v14735_v13 = vsel %vm6533_vm4, %v14693_v19, %v14723_v32  ;;  %v10992_v40 = vld [vmem:[#allocation7 + $0x168] ss:$16 sps:$4 sm:$0xff]  }
 0x515   : > { %16660 = vst [vmem:[#allocation118_spill] sm:$0xff] %v14725_v37  ;;  %v14737_v20 = vpack.c.bf16 %v4329_v23, %v4327_v50  ;;  %v4330_v46 = vmax.f32 %v4047_v63, %v4291_v8  ;;  %5035 = vmatmul.mubr.bf16.gmra.mxu0 %v4575_v15  ;;  %5148 = vmatmul.mubr.bf16.gmra.mxu1 %v4575_v15  ;;  %v4588_v26 = vshll.u32 %v14725_v37, 16  ;;  %v4600_v49 = vshrl.u32 %v14725_v37, 16  ;;  %v11000_v8 = vld [vmem:[#allocation7 + $0x14c] ss:$16 sps:$4 sm:$0xff]  }
 0x516   : > { %v4049_v52 = vpop.f32.mrf.mxu0  ;;  %v4293_v12 = vpop.f32.mrf.mxu1  ;;  %5519 = vmatpush2.bf16.msra.mxu0 %v10977_v4  ;;  %5632 = vmatpush2.bf16.msra.mxu1 %v10980_v45  ;;  %v14743_v22 = vsel %vm6533_vm4, %v14699_v0, %v14730_v57  ;;  %v4594_v0 = vor.u32 %v4592_v10, %v4582_v27  ;;  %v10989_v4 = vld [vmem:[#allocation7 + $0x160] ss:$16 sps:$4 sm:$0xff]   ;;  %v4586_v23 = vor.u32 %v4584_v3, %v14719_v7 }
 0x517   : > { %16661 = vst [vmem:[#allocation119_spill] sm:$0xff] %v14737_v20  ;;  %v14745_v19 = vpack.c.bf16 %v4330_v46, %v4330_v46  ;;  %v4331_v18 = vmax.f32 %v4049_v52, %v4293_v12  ;;  %5520 = vmatprep.subr.bf16.mxu0 %v10985_v48  ;;  %5633 = vmatprep.subr.bf16.mxu1 %v10988_v29  ;;  %v4596_v31 = vshll.u32 %v14737_v20, 16  ;;  %v4590_v16 = vrot.slane %v4588_v26, 1  ;;  %v10997_v48 = vld [vmem:[#allocation7 + $0x144] ss:$16 sps:$4 sm:$0xff]  }
 0x518   : > { %v4051_v47 = vpop.f32.mrf.mxu0  ;;  %v4295_v44 = vpop.f32.mrf.mxu1  ;;  %v4608_v50 = vshrl.u32 %v14737_v20, 16  ;;  %v5834_v29 = vrot.slane %v14725_v37, 1  ;;  %v6588_v15 = vrot.slane %v4600_v49, 1 }
 0x519   : > { %16662 = vst [vmem:[#allocation120_spill] sm:$0xff] %v14745_v19  ;;  %v14750_v54 = vpack.c.bf16 %v4331_v18, %v4331_v18  ;;  %v4598_v61 = vrot.slane %v4596_v31, 1  ;;  %v6596_v45 = vshrl.u32 %v14745_v19, 16  ;;  %v4604_v63 = vshll.u32 %v14745_v19, 16  ;;  %v10998_v47 = vld [vmem:[#allocation7 + $0x148] ss:$16 sps:$4 sm:$0xff]  }
 0x51a   : > { %v4052_v53 = vpop.f32.mrf.mxu0  ;;  %v4296_v42 = vpop.f32.mrf.mxu1  ;;  %5521 = vmatpush2.bf16.msra.mxu0 %v10983_v24  ;;  %5634 = vmatpush2.bf16.msra.mxu1 %v10986_v43  ;;  %v4591_v46 = vsel %vm4479_vm3, %v4586_v23, %v4590_v16  ;;  %v5838_v3 = vrot.slane %v14745_v19, 1  ;;  %v6592_v7 = vrot.slane %v4608_v50, 1  ;;  %v6593_v24 = vrot.slane %v4596_v31, 2  ;;  %v11006_v31 = vld [vmem:[#allocation7 + $0x12c] ss:$16 sps:$4 sm:$0xff]  }
 0x51b   : > { %16663 = vst [vmem:[#allocation121_spill] sm:$0xff] %v14750_v54  ;;  %v4599_v10 = vsel %vm4479_vm3, %v4594_v0, %v4598_v61  ;;  %5522 = vmatprep.subr.bf16.mxu0 %v10991_v14  ;;  %5635 = vmatprep.subr.bf16.mxu1 %v10994_v62  ;;  %v4612_v27 = vshll.u32 %v14750_v54, 16  ;;  %v4610_v52 = vor.u32 %v4608_v50, %v4598_v61  ;;  %v6589_v43 = vrot.slane %v4588_v26, 2  ;;  %v10995_v62 = vld [vmem:[#allocation7 + $0x140] ss:$16 sps:$4 sm:$0xff]  }
 0x51c   : > { %5044 = vmatprep.mubr.bf16.mxu0 %v4599_v10  ;;  %5157 = vmatprep.mubr.bf16.mxu1 %v4599_v10  ;;  %v6602_v18 = vshrl.u32 %v14750_v54, 16  ;;  %v6598_v14 = vrot.slane %v6596_v45, 1  ;;  %v14766_v44 = vsel %vm5807_vm5, %v5834_v29, %v5838_v3  ;;  %v11003_v61 = vld [vmem:[#allocation7 + $0x124] ss:$16 sps:$4 sm:$0xff]   ;;  %v6594_v26 = vor.u32 %v6593_v24, %v6592_v7  ;;  %v11018_v7 = vld [vmem:[#allocation7 + $0x4ec] ss:$16 sps:$4 sm:$0xff]  }
 0x51d   : > { %5045 = vmatmul.mubr.bf16.gmra.mxu0 %v4591_v46  ;;  %5158 = vmatmul.mubr.bf16.gmra.mxu1 %v4591_v46  ;;  %v4614_v12 = vrot.slane %v4612_v27, 1  ;;  %v6605_v0 = vrot.slane %v4612_v27, 2  ;;  %v6590_v53 = vor.u32 %v6589_v43, %v6588_v15  ;;  %v6599_v45 = vrot.slane %v4604_v63, 2  ;;  %v11001_v27 = vld [vmem:[#allocation7 + $0x120] ss:$16 sps:$4 sm:$0xff]  }
 0x51e   : > { %5523 = vmatpush2.bf16.msra.mxu0 %v10989_v4  ;;  %5636 = vmatpush2.bf16.msra.mxu1 %v10992_v40  ;;  %v6604_v42 = vrot.slane %v6602_v18, 1  ;;  %v4606_v4 = vrot.slane %v4604_v63, 1  ;;  %v14771_v23 = vsel %vm6533_vm4, %v14730_v57, %v6594_v26  ;;  %v11004_v15 = vld [vmem:[#allocation7 + $0x128] ss:$16 sps:$4 sm:$0xff]   ;;  %v11009_v57 = vld [vmem:[#allocation7 + $0x104] ss:$16 sps:$4 sm:$0xff]  }
 0x51f   : > { %v4615_v50 = vsel %vm4479_vm3, %v4610_v52, %v4614_v12  ;;  %5524 = vmatprep.subr.bf16.mxu0 %v10997_v48  ;;  %5637 = vmatprep.subr.bf16.mxu1 %v11000_v8  ;;  %v14775_v40 = vsel %vm6533_vm4, %v14723_v32, %v6590_v53  ;;  %v4602_v48 = vor.u32 %v4600_v49, %v4590_v16  ;;  %v11012_v52 = vld [vmem:[#allocation7 + $0x10c] ss:$16 sps:$4 sm:$0xff]   ;;  %v11007_v32 = vld [vmem:[#allocation7 + $0x100] ss:$16 sps:$4 sm:$0xff]   ;;  %v11010_v49 = vld [vmem:[#allocation7 + $0x108] ss:$16 sps:$4 sm:$0xff]  }
 0x520   : > { %5054 = vmatprep.mubr.bf16.mxu0 %v4615_v50  ;;  %5167 = vmatprep.mubr.bf16.mxu1 %v4615_v50  ;;  %v6606_v10 = vor.u32 %v6605_v0, %v6604_v42  ;;  %v6600_v8 = vor.u32 %v6599_v45, %v6598_v14  ;;  %v11015_v16 = vld [vmem:[#allocation7 + $0x4e4] ss:$16 sps:$4 sm:$0xff]   ;;  %v11013_v12 = vld [vmem:[#allocation7 + $0x4e0] ss:$16 sps:$4 sm:$0xff]   ;;  %v11016_v24 = vld [vmem:[#allocation7 + $0x4e8] ss:$16 sps:$4 sm:$0xff]  }
 0x521   : > { %v4607_v63 = vsel %vm4479_vm3, %v4602_v48, %v4606_v4  ;;  %v11021_v43 = vld [vmem:[#allocation7 + $0x4c4] ss:$16 sps:$4 sm:$0xff]   ;;  %v11024_v18 = vld [vmem:[#allocation7 + $0x4cc] ss:$16 sps:$4 sm:$0xff]   ;;  %v11019_v14 = vld [vmem:[#allocation7 + $0x4c0] ss:$16 sps:$4 sm:$0xff]  }
 0x522   : > { %5525 = vmatpush2.bf16.msra.mxu0 %v10995_v62  ;;  %5638 = vmatpush2.bf16.msra.mxu1 %v10998_v47  ;;  %v14778_v46 = vsel %vm6533_vm4, %v6594_v26, %v6606_v10  ;;  %v14782_v3 = vsel %vm6533_vm4, %v6590_v53, %v6600_v8  ;;  %v11022_v62 = vld [vmem:[#allocation7 + $0x4c8] ss:$16 sps:$4 sm:$0xff]   ;;  %v11027_v47 = vld [vmem:[#allocation7 + $0x4a4] ss:$16 sps:$4 sm:$0xff]   ;;  %v11030_v0 = vld [vmem:[#allocation7 + $0x4ac] ss:$16 sps:$4 sm:$0xff]  }
 0x523   : > { %5526 = vmatprep.subr.bf16.mxu0 %v11003_v61  ;;  %5639 = vmatprep.subr.bf16.mxu1 %v11006_v31  ;;  %v11025_v50 = vld [vmem:[#allocation7 + $0x4a0] ss:$16 sps:$4 sm:$0xff]   ;;  %v11028_v61 = vld [vmem:[#allocation7 + $0x4a8] ss:$16 sps:$4 sm:$0xff]   ;;  %v11033_v31 = vld [vmem:[#allocation7 + $0x484] ss:$16 sps:$4 sm:$0xff]  }
 0x524   : > { %v11036_v26 = vld [vmem:[#allocation7 + $0x48c] ss:$16 sps:$4 sm:$0xff]   ;;  %v11031_v53 = vld [vmem:[#allocation7 + $0x480] ss:$16 sps:$4 sm:$0xff]   ;;  %v11034_v42 = vld [vmem:[#allocation7 + $0x488] ss:$16 sps:$4 sm:$0xff]  }
 0x525   : > { %5055 = vmatmul.mubr.bf16.gmra.mxu0 %v4607_v63  ;;  %5168 = vmatmul.mubr.bf16.gmra.mxu1 %v4607_v63  ;;  %v11039_v4 = vld [vmem:[#allocation7 + $0x464] ss:$16 sps:$4 sm:$0xff]   ;;  %v11042_v45 = vld [vmem:[#allocation7 + $0x46c] ss:$16 sps:$4 sm:$0xff]   ;;  %v11037_v10 = vld [vmem:[#allocation7 + $0x460] ss:$16 sps:$4 sm:$0xff]  }
 0x526   : > { %5527 = vmatpush2.bf16.msra.mxu0 %v11001_v27  ;;  %5530 = vmatprep.mubr.bf16.mxu0 %v14566_v55  ;;  %v11040_v48 = vld [vmem:[#allocation7 + $0x468] ss:$16 sps:$4 sm:$0xff]   ;;  %v11045_v27 = vld [vmem:[#allocation7 + $0x444] ss:$16 sps:$4 sm:$0xff]   ;;  %v11048_v8 = vld [vmem:[#allocation7 + $0x44c] ss:$16 sps:$4 sm:$0xff]  }
 0x527   : > { %5640 = vmatpush2.bf16.msra.mxu1 %v11004_v15  ;;  %5643 = vmatprep.mubr.bf16.mxu1 %v14566_v55  ;;  %v11043_v15 = vld [vmem:[#allocation7 + $0x440] ss:$16 sps:$4 sm:$0xff]   ;;  %v11046_v63 = vld [vmem:[#allocation7 + $0x448] ss:$16 sps:$4 sm:$0xff]  }
 0x528   : > { %5528 = vmatprep.subr.bf16.mxu0 %v11009_v57  ;;  %5641 = vmatprep.subr.bf16.mxu1 %v11012_v52  ;;  %v11051_v57 = vld [vmem:[#allocation7 + $0x424] ss:$16 sps:$4 sm:$0xff]   ;;  %v11054_v52 = vld [vmem:[#allocation7 + $0x42c] ss:$16 sps:$4 sm:$0xff]  }
 0x52a   : > { %5529 = vmatpush2.bf16.msra.mxu0 %v11007_v32  ;;  %v11049_v32 = vld [vmem:[#allocation7 + $0x420] ss:$16 sps:$4 sm:$0xff]  }
 0x52b   : > { %5642 = vmatpush2.bf16.msra.mxu1 %v11010_v49  ;;  %6178 = vmatprep.subr.bf16.mxu0 %v11015_v16  ;;  %v11052_v49 = vld [vmem:[#allocation7 + $0x428] ss:$16 sps:$4 sm:$0xff]   ;;  %v11057_v16 = vld [vmem:[#allocation7 + $0x404] ss:$16 sps:$4 sm:$0xff]  }
 0x52c   : > { %6291 = vmatprep.subr.bf16.mxu1 %v11018_v7  ;;  %v11060_v7 = vld [vmem:[#allocation7 + $0x40c] ss:$16 sps:$4 sm:$0xff]  }
 0x52d   : > { %5531 = vmatmul.mubr.bf16.vlgmr.msra.gmra.mxu0 %v14564_v11 }
 0x52e   : > { %5644 = vmatmul.mubr.bf16.vlgmr.msra.gmra.mxu1 %v14564_v11  ;;  %5540 = vmatprep.mubr.bf16.mxu0 %v14583_v17 }
 0x52f   : > { %5653 = vmatprep.mubr.bf16.mxu1 %v14583_v17  ;;  %6179 = vmatpush1.bf16.msra.mxu0 %v11013_v12  ;;  %v11055_v12 = vld [vmem:[#allocation7 + $0x400] ss:$16 sps:$4 sm:$0xff]  }
 0x530   : > { %6292 = vmatpush1.bf16.msra.mxu1 %v11016_v24  ;;  %6180 = vmatprep.subr.bf16.mxu0 %v11021_v43  ;;  %v11058_v24 = vld [vmem:[#allocation7 + $0x408] ss:$16 sps:$4 sm:$0xff]   ;;  %v11063_v43 = vld [vmem:[#allocation7 + $0x5e4] ss:$16 sps:$4 sm:$0xff]  }
 0x531   : > { %6293 = vmatprep.subr.bf16.mxu1 %v11024_v18  ;;  %v11066_v18 = vld [vmem:[#allocation7 + $0x5ec] ss:$16 sps:$4 sm:$0xff]  }
 0x533   : > { %6181 = vmatpush1.bf16.msra.mxu0 %v11019_v14  ;;  %v11061_v14 = vld [vmem:[#allocation7 + $0x5e0] ss:$16 sps:$4 sm:$0xff]  }
 0x534   : > { %6294 = vmatpush1.bf16.msra.mxu1 %v11022_v62  ;;  %6182 = vmatprep.subr.bf16.mxu0 %v11027_v47  ;;  %v11064_v62 = vld [vmem:[#allocation7 + $0x5e8] ss:$16 sps:$4 sm:$0xff]   ;;  %v11069_v47 = vld [vmem:[#allocation7 + $0x5c4] ss:$16 sps:$4 sm:$0xff]  }
 0x535   : > { %5541 = vmatmul.mubr.bf16.gmra.mxu0 %v14578_v60  ;;  %6295 = vmatprep.subr.bf16.mxu1 %v11030_v0  ;;  %v11072_v0 = vld [vmem:[#allocation7 + $0x5cc] ss:$16 sps:$4 sm:$0xff]  }
 0x536   : > { %5654 = vmatmul.mubr.bf16.gmra.mxu1 %v14578_v60  ;;  %5550 = vmatprep.mubr.bf16.mxu0 %v14595_v30 }
 0x537   : > { %5663 = vmatprep.mubr.bf16.mxu1 %v14595_v30  ;;  %6183 = vmatpush1.bf16.msra.mxu0 %v11025_v50  ;;  %v11067_v50 = vld [vmem:[#allocation7 + $0x5c0] ss:$16 sps:$4 sm:$0xff]  }
 0x538   : > { %6296 = vmatpush1.bf16.msra.mxu1 %v11028_v61  ;;  %6184 = vmatprep.subr.bf16.mxu0 %v11033_v31  ;;  %v11070_v61 = vld [vmem:[#allocation7 + $0x5c8] ss:$16 sps:$4 sm:$0xff]   ;;  %v11075_v31 = vld [vmem:[#allocation7 + $0x5a4] ss:$16 sps:$4 sm:$0xff]  }
 0x539   : > { %6297 = vmatprep.subr.bf16.mxu1 %v11036_v26  ;;  %v11078_v26 = vld [vmem:[#allocation7 + $0x5ac] ss:$16 sps:$4 sm:$0xff]  }
 0x53b   : > { %6185 = vmatpush1.bf16.msra.mxu0 %v11031_v53  ;;  %v11073_v53 = vld [vmem:[#allocation7 + $0x5a0] ss:$16 sps:$4 sm:$0xff]  }
 0x53c   : > { %6298 = vmatpush1.bf16.msra.mxu1 %v11034_v42  ;;  %6186 = vmatprep.subr.bf16.mxu0 %v11039_v4  ;;  %v11076_v42 = vld [vmem:[#allocation7 + $0x5a8] ss:$16 sps:$4 sm:$0xff]   ;;  %v11081_v4 = vld [vmem:[#allocation7 + $0x584] ss:$16 sps:$4 sm:$0xff]  }
 0x53d   : > { %5551 = vmatmul.mubr.bf16.gmra.mxu0 %v14589_v21  ;;  %6299 = vmatprep.subr.bf16.mxu1 %v11042_v45  ;;  %v11084_v45 = vld [vmem:[#allocation7 + $0x58c] ss:$16 sps:$4 sm:$0xff]  }
 0x53e   : > { %5664 = vmatmul.mubr.bf16.gmra.mxu1 %v14589_v21  ;;  %5560 = vmatprep.mubr.bf16.mxu0 %v14622_v34 }
 0x53f   : > { %5673 = vmatprep.mubr.bf16.mxu1 %v14622_v34  ;;  %6187 = vmatpush1.bf16.msra.mxu0 %v11037_v10  ;;  %v11079_v10 = vld [vmem:[#allocation7 + $0x580] ss:$16 sps:$4 sm:$0xff]  }
 0x540   : > { %6300 = vmatpush1.bf16.msra.mxu1 %v11040_v48  ;;  %6188 = vmatprep.subr.bf16.mxu0 %v11045_v27  ;;  %v11082_v48 = vld [vmem:[#allocation7 + $0x588] ss:$16 sps:$4 sm:$0xff]   ;;  %v11087_v27 = vld [vmem:[#allocation7 + $0x564] ss:$16 sps:$4 sm:$0xff]  }
 0x541   : > { %6301 = vmatprep.subr.bf16.mxu1 %v11048_v8  ;;  %v11090_v8 = vld [vmem:[#allocation7 + $0x56c] ss:$16 sps:$4 sm:$0xff]  }
 0x543   : > { %6189 = vmatpush1.bf16.msra.mxu0 %v11043_v15  ;;  %v11085_v15 = vld [vmem:[#allocation7 + $0x560] ss:$16 sps:$4 sm:$0xff]  }
 0x544   : > { %6302 = vmatpush1.bf16.msra.mxu1 %v11046_v63  ;;  %6190 = vmatprep.subr.bf16.mxu0 %v11051_v57  ;;  %v11088_v63 = vld [vmem:[#allocation7 + $0x568] ss:$16 sps:$4 sm:$0xff]   ;;  %v11093_v57 = vld [vmem:[#allocation7 + $0x544] ss:$16 sps:$4 sm:$0xff]  }
 0x545   : > { %5561 = vmatmul.mubr.bf16.gmra.mxu0 %v14612_v59  ;;  %6303 = vmatprep.subr.bf16.mxu1 %v11054_v52  ;;  %v11096_v52 = vld [vmem:[#allocation7 + $0x54c] ss:$16 sps:$4 sm:$0xff]  }
 0x546   : > { %5674 = vmatmul.mubr.bf16.gmra.mxu1 %v14612_v59  ;;  %5570 = vmatprep.mubr.bf16.mxu0 %v14650_v35 }
 0x547   : > { %5683 = vmatprep.mubr.bf16.mxu1 %v14650_v35  ;;  %6191 = vmatpush1.bf16.msra.mxu0 %v11049_v32  ;;  %v11091_v32 = vld [vmem:[#allocation7 + $0x540] ss:$16 sps:$4 sm:$0xff]  }
 0x548   : > { %6304 = vmatpush1.bf16.msra.mxu1 %v11052_v49  ;;  %6192 = vmatprep.subr.bf16.mxu0 %v11057_v16  ;;  %v11094_v49 = vld [vmem:[#allocation7 + $0x548] ss:$16 sps:$4 sm:$0xff]   ;;  %v11099_v16 = vld [vmem:[#allocation7 + $0x524] ss:$16 sps:$4 sm:$0xff]  }
 0x549   : > { %6305 = vmatprep.subr.bf16.mxu1 %v11060_v7  ;;  %v11102_v7 = vld [vmem:[#allocation7 + $0x52c] ss:$16 sps:$4 sm:$0xff]  }
 0x54b   : > { %6193 = vmatpush1.bf16.msra.mxu0 %v11055_v12  ;;  %v5812_v12 = vrot.slane %v14583_v17, 1 }
 0x54c   : > { %6306 = vmatpush1.bf16.msra.mxu1 %v11058_v24  ;;  %6194 = vmatprep.subr.bf16.mxu0 %v11063_v43  ;;  %v11097_v24 = vld [vmem:[#allocation7 + $0x520] ss:$16 sps:$4 sm:$0xff]   ;;  %v5811_v43 = vrot.slane %v14566_v55, 1 }
 0x54d   : > { %5571 = vmatmul.mubr.bf16.gmra.mxu0 %v14639_v58  ;;  %6307 = vmatprep.subr.bf16.mxu1 %v11066_v18  ;;  %v11100_v18 = vld [vmem:[#allocation7 + $0x528] ss:$16 sps:$4 sm:$0xff]  }
 0x54e   : > { %5684 = vmatmul.mubr.bf16.gmra.mxu1 %v14639_v58  ;;  %5580 = vmatprep.mubr.bf16.mxu0 %v14678_v5 }
 0x54f   : > { %5693 = vmatprep.mubr.bf16.mxu1 %v14678_v5  ;;  %6195 = vmatpush2.bf16.msra.mxu0 %v11061_v14  ;;  %v11105_v14 = vld [vmem:[#allocation7 + $0x504] ss:$16 sps:$4 sm:$0xff]  }
 0x550   : > { %6308 = vmatpush2.bf16.msra.mxu1 %v11064_v62  ;;  %6196 = vmatprep.subr.bf16.mxu0 %v11069_v47  ;;  %v5813_v62 = vsel %vm5807_vm5, %v5811_v43, %v5812_v12  ;;  %v11108_v47 = vld [vmem:[#allocation7 + $0x50c] ss:$16 sps:$4 sm:$0xff]  }
 0x551   : > { %6309 = vmatprep.subr.bf16.mxu1 %v11072_v0  ;;  %v11103_v0 = vld [vmem:[#allocation7 + $0x500] ss:$16 sps:$4 sm:$0xff]  }
 0x553   : > { %6197 = vmatpush2.bf16.msra.mxu0 %v11067_v50  ;;  %v11106_v50 = vld [vmem:[#allocation7 + $0x508] ss:$16 sps:$4 sm:$0xff]  }
 0x554   : > { %6310 = vmatpush2.bf16.msra.mxu1 %v11070_v61  ;;  %6198 = vmatprep.subr.bf16.mxu0 %v11075_v31  ;;  %v11111_v61 = vld [vmem:[#allocation7 + $0x6e4] ss:$16 sps:$4 sm:$0xff]   ;;  %v5809_v31 = vrot.slane %v14578_v60, 1 }
 0x555   : > { %5581 = vmatmul.mubr.bf16.gmra.mxu0 %v14667_v41  ;;  %6311 = vmatprep.subr.bf16.mxu1 %v11078_v26  ;;  %v11114_v26 = vld [vmem:[#allocation7 + $0x6ec] ss:$16 sps:$4 sm:$0xff]  }
 0x556   : > { %5694 = vmatmul.mubr.bf16.gmra.mxu1 %v14667_v41  ;;  %5590 = vmatprep.mubr.bf16.mxu0 %v14706_v9 }
 0x557   : > { %5703 = vmatprep.mubr.bf16.mxu1 %v14706_v9  ;;  %6199 = vmatpush2.bf16.msra.mxu0 %v11073_v53  ;;  %v5816_v53 = vrot.slane %v14595_v30, 1 }
 0x558   : > { %6312 = vmatpush2.bf16.msra.mxu1 %v11076_v42  ;;  %6200 = vmatprep.subr.bf16.mxu0 %v11081_v4  ;;  %v5808_v42 = vrot.slane %v14564_v11, 1  ;;  %v11109_v4 = vld [vmem:[#allocation7 + $0x6e0] ss:$16 sps:$4 sm:$0xff]  }
 0x559   : > { %6313 = vmatprep.subr.bf16.mxu1 %v11084_v45 }
 0x55a   : > { %v5810_v45 = vsel %vm5807_vm5, %v5808_v42, %v5809_v31  ;;  %v11141_v42 = vld [vmem:[#allocation7 + $0x644] ss:$16 sps:$4 sm:$0xff]  }
 0x55b   : > { %6201 = vmatpush2.bf16.msra.mxu0 %v11079_v10  ;;  %v11112_v10 = vld [vmem:[#allocation7 + $0x6e8] ss:$16 sps:$4 sm:$0xff]  }
 0x55c   : > { %6314 = vmatpush2.bf16.msra.mxu1 %v11082_v48  ;;  %6202 = vmatprep.subr.bf16.mxu0 %v11087_v27  ;;  %v11117_v48 = vld [vmem:[#allocation7 + $0x6c4] ss:$16 sps:$4 sm:$0xff]   ;;  %v5817_v27 = vsel %vm5807_vm5, %v5812_v12, %v5816_v53  ;;  %v11124_v12 = vld [vmem:[#allocation7 + $0x6a8] ss:$16 sps:$4 sm:$0xff]  }
 0x55d   : > { %5591 = vmatmul.mubr.bf16.gmra.mxu0 %v14695_v56  ;;  %6315 = vmatprep.subr.bf16.mxu1 %v11090_v8  ;;  %v11120_v8 = vld [vmem:[#allocation7 + $0x6cc] ss:$16 sps:$4 sm:$0xff]  }
 0x55e   : > { %5704 = vmatmul.mubr.bf16.gmra.mxu1 %v14695_v56  ;;  %5600 = vmatprep.mubr.bf16.mxu0 %v14737_v20 }
 0x55f   : > { %5713 = vmatprep.mubr.bf16.mxu1 %v14737_v20  ;;  %6203 = vmatpush2.bf16.msra.mxu0 %v11085_v15  ;;  %v11115_v15 = vld [vmem:[#allocation7 + $0x6c0] ss:$16 sps:$4 sm:$0xff]  }
 0x560   : > { %6316 = vmatpush2.bf16.msra.mxu1 %v11088_v63  ;;  %6204 = vmatprep.subr.bf16.mxu0 %v11093_v57  ;;  %v11118_v63 = vld [vmem:[#allocation7 + $0x6c8] ss:$16 sps:$4 sm:$0xff]   ;;  %v5814_v57 = vrot.slane %v14589_v21, 1 }
 0x561   : > { %6317 = vmatprep.subr.bf16.mxu1 %v11096_v52  ;;  %v11123_v52 = vld [vmem:[#allocation7 + $0x6a4] ss:$16 sps:$4 sm:$0xff]  }
 0x563   : > { %6205 = vmatpush2.bf16.msra.mxu0 %v11091_v32  ;;  %v11126_v32 = vld [vmem:[#allocation7 + $0x6ac] ss:$16 sps:$4 sm:$0xff]  }
 0x564   : > { %6318 = vmatpush2.bf16.msra.mxu1 %v11094_v49  ;;  %6206 = vmatprep.subr.bf16.mxu0 %v11099_v16  ;;  %v5820_v49 = vrot.slane %v14622_v34, 1  ;;  %v11121_v16 = vld [vmem:[#allocation7 + $0x6a0] ss:$16 sps:$4 sm:$0xff]  }
 0x565   : > { %5601 = vmatmul.mubr.bf16.gmra.mxu0 %v14725_v37  ;;  %6319 = vmatprep.subr.bf16.mxu1 %v11102_v7  ;;  %v5815_v7 = vsel %vm5807_vm5, %v5809_v31, %v5814_v57  ;;  %v11133_v31 = vld [vmem:[#allocation7 + $0x660] ss:$16 sps:$4 sm:$0xff]  }
 0x566   : > { %5714 = vmatmul.mubr.bf16.gmra.mxu1 %v14725_v37  ;;  %6210 = vmatprep.mubr.bf16.mxu0 %v5813_v62  ;;  %v5821_v43 = vsel %vm5807_vm5, %v5816_v53, %v5820_v49  ;;  %v11136_v53 = vld [vmem:[#allocation7 + $0x668] ss:$16 sps:$4 sm:$0xff]  }
 0x567   : > { %6207 = vmatpush2.bf16.msra.mxu0 %v11097_v24  ;;  %6323 = vmatprep.mubr.bf16.mxu1 %v5813_v62  ;;  %v11129_v24 = vld [vmem:[#allocation7 + $0x684] ss:$16 sps:$4 sm:$0xff]   ;;  %v11130_v62 = vld [vmem:[#allocation7 + $0x688] ss:$16 sps:$4 sm:$0xff]  }
 0x568   : > { %6320 = vmatpush2.bf16.msra.mxu1 %v11100_v18  ;;  %6208 = vmatprep.subr.bf16.mxu0 %v11105_v14  ;;  %v11132_v18 = vld [vmem:[#allocation7 + $0x68c] ss:$16 sps:$4 sm:$0xff]   ;;  %v11127_v14 = vld [vmem:[#allocation7 + $0x680] ss:$16 sps:$4 sm:$0xff]  }
 0x569   : > { %6321 = vmatprep.subr.bf16.mxu1 %v11108_v47  ;;  %v5818_v47 = vrot.slane %v14612_v59, 1 }
 0x56b   : > { %6209 = vmatpush2.bf16.msra.mxu0 %v11103_v0  ;;  %v11135_v0 = vld [vmem:[#allocation7 + $0x664] ss:$16 sps:$4 sm:$0xff]  }
 0x56c   : > { %6322 = vmatpush2.bf16.msra.mxu1 %v11106_v50  ;;  %6944 = vmatprep.subr.bf16.mxu0 %v11111_v61  ;;  %v11138_v50 = vld [vmem:[#allocation7 + $0x66c] ss:$16 sps:$4 sm:$0xff]   ;;  %v5824_v61 = vrot.slane %v14650_v35, 1 }
 0x56d   : > { %7057 = vmatprep.subr.bf16.mxu1 %v11114_v26  ;;  %v5819_v26 = vsel %vm5807_vm5, %v5814_v57, %v5818_v47  ;;  %v11145_v57 = vld [vmem:[#allocation7 + $0x620] ss:$16 sps:$4 sm:$0xff]  }
 0x56e   : > { %6211 = vmatmul.mubr.bf16.vlgmr.msra.gmra.mxu0 %v5810_v45 }
 0x56f   : > { %6324 = vmatmul.mubr.bf16.vlgmr.msra.gmra.mxu1 %v5810_v45  ;;  %6220 = vmatprep.mubr.bf16.mxu0 %v5817_v27  ;;  %v11144_v45 = vld [vmem:[#allocation7 + $0x64c] ss:$16 sps:$4 sm:$0xff]  }
 0x570   : > { %6333 = vmatprep.mubr.bf16.mxu1 %v5817_v27  ;;  %6945 = vmatpush1.bf16.msra.mxu0 %v11109_v4  ;;  %v5825_v4 = vsel %vm5807_vm5, %v5820_v49, %v5824_v61  ;;  %v5822_v27 = vrot.slane %v14639_v58, 1  ;;  %v11153_v49 = vld [vmem:[#allocation7 + $0x604] ss:$16 sps:$4 sm:$0xff]  }
 0x571   : > { %7058 = vmatpush1.bf16.msra.mxu1 %v11112_v10  ;;  %6946 = vmatprep.subr.bf16.mxu0 %v11117_v48  ;;  %v11139_v10 = vld [vmem:[#allocation7 + $0x640] ss:$16 sps:$4 sm:$0xff]   ;;  %v11142_v48 = vld [vmem:[#allocation7 + $0x648] ss:$16 sps:$4 sm:$0xff]  }
 0x572   : > { %7059 = vmatprep.subr.bf16.mxu1 %v11120_v8  ;;  %v11147_v8 = vld [vmem:[#allocation7 + $0x624] ss:$16 sps:$4 sm:$0xff]  }
 0x574   : > { %6947 = vmatpush1.bf16.msra.mxu0 %v11115_v15  ;;  %v11150_v15 = vld [vmem:[#allocation7 + $0x62c] ss:$16 sps:$4 sm:$0xff]  }
 0x575   : > { %7060 = vmatpush1.bf16.msra.mxu1 %v11118_v63  ;;  %6948 = vmatprep.subr.bf16.mxu0 %v11123_v52  ;;  %v5828_v63 = vrot.slane %v14678_v5, 1  ;;  %v5823_v52 = vsel %vm5807_vm5, %v5818_v47, %v5822_v27  ;;  %v11157_v47 = vld [vmem:[#allocation7 + $0x7e0] ss:$16 sps:$4 sm:$0xff]  }
 0x576   : > { %6221 = vmatmul.mubr.bf16.gmra.mxu0 %v5815_v7  ;;  %7061 = vmatprep.subr.bf16.mxu1 %v11126_v32  ;;  %v11148_v32 = vld [vmem:[#allocation7 + $0x628] ss:$16 sps:$4 sm:$0xff]  }
 0x577   : > { %6334 = vmatmul.mubr.bf16.gmra.mxu1 %v5815_v7  ;;  %6230 = vmatprep.mubr.bf16.mxu0 %v5821_v43  ;;  %v11156_v7 = vld [vmem:[#allocation7 + $0x60c] ss:$16 sps:$4 sm:$0xff]  }
 0x578   : > { %6343 = vmatprep.mubr.bf16.mxu1 %v5821_v43  ;;  %6949 = vmatpush1.bf16.msra.mxu0 %v11121_v16  ;;  %v5829_v16 = vsel %vm5807_vm5, %v5824_v61, %v5828_v63  ;;  %v5826_v43 = vrot.slane %v14667_v41, 1  ;;  %v11165_v61 = vld [vmem:[#allocation7 + $0x7c4] ss:$16 sps:$4 sm:$0xff]  }
 0x579   : > { %7062 = vmatpush1.bf16.msra.mxu1 %v11124_v12  ;;  %6950 = vmatprep.subr.bf16.mxu0 %v11129_v24  ;;  %v11151_v12 = vld [vmem:[#allocation7 + $0x600] ss:$16 sps:$4 sm:$0xff]   ;;  %v11154_v24 = vld [vmem:[#allocation7 + $0x608] ss:$16 sps:$4 sm:$0xff]  }
 0x57a   : > { %7063 = vmatprep.subr.bf16.mxu1 %v11132_v18  ;;  %v11159_v18 = vld [vmem:[#allocation7 + $0x7e4] ss:$16 sps:$4 sm:$0xff]  }
 0x57c   : > { %6951 = vmatpush1.bf16.msra.mxu0 %v11127_v14  ;;  %v11162_v14 = vld [vmem:[#allocation7 + $0x7ec] ss:$16 sps:$4 sm:$0xff]  }
 0x57d   : > { %7064 = vmatpush1.bf16.msra.mxu1 %v11130_v62  ;;  %6952 = vmatprep.subr.bf16.mxu0 %v11135_v0  ;;  %v5832_v62 = vrot.slane %v14706_v9, 1  ;;  %v5827_v0 = vsel %vm5807_vm5, %v5822_v27, %v5826_v43  ;;  %v11169_v27 = vld [vmem:[#allocation7 + $0x7a0] ss:$16 sps:$4 sm:$0xff]  }
 0x57e   : > { %6231 = vmatmul.mubr.bf16.gmra.mxu0 %v5819_v26  ;;  %7065 = vmatprep.subr.bf16.mxu1 %v11138_v50  ;;  %v11160_v50 = vld [vmem:[#allocation7 + $0x7e8] ss:$16 sps:$4 sm:$0xff]  }
 0x57f   : > { %6344 = vmatmul.mubr.bf16.gmra.mxu1 %v5819_v26  ;;  %6240 = vmatprep.mubr.bf16.mxu0 %v5825_v4  ;;  %v11168_v26 = vld [vmem:[#allocation7 + $0x7cc] ss:$16 sps:$4 sm:$0xff]  }
 0x580   : > { %6353 = vmatprep.mubr.bf16.mxu1 %v5825_v4  ;;  %6953 = vmatpush1.bf16.msra.mxu0 %v11133_v31  ;;  %v5833_v31 = vsel %vm5807_vm5, %v5828_v63, %v5832_v62  ;;  %v5830_v4 = vrot.slane %v14695_v56, 1  ;;  %v11177_v63 = vld [vmem:[#allocation7 + $0x784] ss:$16 sps:$4 sm:$0xff]  }
 0x581   : > { %7066 = vmatpush1.bf16.msra.mxu1 %v11136_v53  ;;  %6954 = vmatprep.subr.bf16.mxu0 %v11141_v42  ;;  %v11163_v53 = vld [vmem:[#allocation7 + $0x7c0] ss:$16 sps:$4 sm:$0xff]   ;;  %v11166_v42 = vld [vmem:[#allocation7 + $0x7c8] ss:$16 sps:$4 sm:$0xff]   ;;  %v11261_v56 = vld [vmem:[#allocation7 + $0x9c4] ss:$16 sps:$4 sm:$0xff]  }
 0x582   : > { %7067 = vmatprep.subr.bf16.mxu1 %v11144_v45  ;;  %v11171_v45 = vld [vmem:[#allocation7 + $0x7a4] ss:$16 sps:$4 sm:$0xff]  }
 0x584   : > { %6955 = vmatpush1.bf16.msra.mxu0 %v11139_v10  ;;  %v11174_v10 = vld [vmem:[#allocation7 + $0x7ac] ss:$16 sps:$4 sm:$0xff]  }
 0x585   : > { %7068 = vmatpush1.bf16.msra.mxu1 %v11142_v48  ;;  %6956 = vmatprep.subr.bf16.mxu0 %v11147_v8  ;;  %v5836_v48 = vrot.slane %v14737_v20, 1  ;;  %v5831_v8 = vsel %vm5807_vm5, %v5826_v43, %v5830_v4  ;;  %v5835_v43 = vsel %vm5807_vm5, %v5830_v4, %v5834_v29  ;;  %v11193_v29 = vld [vmem:[#allocation7 + $0x720] ss:$16 sps:$4 sm:$0xff]   ;;  %v11256_v20 = vld [vmem:[#allocation7 + $0x9e8] ss:$16 sps:$4 sm:$0xff]  }
 0x586   : > { %6241 = vmatmul.mubr.bf16.gmra.mxu0 %v5823_v52  ;;  %7069 = vmatprep.subr.bf16.mxu1 %v11150_v15  ;;  %v11172_v15 = vld [vmem:[#allocation7 + $0x7a8] ss:$16 sps:$4 sm:$0xff]   ;;  %v11199_v4 = vld [vmem:[#allocation7 + $0x700] ss:$16 sps:$4 sm:$0xff]  }
 0x587   : > { %6354 = vmatmul.mubr.bf16.gmra.mxu1 %v5823_v52  ;;  %6250 = vmatprep.mubr.bf16.mxu0 %v5829_v16  ;;  %v11180_v52 = vld [vmem:[#allocation7 + $0x78c] ss:$16 sps:$4 sm:$0xff]  }
 0x588   : > { %6363 = vmatprep.mubr.bf16.mxu1 %v5829_v16  ;;  %6957 = vmatpush1.bf16.msra.mxu0 %v11145_v57  ;;  %v5837_v57 = vsel %vm5807_vm5, %v5832_v62, %v5836_v48  ;;  %v11183_v16 = vld [vmem:[#allocation7 + $0x764] ss:$16 sps:$4 sm:$0xff]  }
 0x589   : > { %7070 = vmatpush1.bf16.msra.mxu1 %v11148_v32  ;;  %6958 = vmatprep.subr.bf16.mxu0 %v11153_v49  ;;  %v11175_v32 = vld [vmem:[#allocation7 + $0x780] ss:$16 sps:$4 sm:$0xff]   ;;  %v11178_v49 = vld [vmem:[#allocation7 + $0x788] ss:$16 sps:$4 sm:$0xff]  }
 0x58a   : > { %7071 = vmatprep.subr.bf16.mxu1 %v11156_v7  ;;  %v11186_v7 = vld [vmem:[#allocation7 + $0x76c] ss:$16 sps:$4 sm:$0xff]  }
 0x58c   : > { %6959 = vmatpush1.bf16.msra.mxu0 %v11151_v12  ;;  %v5840_v12 = vrot.slane %v14750_v54, 1 }
 0x58d   : > { %7072 = vmatpush1.bf16.msra.mxu1 %v11154_v24  ;;  %6960 = vmatprep.subr.bf16.mxu0 %v11159_v18  ;;  %v11181_v24 = vld [vmem:[#allocation7 + $0x760] ss:$16 sps:$4 sm:$0xff]   ;;  %v11184_v18 = vld [vmem:[#allocation7 + $0x768] ss:$16 sps:$4 sm:$0xff]  }
 0x58e   : > { %6251 = vmatmul.mubr.bf16.gmra.mxu0 %v5827_v0  ;;  %7073 = vmatprep.subr.bf16.mxu1 %v11162_v14  ;;  %v11189_v14 = vld [vmem:[#allocation7 + $0x744] ss:$16 sps:$4 sm:$0xff]   ;;  %v5841_v62 = vsel %vm5807_vm5, %v5836_v48, %v5840_v12  ;;  %v11210_v48 = vld [vmem:[#allocation7 + $0x8ec] ss:$16 sps:$4 sm:$0xff]  }
 0x58f   : > { %6364 = vmatmul.mubr.bf16.gmra.mxu1 %v5827_v0  ;;  %6260 = vmatprep.mubr.bf16.mxu0 %v5833_v31  ;;  %v11187_v0 = vld [vmem:[#allocation7 + $0x740] ss:$16 sps:$4 sm:$0xff]   ;;  %v11219_v12 = vld [vmem:[#allocation7 + $0x8a4] ss:$16 sps:$4 sm:$0xff]  }
 0x590   : > { %6373 = vmatprep.mubr.bf16.mxu1 %v5833_v31  ;;  %6961 = vmatpush2.bf16.msra.mxu0 %v11157_v47  ;;  %v11192_v47 = vld [vmem:[#allocation7 + $0x74c] ss:$16 sps:$4 sm:$0xff]  }
 0x591   : > { %7074 = vmatpush2.bf16.msra.mxu1 %v11160_v50  ;;  %6962 = vmatprep.subr.bf16.mxu0 %v11165_v61  ;;  %v11190_v50 = vld [vmem:[#allocation7 + $0x748] ss:$16 sps:$4 sm:$0xff]   ;;  %v11195_v61 = vld [vmem:[#allocation7 + $0x724] ss:$16 sps:$4 sm:$0xff]   ;;  %v11198_v31 = vld [vmem:[#allocation7 + $0x72c] ss:$16 sps:$4 sm:$0xff]  }
 0x592   : > { %7075 = vmatprep.subr.bf16.mxu1 %v11168_v26  ;;  %v11196_v26 = vld [vmem:[#allocation7 + $0x728] ss:$16 sps:$4 sm:$0xff]  }
 0x594   : > { %6963 = vmatpush2.bf16.msra.mxu0 %v11163_v53  ;;  %v11201_v53 = vld [vmem:[#allocation7 + $0x704] ss:$16 sps:$4 sm:$0xff]  }
 0x595   : > { %7076 = vmatpush2.bf16.msra.mxu1 %v11166_v42  ;;  %6964 = vmatprep.subr.bf16.mxu0 %v11171_v45  ;;  %v11204_v42 = vld [vmem:[#allocation7 + $0x70c] ss:$16 sps:$4 sm:$0xff]   ;;  %v11202_v45 = vld [vmem:[#allocation7 + $0x708] ss:$16 sps:$4 sm:$0xff]  }
 0x596   : > { %6261 = vmatmul.mubr.bf16.gmra.mxu0 %v5831_v8  ;;  %7077 = vmatprep.subr.bf16.mxu1 %v11174_v10  ;;  %v11207_v10 = vld [vmem:[#allocation7 + $0x8e4] ss:$16 sps:$4 sm:$0xff]  }
 0x597   : > { %6374 = vmatmul.mubr.bf16.gmra.mxu1 %v5831_v8  ;;  %6270 = vmatprep.mubr.bf16.mxu0 %v5837_v57 }
 0x598   : > { %6383 = vmatprep.mubr.bf16.mxu1 %v5837_v57  ;;  %6965 = vmatpush2.bf16.msra.mxu0 %v11169_v27 }
 0x599   : > { %7078 = vmatpush2.bf16.msra.mxu1 %v11172_v15  ;;  %6966 = vmatprep.subr.bf16.mxu0 %v11177_v63  ;;  %v11205_v15 = vld [vmem:[#allocation7 + $0x8e0] ss:$16 sps:$4 sm:$0xff]   ;;  %v11213_v63 = vld [vmem:[#allocation7 + $0x8c4] ss:$16 sps:$4 sm:$0xff]  }
 0x59a   : > { %7079 = vmatprep.subr.bf16.mxu1 %v11180_v52  ;;  %v11216_v52 = vld [vmem:[#allocation7 + $0x8cc] ss:$16 sps:$4 sm:$0xff]  }
 0x59c   : > { %6967 = vmatpush2.bf16.msra.mxu0 %v11175_v32 }
 0x59d   : > { %7080 = vmatpush2.bf16.msra.mxu1 %v11178_v49  ;;  %6968 = vmatprep.subr.bf16.mxu0 %v11183_v16  ;;  %v11211_v16 = vld [vmem:[#allocation7 + $0x8c0] ss:$16 sps:$4 sm:$0xff]  }
 0x59e   : > { %6271 = vmatmul.mubr.bf16.gmra.mxu0 %v5835_v43  ;;  %7081 = vmatprep.subr.bf16.mxu1 %v11186_v7  ;;  %v11214_v7 = vld [vmem:[#allocation7 + $0x8c8] ss:$16 sps:$4 sm:$0xff]  }
 0x59f   : > { %6384 = vmatmul.mubr.bf16.gmra.mxu1 %v5835_v43  ;;  %6280 = vmatprep.mubr.bf16.mxu0 %v5841_v62 }
 0x5a0   : > { %6393 = vmatprep.mubr.bf16.mxu1 %v5841_v62  ;;  %6969 = vmatpush2.bf16.msra.mxu0 %v11181_v24  ;;  %v11220_v62 = vld [vmem:[#allocation7 + $0x8a8] ss:$16 sps:$4 sm:$0xff]  }
 0x5a1   : > { %7082 = vmatpush2.bf16.msra.mxu1 %v11184_v18  ;;  %6970 = vmatprep.subr.bf16.mxu0 %v11189_v14  ;;  %v11217_v14 = vld [vmem:[#allocation7 + $0x8a0] ss:$16 sps:$4 sm:$0xff]  }
 0x5a2   : > { %7083 = vmatprep.subr.bf16.mxu1 %v11192_v47  ;;  %v11225_v47 = vld [vmem:[#allocation7 + $0x884] ss:$16 sps:$4 sm:$0xff]  }
 0x5a4   : > { %6971 = vmatpush2.bf16.msra.mxu0 %v11187_v0 }
 0x5a5   : > { %7084 = vmatpush2.bf16.msra.mxu1 %v11190_v50  ;;  %6972 = vmatprep.subr.bf16.mxu0 %v11195_v61  ;;  %v11228_v61 = vld [vmem:[#allocation7 + $0x88c] ss:$16 sps:$4 sm:$0xff]  }
 0x5a6   : > { %6281 = vmatmul.mubr.bf16.gmra.mxu0 %v14766_v44  ;;  %7085 = vmatprep.subr.bf16.mxu1 %v11198_v31 }
 0x5a7   : > { %6394 = vmatmul.mubr.bf16.gmra.mxu1 %v14766_v44  ;;  %6976 = vmatprep.mubr.bf16.mxu0 %v14601_v1  ;;  %v11208_v44 = vld [vmem:[#allocation7 + $0x8e8] ss:$16 sps:$4 sm:$0xff]  }
 0x5a8   : > { %6973 = vmatpush2.bf16.msra.mxu0 %v11193_v29  ;;  %7089 = vmatprep.mubr.bf16.mxu1 %v14601_v1 }
 0x5a9   : > { %7086 = vmatpush2.bf16.msra.mxu1 %v11196_v26  ;;  %6974 = vmatprep.subr.bf16.mxu0 %v11201_v53  ;;  %v11223_v26 = vld [vmem:[#allocation7 + $0x880] ss:$16 sps:$4 sm:$0xff]   ;;  %v11226_v53 = vld [vmem:[#allocation7 + $0x888] ss:$16 sps:$4 sm:$0xff]  }
 0x5aa   : > { %7087 = vmatprep.subr.bf16.mxu1 %v11204_v42  ;;  %v11231_v42 = vld [vmem:[#allocation7 + $0x864] ss:$16 sps:$4 sm:$0xff]  }
 0x5ac   : > { %6975 = vmatpush2.bf16.msra.mxu0 %v11199_v4 }
 0x5ad   : > { %7088 = vmatpush2.bf16.msra.mxu1 %v11202_v45  ;;  %v14853_v27 = vpop.f32.mrf.mxu0  ;;  %v14855_v8 = vpop.f32.mrf.mxu1  ;;  %7670 = vmatprep.subr.bf16.mxu0 %v11207_v10 }
 0x5ae   : > { %7783 = vmatprep.subr.bf16.mxu1 %v11210_v48  ;;  %v11229_v48 = vld [vmem:[#allocation7 + $0x860] ss:$16 sps:$4 sm:$0xff]  }
 0x5af   : > { %6977 = vmatmul.mubr.bf16.vlgmr.msra.gmra.mxu0 %v14604_v2  ;;  %v14858_v1 = vpop.f32.mrf.mxu0  ;;  %v14860_v57 = vpop.f32.mrf.mxu1 }
 0x5b0   : > { %7090 = vmatmul.mubr.bf16.vlgmr.msra.gmra.mxu1 %v14604_v2  ;;  %6986 = vmatprep.mubr.bf16.mxu0 %v14629_v6  ;;  %v11222_v2 = vld [vmem:[#allocation7 + $0x8ac] ss:$16 sps:$4 sm:$0xff]  }
 0x5b1   : > { %7099 = vmatprep.mubr.bf16.mxu1 %v14629_v6  ;;  %7671 = vmatpush1.bf16.msra.mxu0 %v11205_v15  ;;  %v14865_v32 = vpop.f32.mrf.mxu0  ;;  %v14867_v49 = vpop.f32.mrf.mxu1  ;;  %v11232_v15 = vld [vmem:[#allocation7 + $0x868] ss:$16 sps:$4 sm:$0xff]  }
 0x5b2   : > { %7784 = vmatpush1.bf16.msra.mxu1 %v11208_v44  ;;  %7672 = vmatprep.subr.bf16.mxu0 %v11213_v63  ;;  %v11237_v44 = vld [vmem:[#allocation7 + $0x844] ss:$16 sps:$4 sm:$0xff]  }
 0x5b3   : > { %7785 = vmatprep.subr.bf16.mxu1 %v11216_v52  ;;  %v14869_v24 = vpop.f32.mrf.mxu0  ;;  %v14871_v43 = vpop.f32.mrf.mxu1 }
 0x5b5   : > { %7673 = vmatpush1.bf16.msra.mxu0 %v11211_v16  ;;  %v14873_v18 = vpop.f32.mrf.mxu0  ;;  %v14875_v6 = vpop.f32.mrf.mxu1  ;;  %v11240_v16 = vld [vmem:[#allocation7 + $0x84c] ss:$16 sps:$4 sm:$0xff]  }
 0x5b6   : > { %7786 = vmatpush1.bf16.msra.mxu1 %v11214_v7  ;;  %7674 = vmatprep.subr.bf16.mxu0 %v11219_v12 }
 0x5b7   : > { %6987 = vmatmul.mubr.bf16.gmra.mxu0 %v14620_v51  ;;  %7787 = vmatprep.subr.bf16.mxu1 %v11222_v2  ;;  %v14878_v0 = vpop.f32.mrf.mxu0  ;;  %v14880_v50 = vpop.f32.mrf.mxu1  ;;  %v11235_v2 = vld [vmem:[#allocation7 + $0x840] ss:$16 sps:$4 sm:$0xff]  }
 0x5b8   : > { %7100 = vmatmul.mubr.bf16.gmra.mxu1 %v14620_v51  ;;  %6996 = vmatprep.mubr.bf16.mxu0 %v14657_v25  ;;  %v11234_v51 = vld [vmem:[#allocation7 + $0x86c] ss:$16 sps:$4 sm:$0xff]  }
 0x5b9   : > { %7109 = vmatprep.mubr.bf16.mxu1 %v14657_v25  ;;  %7675 = vmatpush1.bf16.msra.mxu0 %v11217_v14  ;;  %v14885_v31 = vpop.f32.mrf.mxu0  ;;  %v14887_v29 = vpop.f32.mrf.mxu1  ;;  %v11238_v14 = vld [vmem:[#allocation7 + $0x848] ss:$16 sps:$4 sm:$0xff]  }
 0x5ba   : > { %7788 = vmatpush1.bf16.msra.mxu1 %v11220_v62  ;;  %7676 = vmatprep.subr.bf16.mxu0 %v11225_v47  ;;  %v11243_v62 = vld [vmem:[#allocation7 + $0x824] ss:$16 sps:$4 sm:$0xff]  }
 0x5bb   : > { %7789 = vmatprep.subr.bf16.mxu1 %v11228_v61  ;;  %v14889_v4 = vpop.f32.mrf.mxu0  ;;  %v14891_v45 = vpop.f32.mrf.mxu1 }
 0x5bd   : > { %7677 = vmatpush1.bf16.msra.mxu0 %v11223_v26  ;;  %v14893_v10 = vpop.f32.mrf.mxu0  ;;  %v14895_v25 = vpop.f32.mrf.mxu1 }
 0x5be   : > { %7790 = vmatpush1.bf16.msra.mxu1 %v11226_v53  ;;  %7678 = vmatprep.subr.bf16.mxu0 %v11231_v42  ;;  %v11241_v53 = vld [vmem:[#allocation7 + $0x820] ss:$16 sps:$4 sm:$0xff]   ;;  %v11244_v42 = vld [vmem:[#allocation7 + $0x828] ss:$16 sps:$4 sm:$0xff]  }
 0x5bf   : > { %6997 = vmatmul.mubr.bf16.gmra.mxu0 %v14648_v38  ;;  %7791 = vmatprep.subr.bf16.mxu1 %v11234_v51  ;;  %v14898_v63 = vpop.f32.mrf.mxu0  ;;  %v14900_v52 = vpop.f32.mrf.mxu1  ;;  %v11249_v51 = vld [vmem:[#allocation7 + $0x804] ss:$16 sps:$4 sm:$0xff]  }
 0x5c0   : > { %7110 = vmatmul.mubr.bf16.gmra.mxu1 %v14648_v38  ;;  %7006 = vmatprep.mubr.bf16.mxu0 %v14685_v36  ;;  %v11246_v38 = vld [vmem:[#allocation7 + $0x82c] ss:$16 sps:$4 sm:$0xff]  }
 0x5c1   : > { %7119 = vmatprep.mubr.bf16.mxu1 %v14685_v36  ;;  %7679 = vmatpush1.bf16.msra.mxu0 %v11229_v48  ;;  %v14905_v7 = vpop.f32.mrf.mxu0  ;;  %v14907_v12 = vpop.f32.mrf.mxu1 }
 0x5c2   : > { %7792 = vmatpush1.bf16.msra.mxu1 %v11232_v15  ;;  %7680 = vmatprep.subr.bf16.mxu0 %v11237_v44  ;;  %v11252_v44 = vld [vmem:[#allocation7 + $0x80c] ss:$16 sps:$4 sm:$0xff]  }
 0x5c3   : > { %7793 = vmatprep.subr.bf16.mxu1 %v11240_v16  ;;  %v14909_v47 = vpop.f32.mrf.mxu0  ;;  %v14911_v61 = vpop.f32.mrf.mxu1 }
 0x5c5   : > { %7681 = vmatpush1.bf16.msra.mxu0 %v11235_v2  ;;  %v14913_v26 = vpop.f32.mrf.mxu0  ;;  %v14915_v36 = vpop.f32.mrf.mxu1 }
 0x5c6   : > { %7794 = vmatpush1.bf16.msra.mxu1 %v11238_v14  ;;  %7682 = vmatprep.subr.bf16.mxu0 %v11243_v62  ;;  %v11247_v14 = vld [vmem:[#allocation7 + $0x800] ss:$16 sps:$4 sm:$0xff]   ;;  %v11250_v62 = vld [vmem:[#allocation7 + $0x808] ss:$16 sps:$4 sm:$0xff]  }
 0x5c7   : > { %7007 = vmatmul.mubr.bf16.gmra.mxu0 %v14676_v28  ;;  %7795 = vmatprep.subr.bf16.mxu1 %v11246_v38  ;;  %v14918_v48 = vpop.f32.mrf.mxu0  ;;  %v14920_v15 = vpop.f32.mrf.mxu1  ;;  %v11255_v38 = vld [vmem:[#allocation7 + $0x9e4] ss:$16 sps:$4 sm:$0xff]  }
 0x5c8   : > { %7120 = vmatmul.mubr.bf16.gmra.mxu1 %v14676_v28  ;;  %7016 = vmatprep.mubr.bf16.mxu0 %v14713_v39  ;;  %v11258_v28 = vld [vmem:[#allocation7 + $0x9ec] ss:$16 sps:$4 sm:$0xff]  }
 0x5c9   : > { %7129 = vmatprep.mubr.bf16.mxu1 %v14713_v39  ;;  %7683 = vmatpush1.bf16.msra.mxu0 %v11241_v53  ;;  %v14925_v16 = vpop.f32.mrf.mxu0  ;;  %v14927_v2 = vpop.f32.mrf.mxu1  ;;  %v11253_v53 = vld [vmem:[#allocation7 + $0x9e0] ss:$16 sps:$4 sm:$0xff]  }
 0x5ca   : > { %7796 = vmatpush1.bf16.msra.mxu1 %v11244_v42  ;;  %7684 = vmatprep.subr.bf16.mxu0 %v11249_v51 }
 0x5cb   : > { %7797 = vmatprep.subr.bf16.mxu1 %v11252_v44  ;;  %v14929_v19 = vpop.f32.mrf.mxu0  ;;  %v14931_v54 = vpop.f32.mrf.mxu1  ;;  %v11264_v44 = vld [vmem:[#allocation7 + $0x9cc] ss:$16 sps:$4 sm:$0xff]  }
 0x5cd   : > { %7685 = vmatpush1.bf16.msra.mxu0 %v11247_v14  ;;  %v14933_v37 = vpop.f32.mrf.mxu0  ;;  %v14935_v39 = vpop.f32.mrf.mxu1 }
 0x5ce   : > { %16664 = vst [vmem:[#allocation122_spill] sm:$0xff] %v14933_v37  ;;  %16665 = vst [vmem:[#allocation123_spill] sm:$0xff] %v14935_v39  ;;  %7798 = vmatpush1.bf16.msra.mxu1 %v11250_v62  ;;  %7686 = vmatprep.subr.bf16.mxu0 %v11255_v38  ;;  %v11259_v38 = vld [vmem:[#allocation7 + $0x9c0] ss:$16 sps:$4 sm:$0xff]   ;;  %v11267_v39 = vld [vmem:[#allocation7 + $0x9a4] ss:$16 sps:$4 sm:$0xff]  }
 0x5cf   : > { %7017 = vmatmul.mubr.bf16.gmra.mxu0 %v14704_v33  ;;  %7799 = vmatprep.subr.bf16.mxu1 %v11258_v28  ;;  %v14938_v42 = vpop.f32.mrf.mxu0  ;;  %v14940_v51 = vpop.f32.mrf.mxu1  ;;  %v11262_v28 = vld [vmem:[#allocation7 + $0x9c8] ss:$16 sps:$4 sm:$0xff]  }
 0x5d0   : > { %16666 = vst [vmem:[#allocation124_spill] sm:$0xff] %v14938_v42  ;;  %16667 = vst [vmem:[#allocation125_spill] sm:$0xff] %v14940_v51  ;;  %7130 = vmatmul.mubr.bf16.gmra.mxu1 %v14704_v33  ;;  %7026 = vmatprep.mubr.bf16.mxu0 %v14743_v22  ;;  %v11270_v33 = vld [vmem:[#allocation7 + $0x9ac] ss:$16 sps:$4 sm:$0xff]  }
 0x5d1   : > { %7139 = vmatprep.mubr.bf16.mxu1 %v14743_v22  ;;  %7687 = vmatpush2.bf16.msra.mxu0 %v11253_v53  ;;  %v14945_v14 = vpop.f32.mrf.mxu0  ;;  %v14947_v62 = vpop.f32.mrf.mxu1  ;;  %v11265_v53 = vld [vmem:[#allocation7 + $0x9a0] ss:$16 sps:$4 sm:$0xff]  }
 0x5d2   : > { %16668 = vst [vmem:[#allocation126_spill] sm:$0xff] %v14945_v14  ;;  %16669 = vst [vmem:[#allocation127_spill] sm:$0xff] %v14947_v62  ;;  %7800 = vmatpush2.bf16.msra.mxu1 %v11256_v20  ;;  %7688 = vmatprep.subr.bf16.mxu0 %v11261_v56  ;;  %v11268_v62 = vld [vmem:[#allocation7 + $0x9a8] ss:$16 sps:$4 sm:$0xff]   ;;  %v11273_v14 = vld [vmem:[#allocation7 + $0x984] ss:$16 sps:$4 sm:$0xff]  }
 0x5d3   : > { %7801 = vmatprep.subr.bf16.mxu1 %v11264_v44  ;;  %v14949_v42 = vpop.f32.mrf.mxu0  ;;  %v14951_v51 = vpop.f32.mrf.mxu1  ;;  %v11276_v44 = vld [vmem:[#allocation7 + $0x98c] ss:$16 sps:$4 sm:$0xff]  }
 0x5d4   : > { %16670 = vst [vmem:[#allocation216_spill] sm:$0xff] %v14949_v42  ;;  %16671 = vst [vmem:[#allocation217_spill] sm:$0xff] %v14951_v51  ;;  %v11279_v51 = vld [vmem:[#allocation7 + $0x964] ss:$16 sps:$4 sm:$0xff]  }
 0x5d5   : > { %7689 = vmatpush2.bf16.msra.mxu0 %v11259_v38  ;;  %v14953_v37 = vpop.f32.mrf.mxu0  ;;  %v14955_v22 = vpop.f32.mrf.mxu1 }
 0x5d6   : > { %7802 = vmatpush2.bf16.msra.mxu1 %v11262_v28  ;;  %7690 = vmatprep.subr.bf16.mxu0 %v11267_v39  ;;  %v11271_v28 = vld [vmem:[#allocation7 + $0x980] ss:$16 sps:$4 sm:$0xff]  }
 0x5d7   : > { %7027 = vmatmul.mubr.bf16.gmra.mxu0 %v14735_v13  ;;  %7803 = vmatprep.subr.bf16.mxu1 %v11270_v33  ;;  %v14958_v56 = vpop.f32.mrf.mxu0  ;;  %v14960_v20 = vpop.f32.mrf.mxu1  ;;  %v11274_v33 = vld [vmem:[#allocation7 + $0x988] ss:$16 sps:$4 sm:$0xff]  }
 0x5d8   : > { %16672 = vst [vmem:[#allocation31_spill] sm:$0xff] %v14958_v56  ;;  %16673 = vst [vmem:[#allocation128_spill] sm:$0xff] %v14960_v20  ;;  %7140 = vmatmul.mubr.bf16.gmra.mxu1 %v14735_v13  ;;  %7036 = vmatprep.mubr.bf16.mxu0 %v14771_v23  ;;  %v11282_v13 = vld [vmem:[#allocation7 + $0x96c] ss:$16 sps:$4 sm:$0xff]  }
 0x5d9   : > { %7149 = vmatprep.mubr.bf16.mxu1 %v14771_v23  ;;  %7691 = vmatpush2.bf16.msra.mxu0 %v11265_v53  ;;  %v14965_v38 = vpop.f32.mrf.mxu0  ;;  %v14967_v39 = vpop.f32.mrf.mxu1  ;;  %v11277_v53 = vld [vmem:[#allocation7 + $0x960] ss:$16 sps:$4 sm:$0xff]  }
 0x5da   : > { %16674 = vst [vmem:[#allocation129_spill] sm:$0xff] %v14965_v38  ;;  %16675 = vst [vmem:[#allocation32_spill] sm:$0xff] %v14967_v39  ;;  %7804 = vmatpush2.bf16.msra.mxu1 %v11268_v62  ;;  %7692 = vmatprep.subr.bf16.mxu0 %v11273_v14  ;;  %v11280_v39 = vld [vmem:[#allocation7 + $0x968] ss:$16 sps:$4 sm:$0xff]   ;;  %v11285_v38 = vld [vmem:[#allocation7 + $0x944] ss:$16 sps:$4 sm:$0xff]  }
 0x5db   : > { %7805 = vmatprep.subr.bf16.mxu1 %v11276_v44  ;;  %v14969_v42 = vpop.f32.mrf.mxu0  ;;  %v14971_v20 = vpop.f32.mrf.mxu1  ;;  %v11288_v44 = vld [vmem:[#allocation7 + $0x94c] ss:$16 sps:$4 sm:$0xff]  }
 0x5dc   : > { %16676 = vst [vmem:[#allocation130_spill] sm:$0xff] %v14969_v42  ;;  %16677 = vst [vmem:[#allocation42_spill] sm:$0xff] %v14971_v20  ;;  %v11291_v20 = vld [vmem:[#allocation7 + $0x924] ss:$16 sps:$4 sm:$0xff]  }
 0x5dd   : > { %7693 = vmatpush2.bf16.msra.mxu0 %v11271_v28  ;;  %v14973_v56 = vpop.f32.mrf.mxu0  ;;  %v14975_v23 = vpop.f32.mrf.mxu1 }
 0x5de   : > { %7806 = vmatpush2.bf16.msra.mxu1 %v11274_v33  ;;  %7694 = vmatprep.subr.bf16.mxu0 %v11279_v51  ;;  %v11283_v33 = vld [vmem:[#allocation7 + $0x940] ss:$16 sps:$4 sm:$0xff]  }
 0x5df   : > { %7037 = vmatmul.mubr.bf16.gmra.mxu0 %v14775_v40  ;;  %7807 = vmatprep.subr.bf16.mxu1 %v11282_v13  ;;  %v14978_v14 = vpop.f32.mrf.mxu0  ;;  %v14980_v62 = vpop.f32.mrf.mxu1  ;;  %v11286_v13 = vld [vmem:[#allocation7 + $0x948] ss:$16 sps:$4 sm:$0xff]  }
 0x5e0   : > { %16678 = vst [vmem:[#allocation131_spill] sm:$0xff] %v14978_v14  ;;  %16679 = vst [vmem:[#allocation33_spill] sm:$0xff] %v14980_v62  ;;  %7150 = vmatmul.mubr.bf16.gmra.mxu1 %v14775_v40  ;;  %7046 = vmatprep.mubr.bf16.mxu0 %v14778_v46  ;;  %v11294_v40 = vld [vmem:[#allocation7 + $0x92c] ss:$16 sps:$4 sm:$0xff]   ;;  %v7304_v14 = vrot.slane %v14583_v17, 2 }
 0x5e1   : > { %7159 = vmatprep.mubr.bf16.mxu1 %v14778_v46  ;;  %7695 = vmatpush2.bf16.msra.mxu0 %v11277_v53  ;;  %v14985_v28 = vpop.f32.mrf.mxu0  ;;  %v14987_v51 = vpop.f32.mrf.mxu1 }
 0x5e2   : > { %16680 = vst [vmem:[#allocation132_spill] sm:$0xff] %v14985_v28  ;;  %16681 = vst [vmem:[#allocation133_spill] sm:$0xff] %v14987_v51  ;;  %7808 = vmatpush2.bf16.msra.mxu1 %v11280_v39  ;;  %7696 = vmatprep.subr.bf16.mxu0 %v11285_v38  ;;  %v11289_v28 = vld [vmem:[#allocation7 + $0x920] ss:$16 sps:$4 sm:$0xff]   ;;  %v7303_v51 = vrot.slane %v14566_v55, 2 }
 0x5e3   : > { %7809 = vmatprep.subr.bf16.mxu1 %v11288_v44  ;;  %v14989_v42 = vpop.f32.mrf.mxu0  ;;  %v14991_v62 = vpop.f32.mrf.mxu1  ;;  %v11292_v38 = vld [vmem:[#allocation7 + $0x928] ss:$16 sps:$4 sm:$0xff]   ;;  %v11297_v39 = vld [vmem:[#allocation7 + $0x904] ss:$16 sps:$4 sm:$0xff]  }
 0x5e4   : > { %16682 = vst [vmem:[#allocation34_spill] sm:$0xff] %v14989_v42  ;;  %16683 = vst [vmem:[#allocation134_spill] sm:$0xff] %v14991_v62  ;;  %v7305_v44 = vsel %vm686_vm0, %v7303_v51, %v7304_v14 }
 0x5e5   : > { %7697 = vmatpush2.bf16.msra.mxu0 %v11283_v33  ;;  %v14994_v46 = vpop.f32.mrf.mxu0  ;;  %v14996_v53 = vpop.f32.mrf.mxu1  ;;  %v11300_v33 = vld [vmem:[#allocation7 + $0x90c] ss:$16 sps:$4 sm:$0xff]  }
 0x5e6   : > { %7810 = vmatpush2.bf16.msra.mxu1 %v11286_v13  ;;  %7698 = vmatprep.subr.bf16.mxu0 %v11291_v20  ;;  %v11295_v13 = vld [vmem:[#allocation7 + $0x900] ss:$16 sps:$4 sm:$0xff]  }
 0x5e7   : > { %7047 = vmatmul.mubr.bf16.gmra.mxu0 %v14782_v3  ;;  %7811 = vmatprep.subr.bf16.mxu1 %v11294_v40  ;;  %v15001_v62 = vpop.f32.mrf.mxu0  ;;  %v15003_v17 = vpop.f32.mrf.mxu1  ;;  %v11298_v40 = vld [vmem:[#allocation7 + $0x908] ss:$16 sps:$4 sm:$0xff]  }
 0x5e8   : > { %16684 = vst [vmem:[#allocation46_spill] sm:$0xff] %v15003_v17  ;;  %7160 = vmatmul.mubr.bf16.gmra.mxu1 %v14782_v3  ;;  %7702 = vmatprep.mubr.bf16.mxu0 %v7305_v44  ;;  %v7301_v17 = vrot.slane %v14578_v60, 2  ;;  %v7308_v3 = vrot.slane %v14595_v30, 2 }
 0x5e9   : > { %7699 = vmatpush2.bf16.msra.mxu0 %v11289_v28  ;;  %7815 = vmatprep.mubr.bf16.mxu1 %v7305_v44  ;;  %v15006_v55 = vpop.f32.mrf.mxu0  ;;  %v15008_v20 = vpop.f32.mrf.mxu1  ;;  %v7300_v44 = vrot.slane %v14564_v11, 2 }
 0x5ea   : > { %16685 = vst [vmem:[#allocation135_spill] sm:$0xff] %v15008_v20  ;;  %7812 = vmatpush2.bf16.msra.mxu1 %v11292_v38  ;;  %7700 = vmatprep.subr.bf16.mxu0 %v11297_v39  ;;  %v7309_v60 = vsel %vm686_vm0, %v7304_v14, %v7308_v3  ;;  %v7306_v14 = vrot.slane %v14589_v21, 2 }
 0x5eb   : > { %7813 = vmatprep.subr.bf16.mxu1 %v11300_v33  ;;  %v15010_v51 = vpop.f32.mrf.mxu0  ;;  %v15012_v42 = vpop.f32.mrf.mxu1  ;;  %v7302_v33 = vsel %vm686_vm0, %v7300_v44, %v7301_v17 }
 0x5ec   : > { %16686 = vst [vmem:[#allocation35_spill] sm:$0xff] %v15010_v51  ;;  %16687 = vst [vmem:[#allocation136_spill] sm:$0xff] %v15012_v42 }
 0x5ed   : > { %7701 = vmatpush2.bf16.msra.mxu0 %v11295_v13  ;;  %v5532_v28 = vpop.f32.mrf.mxu0 }
 0x5ee   : > { %7814 = vmatpush2.bf16.msra.mxu1 %v11298_v40  ;;  %v15018_v20 = vadd.f32 %v5532_v28, %v14853_v27  ;;  %v5645_v38 = vpop.f32.mrf.mxu1 }
 0x5ef   : > { %v15021_v39 = vadd.f32 %v5645_v38, %v14855_v8  ;;  %v5534_v51 = vpop.f32.mrf.mxu0  ;;  %v7312_v38 = vrot.slane %v14622_v34, 2 }
 0x5f0   : > { %7703 = vmatmul.mubr.bf16.vlgmr.msra.gmra.mxu0 %v7302_v33  ;;  %v15026_v30 = vadd.f32 %v5534_v51, %v14858_v1  ;;  %v5647_v13 = vpop.f32.mrf.mxu1 }
 0x5f1   : > { %7816 = vmatmul.mubr.bf16.vlgmr.msra.gmra.mxu1 %v7302_v33  ;;  %7712 = vmatprep.mubr.bf16.mxu0 %v7309_v60  ;;  %v15029_v11 = vadd.f32 %v5647_v13, %v14860_v57  ;;  %v5536_v27 = vpop.f32.mrf.mxu0  ;;  %v7307_v13 = vsel %vm686_vm0, %v7301_v17, %v7306_v14 }
 0x5f2   : > { %7825 = vmatprep.mubr.bf16.mxu1 %v7309_v60  ;;  %v15032_v8 = vadd.f32 %v5536_v27, %v14865_v32  ;;  %v5649_v40 = vpop.f32.mrf.mxu1 }
 0x5f3   : > { %v15035_v28 = vadd.f32 %v5649_v40, %v14867_v49  ;;  %v5538_v44 = vpop.f32.mrf.mxu0 }
 0x5f4   : > { %v15039_v1 = vadd.f32 %v5538_v44, %v14869_v24  ;;  %v5651_v51 = vpop.f32.mrf.mxu1  ;;  %v7313_v24 = vsel %vm686_vm0, %v7308_v3, %v7312_v38  ;;  %v7310_v3 = vrot.slane %v14612_v59, 2 }
 0x5f5   : > { %v15043_v57 = vadd.f32 %v5651_v51, %v14871_v43  ;;  %v5542_v33 = vpop.f32.mrf.mxu0 }
 0x5f6   : > { %16688 = vst [vmem:[#allocation137_spill] sm:$0xff] %v15039_v1  ;;  %v15046_v32 = vadd.f32 %v5542_v33, %v14873_v18  ;;  %v5655_v60 = vpop.f32.mrf.mxu1  ;;  %v7316_v33 = vrot.slane %v14650_v35, 2 }
 0x5f7   : > { %16689 = vst [vmem:[#allocation36_spill] sm:$0xff] %v15043_v57  ;;  %v15049_v49 = vadd.f32 %v5655_v60, %v14875_v6  ;;  %v5544_v21 = vpop.f32.mrf.mxu0 }
 0x5f8   : > { %7713 = vmatmul.mubr.bf16.gmra.mxu0 %v7307_v13  ;;  %v15054_v27 = vadd.f32 %v5544_v21, %v14878_v0  ;;  %v5657_v34 = vpop.f32.mrf.mxu1  ;;  %v7311_v21 = vsel %vm686_vm0, %v7306_v14, %v7310_v3 }
 0x5f9   : > { %7826 = vmatmul.mubr.bf16.gmra.mxu1 %v7307_v13  ;;  %7722 = vmatprep.mubr.bf16.mxu0 %v7313_v24  ;;  %v15057_v43 = vadd.f32 %v5657_v34, %v14880_v50  ;;  %v5546_v18 = vpop.f32.mrf.mxu0 }
 0x5fa   : > { %7835 = vmatprep.mubr.bf16.mxu1 %v7313_v24  ;;  %v15060_v6 = vadd.f32 %v5546_v18, %v14885_v31  ;;  %v5659_v40 = vpop.f32.mrf.mxu1 }
 0x5fb   : > { %v15063_v17 = vadd.f32 %v5659_v40, %v14887_v29  ;;  %v5548_v44 = vpop.f32.mrf.mxu0 }
 0x5fc   : > { %v15067_v0 = vadd.f32 %v5548_v44, %v14889_v4  ;;  %v5661_v51 = vpop.f32.mrf.mxu1  ;;  %v7317_v4 = vsel %vm686_vm0, %v7312_v38, %v7316_v33  ;;  %v7314_v38 = vrot.slane %v14639_v58, 2  ;;  %v7320_v44 = vrot.slane %v14678_v5, 2 }
 0x5fd   : > { %v15071_v50 = vadd.f32 %v5661_v51, %v14891_v45  ;;  %v5552_v60 = vpop.f32.mrf.mxu0 }
 0x5fe   : > { %16690 = vst [vmem:[#allocation138_spill] sm:$0xff] %v15067_v0  ;;  %v15074_v31 = vadd.f32 %v5552_v60, %v14893_v10  ;;  %v5665_v13 = vpop.f32.mrf.mxu1 }
 0x5ff   : > { %16691 = vst [vmem:[#allocation50_spill] sm:$0xff] %v15071_v50  ;;  %v15077_v29 = vadd.f32 %v5665_v13, %v14895_v25  ;;  %v5554_v59 = vpop.f32.mrf.mxu0  ;;  %v7315_v13 = vsel %vm686_vm0, %v7310_v3, %v7314_v38 }
 0x600   : > { %7723 = vmatmul.mubr.bf16.gmra.mxu0 %v7311_v21  ;;  %v15082_v24 = vadd.f32 %v5554_v59, %v14898_v63  ;;  %v5667_v35 = vpop.f32.mrf.mxu1 }
 0x601   : > { %7836 = vmatmul.mubr.bf16.gmra.mxu1 %v7311_v21  ;;  %7732 = vmatprep.mubr.bf16.mxu0 %v7317_v4  ;;  %v15085_v45 = vadd.f32 %v5667_v35, %v14900_v52  ;;  %v5556_v10 = vpop.f32.mrf.mxu0 }
 0x602   : > { %7845 = vmatprep.mubr.bf16.mxu1 %v7317_v4  ;;  %v15088_v25 = vadd.f32 %v5556_v10, %v14905_v7  ;;  %v5669_v34 = vpop.f32.mrf.mxu1  ;;  %v7324_v10 = vrot.slane %v14706_v9, 2 }
 0x603   : > { %v15091_v14 = vadd.f32 %v5669_v34, %v14907_v12  ;;  %v5558_v18 = vpop.f32.mrf.mxu0 }
 0x604   : > { %v15095_v63 = vadd.f32 %v5558_v18, %v14909_v47  ;;  %v5671_v40 = vpop.f32.mrf.mxu1  ;;  %v7321_v47 = vsel %vm686_vm0, %v7316_v33, %v7320_v44  ;;  %v7318_v33 = vrot.slane %v14667_v41, 2  ;;  %v16695_v18 = vld [vmem:[#allocation122_spill] sm:$0xff] }
 0x605   : > { %v15099_v52 = vadd.f32 %v5671_v40, %v14911_v61  ;;  %v5562_v51 = vpop.f32.mrf.mxu0 }
 0x606   : > { %16692 = vst [vmem:[#allocation139_spill] sm:$0xff] %v15095_v63  ;;  %v15102_v7 = vadd.f32 %v5562_v51, %v14913_v26  ;;  %v5675_v60 = vpop.f32.mrf.mxu1  ;;  %v16696_v51 = vld [vmem:[#allocation123_spill] sm:$0xff] }
 0x607   : > { %16693 = vst [vmem:[#allocation37_spill] sm:$0xff] %v15099_v52  ;;  %v15105_v12 = vadd.f32 %v5675_v60, %v14915_v36  ;;  %v5564_v58 = vpop.f32.mrf.mxu0  ;;  %v7319_v60 = vsel %vm686_vm0, %v7314_v38, %v7318_v33  ;;  %v16700_v38 = vld [vmem:[#allocation127_spill] sm:$0xff] }
 0x608   : > { %7733 = vmatmul.mubr.bf16.gmra.mxu0 %v7315_v13  ;;  %v15110_v21 = vadd.f32 %v5564_v58, %v14918_v48  ;;  %v5677_v5 = vpop.f32.mrf.mxu1 }
 0x609   : > { %7846 = vmatmul.mubr.bf16.gmra.mxu1 %v7315_v13  ;;  %7742 = vmatprep.mubr.bf16.mxu0 %v7321_v47  ;;  %v15113_v61 = vadd.f32 %v5677_v5, %v14920_v15  ;;  %v5566_v26 = vpop.f32.mrf.mxu0  ;;  %v16697_v13 = vld [vmem:[#allocation124_spill] sm:$0xff] }
 0x60a   : > { %7855 = vmatprep.mubr.bf16.mxu1 %v7321_v47  ;;  %v15116_v36 = vadd.f32 %v5566_v26, %v14925_v16  ;;  %v5679_v59 = vpop.f32.mrf.mxu1  ;;  %v16699_v26 = vld [vmem:[#allocation126_spill] sm:$0xff] }
 0x60b   : > { %v15119_v3 = vadd.f32 %v5679_v59, %v14927_v2  ;;  %v5568_v4 = vpop.f32.mrf.mxu0 }
 0x60c   : > { %v15123_v48 = vadd.f32 %v5568_v4, %v14929_v19  ;;  %v5681_v35 = vpop.f32.mrf.mxu1  ;;  %v7325_v19 = vsel %vm686_vm0, %v7320_v44, %v7324_v10  ;;  %v16701_v44 = vld [vmem:[#allocation117_spill] sm:$0xff] }
 0x60d   : > { %v15127_v15 = vadd.f32 %v5681_v35, %v14931_v54  ;;  %v5572_v34 = vpop.f32.mrf.mxu0  ;;  %v16698_v54 = vld [vmem:[#allocation125_spill] sm:$0xff] }
 0x60e   : > { %16694 = vst [vmem:[#allocation140_spill] sm:$0xff] %v15123_v48  ;;  %v15130_v16 = vadd.f32 %v5572_v34, %v16695_v18  ;;  %v5685_v40 = vpop.f32.mrf.mxu1  ;;  %v7322_v18 = vrot.slane %v16701_v44, 2 }
 0x60f   : > { %v15133_v2 = vadd.f32 %v5685_v40, %v16696_v51  ;;  %v5574_v41 = vpop.f32.mrf.mxu0  ;;  %v16702_v51 = vld [vmem:[#allocation119_spill] sm:$0xff] }
 0x610   : > { %7743 = vmatmul.mubr.bf16.gmra.mxu0 %v7319_v60  ;;  %v15138_v58 = vadd.f32 %v5574_v41, %v16697_v13  ;;  %v5687_v9 = vpop.f32.mrf.mxu1 }
 0x611   : > { %7856 = vmatmul.mubr.bf16.gmra.mxu1 %v7319_v60  ;;  %7752 = vmatprep.mubr.bf16.mxu0 %v7325_v19  ;;  %v15141_v47 = vadd.f32 %v5687_v9, %v16698_v54  ;;  %v5576_v5 = vpop.f32.mrf.mxu0  ;;  %v7328_v60 = vrot.slane %v16702_v51, 2  ;;  %v7323_v54 = vsel %vm686_vm0, %v7318_v33, %v7322_v18  ;;  %v16704_v51 = vld [vmem:[#allocation128_spill] sm:$0xff] }
 0x612   : > { %7865 = vmatprep.mubr.bf16.mxu1 %v7325_v19  ;;  %v15144_v59 = vadd.f32 %v5576_v5, %v16699_v26  ;;  %v5689_v4 = vpop.f32.mrf.mxu1  ;;  %v16706_v33 = vld [vmem:[#allocation32_spill] sm:$0xff] }
 0x613   : > { %v15147_v35 = vadd.f32 %v5689_v4, %v16700_v38  ;;  %v15149_v34 = vpop.f32.mrf.mxu0  ;;  %v7329_v26 = vsel %vm686_vm0, %v7324_v10, %v7328_v60  ;;  %v16703_v4 = vld [vmem:[#allocation31_spill] sm:$0xff]  ;;  %v16707_v10 = vld [vmem:[#allocation118_spill] sm:$0xff] }
 0x614   : > { %v15152_v40 = vpop.f32.mrf.mxu1 }
 0x615   : > { %v5582_v41 = vpop.f32.mrf.mxu0 }
 0x616   : > { %v15156_v13 = vadd.f32 %v5582_v41, %v14953_v37  ;;  %v5695_v19 = vpop.f32.mrf.mxu1  ;;  %v16705_v41 = vld [vmem:[#allocation129_spill] sm:$0xff] }
 0x617   : > { %v15159_v9 = vadd.f32 %v5695_v19, %v14955_v22  ;;  %v5584_v5 = vpop.f32.mrf.mxu0 }
 0x618   : > { %7753 = vmatmul.mubr.bf16.gmra.mxu0 %v7323_v54  ;;  %v15164_v38 = vadd.f32 %v5584_v5, %v16703_v4  ;;  %v5697_v44 = vpop.f32.mrf.mxu1  ;;  %v7326_v5 = vrot.slane %v16707_v10, 2 }
 0x619   : > { %7866 = vmatmul.mubr.bf16.gmra.mxu1 %v7323_v54  ;;  %7762 = vmatprep.mubr.bf16.mxu0 %v7329_v26  ;;  %v15167_v48 = vadd.f32 %v5697_v44, %v16704_v51  ;;  %v5586_v37 = vpop.f32.mrf.mxu0  ;;  %v16708_v54 = vld [vmem:[#allocation121_spill] sm:$0xff] }
 0x61a   : > { %7875 = vmatprep.mubr.bf16.mxu1 %v7329_v26  ;;  %v15170_v22 = vadd.f32 %v5586_v37, %v16705_v41  ;;  %v5699_v19 = vpop.f32.mrf.mxu1  ;;  %v7332_v50 = vrot.slane %v16708_v54, 2  ;;  %v7327_v37 = vsel %vm686_vm0, %v7322_v18, %v7326_v5  ;;  %v16711_v54 = vld [vmem:[#allocation33_spill] sm:$0xff] }
 0x61b   : > { %v15173_v52 = vadd.f32 %v5699_v19, %v16706_v33  ;;  %v15175_v63 = vpop.f32.mrf.mxu0  ;;  %v16710_v33 = vld [vmem:[#allocation131_spill] sm:$0xff]  ;;  %v16713_v18 = vld [vmem:[#allocation133_spill] sm:$0xff] }
 0x61c   : > { %v15178_v4 = vpop.f32.mrf.mxu1  ;;  %v7333_v19 = vsel %vm686_vm0, %v7328_v60, %v7332_v50  ;;  %v16715_v50 = vld [vmem:[#allocation120_spill] sm:$0xff] }
 0x61d   : > { %v5592_v0 = vpop.f32.mrf.mxu0  ;;  %v7330_v60 = vrot.slane %v16715_v50, 2 }
 0x61e   : > { %v15182_v44 = vadd.f32 %v5592_v0, %v14973_v56  ;;  %v5705_v26 = vpop.f32.mrf.mxu1  ;;  %v16712_v0 = vld [vmem:[#allocation132_spill] sm:$0xff] }
 0x61f   : > { %v15185_v51 = vadd.f32 %v5705_v26, %v14975_v23  ;;  %v5594_v41 = vpop.f32.mrf.mxu0 }
 0x620   : > { %7763 = vmatmul.mubr.bf16.gmra.mxu0 %v7327_v37  ;;  %v15190_v10 = vadd.f32 %v5594_v41, %v16710_v33  ;;  %v5707_v57 = vpop.f32.mrf.mxu1 }
 0x621   : > { %16709 = vst [vmem:[#allocation141_spill] sm:$0xff] %v15185_v51  ;;  %7876 = vmatmul.mubr.bf16.gmra.mxu1 %v7327_v37  ;;  %7772 = vmatprep.mubr.bf16.mxu0 %v7333_v19  ;;  %v15193_v1 = vadd.f32 %v5707_v57, %v16711_v54  ;;  %v5596_v56 = vpop.f32.mrf.mxu0  ;;  %v7331_v54 = vsel %vm686_vm0, %v7326_v5, %v7330_v60  ;;  %v16719_v5 = vld [vmem:[#allocation135_spill] sm:$0xff] }
 0x622   : > { %7885 = vmatprep.mubr.bf16.mxu1 %v7333_v19  ;;  %v15196_v23 = vadd.f32 %v5596_v56, %v16712_v0  ;;  %v5709_v26 = vpop.f32.mrf.mxu1 }
 0x623   : > { %v15199_v42 = vadd.f32 %v5709_v26, %v16713_v18  ;;  %v15201_v51 = vpop.f32.mrf.mxu0  ;;  %v16717_v18 = vld [vmem:[#allocation46_spill] sm:$0xff] }
 0x624   : > { %v15204_v41 = vpop.f32.mrf.mxu1 }
 0x625   : > { %16714 = vst [vmem:[#allocation38_spill] sm:$0xff] %v15199_v42  ;;  %16716 = vst [vmem:[#allocation142_spill] sm:$0xff] %v15204_v41  ;;  %v5602_v37 = vpop.f32.mrf.mxu0  ;;  %v16718_v41 = vmov 0  }
 0x626   : > { %v15207_v33 = vadd.f32 %v5602_v37, %v14994_v46  ;;  %v5715_v57 = vpop.f32.mrf.mxu1 }
 0x627   : > { %v15210_v19 = vadd.f32 %v5715_v57, %v14996_v53  ;;  %v5604_v56 = vpop.f32.mrf.mxu0 }
 0x628   : > { %7773 = vmatmul.mubr.bf16.gmra.mxu0 %v7331_v54  ;;  %v15214_v0 = vadd.f32 %v5604_v56, %v15001_v62  ;;  %v5717_v26 = vpop.f32.mrf.mxu1 }
 0x629   : > { %7886 = vmatmul.mubr.bf16.gmra.mxu1 %v7331_v54  ;;  %v15217_v50 = vadd.f32 %v5717_v26, %v16717_v18  ;;  %v5606_v42 = vpop.f32.mrf.mxu0  ;;  %8069 = vmatprep.mubr.bf16.mxu0 %v16718_v41 }
 0x62a   : > { %v15221_v46 = vadd.f32 %v5606_v42, %v15006_v55  ;;  %v5719_v53 = vpop.f32.mrf.mxu1  ;;  %8170 = vmatprep.mubr.bf16.mxu1 %v16718_v41 }
 0x62b   : > { %v15225_v60 = vadd.f32 %v5719_v53, %v16719_v5  ;;  %v15227_v37 = vpop.f32.mrf.mxu0 }
 0x62c   : > { %v15229_v62 = vpop.f32.mrf.mxu1 }
 0x62d   : > { %16720 = vst [vmem:[#allocation54_spill] sm:$0xff] %v15225_v60 }
 0x62e   : > { %v6212_v57 = vpop.f32.mrf.mxu0 }
 0x62f   : > { %v15232_v54 = vadd.f32 %v6212_v57, %v15018_v20  ;;  %v6325_v56 = vpop.f32.mrf.mxu1 }
 0x630   : > { %v15235_v26 = vadd.f32 %v6325_v56, %v15021_v39  ;;  %v6214_v42 = vpop.f32.mrf.mxu0 }
 0x631   : > { %v15238_v55 = vadd.f32 %v6214_v42, %v15026_v30  ;;  %v6327_v18 = vpop.f32.mrf.mxu1 }
 0x632   : > { %v15241_v53 = vadd.f32 %v6327_v18, %v15029_v11  ;;  %v6216_v5 = vpop.f32.mrf.mxu0 }
 0x633   : > { %v15244_v41 = vadd.f32 %v6216_v5, %v15032_v8  ;;  %v6329_v60 = vpop.f32.mrf.mxu1 }
 0x634   : > { %v15247_v20 = vadd.f32 %v6329_v60, %v15035_v28  ;;  %v15249_v57 = vpop.f32.mrf.mxu0 }
 0x635   : > { %v15251_v39 = vpop.f32.mrf.mxu1 }
 0x636   : > { %16721 = vst [vmem:[#allocation143_spill] sm:$0xff] %v15247_v20  ;;  %16722 = vst [vmem:[#allocation39_spill] sm:$0xff] %v15251_v39  ;;  %v6222_v56 = vpop.f32.mrf.mxu0 }
 0x637   : > { %v15254_v30 = vadd.f32 %v6222_v56, %v15046_v32  ;;  %v6335_v42 = vpop.f32.mrf.mxu1 }
 0x638   : > { %v15257_v11 = vadd.f32 %v6335_v42, %v15049_v49  ;;  %v6224_v18 = vpop.f32.mrf.mxu0 }
 0x639   : > { %v15260_v8 = vadd.f32 %v6224_v18, %v15054_v27  ;;  %v6337_v5 = vpop.f32.mrf.mxu1 }
 0x63a   : > { %v15263_v28 = vadd.f32 %v6337_v5, %v15057_v43  ;;  %v6226_v60 = vpop.f32.mrf.mxu0 }
 0x63b   : > { %v15266_v20 = vadd.f32 %v6226_v60, %v15060_v6  ;;  %v6339_v39 = vpop.f32.mrf.mxu1 }
 0x63c   : > { %v15269_v32 = vadd.f32 %v6339_v39, %v15063_v17  ;;  %v15271_v56 = vpop.f32.mrf.mxu0 }
 0x63d   : > { %v15273_v49 = vpop.f32.mrf.mxu1 }
 0x63e   : > { %16723 = vst [vmem:[#allocation144_spill] sm:$0xff] %v15269_v32  ;;  %16724 = vst [vmem:[#allocation41_spill] sm:$0xff] %v15273_v49  ;;  %v6232_v42 = vpop.f32.mrf.mxu0 }
 0x63f   : > { %v15276_v27 = vadd.f32 %v6232_v42, %v15074_v31  ;;  %v6345_v18 = vpop.f32.mrf.mxu1 }
 0x640   : > { %v15279_v43 = vadd.f32 %v6345_v18, %v15077_v29  ;;  %v6234_v5 = vpop.f32.mrf.mxu0 }
 0x641   : > { %v15282_v6 = vadd.f32 %v6234_v5, %v15082_v24  ;;  %v6347_v60 = vpop.f32.mrf.mxu1 }
 0x642   : > { %v15285_v17 = vadd.f32 %v6347_v60, %v15085_v45  ;;  %v6236_v39 = vpop.f32.mrf.mxu0 }
 0x643   : > { %v15288_v32 = vadd.f32 %v6236_v39, %v15088_v25  ;;  %v6349_v49 = vpop.f32.mrf.mxu1 }
 0x644   : > { %v15291_v31 = vadd.f32 %v6349_v49, %v15091_v14  ;;  %v15293_v42 = vpop.f32.mrf.mxu0 }
 0x645   : > { %v15295_v29 = vpop.f32.mrf.mxu1 }
 0x646   : > { %16725 = vst [vmem:[#allocation146_spill] sm:$0xff] %v15291_v31  ;;  %16726 = vst [vmem:[#allocation58_spill] sm:$0xff] %v15295_v29  ;;  %v6242_v18 = vpop.f32.mrf.mxu0 }
 0x647   : > { %v15298_v24 = vadd.f32 %v6242_v18, %v15102_v7  ;;  %v6355_v5 = vpop.f32.mrf.mxu1 }
 0x648   : > { %v15301_v45 = vadd.f32 %v6355_v5, %v15105_v12  ;;  %v6244_v60 = vpop.f32.mrf.mxu0 }
 0x649   : > { %v15304_v25 = vadd.f32 %v6244_v60, %v15110_v21  ;;  %v6357_v39 = vpop.f32.mrf.mxu1 }
 0x64a   : > { %v15307_v14 = vadd.f32 %v6357_v39, %v15113_v61  ;;  %v6246_v49 = vpop.f32.mrf.mxu0 }
 0x64b   : > { %v15310_v31 = vadd.f32 %v6246_v49, %v15116_v36  ;;  %v6359_v29 = vpop.f32.mrf.mxu1 }
 0x64c   : > { %v15313_v7 = vadd.f32 %v6359_v29, %v15119_v3  ;;  %v15315_v18 = vpop.f32.mrf.mxu0 }
 0x64d   : > { %16727 = vst [vmem:[#allocation147_spill] sm:$0xff] %v15310_v31  ;;  %v6361_v12 = vpop.f32.mrf.mxu1  ;;  %v16731_v31 = vld [vmem:[#allocation216_spill] sm:$0xff] }
 0x64e   : > { %16728 = vst [vmem:[#allocation43_spill] sm:$0xff] %v15313_v7  ;;  %v15318_v5 = vadd.f32 %v6361_v12, %v15127_v15  ;;  %v6252_v21 = vpop.f32.mrf.mxu0  ;;  %v5579_v15 = vadd.f32 %v15149_v34, %v16731_v31 }
 0x64f   : > { %v15321_v60 = vadd.f32 %v6252_v21, %v15130_v16  ;;  %v6365_v61 = vpop.f32.mrf.mxu1  ;;  %v16732_v21 = vld [vmem:[#allocation217_spill] sm:$0xff] }
 0x650   : > { %v15324_v39 = vadd.f32 %v6365_v61, %v15133_v2  ;;  %v6254_v36 = vpop.f32.mrf.mxu0  ;;  %v5692_v2 = vadd.f32 %v15152_v40, %v16732_v21 }
 0x651   : > { %v15327_v49 = vadd.f32 %v6254_v36, %v15138_v58  ;;  %v6367_v3 = vpop.f32.mrf.mxu1 }
 0x652   : > { %v15330_v29 = vadd.f32 %v6367_v3, %v15141_v47  ;;  %v6256_v7 = vpop.f32.mrf.mxu0 }
 0x653   : > { %16729 = vst [vmem:[#allocation148_spill] sm:$0xff] %v15327_v49  ;;  %v15335_v12 = vadd.f32 %v6256_v7, %v15144_v59  ;;  %v6369_v16 = vpop.f32.mrf.mxu1 }
 0x654   : > { %16730 = vst [vmem:[#allocation45_spill] sm:$0xff] %v15330_v29  ;;  %v15340_v61 = vadd.f32 %v6369_v16, %v15147_v35  ;;  %v6258_v58 = vpop.f32.mrf.mxu0  ;;  %v16733_v16 = vld [vmem:[#allocation130_spill] sm:$0xff] }
 0x655   : > { %v15342_v36 = vadd.f32 %v6258_v58, %v5579_v15  ;;  %v6371_v49 = vpop.f32.mrf.mxu1 }
 0x656   : > { %v15344_v47 = vadd.f32 %v6371_v49, %v5692_v2  ;;  %v6262_v3 = vpop.f32.mrf.mxu0  ;;  %v5589_v49 = vadd.f32 %v15175_v63, %v16733_v16  ;;  %v16734_v2 = vld [vmem:[#allocation42_spill] sm:$0xff] }
 0x657   : > { %v15347_v29 = vadd.f32 %v6262_v3, %v15156_v13  ;;  %v6375_v34 = vpop.f32.mrf.mxu1 }
 0x658   : > { %v15350_v59 = vadd.f32 %v6375_v34, %v15159_v9  ;;  %v6264_v31 = vpop.f32.mrf.mxu0  ;;  %v5702_v9 = vadd.f32 %v15178_v4, %v16734_v2  ;;  %v16739_v2 = vld [vmem:[#allocation34_spill] sm:$0xff] }
 0x659   : > { %v15353_v40 = vadd.f32 %v6264_v31, %v15164_v38  ;;  %v6377_v35 = vpop.f32.mrf.mxu1 }
 0x65a   : > { %v15356_v7 = vadd.f32 %v6377_v35, %v15167_v48  ;;  %v6266_v15 = vpop.f32.mrf.mxu0 }
 0x65b   : > { %v15361_v21 = vadd.f32 %v6266_v15, %v15170_v22  ;;  %v6379_v13 = vpop.f32.mrf.mxu1  ;;  %v16735_v22 = vld [vmem:[#allocation141_spill] sm:$0xff] }
 0x65c   : > { %v15366_v58 = vadd.f32 %v6379_v13, %v15173_v52  ;;  %v6268_v38 = vpop.f32.mrf.mxu0 }
 0x65d   : > { %v15368_v3 = vadd.f32 %v6268_v38, %v5589_v49  ;;  %v6381_v34 = vpop.f32.mrf.mxu1 }
 0x65e   : > { %v15370_v48 = vadd.f32 %v6381_v34, %v5702_v9  ;;  %v6272_v31 = vpop.f32.mrf.mxu0  ;;  %v5599_v9 = vadd.f32 %v15201_v51, %v16739_v2  ;;  %v16740_v34 = vld [vmem:[#allocation134_spill] sm:$0xff] }
 0x65f   : > { %v15373_v35 = vadd.f32 %v6272_v31, %v15182_v44  ;;  %v6385_v63 = vpop.f32.mrf.mxu1  ;;  %v16741_v31 = vld [vmem:[#allocation142_spill] sm:$0xff] }
 0x660   : > { %v15376_v15 = vadd.f32 %v6385_v63, %v16735_v22  ;;  %v6274_v16 = vpop.f32.mrf.mxu0  ;;  %v5712_v63 = vadd.f32 %v16741_v31, %v16740_v34  ;;  %v16742_v22 = vld [vmem:[#allocation38_spill] sm:$0xff]  ;;  %v16744_v31 = vld [vmem:[#allocation35_spill] sm:$0xff] }
 0x661   : > { %v15379_v4 = vadd.f32 %v6274_v16, %v15190_v10  ;;  %v6387_v52 = vpop.f32.mrf.mxu1 }
 0x662   : > { %16736 = vst [vmem:[#allocation150_spill] sm:$0xff] %v15376_v15  ;;  %v15382_v13 = vadd.f32 %v6387_v52, %v15193_v1  ;;  %v6276_v49 = vpop.f32.mrf.mxu0 }
 0x663   : > { %16737 = vst [vmem:[#allocation62_spill] sm:$0xff] %v15379_v4  ;;  %v15387_v38 = vadd.f32 %v6276_v49, %v15196_v23  ;;  %v6389_v44 = vpop.f32.mrf.mxu1 }
 0x664   : > { %16738 = vst [vmem:[#allocation151_spill] sm:$0xff] %v15382_v13  ;;  %v15392_v15 = vadd.f32 %v6389_v44, %v16742_v22  ;;  %v6278_v10 = vpop.f32.mrf.mxu0  ;;  %v16745_v22 = vld [vmem:[#allocation136_spill] sm:$0xff] }
 0x665   : > { %v15394_v16 = vadd.f32 %v6278_v10, %v5599_v9  ;;  %v6391_v4 = vpop.f32.mrf.mxu1  ;;  %v16746_v10 = vld [vmem:[#allocation54_spill] sm:$0xff] }
 0x666   : > { %v15396_v1 = vadd.f32 %v6391_v4, %v5712_v63  ;;  %v6282_v52 = vpop.f32.mrf.mxu0  ;;  %v5609_v4 = vadd.f32 %v15227_v37, %v16744_v31 }
 0x667   : > { %v15399_v13 = vadd.f32 %v6282_v52, %v15207_v33  ;;  %v6395_v51 = vpop.f32.mrf.mxu1 }
 0x668   : > { %v15402_v23 = vadd.f32 %v6395_v51, %v15210_v19  ;;  %v6284_v49 = vpop.f32.mrf.mxu0  ;;  %v5722_v19 = vadd.f32 %v15229_v62, %v16745_v22  ;;  %v16749_v22 = vld [vmem:[#allocation137_spill] sm:$0xff] }
 0x669   : > { %v15405_v2 = vadd.f32 %v6284_v49, %v15214_v0  ;;  %v6397_v44 = vpop.f32.mrf.mxu1 }
 0x66a   : > { %v15408_v34 = vadd.f32 %v6397_v44, %v15217_v50  ;;  %v6286_v9 = vpop.f32.mrf.mxu0 }
 0x66b   : > { %v15413_v63 = vadd.f32 %v6286_v9, %v15221_v46  ;;  %v6399_v33 = vpop.f32.mrf.mxu1 }
 0x66c   : > { %16743 = vst [vmem:[#allocation47_spill] sm:$0xff] %v15408_v34  ;;  %v15418_v52 = vadd.f32 %v6399_v33, %v16746_v10  ;;  %v6288_v0 = vpop.f32.mrf.mxu0 }
 0x66d   : > { %v15420_v51 = vadd.f32 %v6288_v0, %v5609_v4  ;;  %v6401_v49 = vpop.f32.mrf.mxu1  ;;  %v16750_v0 = vld [vmem:[#allocation36_spill] sm:$0xff] }
 0x66e   : > { %v15422_v50 = vadd.f32 %v6401_v49, %v5722_v19  ;;  %v6409_v19 = vadd.f32 %v15249_v57, %v16749_v22  ;;  %v16751_v49 = vld [vmem:[#allocation39_spill] sm:$0xff] }
 0x66f   : > { %16747 = vst [vmem:[#allocation152_spill] sm:$0xff] %v15420_v51  ;;  %v6978_v44 = vpop.f32.mrf.mxu0 }
 0x670   : > { %16748 = vst [vmem:[#allocation49_spill] sm:$0xff] %v15422_v50  ;;  %v15425_v34 = vadd.f32 %v6978_v44, %v15232_v54  ;;  %v7091_v37 = vpop.f32.mrf.mxu1  ;;  %v16752_v44 = vld [vmem:[#allocation143_spill] sm:$0xff] }
 0x671   : > { %v15428_v46 = vadd.f32 %v7091_v37, %v15235_v26  ;;  %v6980_v9 = vpop.f32.mrf.mxu0  ;;  %v6411_v26 = vadd.f32 %v16751_v49, %v16750_v0  ;;  %v16755_v49 = vld [vmem:[#allocation138_spill] sm:$0xff] }
 0x672   : > { %v15431_v62 = vadd.f32 %v6980_v9, %v15238_v55  ;;  %v7093_v31 = vpop.f32.mrf.mxu1 }
 0x673   : > { %v15434_v33 = vadd.f32 %v7093_v31, %v15241_v53  ;;  %v6982_v4 = vpop.f32.mrf.mxu0 }
 0x674   : > { %v15439_v10 = vadd.f32 %v6982_v4, %v15244_v41  ;;  %v7095_v54 = vpop.f32.mrf.mxu1 }
 0x675   : > { %v15444_v37 = vadd.f32 %v7095_v54, %v16752_v44  ;;  %v6984_v55 = vpop.f32.mrf.mxu0  ;;  %v16756_v44 = vld [vmem:[#allocation50_spill] sm:$0xff] }
 0x676   : > { %v15446_v9 = vadd.f32 %v6984_v55, %v6409_v19  ;;  %v7097_v50 = vpop.f32.mrf.mxu1  ;;  %v16757_v55 = vld [vmem:[#allocation41_spill] sm:$0xff] }
 0x677   : > { %v15448_v53 = vadd.f32 %v7097_v50, %v6411_v26  ;;  %v6988_v31 = vpop.f32.mrf.mxu0  ;;  %v6417_v50 = vadd.f32 %v15271_v56, %v16755_v49 }
 0x678   : > { %v15451_v51 = vadd.f32 %v6988_v31, %v15254_v30  ;;  %v7101_v57 = vpop.f32.mrf.mxu1  ;;  %v16758_v31 = vld [vmem:[#allocation144_spill] sm:$0xff] }
 0x679   : > { %v15454_v41 = vadd.f32 %v7101_v57, %v15257_v11  ;;  %v6990_v4 = vpop.f32.mrf.mxu0  ;;  %v6419_v11 = vadd.f32 %v16757_v55, %v16756_v44  ;;  %v16761_v55 = vld [vmem:[#allocation139_spill] sm:$0xff] }
 0x67a   : > { %v15457_v22 = vadd.f32 %v6990_v4, %v15260_v8  ;;  %v7103_v54 = vpop.f32.mrf.mxu1 }
 0x67b   : > { %v15460_v0 = vadd.f32 %v7103_v54, %v15263_v28  ;;  %v6992_v19 = vpop.f32.mrf.mxu0 }
 0x67c   : > { %16753 = vst [vmem:[#allocation154_spill] sm:$0xff] %v15457_v22  ;;  %v15465_v26 = vadd.f32 %v6992_v19, %v15266_v20  ;;  %v7105_v30 = vpop.f32.mrf.mxu1 }
 0x67d   : > { %16754 = vst [vmem:[#allocation66_spill] sm:$0xff] %v15460_v0  ;;  %v15470_v57 = vadd.f32 %v7105_v30, %v16758_v31  ;;  %v6994_v8 = vpop.f32.mrf.mxu0  ;;  %v16762_v31 = vld [vmem:[#allocation37_spill] sm:$0xff] }
 0x67e   : > { %v15472_v4 = vadd.f32 %v6994_v8, %v6417_v50  ;;  %v7107_v22 = vpop.f32.mrf.mxu1  ;;  %v16763_v8 = vld [vmem:[#allocation58_spill] sm:$0xff] }
 0x67f   : > { %v15474_v28 = vadd.f32 %v7107_v22, %v6419_v11  ;;  %v6998_v54 = vpop.f32.mrf.mxu0  ;;  %v6425_v22 = vadd.f32 %v15293_v42, %v16761_v55 }
 0x680   : > { %v15477_v0 = vadd.f32 %v6998_v54, %v15276_v27  ;;  %v7111_v56 = vpop.f32.mrf.mxu1  ;;  %v16764_v54 = vld [vmem:[#allocation146_spill] sm:$0xff] }
 0x681   : > { %v15480_v20 = vadd.f32 %v7111_v56, %v15279_v43  ;;  %v7000_v19 = vpop.f32.mrf.mxu0  ;;  %v6427_v43 = vadd.f32 %v16763_v8, %v16762_v31  ;;  %v16766_v8 = vld [vmem:[#allocation140_spill] sm:$0xff] }
 0x682   : > { %v15483_v49 = vadd.f32 %v7000_v19, %v15282_v6  ;;  %v7113_v30 = vpop.f32.mrf.mxu1 }
 0x683   : > { %v15486_v44 = vadd.f32 %v7113_v30, %v15285_v17  ;;  %v7002_v50 = vpop.f32.mrf.mxu0 }
 0x684   : > { %16759 = vst [vmem:[#allocation155_spill] sm:$0xff] %v15483_v49  ;;  %v15491_v11 = vadd.f32 %v7002_v50, %v15288_v32  ;;  %v7115_v27 = vpop.f32.mrf.mxu1 }
 0x685   : > { %16760 = vst [vmem:[#allocation68_spill] sm:$0xff] %v15486_v44  ;;  %v15496_v56 = vadd.f32 %v7115_v27, %v16764_v54  ;;  %v7004_v6 = vpop.f32.mrf.mxu0 }
 0x686   : > { %v15498_v19 = vadd.f32 %v7004_v6, %v6425_v22  ;;  %v7117_v49 = vpop.f32.mrf.mxu1  ;;  %v16768_v6 = vld [vmem:[#allocation43_spill] sm:$0xff] }
 0x687   : > { %v15500_v17 = vadd.f32 %v7117_v49, %v6427_v43  ;;  %v7008_v30 = vpop.f32.mrf.mxu0  ;;  %v6433_v49 = vadd.f32 %v15315_v18, %v16766_v8  ;;  %v16767_v43 = vld [vmem:[#allocation147_spill] sm:$0xff]  ;;  %v16769_v8 = vld [vmem:[#allocation148_spill] sm:$0xff] }
 0x688   : > { %v15503_v44 = vadd.f32 %v7008_v30, %v15298_v24  ;;  %v7121_v42 = vpop.f32.mrf.mxu1 }
 0x689   : > { %v15506_v32 = vadd.f32 %v7121_v42, %v15301_v45  ;;  %v7010_v50 = vpop.f32.mrf.mxu0 }
 0x68a   : > { %v15509_v55 = vadd.f32 %v7010_v50, %v15304_v25  ;;  %v7123_v27 = vpop.f32.mrf.mxu1 }
 0x68b   : > { %v15512_v31 = vadd.f32 %v7123_v27, %v15307_v14  ;;  %v7012_v22 = vpop.f32.mrf.mxu0 }
 0x68c   : > { %v15517_v54 = vadd.f32 %v7012_v22, %v16767_v43  ;;  %v7125_v24 = vpop.f32.mrf.mxu1 }
 0x68d   : > { %16765 = vst [vmem:[#allocation157_spill] sm:$0xff] %v15512_v31  ;;  %v15520_v30 = vadd.f32 %v7125_v24, %v16768_v6  ;;  %v7014_v45 = vpop.f32.mrf.mxu0  ;;  %v16770_v6 = vld [vmem:[#allocation45_spill] sm:$0xff] }
 0x68e   : > { %v15522_v42 = vadd.f32 %v7014_v45, %v6433_v49  ;;  %v7127_v25 = vpop.f32.mrf.mxu1 }
 0x68f   : > { %v15525_v50 = vadd.f32 %v7127_v25, %v15318_v5  ;;  %v7018_v14 = vpop.f32.mrf.mxu0 }
 0x690   : > { %v15528_v27 = vadd.f32 %v7018_v14, %v15321_v60  ;;  %v7131_v31 = vpop.f32.mrf.mxu1 }
 0x691   : > { %v15531_v18 = vadd.f32 %v7131_v31, %v15324_v39  ;;  %v7020_v22 = vpop.f32.mrf.mxu0 }
 0x692   : > { %v15534_v43 = vadd.f32 %v7020_v22, %v16769_v8  ;;  %v7133_v24 = vpop.f32.mrf.mxu1 }
 0x693   : > { %v15537_v49 = vadd.f32 %v7133_v24, %v16770_v6  ;;  %v7022_v45 = vpop.f32.mrf.mxu0 }
 0x694   : > { %v15540_v5 = vadd.f32 %v7022_v45, %v15335_v12  ;;  %v7135_v25 = vpop.f32.mrf.mxu1 }
 0x695   : > { %v15543_v60 = vadd.f32 %v7135_v25, %v15340_v61  ;;  %v7024_v14 = vpop.f32.mrf.mxu0 }
 0x696   : > { %v15546_v39 = vadd.f32 %v7024_v14, %v15342_v36  ;;  %v7137_v31 = vpop.f32.mrf.mxu1 }
 0x697   : > { %v15549_v22 = vadd.f32 %v7137_v31, %v15344_v47  ;;  %v7028_v8 = vpop.f32.mrf.mxu0 }
 0x698   : > { %v15552_v24 = vadd.f32 %v7028_v8, %v15347_v29  ;;  %v7141_v6 = vpop.f32.mrf.mxu1 }
 0x699   : > { %v15555_v12 = vadd.f32 %v7141_v6, %v15350_v59  ;;  %v7030_v45 = vpop.f32.mrf.mxu0 }
 0x69a   : > { %v15558_v61 = vadd.f32 %v7030_v45, %v15353_v40  ;;  %v7143_v25 = vpop.f32.mrf.mxu1 }
 0x69b   : > { %v15561_v36 = vadd.f32 %v7143_v25, %v15356_v7  ;;  %v7032_v14 = vpop.f32.mrf.mxu0 }
 0x69c   : > { %v15564_v47 = vadd.f32 %v7032_v14, %v15361_v21  ;;  %v7145_v31 = vpop.f32.mrf.mxu1 }
 0x69d   : > { %16771 = vst [vmem:[#allocation53_spill] sm:$0xff] %v15561_v36  ;;  %v15567_v29 = vadd.f32 %v7145_v31, %v15366_v58  ;;  %v7034_v8 = vpop.f32.mrf.mxu0  ;;  %v16774_v36 = vld [vmem:[#allocation150_spill] sm:$0xff] }
 0x69e   : > { %16772 = vst [vmem:[#allocation158_spill] sm:$0xff] %v15564_v47  ;;  %v15570_v59 = vadd.f32 %v7034_v8, %v15368_v3  ;;  %v7147_v6 = vpop.f32.mrf.mxu1  ;;  %v16775_v47 = vld [vmem:[#allocation62_spill] sm:$0xff] }
 0x69f   : > { %16773 = vst [vmem:[#allocation70_spill] sm:$0xff] %v15567_v29  ;;  %v15573_v40 = vadd.f32 %v7147_v6, %v15370_v48  ;;  %v7038_v45 = vpop.f32.mrf.mxu0  ;;  %v16776_v29 = vld [vmem:[#allocation151_spill] sm:$0xff] }
 0x6a0   : > { %v15576_v7 = vadd.f32 %v7038_v45, %v15373_v35  ;;  %v7151_v25 = vpop.f32.mrf.mxu1 }
 0x6a1   : > { %v15579_v21 = vadd.f32 %v7151_v25, %v16774_v36  ;;  %v7040_v14 = vpop.f32.mrf.mxu0 }
 0x6a2   : > { %v15582_v58 = vadd.f32 %v7040_v14, %v16775_v47  ;;  %v7153_v31 = vpop.f32.mrf.mxu1 }
 0x6a3   : > { %v15585_v3 = vadd.f32 %v7153_v31, %v16776_v29  ;;  %v7042_v8 = vpop.f32.mrf.mxu0 }
 0x6a4   : > { %v15588_v48 = vadd.f32 %v7042_v8, %v15387_v38  ;;  %v7155_v6 = vpop.f32.mrf.mxu1 }
 0x6a5   : > { %v15591_v35 = vadd.f32 %v7155_v6, %v15392_v15  ;;  %v7044_v45 = vpop.f32.mrf.mxu0 }
 0x6a6   : > { %v15594_v36 = vadd.f32 %v7044_v45, %v15394_v16  ;;  %v7157_v25 = vpop.f32.mrf.mxu1 }
 0x6a7   : > { %16777 = vst [vmem:[#allocation159_spill] sm:$0xff] %v15591_v35  ;;  %v15597_v47 = vadd.f32 %v7157_v25, %v15396_v1  ;;  %v7048_v14 = vpop.f32.mrf.mxu0  ;;  %v16780_v35 = vld [vmem:[#allocation47_spill] sm:$0xff] }
 0x6a8   : > { %v15600_v29 = vadd.f32 %v7048_v14, %v15399_v13  ;;  %v7161_v31 = vpop.f32.mrf.mxu1 }
 0x6a9   : > { %v15603_v38 = vadd.f32 %v7161_v31, %v15402_v23  ;;  %v7050_v8 = vpop.f32.mrf.mxu0 }
 0x6aa   : > { %v15606_v15 = vadd.f32 %v7050_v8, %v15405_v2  ;;  %v7163_v6 = vpop.f32.mrf.mxu1 }
 0x6ab   : > { %16778 = vst [vmem:[#allocation72_spill] sm:$0xff] %v15603_v38  ;;  %v15609_v16 = vadd.f32 %v7163_v6, %v16780_v35  ;;  %v7052_v45 = vpop.f32.mrf.mxu0 }
 0x6ac   : > { %16779 = vst [vmem:[#allocation161_spill] sm:$0xff] %v15606_v15  ;;  %v15612_v1 = vadd.f32 %v7052_v45, %v15413_v63  ;;  %v7165_v25 = vpop.f32.mrf.mxu1 }
 0x6ad   : > { %16781 = vst [vmem:[#allocation57_spill] sm:$0xff] %v15609_v16  ;;  %v15615_v13 = vadd.f32 %v7165_v25, %v15418_v52  ;;  %v15617_v14 = vpop.f32.mrf.mxu0 }
 0x6ae   : > { %16782 = vst [vmem:[#allocation162_spill] sm:$0xff] %v15612_v1  ;;  %16784 = vst [vmem:[#allocation163_spill] sm:$0xff] %v15617_v14  ;;  %v15619_v23 = vpop.f32.mrf.mxu1 }
 0x6af   : > { %16783 = vst [vmem:[#allocation74_spill] sm:$0xff] %v15615_v13  ;;  %16785 = vst [vmem:[#allocation76_spill] sm:$0xff] %v15619_v23 }
 0x6b0   : > { %v7704_v31 = vpop.f32.mrf.mxu0 }
 0x6b1   : > { %v7896_v2 = vadd.f32 %v7704_v31, %v15425_v34  ;;  %v7817_v8 = vpop.f32.mrf.mxu1 }
 0x6b2   : > { %v7898_v15 = vadd.f32 %v7817_v8, %v15428_v46  ;;  %v7706_v35 = vpop.f32.mrf.mxu0 }
 0x6b3   : > { %v7897_v6 = vadd.f32 %v7706_v35, %v15431_v62  ;;  %v7819_v16 = vpop.f32.mrf.mxu1 }
 0x6b4   : > { %v7960_v63 = vmax.f32 %v7896_v2, %v7898_v15  ;;  %v7899_v45 = vadd.f32 %v7819_v16, %v15434_v33  ;;  %v7708_v1 = vpop.f32.mrf.mxu0 }
 0x6b5   : > { %v7900_v52 = vadd.f32 %v7708_v1, %v15439_v10  ;;  %v7821_v25 = vpop.f32.mrf.mxu1  ;;  %v16786_v1 = vld [vmem:[#allocation154_spill] sm:$0xff] }
 0x6b6   : > { %v7961_v13 = vmax.f32 %v7897_v6, %v7899_v45  ;;  %v7902_v23 = vadd.f32 %v7821_v25, %v15444_v37  ;;  %v7710_v14 = vpop.f32.mrf.mxu0  ;;  %v16787_v45 = vld [vmem:[#allocation66_spill] sm:$0xff] }
 0x6b7   : > { %v7901_v34 = vadd.f32 %v7710_v14, %v15446_v9  ;;  %v7823_v31 = vpop.f32.mrf.mxu1 }
 0x6b8   : > { %v7962_v38 = vmax.f32 %v7900_v52, %v7902_v23  ;;  %v7903_v46 = vadd.f32 %v7823_v31, %v15448_v53  ;;  %v7714_v8 = vpop.f32.mrf.mxu0 }
 0x6b9   : > { %v7904_v62 = vadd.f32 %v7714_v8, %v15451_v51  ;;  %v7827_v15 = vpop.f32.mrf.mxu1 }
 0x6ba   : > { %v15630_v2 = vpack.c.bf16 %v7962_v38, %v7960_v63  ;;  %v7963_v33 = vmax.f32 %v7901_v34, %v7903_v46  ;;  %v7906_v10 = vadd.f32 %v7827_v15, %v15454_v41  ;;  %v7716_v16 = vpop.f32.mrf.mxu0 }
 0x6bb   : > { %v7905_v35 = vadd.f32 %v7716_v16, %v16786_v1  ;;  %v7829_v37 = vpop.f32.mrf.mxu1 }
 0x6bc   : > { %v7964_v6 = vmax.f32 %v7904_v62, %v7906_v10  ;;  %v7907_v9 = vadd.f32 %v7829_v37, %v16787_v45  ;;  %v7718_v14 = vpop.f32.mrf.mxu0  ;;  %v15635_v23 = vpack.c.bf16 %v7963_v33, %v7961_v13  ;;  %v16788_v10 = vld [vmem:[#allocation155_spill] sm:$0xff] }
 0x6bd   : > { %v7908_v53 = vadd.f32 %v7718_v14, %v15465_v26  ;;  %v7831_v52 = vpop.f32.mrf.mxu1 }
 0x6be   : > { %v7965_v51 = vmax.f32 %v7905_v35, %v7907_v9  ;;  %v7910_v38 = vadd.f32 %v7831_v52, %v15470_v57  ;;  %v7720_v63 = vpop.f32.mrf.mxu0  ;;  %v16789_v35 = vld [vmem:[#allocation68_spill] sm:$0xff] }
 0x6bf   : > { %v7909_v25 = vadd.f32 %v7720_v63, %v15472_v4  ;;  %v7833_v41 = vpop.f32.mrf.mxu1 }
 0x6c0   : > { %v7966_v34 = vmax.f32 %v7908_v53, %v7910_v38  ;;  %v7911_v31 = vadd.f32 %v7833_v41, %v15474_v28  ;;  %v7724_v46 = vpop.f32.mrf.mxu0 }
 0x6c1   : > { %v7912_v8 = vadd.f32 %v7724_v46, %v15477_v0  ;;  %v7837_v62 = vpop.f32.mrf.mxu1 }
 0x6c2   : > { %v15642_v15 = vpack.c.bf16 %v7966_v34, %v7964_v6  ;;  %v7967_v13 = vmax.f32 %v7909_v25, %v7911_v31  ;;  %v7914_v26 = vadd.f32 %v7837_v62, %v15480_v20  ;;  %v7726_v33 = vpop.f32.mrf.mxu0  ;;  %v16790_v62 = vld [vmem:[#allocation157_spill] sm:$0xff] }
 0x6c3   : > { %v7913_v16 = vadd.f32 %v7726_v33, %v16788_v10  ;;  %v7839_v57 = vpop.f32.mrf.mxu1 }
 0x6c4   : > { %v7968_v1 = vmax.f32 %v7912_v8, %v7914_v26  ;;  %v7915_v4 = vadd.f32 %v7839_v57, %v16789_v35  ;;  %v7728_v37 = vpop.f32.mrf.mxu0  ;;  %v15647_v45 = vpack.c.bf16 %v7967_v13, %v7965_v51 }
 0x6c5   : > { %v7916_v28 = vadd.f32 %v7728_v37, %v15491_v11  ;;  %v7841_v9 = vpop.f32.mrf.mxu1 }
 0x6c6   : > { %v7969_v0 = vmax.f32 %v7913_v16, %v7915_v4  ;;  %v7918_v6 = vadd.f32 %v7841_v9, %v15496_v56  ;;  %v7730_v14 = vpop.f32.mrf.mxu0 }
 0x6c7   : > { %v7917_v53 = vadd.f32 %v7730_v14, %v15498_v19  ;;  %v7843_v20 = vpop.f32.mrf.mxu1 }
 0x6c8   : > { %v7970_v52 = vmax.f32 %v7916_v28, %v7918_v6  ;;  %v7919_v38 = vadd.f32 %v7843_v20, %v15500_v17  ;;  %v7734_v63 = vpop.f32.mrf.mxu0 }
 0x6c9   : > { %v7920_v25 = vadd.f32 %v7734_v63, %v15503_v44  ;;  %v7847_v41 = vpop.f32.mrf.mxu1 }
 0x6ca   : > { %v15654_v34 = vpack.c.bf16 %v7970_v52, %v7968_v1  ;;  %v7971_v51 = vmax.f32 %v7917_v53, %v7919_v38  ;;  %v7922_v11 = vadd.f32 %v7847_v41, %v15506_v32  ;;  %v7736_v31 = vpop.f32.mrf.mxu0 }
 0x6cb   : > { %v7921_v46 = vadd.f32 %v7736_v31, %v15509_v55  ;;  %v7849_v56 = vpop.f32.mrf.mxu1 }
 0x6cc   : > { %v7972_v8 = vmax.f32 %v7920_v25, %v7922_v11  ;;  %v7923_v19 = vadd.f32 %v7849_v56, %v16790_v62  ;;  %v7738_v13 = vpop.f32.mrf.mxu0  ;;  %v15659_v26 = vpack.c.bf16 %v7971_v51, %v7969_v0 }
 0x6cd   : > { %v7924_v17 = vadd.f32 %v7738_v13, %v15517_v54  ;;  %v7851_v33 = vpop.f32.mrf.mxu1 }
 0x6ce   : > { %v7973_v44 = vmax.f32 %v7921_v46, %v7923_v19  ;;  %v7926_v10 = vadd.f32 %v7851_v33, %v15520_v30  ;;  %v7740_v16 = vpop.f32.mrf.mxu0  ;;  %v16791_v19 = vld [vmem:[#allocation53_spill] sm:$0xff] }
 0x6cf   : > { %v7925_v57 = vadd.f32 %v7740_v16, %v15522_v42  ;;  %v7853_v32 = vpop.f32.mrf.mxu1 }
 0x6d0   : > { %v7974_v1 = vmax.f32 %v7924_v17, %v7926_v10  ;;  %v7927_v55 = vadd.f32 %v7853_v32, %v15525_v50  ;;  %v7744_v35 = vpop.f32.mrf.mxu0  ;;  %v16793_v10 = vld [vmem:[#allocation70_spill] sm:$0xff] }
 0x6d1   : > { %v7928_v4 = vadd.f32 %v7744_v35, %v15528_v27  ;;  %v7857_v37 = vpop.f32.mrf.mxu1 }
 0x6d2   : > { %v15666_v28 = vpack.c.bf16 %v7974_v1, %v7972_v8  ;;  %v7975_v9 = vmax.f32 %v7925_v57, %v7927_v55  ;;  %v7930_v54 = vadd.f32 %v7857_v37, %v15531_v18  ;;  %v7746_v0 = vpop.f32.mrf.mxu0 }
 0x6d3   : > { %v7929_v6 = vadd.f32 %v7746_v0, %v15534_v43  ;;  %v7859_v30 = vpop.f32.mrf.mxu1 }
 0x6d4   : > { %v7976_v14 = vmax.f32 %v7928_v4, %v7930_v54  ;;  %v7931_v42 = vadd.f32 %v7859_v30, %v15537_v49  ;;  %v7748_v53 = vpop.f32.mrf.mxu0  ;;  %v15671_v20 = vpack.c.bf16 %v7975_v9, %v7973_v44 }
 0x6d5   : > { %v7932_v50 = vadd.f32 %v7748_v53, %v15540_v5  ;;  %v7861_v52 = vpop.f32.mrf.mxu1 }
 0x6d6   : > { %v7977_v27 = vmax.f32 %v7929_v6, %v7931_v42  ;;  %v7934_v38 = vadd.f32 %v7861_v52, %v15543_v60  ;;  %v7750_v63 = vpop.f32.mrf.mxu0 }
 0x6d7   : > { %v7933_v25 = vadd.f32 %v7750_v63, %v15546_v39  ;;  %v7863_v18 = vpop.f32.mrf.mxu1 }
 0x6d8   : > { %v7978_v41 = vmax.f32 %v7932_v50, %v7934_v38  ;;  %v7935_v43 = vadd.f32 %v7863_v18, %v15549_v22  ;;  %v7754_v51 = vpop.f32.mrf.mxu0  ;;  %v16792_v22 = vld [vmem:[#allocation158_spill] sm:$0xff] }
 0x6d9   : > { %v7936_v11 = vadd.f32 %v7754_v51, %v15552_v24  ;;  %v7867_v49 = vpop.f32.mrf.mxu1 }
 0x6da   : > { %v15678_v31 = vpack.c.bf16 %v7978_v41, %v7976_v14  ;;  %v7979_v46 = vmax.f32 %v7933_v25, %v7935_v43  ;;  %v7938_v5 = vadd.f32 %v7867_v49, %v15555_v12  ;;  %v7756_v56 = vpop.f32.mrf.mxu0 }
 0x6db   : > { %v7937_v8 = vadd.f32 %v7756_v56, %v15558_v61  ;;  %v7869_v60 = vpop.f32.mrf.mxu1 }
 0x6dc   : > { %v7980_v62 = vmax.f32 %v7936_v11, %v7938_v5  ;;  %v7939_v39 = vadd.f32 %v7869_v60, %v16791_v19  ;;  %v7758_v13 = vpop.f32.mrf.mxu0  ;;  %v15683_v17 = vpack.c.bf16 %v7979_v46, %v7977_v27  ;;  %v16794_v27 = vld [vmem:[#allocation159_spill] sm:$0xff]  ;;  %v16795_v11 = vld [vmem:[#allocation72_spill] sm:$0xff]  ;;  %v16796_v46 = vld [vmem:[#allocation161_spill] sm:$0xff] }
 0x6dd   : > { %v7940_v33 = vadd.f32 %v7758_v13, %v16792_v22  ;;  %v7871_v44 = vpop.f32.mrf.mxu1  ;;  %v16797_v60 = vld [vmem:[#allocation57_spill] sm:$0xff]  ;;  %v16799_v13 = vld [vmem:[#allocation163_spill] sm:$0xff]  ;;  %v16800_v22 = vld [vmem:[#allocation162_spill] sm:$0xff] }
 0x6de   : > { %v7981_v24 = vmax.f32 %v7937_v8, %v7939_v39  ;;  %v7942_v16 = vadd.f32 %v7871_v44, %v16793_v10  ;;  %v7760_v57 = vpop.f32.mrf.mxu0  ;;  %v16798_v39 = vld [vmem:[#allocation152_spill] sm:$0xff]  ;;  %v16801_v44 = vld [vmem:[#allocation49_spill] sm:$0xff] }
 0x6df   : > { %v7941_v32 = vadd.f32 %v7760_v57, %v15570_v59  ;;  %v7873_v12 = vpop.f32.mrf.mxu1  ;;  %v16803_v57 = vld [vmem:[#allocation74_spill] sm:$0xff] }
 0x6e0   : > { %v7982_v1 = vmax.f32 %v7940_v33, %v7942_v16  ;;  %v7943_v61 = vadd.f32 %v7873_v12, %v15573_v40  ;;  %v7764_v55 = vpop.f32.mrf.mxu0 }
 0x6e1   : > { %v7944_v35 = vadd.f32 %v7764_v55, %v15576_v7  ;;  %v7877_v4 = vpop.f32.mrf.mxu1 }
 0x6e2   : > { %v8002_v37 = vpack.c.bf16 %v7982_v1, %v7980_v62  ;;  %v7983_v9 = vmax.f32 %v7941_v32, %v7943_v61  ;;  %v7946_v54 = vadd.f32 %v7877_v4, %v15579_v21  ;;  %v7766_v0 = vpop.f32.mrf.mxu0 }
 0x6e3   : > { %v7945_v6 = vadd.f32 %v7766_v0, %v15582_v58  ;;  %v7879_v30 = vpop.f32.mrf.mxu1  ;;  %v11316_v0 = vld [vmem:[#allocation13 + $0x30] sm:$0xff]  }
 0x6e4   : > { %v7984_v14 = vmax.f32 %v7944_v35, %v7946_v54  ;;  %v7947_v42 = vadd.f32 %v7879_v30, %v15585_v3  ;;  %v7768_v59 = vpop.f32.mrf.mxu0  ;;  %v8003_v53 = vpack.c.bf16 %v7983_v9, %v7981_v24  ;;  %v16802_v24 = vld [vmem:[#allocation76_spill] sm:$0xff]  ;;  %v11303_v30 = vld [vmem:[#allocation11 + $0x8] sm:$0xff]  }
 0x6e5   : > { %v7948_v50 = vadd.f32 %v7768_v59, %v15588_v48  ;;  %v7881_v40 = vpop.f32.mrf.mxu1  ;;  %v7233_v10 = vadd.f32 %v16802_v24, %v16801_v44  ;;  %v11320_v59 = vld [vmem:[#allocation13 + $0x28] sm:$0xff]  }
 0x6e6   : > { %v7985_v52 = vmax.f32 %v7945_v6, %v7947_v42  ;;  %v7950_v7 = vadd.f32 %v7881_v40, %v16794_v27  ;;  %v7770_v38 = vpop.f32.mrf.mxu0  ;;  %v11317_v6 = vld [vmem:[#allocation13 + $0xe8] sm:$0xff]   ;;  %v11322_v40 = vld [vmem:[#allocation13 + $0xa0] sm:$0xff]   ;;  %v11306_v27 = vld [vmem:[#allocation11 + $0x2c] sm:$0xff]  }
 0x6e7   : > { %v7949_v63 = vadd.f32 %v7770_v38, %v15594_v36  ;;  %v7883_v25 = vpop.f32.mrf.mxu1  ;;  %v11318_v42 = vld [vmem:[#allocation13 + $0xa8] sm:$0xff]   ;;  %v11308_v38 = vld [vmem:[#allocation11 + $0x34] ss:$0 sps:$4 sm:$0xff]  }
 0x6e8   : > { %v7986_v21 = vmax.f32 %v7948_v50, %v7950_v7  ;;  %v7951_v18 = vadd.f32 %v7883_v25, %v15597_v47  ;;  %v7774_v58 = vpop.f32.mrf.mxu0  ;;  %v7231_v47 = vadd.f32 %v16799_v13, %v16798_v39  ;;  %v11323_v50 = vld [vmem:[#allocation13 + $0x60] sm:$0xff]   ;;  %v11327_v25 = vld [vmem:[#allocation13 + $0x58] sm:$0xff]  }
 0x6e9   : > { %v7952_v41 = vadd.f32 %v7774_v58, %v15600_v29  ;;  %v7887_v43 = vpop.f32.mrf.mxu1  ;;  %v11307_v7 = vld [vmem:[#allocation11 + $0x18] ss:$0 sps:$4 sm:$0xff]   ;;  %v11326_v58 = vld [vmem:[#allocation13 + $0x98] sm:$0xff]   ;;  %v16805_v39 = vld [vmem:[#allocation113_spill] sm:$0xff] }
 0x6ea   : > { %v8004_v3 = vpack.c.bf16 %v7986_v21, %v7984_v14  ;;  %v7987_v51 = vmax.f32 %v7949_v63, %v7951_v18  ;;  %v7954_v49 = vadd.f32 %v7887_v43, %v16795_v11  ;;  %v7776_v48 = vpop.f32.mrf.mxu0  ;;  %v11304_v14 = vld [vmem:[#allocation11 + $0x24] sm:$0xff]   ;;  %v11324_v63 = vld [vmem:[#allocation13 + $0x20] sm:$0xff]   ;;  %v11328_v21 = vld [vmem:[#allocation13 + $0x18] sm:$0xff]   ;;  %v16806_v13 = vsub.s32 0, %v16805_v39 }
 0x6eb   : > { %v7953_v5 = vadd.f32 %v7776_v48, %v16796_v46  ;;  %v7889_v56 = vpop.f32.mrf.mxu1  ;;  %v11325_v18 = vld [vmem:[#allocation13 + $0xd8] sm:$0xff]   ;;  %v11332_v43 = vld [vmem:[#allocation13 + $0x10] sm:$0xff]   ;;  %v11335_v11 = vld [vmem:[#allocation13 + $0x48] sm:$0xff]   ;;  %v16807_v44 = vsub.s32 1, %v16805_v39 }
 0x6ec   : > { %v7988_v8 = vmax.f32 %v7952_v41, %v7954_v49  ;;  %v7955_v62 = vadd.f32 %v7889_v56, %v16797_v60  ;;  %v7778_v36 = vpop.f32.mrf.mxu0  ;;  %v8005_v19 = vpack.c.bf16 %v7987_v51, %v7985_v52  ;;  %v11305_v52 = vld [vmem:[#allocation11 + $0x10] sm:$0xff]   ;;  %v11331_v41 = vld [vmem:[#allocation13 + $0x50] sm:$0xff]   ;;  %v11333_v49 = vld [vmem:[#allocation13 + $0xc8] sm:$0xff]  }
 0x6ed   : > { %v7956_v33 = vadd.f32 %v7778_v36, %v16800_v22  ;;  %v7891_v29 = vpop.f32.mrf.mxu1  ;;  %v11330_v51 = vld [vmem:[#allocation13 + $0x90] sm:$0xff]   ;;  %v11334_v48 = vld [vmem:[#allocation13 + $0x88] sm:$0xff]   ;;  %v11339_v56 = vld [vmem:[#allocation13 + $0x40] sm:$0xff]  }
 0x6ee   : > { %v7989_v16 = vmax.f32 %v7953_v5, %v7955_v62  ;;  %v7958_v32 = vadd.f32 %v7891_v29, %v16803_v57  ;;  %v7780_v12 = vpop.f32.mrf.mxu0  ;;  %v11336_v46 = vld [vmem:[#allocation13 + $0x8] sm:$0xff]   ;;  %v11337_v5 = vld [vmem:[#allocation13 + $0xc0] sm:$0xff]   ;;  %v11341_v62 = vld [vmem:[#allocation13 + $0x178] sm:$0xff]  }
 0x6ef   : > { %v7957_v1 = vadd.f32 %v7780_v12, %v7231_v47  ;;  %v7893_v61 = vpop.f32.mrf.mxu1  ;;  %v11338_v60 = vld [vmem:[#allocation13 + $0x80] sm:$0xff]   ;;  %v11343_v36 = vld [vmem:[#allocation13 + $0x1f8] sm:$0xff]  }
 0x6f0   : > { %v7990_v55 = vmax.f32 %v7956_v33, %v7958_v32  ;;  %v7959_v35 = vadd.f32 %v7893_v61, %v7233_v10 }
 0x6f2   : > { %v8006_v4 = vpack.c.bf16 %v7990_v55, %v7988_v8  ;;  %v7991_v9 = vmax.f32 %v7957_v1, %v7959_v35  ;;  %v11340_v8 = vld [vmem:[#allocation13] sm:$0xff]  }
 0x6f4   : > { %v8007_v54 = vpack.c.bf16 %v7991_v9, %v7989_v16 }
 0x6f6   : > { %8037 = vmatprep.subr.bf16.mxu0 %v8007_v54  ;;  %8138 = vmatprep.subr.bf16.mxu1 %v8007_v54 }
 0x6f7   : > { %8038 = vmatpush1.bf16.msra.mxu0 %v8006_v4  ;;  %8139 = vmatpush1.bf16.msra.mxu1 %v8006_v4 }
 0x6f8   : > { %8039 = vmatprep.subr.bf16.mxu0 %v8005_v19  ;;  %8140 = vmatprep.subr.bf16.mxu1 %v8005_v19  ;;  %v8223_v19 = vld [vmem:[#allocation8] sm:$0x3] }
 0x6f9   : > { %v15736_v47 = vrot.slane %v8223_v19, %v16806_v13  ;;  %v15740_v24 = vrot.slane %v8223_v19, %v16807_v44  ;;  %v11349_v19 = vld [vmem:[#allocation13 + $0x168] sm:$0xff]  }
 0x6fb   : > { %8040 = vmatpush1.bf16.msra.mxu0 %v8004_v3  ;;  %8141 = vmatpush1.bf16.msra.mxu1 %v8004_v3  ;;  %v11329_v3 = vld [vmem:[#allocation13 + $0xd0] sm:$0xff]  }
 0x6fc   : > { %8041 = vmatprep.subr.bf16.mxu0 %v8003_v53  ;;  %8142 = vmatprep.subr.bf16.mxu1 %v8003_v53  ;;  %v11321_v53 = vld [vmem:[#allocation13 + $0xe0] sm:$0xff]  }
 0x6ff   : > { %8042 = vmatpush1.bf16.msra.mxu0 %v8002_v37  ;;  %8143 = vmatpush1.bf16.msra.mxu1 %v8002_v37  ;;  %v11315_v37 = vld [vmem:[#allocation13 + $0x70] sm:$0xff]  }
 0x700   : > { %8043 = vmatprep.subr.bf16.mxu0 %v15683_v17  ;;  %8144 = vmatprep.subr.bf16.mxu1 %v15683_v17  ;;  %v11313_v17 = vld [vmem:[#allocation13 + $0xf0] sm:$0xff]  }
 0x703   : > { %8044 = vmatpush1.bf16.msra.mxu0 %v15678_v31  ;;  %8145 = vmatpush1.bf16.msra.mxu1 %v15678_v31  ;;  %v11301_v31 = vld [vmem:[#allocation11] sm:$0xff]  }
 0x704   : > { %8045 = vmatprep.subr.bf16.mxu0 %v15671_v20  ;;  %8146 = vmatprep.subr.bf16.mxu1 %v15671_v20  ;;  %v11311_v20 = vld [vmem:[#allocation13 + $0x78] sm:$0xff]  }
 0x707   : > { %8046 = vmatpush1.bf16.msra.mxu0 %v15666_v28  ;;  %8147 = vmatpush1.bf16.msra.mxu1 %v15666_v28  ;;  %v11309_v28 = vld [vmem:[#allocation13 + $0xf8] sm:$0xff]  }
 0x708   : > { %8047 = vmatprep.subr.bf16.mxu0 %v15659_v26  ;;  %8148 = vmatprep.subr.bf16.mxu1 %v15659_v26  ;;  %v11302_v26 = vld [vmem:[#allocation11 + $0x1c] sm:$0xff]  }
 0x70b   : > { %8048 = vmatpush1.bf16.msra.mxu0 %v15654_v34  ;;  %8149 = vmatpush1.bf16.msra.mxu1 %v15654_v34  ;;  %v11310_v34 = vld [vmem:[#allocation13 + $0xb8] sm:$0xff]  }
 0x70c   : > { %8049 = vmatprep.subr.bf16.mxu0 %v15647_v45  ;;  %8150 = vmatprep.subr.bf16.mxu1 %v15647_v45  ;;  %v11312_v45 = vld [vmem:[#allocation13 + $0x38] sm:$0xff]  }
 0x70f   : > { %8050 = vmatpush1.bf16.msra.mxu0 %v15642_v15  ;;  %8151 = vmatpush1.bf16.msra.mxu1 %v15642_v15  ;;  %v16804_v15 = vmov 0  }
 0x710   : > { %8051 = vmatprep.subr.bf16.mxu0 %v15635_v23  ;;  %8152 = vmatprep.subr.bf16.mxu1 %v15635_v23  ;;  %v11314_v23 = vld [vmem:[#allocation13 + $0xb0] sm:$0xff]  }
 0x713   : > { %8052 = vmatpush1.bf16.msra.mxu0 %v15630_v2  ;;  %8153 = vmatpush1.bf16.msra.mxu1 %v15630_v2  ;;  %v11319_v2 = vld [vmem:[#allocation13 + $0x68] sm:$0xff]  }
 0x714   : > { %10424 = vmatprep.subr.bf16.mxu0 %v11309_v28  ;;  %10446 = vmatprep.subr.bf16.mxu1 %v11311_v20 }
 0x716   : > { %8070 = vmatmul.mubr.bf16.vlgmr.msra.gmra.mxu0 %v11301_v31  ;;  %8171 = vmatmul.mubr.bf16.vlgmr.msra.gmra.mxu1 %v11302_v26 }
 0x717   : > { %8079 = vmatprep.mubr.bf16.mxu0 %v16804_v15  ;;  %8180 = vmatprep.mubr.bf16.mxu1 %v16804_v15 }
 0x718   : > { %10425 = vmatpush3.bf16.msra.mxu0 %v11310_v34  ;;  %10447 = vmatpush3.bf16.msra.mxu1 %v11312_v45 }
 0x719   : > { %10426 = vmatprep.subr.bf16.mxu0 %v11313_v17  ;;  %10448 = vmatprep.subr.bf16.mxu1 %v11315_v37 }
 0x71c   : > { %10427 = vmatpush3.bf16.msra.mxu0 %v11314_v23  ;;  %10449 = vmatpush3.bf16.msra.mxu1 %v11316_v0 }
 0x71d   : > { %10428 = vmatprep.subr.bf16.mxu0 %v11317_v6  ;;  %10450 = vmatprep.subr.bf16.mxu1 %v11319_v2 }
 0x71e   : > { %8080 = vmatmul.mubr.bf16.gmra.mxu0 %v11303_v30  ;;  %8181 = vmatmul.mubr.bf16.gmra.mxu1 %v11304_v14 }
 0x71f   : > { %8089 = vmatprep.mubr.bf16.mxu0 %v16804_v15  ;;  %8190 = vmatprep.mubr.bf16.mxu1 %v16804_v15 }
 0x720   : > { %10429 = vmatpush3.bf16.msra.mxu0 %v11318_v42  ;;  %10451 = vmatpush3.bf16.msra.mxu1 %v11320_v59  ;;  %v11344_v59 = vld [vmem:[#allocation13 + $0x1b8] sm:$0xff]  }
 0x721   : > { %10430 = vmatprep.subr.bf16.mxu0 %v11321_v53  ;;  %10452 = vmatprep.subr.bf16.mxu1 %v11323_v50 }
 0x724   : > { %10431 = vmatpush3.bf16.msra.mxu0 %v11322_v40  ;;  %10453 = vmatpush3.bf16.msra.mxu1 %v11324_v63  ;;  %v11347_v40 = vld [vmem:[#allocation13 + $0x1f0] sm:$0xff]   ;;  %v11342_v63 = vld [vmem:[#allocation13 + $0x138] sm:$0xff]  }
 0x725   : > { %10454 = vmatprep.subr.bf16.mxu1 %v11327_v25  ;;  %10432 = vmatprep.subr.bf16.mxu0 %v11325_v18 }
 0x726   : > { %8090 = vmatmul.mubr.bf16.gmra.mxu0 %v11305_v52  ;;  %8191 = vmatmul.mubr.bf16.gmra.mxu1 %v11306_v27 }
 0x727   : > { %8099 = vmatprep.mubr.bf16.mxu0 %v16804_v15  ;;  %8200 = vmatprep.mubr.bf16.mxu1 %v16804_v15 }
 0x728   : > { %10455 = vmatpush3.bf16.msra.mxu1 %v11328_v21  ;;  %10433 = vmatpush3.bf16.msra.mxu0 %v11326_v58  ;;  %v11345_v58 = vld [vmem:[#allocation13 + $0x170] sm:$0xff]  }
 0x729   : > { %10456 = vmatprep.subr.bf16.mxu1 %v11331_v41  ;;  %10434 = vmatprep.subr.bf16.mxu0 %v11329_v3 }
 0x72c   : > { %10457 = vmatpush3.bf16.msra.mxu1 %v11332_v43  ;;  %10435 = vmatpush3.bf16.msra.mxu0 %v11330_v51  ;;  %v11348_v51 = vld [vmem:[#allocation13 + $0x1b0] sm:$0xff]  }
 0x72d   : > { %10458 = vmatprep.subr.bf16.mxu1 %v11335_v11  ;;  %10436 = vmatprep.subr.bf16.mxu0 %v11333_v49 }
 0x72e   : > { %8100 = vmatmul.mubr.bf16.gmra.mxu0 %v11307_v7  ;;  %8201 = vmatmul.mubr.bf16.gmra.mxu1 %v11308_v38 }
 0x730   : > { %10459 = vmatpush3.bf16.msra.mxu1 %v11336_v46  ;;  %10437 = vmatpush3.bf16.msra.mxu0 %v11334_v48  ;;  %v11351_v48 = vld [vmem:[#allocation13 + $0x1e8] sm:$0xff]  }
 0x731   : > { %10460 = vmatprep.subr.bf16.mxu1 %v11339_v56  ;;  %10438 = vmatprep.subr.bf16.mxu0 %v11337_v5 }
 0x734   : > { %10461 = vmatpush3.bf16.msra.mxu1 %v11340_v8  ;;  %10439 = vmatpush3.bf16.msra.mxu0 %v11338_v60  ;;  %v11346_v8 = vld [vmem:[#allocation13 + $0x130] sm:$0xff]  }
 0x735   : > { %10490 = vmatprep.subr.bf16.mxu1 %v11343_v36  ;;  %10468 = vmatprep.subr.bf16.mxu0 %v11341_v62 }
 0x7d6   : > { %v8071_v22 = vpop.f32.mrf.mxu0  ;;  %v8172_v33 = vpop.f32.mrf.mxu1 }
 0x7d7   : > { %v8209_v29 = vmax.f32 %v8071_v22, %v8172_v33  ;;  %v11352_v22 = vld [vmem:[#allocation13 + $0x1a8] sm:$0xff]  }
 0x7d8   : > { %v8073_v10 = vpop.f32.mrf.mxu0  ;;  %v8174_v16 = vpop.f32.mrf.mxu1 }
 0x7d9   : > { %v8235_v57 = vadd.f32 %v15736_v47, %v8209_v29  ;;  %v8210_v32 = vmax.f32 %v8073_v10, %v8174_v16  ;;  %v11355_v16 = vld [vmem:[#allocation13 + $0x1e0] sm:$0xff]  }
 0x7da   : > { %v8075_v12 = vpop.f32.mrf.mxu0  ;;  %v8176_v1 = vpop.f32.mrf.mxu1 }
 0x7db   : > { %v8249_v61 = vmax.f32 %v8235_v57, 0.0  ;;  %v8236_v55 = vadd.f32 %v15740_v24, %v8210_v32  ;;  %v8211_v35 = vmax.f32 %v8075_v12, %v8176_v1  ;;  %v11350_v12 = vld [vmem:[#allocation13 + $0x128] sm:$0xff]  }
 0x7dc   : > { %v8077_v4 = vpop.f32.mrf.mxu0  ;;  %v8178_v9 = vpop.f32.mrf.mxu1 }
 0x7dd   : > { %8263 = vst [vmem:[%s15746_s29] sm:$0xff] %v8249_v61  ;;  %v8250_v54 = vmax.f32 %v8236_v55, 0.0  ;;  %v8237_v28 = vadd.f32 %v15736_v47, %v8211_v35  ;;  %v8212_v20 = vmax.f32 %v8077_v4, %v8178_v9  ;;  %v11353_v4 = vld [vmem:[#allocation13 + $0x160] sm:$0xff]  }
 0x7de   : > { %v8081_v31 = vpop.f32.mrf.mxu0  ;;  %v8182_v26 = vpop.f32.mrf.mxu1 }
 0x7df   : > { %8264 = vst [vmem:[%s15746_s29 + $0x8] sm:$0xff] %v8250_v54  ;;  %v8251_v34 = vmax.f32 %v8237_v28, 0.0  ;;  %v8238_v45 = vadd.f32 %v15740_v24, %v8212_v20  ;;  %v8213_v17 = vmax.f32 %v8081_v31, %v8182_v26  ;;  %v11356_v28 = vld [vmem:[#allocation13 + $0x1a0] sm:$0xff]  }
 0x7e0   : > { %v8083_v37 = vpop.f32.mrf.mxu0  ;;  %v8184_v15 = vpop.f32.mrf.mxu1 }
 0x7e1   : > { %8265 = vst [vmem:[%s15746_s29 + $0x10] sm:$0xff] %v8251_v34  ;;  %v8252_v23 = vmax.f32 %v8238_v45, 0.0  ;;  %v15755_v0 = vadd.f32 %v15736_v47, %v8213_v17  ;;  %v8214_v6 = vmax.f32 %v8083_v37, %v8184_v15  ;;  %v8277_v2 = vpack.c.bf16 %v8251_v34, %v8249_v61  ;;  %v11359_v34 = vld [vmem:[#allocation13 + $0x1d8] sm:$0xff]   ;;  %v11354_v37 = vld [vmem:[#allocation13 + $0x120] sm:$0xff]  }
 0x7e2   : > { %v8085_v30 = vpop.f32.mrf.mxu0  ;;  %v8186_v14 = vpop.f32.mrf.mxu1 }
 0x7e3   : > { %8266 = vst [vmem:[%s15746_s29 + $0x18] sm:$0xff] %v8252_v23  ;;  %v8278_v42 = vpack.c.bf16 %v8252_v23, %v8250_v54  ;;  %v8253_v53 = vmax.f32 %v15755_v0, 0.0  ;;  %v8240_v50 = vadd.f32 %v15740_v24, %v8214_v6  ;;  %v8215_v52 = vmax.f32 %v8085_v30, %v8186_v14  ;;  %v11377_v0 = vld [vmem:[#allocation13 + $0x270] sm:$0xff]  }
 0x7e4   : > { %v8087_v27 = vpop.f32.mrf.mxu0  ;;  %v8188_v7 = vpop.f32.mrf.mxu1  ;;  %v8352_v18 = vrot.slane %v8277_v2, 4 }
 0x7e5   : > { %v8353_v38 = vrot.slane %v8278_v42, 4  ;;  %8620 = vmatprep.mubr.bf16.mxu1 %v8278_v42  ;;  %8267 = vst [vmem:[%s15746_s29 + $0x20] sm:$0xff] %v8253_v53  ;;  %v8254_v25 = vmax.f32 %v8240_v50, 0.0  ;;  %v8216_v21 = vmax.f32 %v8087_v27, %v8188_v7  ;;  %v15764_v41 = vadd.f32 %v15736_v47, %v8215_v52  ;;  %v11360_v42 = vld [vmem:[#allocation13 + $0x198] sm:$0xff]  }
 0x7e6   : > { %8621 = vmatmul.mubr.bf16.vlgmr.msra.gmra.mxu1 %v8277_v2  ;;  %v8091_v43 = vpop.f32.mrf.mxu0  ;;  %v8192_v3 = vpop.f32.mrf.mxu1  ;;  %v11357_v2 = vld [vmem:[#allocation13 + $0x158] sm:$0xff]  }
 0x7e7   : > { %8484 = vmatprep.mubr.bf16.mxu0 %v8353_v38  ;;  %10491 = vmatpush3.bf16.msra.mxu1 %v11344_v59  ;;  %8268 = vst [vmem:[%s15746_s29 + $0x28] sm:$0xff] %v8254_v25  ;;  %v8242_v11 = vadd.f32 %v15740_v24, %v8216_v21  ;;  %v8217_v49 = vmax.f32 %v8091_v43, %v8192_v3  ;;  %v8255_v46 = vmax.f32 %v15764_v41, 0.0  ;;  %v11361_v38 = vld [vmem:[#allocation13 + $0x150] sm:$0xff]   ;;  %v11365_v21 = vld [vmem:[#allocation13 + $0x148] sm:$0xff]   ;;  %v11369_v3 = vld [vmem:[#allocation13 + $0x140] sm:$0xff]  }
 0x7e8   : > { %8485 = vmatmul.mubr.bf16.vlgmr.msra.gmra.mxu0 %v8352_v18  ;;  %10492 = vmatprep.subr.bf16.mxu1 %v11347_v40  ;;  %v8093_v5 = vpop.f32.mrf.mxu0  ;;  %v8194_v56 = vpop.f32.mrf.mxu1  ;;  %v11363_v40 = vld [vmem:[#allocation13 + $0x1d0] sm:$0xff]   ;;  %v11368_v18 = vld [vmem:[#allocation13 + $0x188] sm:$0xff]  }
 0x7e9   : > { %10469 = vmatpush3.bf16.msra.mxu0 %v11342_v63  ;;  %v8256_v60 = vmax.f32 %v8242_v11, 0.0  ;;  %v15770_v62 = vadd.f32 %v15736_v47, %v8217_v49  ;;  %v8218_v36 = vmax.f32 %v8093_v5, %v8194_v56  ;;  %8269 = vst [vmem:[%s15746_s29 + $0x30] sm:$0xff] %v8255_v46  ;;  %v11364_v63 = vld [vmem:[#allocation13 + $0x190] sm:$0xff]   ;;  %v11366_v43 = vld [vmem:[#allocation13 + $0x108] sm:$0xff]   ;;  %v8279_v49 = vpack.c.bf16 %v8255_v46, %v8253_v53  ;;  %v11370_v5 = vld [vmem:[#allocation13 + $0x100] sm:$0xff]  }
 0x7ea   : > { %10470 = vmatprep.subr.bf16.mxu0 %v11345_v58  ;;  %v8095_v39 = vpop.f32.mrf.mxu0  ;;  %v8196_v13 = vpop.f32.mrf.mxu1  ;;  %v11371_v58 = vld [vmem:[#allocation13 + $0x1c0] sm:$0xff]   ;;  %v11373_v56 = vld [vmem:[#allocation13 + $0x278] sm:$0xff]   ;;  %v11380_v41 = vld [vmem:[#allocation13 + $0x2b0] sm:$0xff]  }
 0x7eb   : > { %10493 = vmatpush3.bf16.msra.mxu1 %v11348_v51  ;;  %8270 = vst [vmem:[%s15746_s29 + $0x38] sm:$0xff] %v8256_v60  ;;  %v8280_v33 = vpack.c.bf16 %v8256_v60, %v8254_v25  ;;  %v8257_v29 = vmax.f32 %v15770_v62, 0.0  ;;  %v15778_v44 = vadd.f32 %v15740_v24, %v8218_v36  ;;  %v8219_v10 = vmax.f32 %v8095_v39, %v8196_v13  ;;  %v11367_v25 = vld [vmem:[#allocation13 + $0x1c8] sm:$0xff]   ;;  %v11372_v51 = vld [vmem:[#allocation13 + $0x180] sm:$0xff]   ;;  %v11374_v39 = vld [vmem:[#allocation13 + $0x238] sm:$0xff]  }
 0x7ec   : > { %10494 = vmatprep.subr.bf16.mxu1 %v11351_v48  ;;  %v8097_v57 = vpop.f32.mrf.mxu0  ;;  %v8198_v32 = vpop.f32.mrf.mxu1  ;;  %v11375_v48 = vld [vmem:[#allocation13 + $0x2f8] sm:$0xff]   ;;  %v8833_v36 = vrot.slane %v8279_v49, 4  ;;  %v11383_v53 = vld [vmem:[#allocation13 + $0x2e8] sm:$0xff]   ;;  %v11378_v46 = vld [vmem:[#allocation13 + $0x230] sm:$0xff]  }
 0x7ed   : > { %10471 = vmatpush3.bf16.msra.mxu0 %v11346_v8  ;;  %8789 = vmatprep.mubr.bf16.mxu0 %v8280_v33  ;;  %v8834_v1 = vrot.slane %v8280_v33, 4  ;;  %8271 = vst [vmem:[%s15746_s29 + $0x40] sm:$0xff] %v8257_v29  ;;  %v8258_v61 = vmax.f32 %v15778_v44, 0.0  ;;  %v15785_v55 = vadd.f32 %v15736_v47, %v8219_v10  ;;  %v8220_v35 = vmax.f32 %v8097_v57, %v8198_v32  ;;  %v11376_v8 = vld [vmem:[#allocation13 + $0x2b8] sm:$0xff]   ;;  %v11381_v13 = vld [vmem:[#allocation13 + $0x268] sm:$0xff]   ;;  %v11387_v33 = vld [vmem:[#allocation13 + $0x2e0] sm:$0xff]  }
 0x7ee   : > { %10472 = vmatprep.subr.bf16.mxu0 %v11349_v19  ;;  %v8101_v9 = vpop.f32.mrf.mxu0  ;;  %v8202_v54 = vpop.f32.mrf.mxu1  ;;  %v11379_v19 = vld [vmem:[#allocation13 + $0x2f0] sm:$0xff]   ;;  %v11382_v44 = vld [vmem:[#allocation13 + $0x228] sm:$0xff]   ;;  %v11385_v10 = vld [vmem:[#allocation13 + $0x260] sm:$0xff]  }
 0x7ef   : > { %10495 = vmatpush3.bf16.msra.mxu1 %v11352_v22  ;;  %8965 = vmatprep.mubr.bf16.mxu1 %v8834_v1  ;;  %8272 = vst [vmem:[%s15746_s29 + $0x48] sm:$0xff] %v8258_v61  ;;  %v8259_v20 = vmax.f32 %v15785_v55, 0.0  ;;  %v8246_v31 = vadd.f32 %v15740_v24, %v8220_v35  ;;  %v8221_v26 = vmax.f32 %v8101_v9, %v8202_v54  ;;  %v11384_v22 = vld [vmem:[#allocation13 + $0x2a8] sm:$0xff]   ;;  %v11391_v57 = vld [vmem:[#allocation13 + $0x2d8] sm:$0xff]   ;;  %v11386_v32 = vld [vmem:[#allocation13 + $0x220] sm:$0xff]  }
 0x7f0   : > { %10496 = vmatprep.subr.bf16.mxu1 %v11355_v16  ;;  %v8103_v45 = vpop.f32.mrf.mxu0  ;;  %v8204_v17 = vpop.f32.mrf.mxu1  ;;  %v11388_v16 = vld [vmem:[#allocation13 + $0x2a0] sm:$0xff]   ;;  %v11392_v1 = vld [vmem:[#allocation13 + $0x298] sm:$0xff]   ;;  %v11396_v9 = vld [vmem:[#allocation13 + $0x290] sm:$0xff]  }
 0x7f1   : > { %10473 = vmatpush3.bf16.msra.mxu0 %v11350_v12  ;;  %8273 = vst [vmem:[%s15746_s29 + $0x50] sm:$0xff] %v8259_v20  ;;  %v8260_v15 = vmax.f32 %v8246_v31, 0.0  ;;  %v8247_v23 = vadd.f32 %v15736_v47, %v8221_v26  ;;  %v8222_v6 = vmax.f32 %v8103_v45, %v8204_v17  ;;  %v11358_v47 = vld [vmem:[#allocation13 + $0x118] sm:$0xff]   ;;  %v11399_v54 = vld [vmem:[#allocation13 + $0x2c8] sm:$0xff]   ;;  %v11401_v17 = vld [vmem:[#allocation13 + $0x240] sm:$0xff]  }
 0x7f2   : > { %10474 = vmatprep.subr.bf16.mxu0 %v11353_v4  ;;  %v8105_v30 = vpop.f32.mrf.mxu0  ;;  %v8206_v14 = vpop.f32.mrf.mxu1  ;;  %v11389_v12 = vld [vmem:[#allocation13 + $0x258] sm:$0xff]   ;;  %v11393_v4 = vld [vmem:[#allocation13 + $0x250] sm:$0xff]   ;;  %v11397_v31 = vld [vmem:[#allocation13 + $0x248] sm:$0xff]  }
 0x7f3   : > { %10497 = vmatpush3.bf16.msra.mxu1 %v11356_v28  ;;  %8274 = vst [vmem:[%s15746_s29 + $0x58] sm:$0xff] %v8260_v15  ;;  %v15795_v59 = vmax.f32 %v8247_v23, 0.0  ;;  %v8248_v50 = vadd.f32 %v15740_v24, %v8222_v6  ;;  %v11362_v24 = vld [vmem:[#allocation13 + $0x110] sm:$0xff]   ;;  %v8282_v11 = vpack.c.bf16 %v8260_v15, %v8258_v61  ;;  %v11390_v35 = vld [vmem:[#allocation13 + $0x218] sm:$0xff]   ;;  %v11400_v26 = vld [vmem:[#allocation13 + $0x288] sm:$0xff]   ;;  %v8281_v15 = vpack.c.bf16 %v8259_v20, %v8257_v29 }
 0x7f4   : > { %10498 = vmatprep.subr.bf16.mxu1 %v11359_v34  ;;  %v8106_v52 = vpop.f32.mrf.mxu0  ;;  %v8207_v27 = vpop.f32.mrf.mxu1  ;;  %v11395_v61 = vld [vmem:[#allocation13 + $0x2d0] sm:$0xff]   ;;  %v11403_v34 = vld [vmem:[#allocation13 + $0x2c0] sm:$0xff]   ;;  %v11398_v45 = vld [vmem:[#allocation13 + $0x208] sm:$0xff]  }
 0x7f5   : > { %10475 = vmatpush3.bf16.msra.mxu0 %v11354_v37  ;;  %8275 = vst [vmem:[%s15746_s29 + $0x60] sm:$0xff] %v15795_v59  ;;  %v15800_v7 = vmax.f32 %v8248_v50, 0.0  ;;  %v9180_v60 = vrot.slane %v8282_v11, 4  ;;  %v11394_v28 = vld [vmem:[#allocation13 + $0x210] sm:$0xff]   ;;  %v11404_v37 = vld [vmem:[#allocation13 + $0x280] sm:$0xff]   ;;  %v11405_v6 = vld [vmem:[#allocation13 + $0x378] sm:$0xff]  }
 0x7f6   : > { %10476 = vmatprep.subr.bf16.mxu0 %v11357_v2  ;;  %v11402_v23 = vld [vmem:[#allocation13 + $0x200] sm:$0xff]   ;;  %v9179_v2 = vrot.slane %v8281_v15, 4  ;;  %v11406_v30 = vld [vmem:[#allocation13 + $0x338] sm:$0xff]   ;;  %v11408_v62 = vld [vmem:[#allocation13 + $0x330] sm:$0xff]  }
 0x7f7   : > { %10499 = vmatpush3.bf16.msra.mxu1 %v11360_v42  ;;  %8276 = vst [vmem:[%s15746_s29 + $0x68] sm:$0xff] %v15800_v7  ;;  %v8284_v14 = vpack.c.bf16 %v15800_v7, %v15800_v7  ;;  %v11407_v42 = vld [vmem:[#allocation13 + $0x370] sm:$0xff]   ;;  %v11409_v29 = vld [vmem:[#allocation13 + $0x368] sm:$0xff]   ;;  %v11411_v20 = vld [vmem:[#allocation13 + $0x360] sm:$0xff]  }
 0x7f8   : > { %10500 = vmatprep.subr.bf16.mxu1 %v11363_v40  ;;  %v11410_v55 = vld [vmem:[#allocation13 + $0x328] sm:$0xff]   ;;  %v11412_v50 = vld [vmem:[#allocation13 + $0x320] sm:$0xff]   ;;  %v11413_v40 = vld [vmem:[#allocation13 + $0x358] sm:$0xff]  }
 0x7f9   : > { %10477 = vmatpush3.bf16.msra.mxu0 %v11358_v47  ;;  %v11414_v52 = vld [vmem:[#allocation13 + $0x318] sm:$0xff]   ;;  %v11415_v27 = vld [vmem:[#allocation13 + $0x350] sm:$0xff]   ;;  %v11417_v7 = vld [vmem:[#allocation13 + $0x348] sm:$0xff]  }
 0x7fa   : > { %10478 = vmatprep.subr.bf16.mxu0 %v11361_v38  ;;  %v11416_v47 = vld [vmem:[#allocation13 + $0x310] sm:$0xff]   ;;  %v11418_v38 = vld [vmem:[#allocation13 + $0x308] sm:$0xff]  }
 0x7fb   : > { %10501 = vmatpush3.bf16.msra.mxu1 %v11364_v63  ;;  %v11419_v63 = vld [vmem:[#allocation13 + $0x340] sm:$0xff]  }
 0x7fc   : > { %10502 = vmatprep.subr.bf16.mxu1 %v11367_v25  ;;  %v11420_v25 = vld [vmem:[#allocation13 + $0x300] sm:$0xff]  }
 0x7fd   : > { %10479 = vmatpush3.bf16.msra.mxu0 %v11362_v24  ;;  %v8283_v24 = vpack.c.bf16 %v15795_v59, %v15795_v59 }
 0x7fe   : > { %10480 = vmatprep.subr.bf16.mxu0 %v11365_v21 }
 0x7ff   : > { %10503 = vmatpush3.bf16.msra.mxu1 %v11368_v18 }
 0x800   : > { %10504 = vmatprep.subr.bf16.mxu1 %v11371_v58 }
 0x801   : > { %10481 = vmatpush3.bf16.msra.mxu0 %v11366_v43 }
 0x802   : > { %10482 = vmatprep.subr.bf16.mxu0 %v11369_v3 }
 0x803   : > { %10505 = vmatpush3.bf16.msra.mxu1 %v11372_v51 }
 0x804   : > { %10534 = vmatprep.subr.bf16.mxu1 %v11375_v48 }
 0x805   : > { %10483 = vmatpush3.bf16.msra.mxu0 %v11370_v5 }
 0x806   : > { %10512 = vmatprep.subr.bf16.mxu0 %v11373_v56  ;;  %8966 = vmatmul.mubr.bf16.vlgmr.msra.gmra.mxu1 %v8833_v36 }
 0x807   : > { %10535 = vmatpush3.bf16.msra.mxu1 %v11376_v8  ;;  %9311 = vmatprep.mubr.bf16.mxu1 %v9180_v60 }
 0x808   : > { %8790 = vmatmul.mubr.bf16.vlgmr.msra.gmra.mxu0 %v8279_v49  ;;  %10536 = vmatprep.subr.bf16.mxu1 %v11379_v19 }
 0x809   : > { %10513 = vmatpush3.bf16.msra.mxu0 %v11374_v39  ;;  %9135 = vmatprep.mubr.bf16.mxu0 %v8282_v11 }
 0x80a   : > { %10514 = vmatprep.subr.bf16.mxu0 %v11377_v0 }
 0x80b   : > { %10537 = vmatpush3.bf16.msra.mxu1 %v11380_v41 }
 0x80c   : > { %10538 = vmatprep.subr.bf16.mxu1 %v11383_v53 }
 0x80d   : > { %10515 = vmatpush3.bf16.msra.mxu0 %v11378_v46 }
 0x80e   : > { %10516 = vmatprep.subr.bf16.mxu0 %v11381_v13 }
 0x80f   : > { %10539 = vmatpush3.bf16.msra.mxu1 %v11384_v22 }
 0x810   : > { %10540 = vmatprep.subr.bf16.mxu1 %v11387_v33 }
 0x811   : > { %10517 = vmatpush3.bf16.msra.mxu0 %v11382_v44 }
 0x812   : > { %10518 = vmatprep.subr.bf16.mxu0 %v11385_v10 }
 0x813   : > { %10541 = vmatpush3.bf16.msra.mxu1 %v11388_v16 }
 0x814   : > { %10542 = vmatprep.subr.bf16.mxu1 %v11391_v57 }
 0x815   : > { %10519 = vmatpush3.bf16.msra.mxu0 %v11386_v32 }
 0x816   : > { %10520 = vmatprep.subr.bf16.mxu0 %v11389_v12 }
 0x817   : > { %10543 = vmatpush3.bf16.msra.mxu1 %v11392_v1 }
 0x818   : > { %10544 = vmatprep.subr.bf16.mxu1 %v11395_v61 }
 0x819   : > { %10521 = vmatpush3.bf16.msra.mxu0 %v11390_v35 }
 0x81a   : > { %10522 = vmatprep.subr.bf16.mxu0 %v11393_v4 }
 0x81b   : > { %10545 = vmatpush3.bf16.msra.mxu1 %v11396_v9 }
 0x81c   : > { %10546 = vmatprep.subr.bf16.mxu1 %v11399_v54 }
 0x81d   : > { %10523 = vmatpush3.bf16.msra.mxu0 %v11394_v28 }
 0x81e   : > { %10524 = vmatprep.subr.bf16.mxu0 %v11397_v31 }
 0x81f   : > { %10547 = vmatpush3.bf16.msra.mxu1 %v11400_v26  ;;  %v10418_v26 = vld [vmem:[#allocation14] ss:$0 sm:$0xff] }
 0x820   : > { %10548 = vmatprep.subr.bf16.mxu1 %v11403_v34 }
 0x821   : > { %10525 = vmatpush3.bf16.msra.mxu0 %v11398_v45 }
 0x822   : > { %10526 = vmatprep.subr.bf16.mxu0 %v11401_v17 }
 0x823   : > { %10549 = vmatpush3.bf16.msra.mxu1 %v11404_v37 }
 0x825   : > { %10527 = vmatpush3.bf16.msra.mxu0 %v11402_v23 }
 0x826   : > { %10556 = vmatprep.subr.bf16.mxu0 %v11405_v6  ;;  %9312 = vmatmul.mubr.bf16.vlgmr.msra.gmra.mxu1 %v9179_v2 }
 0x828   : > { %9136 = vmatmul.mubr.bf16.vlgmr.msra.gmra.mxu0 %v8281_v15 }
 0x829   : > { %10557 = vmatpush3.bf16.msra.mxu0 %v11406_v30  ;;  %9481 = vmatprep.mubr.bf16.mxu0 %v8284_v14 }
 0x82a   : > { %10558 = vmatprep.subr.bf16.mxu0 %v11407_v42 }
 0x82d   : > { %10559 = vmatpush3.bf16.msra.mxu0 %v11408_v62 }
 0x82e   : > { %10560 = vmatprep.subr.bf16.mxu0 %v11409_v29 }
 0x831   : > { %10561 = vmatpush3.bf16.msra.mxu0 %v11410_v55 }
 0x832   : > { %10562 = vmatprep.subr.bf16.mxu0 %v11411_v20 }
 0x835   : > { %10563 = vmatpush3.bf16.msra.mxu0 %v11412_v50 }
 0x836   : > { %10564 = vmatprep.subr.bf16.mxu0 %v11413_v40 }
 0x839   : > { %10565 = vmatpush3.bf16.msra.mxu0 %v11414_v52 }
 0x83a   : > { %10566 = vmatprep.subr.bf16.mxu0 %v11415_v27 }
 0x83d   : > { %10567 = vmatpush3.bf16.msra.mxu0 %v11416_v47 }
 0x83e   : > { %10568 = vmatprep.subr.bf16.mxu0 %v11417_v7 }
 0x841   : > { %10569 = vmatpush3.bf16.msra.mxu0 %v11418_v38 }
 0x842   : > { %10570 = vmatprep.subr.bf16.mxu0 %v11419_v63 }
 0x845   : > { %10571 = vmatpush3.bf16.msra.mxu0 %v11420_v25 }
 0x848   : > { %9482 = vmatmul.mubr.bf16.vlgmr.msra.gmra.mxu0 %v8283_v24 }
 0x8a6   : > { %v10462_v21 = vpop.f32.mrf.mxu1 }
 0x8a8   : > { %v10440_v18 = vpop.f32.mrf.mxu0  ;;  %v10463_v58 = vpop.f32.mrf.mxu1 }
 0x8a9   : > { %v10464_v43 = vadd.f32 %v10463_v58, %v10462_v21 }
 0x8aa   : > { %v10441_v3 = vpop.f32.mrf.mxu0  ;;  %v10465_v51 = vpop.f32.mrf.mxu1 }
 0x8ab   : > { %v10442_v11 = vadd.f32 %v10441_v3, %v10440_v18 }
 0x8ac   : > { %v10443_v49 = vpop.f32.mrf.mxu0  ;;  %v10466_v48 = vpop.f32.mrf.mxu1 }
 0x8ad   : > { %v8623_v5 = vadd.f32 %v10464_v43, %v10442_v11 }
 0x8ae   : > { %v10444_v56 = vpop.f32.mrf.mxu0 }
 0x8c6   : > { %v10506_v8 = vpop.f32.mrf.mxu1 }
 0x8c8   : > { %v10484_v60 = vpop.f32.mrf.mxu0  ;;  %v10507_v36 = vpop.f32.mrf.mxu1 }
 0x8c9   : > { %v10508_v12 = vadd.f32 %v10507_v36, %v10506_v8 }
 0x8ca   : > { %v10485_v19 = vpop.f32.mrf.mxu0  ;;  %v10509_v39 = vpop.f32.mrf.mxu1 }
 0x8cb   : > { %v10486_v57 = vadd.f32 %v10485_v19, %v10484_v60 }
 0x8cc   : > { %v10487_v0 = vpop.f32.mrf.mxu0  ;;  %v10510_v59 = vpop.f32.mrf.mxu1 }
 0x8cd   : > { %v8797_v32 = vadd.f32 %v10486_v57, %v8623_v5 }
 0x8ce   : > { %v10488_v41 = vpop.f32.mrf.mxu0 }
 0x8cf   : > { %v8973_v61 = vadd.f32 %v10508_v12, %v8797_v32 }
 0x8e6   : > { %v10550_v53 = vpop.f32.mrf.mxu1 }
 0x8e8   : > { %v10528_v46 = vpop.f32.mrf.mxu0  ;;  %v10551_v13 = vpop.f32.mrf.mxu1 }
 0x8e9   : > { %v10552_v9 = vadd.f32 %v10551_v13, %v10550_v53 }
 0x8ea   : > { %v10529_v22 = vpop.f32.mrf.mxu0  ;;  %v10553_v33 = vpop.f32.mrf.mxu1 }
 0x8eb   : > { %v10530_v1 = vadd.f32 %v10529_v22, %v10528_v46 }
 0x8ec   : > { %v10531_v44 = vpop.f32.mrf.mxu0  ;;  %v10554_v10 = vpop.f32.mrf.mxu1 }
 0x8ed   : > { %v9143_v35 = vadd.f32 %v10530_v1, %v8973_v61 }
 0x8ee   : > { %v10532_v16 = vpop.f32.mrf.mxu0 }
 0x8ef   : > { %v9319_v28 = vadd.f32 %v10552_v9, %v9143_v35 }
 0x908   : > { %v10572_v4 = vpop.f32.mrf.mxu0 }
 0x90a   : > { %v10573_v54 = vpop.f32.mrf.mxu0 }
 0x90b   : > { %v10574_v31 = vadd.f32 %v10573_v54, %v10572_v4 }
 0x90c   : > { %v10575_v34 = vpop.f32.mrf.mxu0 }
 0x90d   : > { %v9489_v45 = vadd.f32 %v10574_v31, %v9319_v28 }
 0x90e   : > { %v10576_v17 = vpop.f32.mrf.mxu0 }
 0x90f   : > { %v9497_v37 = vadd.f32 %v10418_v26, %v9489_v45 }
 0x911   : > { %9498 = vst [vmem:[%s473_s11] sm:$0xff] %v9497_v37 }
 0x912   : > { %11642 = shalt.err (!%p11639_p12)
}
 0x913   : > { %s11643_s6 = scalar_lea.hbm %s9521_s4, 128  ;;  %s11647_s28 = scalar_lea.hbm %s15860_s10, 256 }
 0x914   : > { %p11644_p1 = scmp.ne.s32.totalorder %s9521_s4, %s11643_s6  ;;  %p11648_p9 = scmp.lt.s32.totalorder %s9521_s4, %s15860_s10 }
 0x915   : > { %p11649_p4 = scmp.lt.s32.totalorder %s11647_s28, %s11643_s6 }
 0x916   : > { %p11645_p2 = pnand %p11644_p1, %p16808_p10 }
 0x917   : > { %p11650_p5 = por %p11649_p4, %p11648_p9 }
 0x918   : > { %p11646_p3 = pneg %p11645_p2 }
 0x91a   : > { %p11651_p6 = pnand %p11650_p5, %p11646_p3 }
 0x91c   : > { %11654 = shalt.err (!%p11651_p6)
}
 0x91d   : > { %10614 = dma.vmem_to_hbm [thread:$0]  (%p16808_p10), %s9524_s25, 128, %s9521_s4, %s9506_s27  }
 0x91e PF: > { %p10661_p7 = scmp.ge.s32.totalorder %s11709_s16, 2  ;;  %s9544_s30 = sand.u32 1, %s11697_s13  }
 0x91f   : > { %p16809_p13 = scmp.ne.s32.totalorder %s15885_s24, 0  ;;  %s9545_s18 = scalar_lea.sflag [#allocation4], %s9544_s30 }
 0x921   : > { %p10642_p8 = pnand %p10661_p7, %p16809_p13 }
 0x923   : > { %p10643_p11 = pneg %p10642_p8 }
 0x925   : > { %11692 = dma.done.wait (%p10643_p11), %s9545_s18, 128  }
 0x926   : > { %11694 = vsyncadd (%p10643_p11), %s9545_s18, 4294967168  ;;  %p26_p0 = scmp.ge.s32.totalorder %s11807_s19, 4   ;;  %s16810_s13 = smov %s11701_s14 }
 0x927   : > { %s16811_s14 = smov %s11705_s15  ;;  %s16812_s15 = smov %s11818_s22 }
 0x928   : > { %s16813_s16 = smov %s11807_s19  ;;  %28 = sbr.rel (!%p26_p0) target bundleno = 12 (0xc), region = 152 }
 0x92d   :  { %9550 = vsyncpa [#allocation3], 1 }
 0x92e   :  { %9552 = vsyncpa [#allocation3 + $0x1], 1 }
 0x92f   :  { %9553 = vsyncpa [#allocation6], 1 }
 0x930   :  { %9554 = vsyncpa [#allocation9], 1 }
 0x931   :  { %9555 = vsyncpa [#allocation12], 1 }
 0x932   :  { %9556 = vsyncpa [#allocation15], 1 }
 0x933   :  { %9557 = vsyncpa [#allocation4], 1 }
 0x934   :  { %9559 = vsyncpa [#allocation4 + $0x1], 1 }

</bundles_post_ra>
